<compile_context>
chip_gen: v5e
topology: v5e:2x2
jax: 0.10.0
libtpu: 0.0.40
codegen_flags: <defaults>
</compile_context>

<pallas_src>
import jax
import jax.numpy as jnp
from jax.experimental import pallas as pl
from jax.experimental.pallas import tpu as pltpu


def _round_up(x, m):
    return (x + m - 1) // m * m


# ----------------------------------------------------------------------------
# Kernel 1: fused conv1 -> relu -> conv2 -> relu -> 2x2 maxpool  (per image)
# ----------------------------------------------------------------------------
def _conv_pool_kernel(p_ref, w1_ref, b1_ref, w2_ref, b2_ref, o_ref):
    # p_ref : (1, 9, 576, 9) bf16   conv1 patches per conv2 tap (rows reordered
    #                               so pool partners sit in 4 blocks of 144 rows)
    # w1_ref: (9, 32)  bf16         conv1 weight (kh*3+kw, cout)
    # b1_ref: (1, 32)  f32
    # w2_ref: (9, 32, 64) bf16      conv2 weight (kh*3+kw, cin, cout)
    # b2_ref: (1, 64)  f32
    # o_ref : (1, 144, 64) bf16     pooled NHWC activations (row = s*12 + t)
    acc = jnp.zeros((576, 64), jnp.float32)
    for s in range(9):                                  # conv2 taps, unrolled
        h1s = jnp.dot(p_ref[0, s], w1_ref[...],
                      preferred_element_type=jnp.float32)          # (576, 32)
        h1s = jnp.maximum(h1s + b1_ref[...], 0.0).astype(jnp.bfloat16)
        acc = acc + jnp.dot(h1s, w2_ref[s],
                            preferred_element_type=jnp.float32)    # (576, 64)
    h2 = jnp.maximum(acc + b2_ref[...], 0.0)            # bias + ReLU (f32)
    # 2x2 max-pool: the 4 window partners are the same row u of the 4 blocks.
    pooled = jnp.maximum(jnp.maximum(h2[0:144], h2[144:288]),
                         jnp.maximum(h2[288:432], h2[432:576]))     # (144, 64)
    o_ref[0] = pooled.astype(o_ref.dtype)


def _conv_patches(x_nhw):
    """x: (N, 28, 28) f32 -> (N, 9, 576, 9) conv1-patch tensor.

    P[n, kh*3+kw, (dy*2+dx)*144 + s*12 + t, dh*3+dw]
        = x[n, 2s+dy+kh+dh, 2t+dx+kw+dw]
    i.e. for every conv2 tap (kh,kw) the 3x3 conv1 patch of every conv2 output
    pixel, with the 576 pixels ordered so that the 4 members of each 2x2 pool
    window occupy the same row u of 4 contiguous 144-row blocks.
    """
    n = x_nhw.shape[0]
    cols = []
    for dh in range(3):
        for dw in range(3):
            cols.append(x_nhw[:, dh:dh + 26, dw:dw + 26])
    c1 = jnp.stack(cols, axis=-1)                       # (N, 26, 26, 9)
    shifts = []
    for kh in range(3):
        for kw in range(3):
            qblocks = []
            for dy in range(2):
                for dx in range(2):
                    blk = c1[:, kh + dy:kh + dy + 24:2,
                             kw + dx:kw + dx + 24:2, :]             # (N,12,12,9)
                    qblocks.append(blk.reshape(n, 144, 9))
            shifts.append(jnp.concatenate(qblocks, axis=1))         # (N,576,9)
    return jnp.stack(shifts, axis=1)                    # (N, 9, 576, 9)


def conv_stack(x_nchw, w1, b1, w2, b2):
    n = x_nchw.shape[0]
    patches = _conv_patches(x_nchw[:, 0, :, :]).astype(jnp.bfloat16)
    return pl.pallas_call(
        _conv_pool_kernel,
        out_shape=jax.ShapeDtypeStruct((n, 144, 64), jnp.bfloat16),
        grid=(n,),
        in_specs=[
            pl.BlockSpec((1, 9, 576, 9), lambda i: (i, 0, 0, 0)),
            pl.BlockSpec((9, 32), lambda i: (0, 0)),
            pl.BlockSpec((1, 32), lambda i: (0, 0)),
            pl.BlockSpec((9, 32, 64), lambda i: (0, 0, 0)),
            pl.BlockSpec((1, 64), lambda i: (0, 0)),
        ],
        out_specs=pl.BlockSpec((1, 144, 64), lambda i: (i, 0, 0)),
        compiler_params=pltpu.CompilerParams(
            dimension_semantics=("parallel",),
            vmem_limit_bytes=32 * 1024 * 1024,
        ),
    )(patches, w1, b1, w2, b2)


# ----------------------------------------------------------------------------
# Kernel 2: fused fc1 -> relu -> fc2 -> log_softmax   (M-tiled over batch rows)
# ----------------------------------------------------------------------------
def _head_kernel(x_ref, w1_ref, b1_ref, w2_ref, b2_ref, o_ref):
    # x_ref : (tm, 9216) bf16 ; w1_ref: (9216, 128) bf16 (VMEM-resident)
    # w2_ref: (128, 10) bf16 ; biases f32 ; o_ref: (tm, 10) f32
    h = jnp.dot(x_ref[...], w1_ref[...], preferred_element_type=jnp.float32)
    h = jnp.maximum(h + b1_ref[...], 0.0).astype(jnp.bfloat16)
    logits = jnp.dot(h, w2_ref[...], preferred_element_type=jnp.float32)
    logits = logits + b2_ref[...]
    m = jnp.max(logits, axis=-1, keepdims=True)
    lse = jnp.log(jnp.sum(jnp.exp(logits - m), axis=-1, keepdims=True)) + m
    o_ref[...] = (logits - lse).astype(o_ref.dtype)


def fc_head(flat_bf16, wfc1, bfc1, wfc2, bfc2):
    m, k = flat_bf16.shape
    tm = min(128, _round_up(m, 16))          # bf16 sublane-tile aligned
    mp = _round_up(m, tm)
    if mp != m:
        flat_bf16 = jnp.pad(flat_bf16, ((0, mp - m), (0, 0)))
    out = pl.pallas_call(
        _head_kernel,
        out_shape=jax.ShapeDtypeStruct((mp, 10), jnp.float32),
        grid=(mp // tm,),
        in_specs=[
            pl.BlockSpec((tm, k), lambda i: (i, 0)),
            pl.BlockSpec((k, 128), lambda i: (0, 0)),
            pl.BlockSpec((1, 128), lambda i: (0, 0)),
            pl.BlockSpec((128, 10), lambda i: (0, 0)),
            pl.BlockSpec((1, 10), lambda i: (0, 0)),
        ],
        out_specs=pl.BlockSpec((tm, 10), lambda i: (i, 0)),
        compiler_params=pltpu.CompilerParams(
            dimension_semantics=("parallel",),
            vmem_limit_bytes=32 * 1024 * 1024,   # fits v7x 64 MiB / v5e-v6e 128 MiB
        ),
    )(flat_bf16, wfc1, bfc1, wfc2, bfc2)
    return out[:m]


# ----------------------------------------------------------------------------
# Parameters (deterministic synthetic init; torch-shaped then repacked)
# ----------------------------------------------------------------------------
def init_params():
    keys = jax.random.split(jax.random.PRNGKey(42), 8)
    s = 0.05
    w1_t = s * jax.random.normal(keys[0], (32, 1, 3, 3), jnp.float32)
    b1 = s * jax.random.normal(keys[1], (32,), jnp.float32)
    w2_t = s * jax.random.normal(keys[2], (64, 32, 3, 3), jnp.float32)
    b2 = s * jax.random.normal(keys[3], (64,), jnp.float32)
    wfc1_t = s * jax.random.normal(keys[4], (128, 9216), jnp.float32)
    bfc1 = s * jax.random.normal(keys[5], (128,), jnp.float32)
    wfc2_t = s * jax.random.normal(keys[6], (10, 128), jnp.float32)
    bfc2 = s * jax.random.normal(keys[7], (10,), jnp.float32)

    # conv weights -> (kh*3+kw [, cin], cout), bf16 for the MXU.
    w1 = jnp.transpose(w1_t, (2, 3, 1, 0)).reshape(9, 32).astype(jnp.bfloat16)
    w2 = jnp.transpose(w2_t, (2, 3, 1, 0)).reshape(9, 32, 64).astype(jnp.bfloat16)
    # fc1 weight: fold the torch NCHW flatten (c*144 + s*12 + t) into a one-time
    # row permutation so the kernel can consume NHWC ((s*12+t)*64 + c) directly.
    wfc1 = (wfc1_t.reshape(128, 64, 12, 12)
                 .transpose(2, 3, 1, 0)
                 .reshape(9216, 128)
                 .astype(jnp.bfloat16))
    wfc2 = wfc2_t.T.astype(jnp.bfloat16)                 # (128, 10)
    return {
        "w1": w1, "b1": b1.reshape(1, 32),
        "w2": w2, "b2": b2.reshape(1, 64),
        "wfc1": wfc1, "bfc1": bfc1.reshape(1, 128),
        "wfc2": wfc2, "bfc2": bfc2.reshape(1, 10),
    }


# ----------------------------------------------------------------------------
# Forward pass (matches Net.forward in eval mode)
# ----------------------------------------------------------------------------
def net_forward(x_nchw, params):
    n = x_nchw.shape[0]
    pooled = conv_stack(x_nchw, params["w1"], params["b1"],
                        params["w2"], params["b2"])      # (N, 144, 64) bf16
    # dropout1: identity (eval mode)
    flat = pooled.reshape(n, 144 * 64)                   # free NHWC flatten
    # dropout2 inside head is identity (eval mode)
    return fc_head(flat, params["wfc1"], params["bfc1"],
                   params["wfc2"], params["bfc2"])       # (N, 10) f32


if __name__ == "__main__":
    params = init_params()
    x = jax.random.normal(jax.random.PRNGKey(0), (2, 1, 28, 28), jnp.float32)
    fwd = jax.jit(net_forward)
    out = jax.block_until_ready(fwd(x, params))
    assert out.shape == (2, 10)
    # log_softmax rows must exponentiate-sum to ~1
    assert jnp.allclose(jnp.sum(jnp.exp(out), axis=1), 1.0, atol=1e-3)
    print("KERNEL_OK")
</pallas_src>

<mosaic_0001>
module attributes {stable_mosaic.version = 11 : i64} {
  func.func @_conv_pool_kernel(%arg0: i32, %arg1: memref<1x9x576x9xbf16, #tpu.memory_space<vmem>>, %arg2: memref<9x32xbf16, #tpu.memory_space<vmem>>, %arg3: memref<1x32xf32, #tpu.memory_space<vmem>>, %arg4: memref<9x32x64xbf16, #tpu.memory_space<vmem>>, %arg5: memref<1x64xf32, #tpu.memory_space<vmem>>, %arg6: memref<1x144x64xbf16, #tpu.memory_space<vmem>>) attributes {dimension_semantics = [#tpu.dimension_semantics<parallel>], iteration_bounds = array<i64: 2>, scalar_prefetch = 0 : i64, scratch_operands = 0 : i64, tpu.core_type = #tpu.core_type<tc>, window_params = [{transform_indices = @transform_0, window_bounds = array<i64: 1, 9, 576, 9>}, {pipeline_mode = #tpu.pipeline_mode<synchronous>, transform_indices = @transform_1, window_bounds = array<i64: 9, 32>}, {pipeline_mode = #tpu.pipeline_mode<synchronous>, transform_indices = @transform_2, window_bounds = array<i64: 1, 32>}, {pipeline_mode = #tpu.pipeline_mode<synchronous>, transform_indices = @transform_3, window_bounds = array<i64: 9, 32, 64>}, {pipeline_mode = #tpu.pipeline_mode<synchronous>, transform_indices = @transform_4, window_bounds = array<i64: 1, 64>}, {transform_indices = @transform_5, window_bounds = array<i64: 1, 144, 64>}]} {
    %cst = arith.constant 0.000000e+00 : f32
    %0 = vector.broadcast %cst : f32 to vector<576x64xf32>
    %c0 = arith.constant 0 : index
    %c0_0 = arith.constant 0 : index
    %c0_1 = arith.constant 0 : index
    %c0_2 = arith.constant 0 : index
    %1 = vector.load %arg1[%c0, %c0_0, %c0_1, %c0_2] : memref<1x9x576x9xbf16, #tpu.memory_space<vmem>>, vector<1x1x576x9xbf16>
    %2 = vector.shape_cast %1 : vector<1x1x576x9xbf16> to vector<576x9xbf16>
    %c0_3 = arith.constant 0 : index
    %c0_4 = arith.constant 0 : index
    %3 = vector.load %arg2[%c0_3, %c0_4] : memref<9x32xbf16, #tpu.memory_space<vmem>>, vector<9x32xbf16>
    %cst_5 = arith.constant dense<0.000000e+00> : vector<576x32xf32>
    %4 = tpu.matmul %2, %3, %cst_5 {dimension_numbers = #tpu.dot_dimension_numbers<[1], [0], [0], [1], [0, 0, 1, 1], [], []>} : vector<576x9xbf16>, vector<9x32xbf16>, vector<576x32xf32> -> vector<576x32xf32>
    %c0_6 = arith.constant 0 : index
    %c0_7 = arith.constant 0 : index
    %5 = vector.load %arg3[%c0_6, %c0_7] : memref<1x32xf32, #tpu.memory_space<vmem>>, vector<1x32xf32>
    %6 = vector.broadcast %5 : vector<1x32xf32> to vector<576x32xf32>
    %7 = arith.addf %4, %6 : vector<576x32xf32>
    %cst_8 = arith.constant 0.000000e+00 : f32
    %8 = vector.broadcast %cst_8 : f32 to vector<576x32xf32>
    %9 = arith.maximumf %7, %8 : vector<576x32xf32>
    %10 = arith.truncf %9 : vector<576x32xf32> to vector<576x32xbf16>
    %c0_9 = arith.constant 0 : index
    %c0_10 = arith.constant 0 : index
    %c0_11 = arith.constant 0 : index
    %11 = vector.load %arg4[%c0_9, %c0_10, %c0_11] : memref<9x32x64xbf16, #tpu.memory_space<vmem>>, vector<1x32x64xbf16>
    %12 = vector.shape_cast %11 : vector<1x32x64xbf16> to vector<32x64xbf16>
    %cst_12 = arith.constant dense<0.000000e+00> : vector<576x64xf32>
    %13 = tpu.matmul %10, %12, %cst_12 {dimension_numbers = #tpu.dot_dimension_numbers<[1], [0], [0], [1], [0, 0, 1, 1], [], []>} : vector<576x32xbf16>, vector<32x64xbf16>, vector<576x64xf32> -> vector<576x64xf32>
    %14 = arith.addf %0, %13 : vector<576x64xf32>
    %c0_13 = arith.constant 0 : index
    %c1 = arith.constant 1 : index
    %c0_14 = arith.constant 0 : index
    %c0_15 = arith.constant 0 : index
    %15 = vector.load %arg1[%c0_13, %c1, %c0_14, %c0_15] : memref<1x9x576x9xbf16, #tpu.memory_space<vmem>>, vector<1x1x576x9xbf16>
    %16 = vector.shape_cast %15 : vector<1x1x576x9xbf16> to vector<576x9xbf16>
    %c0_16 = arith.constant 0 : index
    %c0_17 = arith.constant 0 : index
    %17 = vector.load %arg2[%c0_16, %c0_17] : memref<9x32xbf16, #tpu.memory_space<vmem>>, vector<9x32xbf16>
    %cst_18 = arith.constant dense<0.000000e+00> : vector<576x32xf32>
    %18 = tpu.matmul %16, %17, %cst_18 {dimension_numbers = #tpu.dot_dimension_numbers<[1], [0], [0], [1], [0, 0, 1, 1], [], []>} : vector<576x9xbf16>, vector<9x32xbf16>, vector<576x32xf32> -> vector<576x32xf32>
    %c0_19 = arith.constant 0 : index
    %c0_20 = arith.constant 0 : index
    %19 = vector.load %arg3[%c0_19, %c0_20] : memref<1x32xf32, #tpu.memory_space<vmem>>, vector<1x32xf32>
    %20 = vector.broadcast %19 : vector<1x32xf32> to vector<576x32xf32>
    %21 = arith.addf %18, %20 : vector<576x32xf32>
    %cst_21 = arith.constant 0.000000e+00 : f32
    %22 = vector.broadcast %cst_21 : f32 to vector<576x32xf32>
    %23 = arith.maximumf %21, %22 : vector<576x32xf32>
    %24 = arith.truncf %23 : vector<576x32xf32> to vector<576x32xbf16>
    %c1_22 = arith.constant 1 : index
    %c0_23 = arith.constant 0 : index
    %c0_24 = arith.constant 0 : index
    %25 = vector.load %arg4[%c1_22, %c0_23, %c0_24] : memref<9x32x64xbf16, #tpu.memory_space<vmem>>, vector<1x32x64xbf16>
    %26 = vector.shape_cast %25 : vector<1x32x64xbf16> to vector<32x64xbf16>
    %cst_25 = arith.constant dense<0.000000e+00> : vector<576x64xf32>
    %27 = tpu.matmul %24, %26, %cst_25 {dimension_numbers = #tpu.dot_dimension_numbers<[1], [0], [0], [1], [0, 0, 1, 1], [], []>} : vector<576x32xbf16>, vector<32x64xbf16>, vector<576x64xf32> -> vector<576x64xf32>
    %28 = arith.addf %14, %27 : vector<576x64xf32>
    %c0_26 = arith.constant 0 : index
    %c2 = arith.constant 2 : index
    %c0_27 = arith.constant 0 : index
    %c0_28 = arith.constant 0 : index
    %29 = vector.load %arg1[%c0_26, %c2, %c0_27, %c0_28] : memref<1x9x576x9xbf16, #tpu.memory_space<vmem>>, vector<1x1x576x9xbf16>
    %30 = vector.shape_cast %29 : vector<1x1x576x9xbf16> to vector<576x9xbf16>
    %c0_29 = arith.constant 0 : index
    %c0_30 = arith.constant 0 : index
    %31 = vector.load %arg2[%c0_29, %c0_30] : memref<9x32xbf16, #tpu.memory_space<vmem>>, vector<9x32xbf16>
    %cst_31 = arith.constant dense<0.000000e+00> : vector<576x32xf32>
    %32 = tpu.matmul %30, %31, %cst_31 {dimension_numbers = #tpu.dot_dimension_numbers<[1], [0], [0], [1], [0, 0, 1, 1], [], []>} : vector<576x9xbf16>, vector<9x32xbf16>, vector<576x32xf32> -> vector<576x32xf32>
    %c0_32 = arith.constant 0 : index
    %c0_33 = arith.constant 0 : index
    %33 = vector.load %arg3[%c0_32, %c0_33] : memref<1x32xf32, #tpu.memory_space<vmem>>, vector<1x32xf32>
    %34 = vector.broadcast %33 : vector<1x32xf32> to vector<576x32xf32>
    %35 = arith.addf %32, %34 : vector<576x32xf32>
    %cst_34 = arith.constant 0.000000e+00 : f32
    %36 = vector.broadcast %cst_34 : f32 to vector<576x32xf32>
    %37 = arith.maximumf %35, %36 : vector<576x32xf32>
    %38 = arith.truncf %37 : vector<576x32xf32> to vector<576x32xbf16>
    %c2_35 = arith.constant 2 : index
    %c0_36 = arith.constant 0 : index
    %c0_37 = arith.constant 0 : index
    %39 = vector.load %arg4[%c2_35, %c0_36, %c0_37] : memref<9x32x64xbf16, #tpu.memory_space<vmem>>, vector<1x32x64xbf16>
    %40 = vector.shape_cast %39 : vector<1x32x64xbf16> to vector<32x64xbf16>
    %cst_38 = arith.constant dense<0.000000e+00> : vector<576x64xf32>
    %41 = tpu.matmul %38, %40, %cst_38 {dimension_numbers = #tpu.dot_dimension_numbers<[1], [0], [0], [1], [0, 0, 1, 1], [], []>} : vector<576x32xbf16>, vector<32x64xbf16>, vector<576x64xf32> -> vector<576x64xf32>
    %42 = arith.addf %28, %41 : vector<576x64xf32>
    %c0_39 = arith.constant 0 : index
    %c3 = arith.constant 3 : index
    %c0_40 = arith.constant 0 : index
    %c0_41 = arith.constant 0 : index
    %43 = vector.load %arg1[%c0_39, %c3, %c0_40, %c0_41] : memref<1x9x576x9xbf16, #tpu.memory_space<vmem>>, vector<1x1x576x9xbf16>
    %44 = vector.shape_cast %43 : vector<1x1x576x9xbf16> to vector<576x9xbf16>
    %c0_42 = arith.constant 0 : index
    %c0_43 = arith.constant 0 : index
    %45 = vector.load %arg2[%c0_42, %c0_43] : memref<9x32xbf16, #tpu.memory_space<vmem>>, vector<9x32xbf16>
    %cst_44 = arith.constant dense<0.000000e+00> : vector<576x32xf32>
    %46 = tpu.matmul %44, %45, %cst_44 {dimension_numbers = #tpu.dot_dimension_numbers<[1], [0], [0], [1], [0, 0, 1, 1], [], []>} : vector<576x9xbf16>, vector<9x32xbf16>, vector<576x32xf32> -> vector<576x32xf32>
    %c0_45 = arith.constant 0 : index
    %c0_46 = arith.constant 0 : index
    %47 = vector.load %arg3[%c0_45, %c0_46] : memref<1x32xf32, #tpu.memory_space<vmem>>, vector<1x32xf32>
    %48 = vector.broadcast %47 : vector<1x32xf32> to vector<576x32xf32>
    %49 = arith.addf %46, %48 : vector<576x32xf32>
    %cst_47 = arith.constant 0.000000e+00 : f32
    %50 = vector.broadcast %cst_47 : f32 to vector<576x32xf32>
    %51 = arith.maximumf %49, %50 : vector<576x32xf32>
    %52 = arith.truncf %51 : vector<576x32xf32> to vector<576x32xbf16>
    %c3_48 = arith.constant 3 : index
    %c0_49 = arith.constant 0 : index
    %c0_50 = arith.constant 0 : index
    %53 = vector.load %arg4[%c3_48, %c0_49, %c0_50] : memref<9x32x64xbf16, #tpu.memory_space<vmem>>, vector<1x32x64xbf16>
    %54 = vector.shape_cast %53 : vector<1x32x64xbf16> to vector<32x64xbf16>
    %cst_51 = arith.constant dense<0.000000e+00> : vector<576x64xf32>
    %55 = tpu.matmul %52, %54, %cst_51 {dimension_numbers = #tpu.dot_dimension_numbers<[1], [0], [0], [1], [0, 0, 1, 1], [], []>} : vector<576x32xbf16>, vector<32x64xbf16>, vector<576x64xf32> -> vector<576x64xf32>
    %56 = arith.addf %42, %55 : vector<576x64xf32>
    %c0_52 = arith.constant 0 : index
    %c4 = arith.constant 4 : index
    %c0_53 = arith.constant 0 : index
    %c0_54 = arith.constant 0 : index
    %57 = vector.load %arg1[%c0_52, %c4, %c0_53, %c0_54] : memref<1x9x576x9xbf16, #tpu.memory_space<vmem>>, vector<1x1x576x9xbf16>
    %58 = vector.shape_cast %57 : vector<1x1x576x9xbf16> to vector<576x9xbf16>
    %c0_55 = arith.constant 0 : index
    %c0_56 = arith.constant 0 : index
    %59 = vector.load %arg2[%c0_55, %c0_56] : memref<9x32xbf16, #tpu.memory_space<vmem>>, vector<9x32xbf16>
    %cst_57 = arith.constant dense<0.000000e+00> : vector<576x32xf32>
    %60 = tpu.matmul %58, %59, %cst_57 {dimension_numbers = #tpu.dot_dimension_numbers<[1], [0], [0], [1], [0, 0, 1, 1], [], []>} : vector<576x9xbf16>, vector<9x32xbf16>, vector<576x32xf32> -> vector<576x32xf32>
    %c0_58 = arith.constant 0 : index
    %c0_59 = arith.constant 0 : index
    %61 = vector.load %arg3[%c0_58, %c0_59] : memref<1x32xf32, #tpu.memory_space<vmem>>, vector<1x32xf32>
    %62 = vector.broadcast %61 : vector<1x32xf32> to vector<576x32xf32>
    %63 = arith.addf %60, %62 : vector<576x32xf32>
    %cst_60 = arith.constant 0.000000e+00 : f32
    %64 = vector.broadcast %cst_60 : f32 to vector<576x32xf32>
    %65 = arith.maximumf %63, %64 : vector<576x32xf32>
    %66 = arith.truncf %65 : vector<576x32xf32> to vector<576x32xbf16>
    %c4_61 = arith.constant 4 : index
    %c0_62 = arith.constant 0 : index
    %c0_63 = arith.constant 0 : index
    %67 = vector.load %arg4[%c4_61, %c0_62, %c0_63] : memref<9x32x64xbf16, #tpu.memory_space<vmem>>, vector<1x32x64xbf16>
    %68 = vector.shape_cast %67 : vector<1x32x64xbf16> to vector<32x64xbf16>
    %cst_64 = arith.constant dense<0.000000e+00> : vector<576x64xf32>
    %69 = tpu.matmul %66, %68, %cst_64 {dimension_numbers = #tpu.dot_dimension_numbers<[1], [0], [0], [1], [0, 0, 1, 1], [], []>} : vector<576x32xbf16>, vector<32x64xbf16>, vector<576x64xf32> -> vector<576x64xf32>
    %70 = arith.addf %56, %69 : vector<576x64xf32>
    %c0_65 = arith.constant 0 : index
    %c5 = arith.constant 5 : index
    %c0_66 = arith.constant 0 : index
    %c0_67 = arith.constant 0 : index
    %71 = vector.load %arg1[%c0_65, %c5, %c0_66, %c0_67] : memref<1x9x576x9xbf16, #tpu.memory_space<vmem>>, vector<1x1x576x9xbf16>
    %72 = vector.shape_cast %71 : vector<1x1x576x9xbf16> to vector<576x9xbf16>
    %c0_68 = arith.constant 0 : index
    %c0_69 = arith.constant 0 : index
    %73 = vector.load %arg2[%c0_68, %c0_69] : memref<9x32xbf16, #tpu.memory_space<vmem>>, vector<9x32xbf16>
    %cst_70 = arith.constant dense<0.000000e+00> : vector<576x32xf32>
    %74 = tpu.matmul %72, %73, %cst_70 {dimension_numbers = #tpu.dot_dimension_numbers<[1], [0], [0], [1], [0, 0, 1, 1], [], []>} : vector<576x9xbf16>, vector<9x32xbf16>, vector<576x32xf32> -> vector<576x32xf32>
    %c0_71 = arith.constant 0 : index
    %c0_72 = arith.constant 0 : index
    %75 = vector.load %arg3[%c0_71, %c0_72] : memref<1x32xf32, #tpu.memory_space<vmem>>, vector<1x32xf32>
    %76 = vector.broadcast %75 : vector<1x32xf32> to vector<576x32xf32>
    %77 = arith.addf %74, %76 : vector<576x32xf32>
    %cst_73 = arith.constant 0.000000e+00 : f32
    %78 = vector.broadcast %cst_73 : f32 to vector<576x32xf32>
    %79 = arith.maximumf %77, %78 : vector<576x32xf32>
    %80 = arith.truncf %79 : vector<576x32xf32> to vector<576x32xbf16>
    %c5_74 = arith.constant 5 : index
    %c0_75 = arith.constant 0 : index
    %c0_76 = arith.constant 0 : index
    %81 = vector.load %arg4[%c5_74, %c0_75, %c0_76] : memref<9x32x64xbf16, #tpu.memory_space<vmem>>, vector<1x32x64xbf16>
    %82 = vector.shape_cast %81 : vector<1x32x64xbf16> to vector<32x64xbf16>
    %cst_77 = arith.constant dense<0.000000e+00> : vector<576x64xf32>
    %83 = tpu.matmul %80, %82, %cst_77 {dimension_numbers = #tpu.dot_dimension_numbers<[1], [0], [0], [1], [0, 0, 1, 1], [], []>} : vector<576x32xbf16>, vector<32x64xbf16>, vector<576x64xf32> -> vector<576x64xf32>
    %84 = arith.addf %70, %83 : vector<576x64xf32>
    %c0_78 = arith.constant 0 : index
    %c6 = arith.constant 6 : index
    %c0_79 = arith.constant 0 : index
    %c0_80 = arith.constant 0 : index
    %85 = vector.load %arg1[%c0_78, %c6, %c0_79, %c0_80] : memref<1x9x576x9xbf16, #tpu.memory_space<vmem>>, vector<1x1x576x9xbf16>
    %86 = vector.shape_cast %85 : vector<1x1x576x9xbf16> to vector<576x9xbf16>
    %c0_81 = arith.constant 0 : index
    %c0_82 = arith.constant 0 : index
    %87 = vector.load %arg2[%c0_81, %c0_82] : memref<9x32xbf16, #tpu.memory_space<vmem>>, vector<9x32xbf16>
    %cst_83 = arith.constant dense<0.000000e+00> : vector<576x32xf32>
    %88 = tpu.matmul %86, %87, %cst_83 {dimension_numbers = #tpu.dot_dimension_numbers<[1], [0], [0], [1], [0, 0, 1, 1], [], []>} : vector<576x9xbf16>, vector<9x32xbf16>, vector<576x32xf32> -> vector<576x32xf32>
    %c0_84 = arith.constant 0 : index
    %c0_85 = arith.constant 0 : index
    %89 = vector.load %arg3[%c0_84, %c0_85] : memref<1x32xf32, #tpu.memory_space<vmem>>, vector<1x32xf32>
    %90 = vector.broadcast %89 : vector<1x32xf32> to vector<576x32xf32>
    %91 = arith.addf %88, %90 : vector<576x32xf32>
    %cst_86 = arith.constant 0.000000e+00 : f32
    %92 = vector.broadcast %cst_86 : f32 to vector<576x32xf32>
    %93 = arith.maximumf %91, %92 : vector<576x32xf32>
    %94 = arith.truncf %93 : vector<576x32xf32> to vector<576x32xbf16>
    %c6_87 = arith.constant 6 : index
    %c0_88 = arith.constant 0 : index
    %c0_89 = arith.constant 0 : index
    %95 = vector.load %arg4[%c6_87, %c0_88, %c0_89] : memref<9x32x64xbf16, #tpu.memory_space<vmem>>, vector<1x32x64xbf16>
    %96 = vector.shape_cast %95 : vector<1x32x64xbf16> to vector<32x64xbf16>
    %cst_90 = arith.constant dense<0.000000e+00> : vector<576x64xf32>
    %97 = tpu.matmul %94, %96, %cst_90 {dimension_numbers = #tpu.dot_dimension_numbers<[1], [0], [0], [1], [0, 0, 1, 1], [], []>} : vector<576x32xbf16>, vector<32x64xbf16>, vector<576x64xf32> -> vector<576x64xf32>
    %98 = arith.addf %84, %97 : vector<576x64xf32>
    %c0_91 = arith.constant 0 : index
    %c7 = arith.constant 7 : index
    %c0_92 = arith.constant 0 : index
    %c0_93 = arith.constant 0 : index
    %99 = vector.load %arg1[%c0_91, %c7, %c0_92, %c0_93] : memref<1x9x576x9xbf16, #tpu.memory_space<vmem>>, vector<1x1x576x9xbf16>
    %100 = vector.shape_cast %99 : vector<1x1x576x9xbf16> to vector<576x9xbf16>
    %c0_94 = arith.constant 0 : index
    %c0_95 = arith.constant 0 : index
    %101 = vector.load %arg2[%c0_94, %c0_95] : memref<9x32xbf16, #tpu.memory_space<vmem>>, vector<9x32xbf16>
    %cst_96 = arith.constant dense<0.000000e+00> : vector<576x32xf32>
    %102 = tpu.matmul %100, %101, %cst_96 {dimension_numbers = #tpu.dot_dimension_numbers<[1], [0], [0], [1], [0, 0, 1, 1], [], []>} : vector<576x9xbf16>, vector<9x32xbf16>, vector<576x32xf32> -> vector<576x32xf32>
    %c0_97 = arith.constant 0 : index
    %c0_98 = arith.constant 0 : index
    %103 = vector.load %arg3[%c0_97, %c0_98] : memref<1x32xf32, #tpu.memory_space<vmem>>, vector<1x32xf32>
    %104 = vector.broadcast %103 : vector<1x32xf32> to vector<576x32xf32>
    %105 = arith.addf %102, %104 : vector<576x32xf32>
    %cst_99 = arith.constant 0.000000e+00 : f32
    %106 = vector.broadcast %cst_99 : f32 to vector<576x32xf32>
    %107 = arith.maximumf %105, %106 : vector<576x32xf32>
    %108 = arith.truncf %107 : vector<576x32xf32> to vector<576x32xbf16>
    %c7_100 = arith.constant 7 : index
    %c0_101 = arith.constant 0 : index
    %c0_102 = arith.constant 0 : index
    %109 = vector.load %arg4[%c7_100, %c0_101, %c0_102] : memref<9x32x64xbf16, #tpu.memory_space<vmem>>, vector<1x32x64xbf16>
    %110 = vector.shape_cast %109 : vector<1x32x64xbf16> to vector<32x64xbf16>
    %cst_103 = arith.constant dense<0.000000e+00> : vector<576x64xf32>
    %111 = tpu.matmul %108, %110, %cst_103 {dimension_numbers = #tpu.dot_dimension_numbers<[1], [0], [0], [1], [0, 0, 1, 1], [], []>} : vector<576x32xbf16>, vector<32x64xbf16>, vector<576x64xf32> -> vector<576x64xf32>
    %112 = arith.addf %98, %111 : vector<576x64xf32>
    %c0_104 = arith.constant 0 : index
    %c8 = arith.constant 8 : index
    %c0_105 = arith.constant 0 : index
    %c0_106 = arith.constant 0 : index
    %113 = vector.load %arg1[%c0_104, %c8, %c0_105, %c0_106] : memref<1x9x576x9xbf16, #tpu.memory_space<vmem>>, vector<1x1x576x9xbf16>
    %114 = vector.shape_cast %113 : vector<1x1x576x9xbf16> to vector<576x9xbf16>
    %c0_107 = arith.constant 0 : index
    %c0_108 = arith.constant 0 : index
    %115 = vector.load %arg2[%c0_107, %c0_108] : memref<9x32xbf16, #tpu.memory_space<vmem>>, vector<9x32xbf16>
    %cst_109 = arith.constant dense<0.000000e+00> : vector<576x32xf32>
    %116 = tpu.matmul %114, %115, %cst_109 {dimension_numbers = #tpu.dot_dimension_numbers<[1], [0], [0], [1], [0, 0, 1, 1], [], []>} : vector<576x9xbf16>, vector<9x32xbf16>, vector<576x32xf32> -> vector<576x32xf32>
    %c0_110 = arith.constant 0 : index
    %c0_111 = arith.constant 0 : index
    %117 = vector.load %arg3[%c0_110, %c0_111] : memref<1x32xf32, #tpu.memory_space<vmem>>, vector<1x32xf32>
    %118 = vector.broadcast %117 : vector<1x32xf32> to vector<576x32xf32>
    %119 = arith.addf %116, %118 : vector<576x32xf32>
    %cst_112 = arith.constant 0.000000e+00 : f32
    %120 = vector.broadcast %cst_112 : f32 to vector<576x32xf32>
    %121 = arith.maximumf %119, %120 : vector<576x32xf32>
    %122 = arith.truncf %121 : vector<576x32xf32> to vector<576x32xbf16>
    %c8_113 = arith.constant 8 : index
    %c0_114 = arith.constant 0 : index
    %c0_115 = arith.constant 0 : index
    %123 = vector.load %arg4[%c8_113, %c0_114, %c0_115] : memref<9x32x64xbf16, #tpu.memory_space<vmem>>, vector<1x32x64xbf16>
    %124 = vector.shape_cast %123 : vector<1x32x64xbf16> to vector<32x64xbf16>
    %cst_116 = arith.constant dense<0.000000e+00> : vector<576x64xf32>
    %125 = tpu.matmul %122, %124, %cst_116 {dimension_numbers = #tpu.dot_dimension_numbers<[1], [0], [0], [1], [0, 0, 1, 1], [], []>} : vector<576x32xbf16>, vector<32x64xbf16>, vector<576x64xf32> -> vector<576x64xf32>
    %126 = arith.addf %112, %125 : vector<576x64xf32>
    %c0_117 = arith.constant 0 : index
    %c0_118 = arith.constant 0 : index
    %127 = vector.load %arg5[%c0_117, %c0_118] : memref<1x64xf32, #tpu.memory_space<vmem>>, vector<1x64xf32>
    %128 = vector.broadcast %127 : vector<1x64xf32> to vector<576x64xf32>
    %129 = arith.addf %126, %128 : vector<576x64xf32>
    %cst_119 = arith.constant 0.000000e+00 : f32
    %130 = vector.broadcast %cst_119 : f32 to vector<576x64xf32>
    %131 = arith.maximumf %129, %130 : vector<576x64xf32>
    %132 = vector.extract_strided_slice %131 {offsets = [0, 0], sizes = [144, 64], strides = [1, 1]} : vector<576x64xf32> to vector<144x64xf32>
    %133 = vector.extract_strided_slice %131 {offsets = [144, 0], sizes = [144, 64], strides = [1, 1]} : vector<576x64xf32> to vector<144x64xf32>
    %134 = arith.maximumf %132, %133 : vector<144x64xf32>
    %135 = vector.extract_strided_slice %131 {offsets = [288, 0], sizes = [144, 64], strides = [1, 1]} : vector<576x64xf32> to vector<144x64xf32>
    %136 = vector.extract_strided_slice %131 {offsets = [432, 0], sizes = [144, 64], strides = [1, 1]} : vector<576x64xf32> to vector<144x64xf32>
    %137 = arith.maximumf %135, %136 : vector<144x64xf32>
    %138 = arith.maximumf %134, %137 : vector<144x64xf32>
    %139 = arith.truncf %138 : vector<144x64xf32> to vector<144x64xbf16>
    %c0_120 = arith.constant 0 : index
    %c0_121 = arith.constant 0 : index
    %c0_122 = arith.constant 0 : index
    %140 = vector.load %arg6[%c0_120, %c0_121, %c0_122] : memref<1x144x64xbf16, #tpu.memory_space<vmem>>, vector<1x144x64xbf16>
    %141 = vector.shape_cast %140 : vector<1x144x64xbf16> to vector<144x64xbf16>
    %142 = vector.shape_cast %139 : vector<144x64xbf16> to vector<1x144x64xbf16>
    tpu.vector_store %arg6[%c0_120, %c0_121, %c0_122], %142 {strides = array<i32>} : memref<1x144x64xbf16, #tpu.memory_space<vmem>>, vector<1x144x64xbf16>,
    return
  }
  func.func @transform_0(%arg0: i32) -> (i32, i32, i32, i32) {
    %c0_i32 = arith.constant 0 : i32
    %c0_i32_0 = arith.constant 0 : i32
    %c0_i32_1 = arith.constant 0 : i32
    %c0_i32_2 = arith.constant 0 : i32
    return %arg0, %c0_i32, %c0_i32_0, %c0_i32_1 : i32, i32, i32, i32
  }
  func.func @transform_1(%arg0: i32) -> (i32, i32) {
    %c0_i32 = arith.constant 0 : i32
    %c0_i32_0 = arith.constant 0 : i32
    %c0_i32_1 = arith.constant 0 : i32
    return %c0_i32, %c0_i32_0 : i32, i32
  }
  func.func @transform_2(%arg0: i32) -> (i32, i32) {
    %c0_i32 = arith.constant 0 : i32
    %c0_i32_0 = arith.constant 0 : i32
    %c0_i32_1 = arith.constant 0 : i32
    return %c0_i32, %c0_i32_0 : i32, i32
  }
  func.func @transform_3(%arg0: i32) -> (i32, i32, i32) {
    %c0_i32 = arith.constant 0 : i32
    %c0_i32_0 = arith.constant 0 : i32
    %c0_i32_1 = arith.constant 0 : i32
    %c0_i32_2 = arith.constant 0 : i32
    return %c0_i32, %c0_i32_0, %c0_i32_1 : i32, i32, i32
  }
  func.func @transform_4(%arg0: i32) -> (i32, i32) {
    %c0_i32 = arith.constant 0 : i32
    %c0_i32_0 = arith.constant 0 : i32
    %c0_i32_1 = arith.constant 0 : i32
    return %c0_i32, %c0_i32_0 : i32, i32
  }
  func.func @transform_5(%arg0: i32) -> (i32, i32, i32) {
    %c0_i32 = arith.constant 0 : i32
    %c0_i32_0 = arith.constant 0 : i32
    %c0_i32_1 = arith.constant 0 : i32
    return %arg0, %c0_i32, %c0_i32_0 : i32, i32, i32
  }
}

module attributes {stable_mosaic.version = 11 : i64} {
  func.func @_head_kernel(%arg0: i32, %arg1: memref<16x9216xbf16, #tpu.memory_space<vmem>>, %arg2: memref<9216x128xbf16, #tpu.memory_space<vmem>>, %arg3: memref<1x128xf32, #tpu.memory_space<vmem>>, %arg4: memref<128x10xbf16, #tpu.memory_space<vmem>>, %arg5: memref<1x10xf32, #tpu.memory_space<vmem>>, %arg6: memref<16x10xf32, #tpu.memory_space<vmem>>) attributes {dimension_semantics = [#tpu.dimension_semantics<parallel>], iteration_bounds = array<i64: 1>, scalar_prefetch = 0 : i64, scratch_operands = 0 : i64, tpu.core_type = #tpu.core_type<tc>, window_params = [{transform_indices = @transform_0, window_bounds = array<i64: 16, 9216>}, {pipeline_mode = #tpu.pipeline_mode<synchronous>, transform_indices = @transform_1, window_bounds = array<i64: 9216, 128>}, {pipeline_mode = #tpu.pipeline_mode<synchronous>, transform_indices = @transform_2, window_bounds = array<i64: 1, 128>}, {pipeline_mode = #tpu.pipeline_mode<synchronous>, transform_indices = @transform_3, window_bounds = array<i64: 128, 10>}, {pipeline_mode = #tpu.pipeline_mode<synchronous>, transform_indices = @transform_4, window_bounds = array<i64: 1, 10>}, {transform_indices = @transform_5, window_bounds = array<i64: 16, 10>}]} {
    %c0 = arith.constant 0 : index
    %c0_0 = arith.constant 0 : index
    %0 = vector.load %arg1[%c0, %c0_0] : memref<16x9216xbf16, #tpu.memory_space<vmem>>, vector<16x9216xbf16>
    %c0_1 = arith.constant 0 : index
    %c0_2 = arith.constant 0 : index
    %1 = vector.load %arg2[%c0_1, %c0_2] : memref<9216x128xbf16, #tpu.memory_space<vmem>>, vector<9216x128xbf16>
    %cst = arith.constant dense<0.000000e+00> : vector<16x128xf32>
    %2 = tpu.matmul %0, %1, %cst {dimension_numbers = #tpu.dot_dimension_numbers<[1], [0], [0], [1], [0, 0, 1, 1], [], []>} : vector<16x9216xbf16>, vector<9216x128xbf16>, vector<16x128xf32> -> vector<16x128xf32>
    %c0_3 = arith.constant 0 : index
    %c0_4 = arith.constant 0 : index
    %3 = vector.load %arg3[%c0_3, %c0_4] : memref<1x128xf32, #tpu.memory_space<vmem>>, vector<1x128xf32>
    %4 = vector.broadcast %3 : vector<1x128xf32> to vector<16x128xf32>
    %5 = arith.addf %2, %4 : vector<16x128xf32>
    %cst_5 = arith.constant 0.000000e+00 : f32
    %6 = vector.broadcast %cst_5 : f32 to vector<16x128xf32>
    %7 = arith.maximumf %5, %6 : vector<16x128xf32>
    %8 = arith.truncf %7 : vector<16x128xf32> to vector<16x128xbf16>
    %c0_6 = arith.constant 0 : index
    %c0_7 = arith.constant 0 : index
    %9 = vector.load %arg4[%c0_6, %c0_7] : memref<128x10xbf16, #tpu.memory_space<vmem>>, vector<128x10xbf16>
    %cst_8 = arith.constant dense<0.000000e+00> : vector<16x10xf32>
    %10 = tpu.matmul %8, %9, %cst_8 {dimension_numbers = #tpu.dot_dimension_numbers<[1], [0], [0], [1], [0, 0, 1, 1], [], []>} : vector<16x128xbf16>, vector<128x10xbf16>, vector<16x10xf32> -> vector<16x10xf32>
    %c0_9 = arith.constant 0 : index
    %c0_10 = arith.constant 0 : index
    %11 = vector.load %arg5[%c0_9, %c0_10] : memref<1x10xf32, #tpu.memory_space<vmem>>, vector<1x10xf32>
    %12 = vector.broadcast %11 : vector<1x10xf32> to vector<16x10xf32>
    %13 = arith.addf %10, %12 : vector<16x10xf32>
    %cst_11 = arith.constant dense<0xFF800000> : vector<16xf32>
    %14 = vector.multi_reduction <maximumf>, %13, %cst_11 [1] : vector<16x10xf32> to vector<16xf32>
    %15 = vector.shape_cast %14 : vector<16xf32> to vector<16x1xf32>
    %16 = vector.broadcast %15 : vector<16x1xf32> to vector<16x10xf32>
    %17 = arith.subf %13, %16 : vector<16x10xf32>
    %18 = math.exp %17 : vector<16x10xf32>
    %cst_12 = arith.constant dense<0.000000e+00> : vector<16xf32>
    %19 = vector.multi_reduction <add>, %18, %cst_12 [1] : vector<16x10xf32> to vector<16xf32>
    %20 = vector.shape_cast %19 : vector<16xf32> to vector<16x1xf32>
    %21 = math.log %20 : vector<16x1xf32>
    %22 = arith.addf %21, %15 : vector<16x1xf32>
    %23 = vector.broadcast %22 : vector<16x1xf32> to vector<16x10xf32>
    %24 = arith.subf %13, %23 : vector<16x10xf32>
    %c0_13 = arith.constant 0 : index
    %c0_14 = arith.constant 0 : index
    %25 = vector.load %arg6[%c0_13, %c0_14] : memref<16x10xf32, #tpu.memory_space<vmem>>, vector<16x10xf32>
    tpu.vector_store %arg6[%c0_13, %c0_14], %24 {strides = array<i32>} : memref<16x10xf32, #tpu.memory_space<vmem>>, vector<16x10xf32>,
    return
  }
  func.func @transform_0(%arg0: i32) -> (i32, i32) {
    %c0_i32 = arith.constant 0 : i32
    %c0_i32_0 = arith.constant 0 : i32
    return %arg0, %c0_i32 : i32, i32
  }
  func.func @transform_1(%arg0: i32) -> (i32, i32) {
    %c0_i32 = arith.constant 0 : i32
    %c0_i32_0 = arith.constant 0 : i32
    %c0_i32_1 = arith.constant 0 : i32
    return %c0_i32, %c0_i32_0 : i32, i32
  }
  func.func @transform_2(%arg0: i32) -> (i32, i32) {
    %c0_i32 = arith.constant 0 : i32
    %c0_i32_0 = arith.constant 0 : i32
    %c0_i32_1 = arith.constant 0 : i32
    return %c0_i32, %c0_i32_0 : i32, i32
  }
  func.func @transform_3(%arg0: i32) -> (i32, i32) {
    %c0_i32 = arith.constant 0 : i32
    %c0_i32_0 = arith.constant 0 : i32
    %c0_i32_1 = arith.constant 0 : i32
    return %c0_i32, %c0_i32_0 : i32, i32
  }
  func.func @transform_4(%arg0: i32) -> (i32, i32) {
    %c0_i32 = arith.constant 0 : i32
    %c0_i32_0 = arith.constant 0 : i32
    %c0_i32_1 = arith.constant 0 : i32
    return %c0_i32, %c0_i32_0 : i32, i32
  }
  func.func @transform_5(%arg0: i32) -> (i32, i32) {
    %c0_i32 = arith.constant 0 : i32
    %c0_i32_0 = arith.constant 0 : i32
    return %arg0, %c0_i32 : i32, i32
  }
}

</mosaic_0001>

<bundles_post_ra>
// kernel: net_forward.2
= control target key start
LH: loop header
LB: loop body
LE: loop exit
PB: predicated region body
PF: predicated region fallthrough
CT: control target
= control target key end

     0   :  { %s12833_s18 = smov 0   ;;  %s16004_s0 = inlined_call_operand.vmem [shape: bf16[2,9,576,9], index: 0, kind: input, shape index: {}]   ;;  %s16005_s1 = inlined_call_operand.vmem [shape: bf16[9,32], index: 1, kind: input, shape index: {}]   ;;  %s16006_s2 = inlined_call_operand.vmem [shape: f32[1,32], index: 2, kind: input, shape index: {}]   ;;  %s16007_s3 = inlined_call_operand.vmem [shape: bf16[9,32,64], index: 3, kind: input, shape index: {}]   ;;  %s16008_s4 = inlined_call_operand.vmem [shape: f32[1,64], index: 4, kind: input, shape index: {}]   ;;  %s16009_s5 = inlined_call_operand.vmem [shape: bf16[2,144,64], index: 5, kind: output, shape index: {}]  }
   0x1 LB: > { %s9790_s19 = sadd.s32 4294967295, %s12800_s18   ;;  %p9794_p0 = scmp.ge.s32.totalorder %s12800_s18, 1  ;;  %s12800_s18 = sphi %s12833_s18, %s15_s18  }
   0x2   : > { %p187_p1 = scmp.lt.s32.totalorder %s12800_s18, 3 }
   0x4   : > { %p188_p2 = pnand %p9794_p0, %p187_p1 }
   0x6   : > { %191 = sbr.rel (%p188_p2) target bundleno = 2897 (0xb51), region = 40 }
   0xb   : > { %v9943_v0 = vld [vmem:[%s16005_s1] sm:$0xf]  ;;  %v12463_v1 = vld [vmem:[%s16005_s1] sm:$0x10]  ;;  %vm598_vm0 = vcmask 1043456   ;;  %vm599_vm1 = vcmask 1044480  }
   0xc   : > { %v9944_v2 = vor.u32 %v12463_v1, %v9943_v0  ;;  %p215_p3 = scmp.lt.s32.totalorder %s9790_s19, 1  ;;  %v12802_v3 = vmov 65535   ;;  %v12503_v6 = vld [vmem:[%s16007_s3 + $0x18] sm:$0xff]  ;;  %vm489_vm2 = vcmask 72704   ;;  %v12502_v33 = vld [vmem:[%s16007_s3 + $0x10] sm:$0xff]  ;;  %v12465_v34 = vld [vmem:[%s16007_s3 + $0x8] sm:$0xff] }
   0xd   : > { %v600_v4 = vsel %vm598_vm0, 4294967295, %v12802_v3  ;;  %v12541_v35 = vld [vmem:[%s16007_s3 + $0x28] sm:$0xff]  ;;  %v12934_v41 = vld [vmem:[%s16006_s2] ss:$0 sm:$0xff]  ;;  %vm1581_vm3 = vcmask 261120   ;;  %vm9716_vm4 = vcmask 519168  }
   0xe   : > { %v601_v5 = vsel %vm599_vm1, %v600_v4, 0  ;;  %s16231_s19 = smov (!%p215_p3, %s9790_s19), 1 }
   0xf   : > { %v12852_v7 = vand.u32 %v9944_v2, %v601_v5  ;;  %s12772_s26 = smul.u32 2592, %s16231_s19 }
  0x10   : > { %s12773_s16 = smul.u32 72, %s16231_s19 }
  0x11   : > { %16012 = vst [vmem:[#allocation2_spill] sm:$0xff] %v12852_v7  ;;  %612 = vmatpush.bf16.msra.mxu0 %v12852_v7  ;;  %12770 = vmatpush.bf16.msra.mxu2 %v12852_v7  ;;  %s12861_s29 = scalar_lea.vmem %s16004_s0, %s12772_s26 }
  0x12   : > { %12771 = vmatpush.bf16.msra.mxu3 %v12852_v7  ;;  %v12427_v8 = vld [vmem:[%s12861_s29] sm:$0xff]  ;;  %v12445_v9 = vld [vmem:[%s12861_s29 + $0x90] sm:$0xff]  ;;  %1274 = vmatpush.bf16.msra.mxu1 %v12852_v7  ;;  %v12428_v11 = vld [vmem:[%s12861_s29 + $0x8] sm:$0xff]  ;;  %s15881_s21 = scalar_lea.vmem %s16009_s5, %s12773_s16 }
  0x13   : > { %v12484_v10 = vld [vmem:[%s12861_s29 + $0x1b0] sm:$0xff]  ;;  %v12446_v12 = vld [vmem:[%s12861_s29 + $0x98] sm:$0xff]  ;;  %v12447_v15 = vld [vmem:[%s12861_s29 + $0xa0] sm:$0xff] }
  0x14   : > { %9945 = vmatmul.msk.bf16.vlgmr.msra.gmra.mxu0 %vm489_vm2, %v12427_v8  ;;  %9963 = vmatmul.msk.bf16.vlgmr.msra.gmra.mxu2 %vm489_vm2, %v12445_v9  ;;  %v12485_v13 = vld [vmem:[%s12861_s29 + $0x1b8] sm:$0xff]  ;;  %v12429_v14 = vld [vmem:[%s12861_s29 + $0x10] sm:$0xff]  ;;  %v12486_v16 = vld [vmem:[%s12861_s29 + $0x1c0] sm:$0xff] }
  0x15   : > { %1696 = vmatpush.bf16.msrb.mxu2 %v12503_v6  ;;  %2556 = vmatpush.bf16.msrb.mxu0 %v12852_v7  ;;  %v12430_v17 = vld [vmem:[%s12861_s29 + $0x18] sm:$0xff]  ;;  %v12448_v18 = vld [vmem:[%s12861_s29 + $0xa8] sm:$0xff]  ;;  %v12431_v20 = vld [vmem:[%s12861_s29 + $0x20] sm:$0xff] }
  0x16   : > { %10215 = vmatmul.msk.bf16.vlgmr.msra.gmra.mxu3 %vm489_vm2, %v12484_v10  ;;  %v12487_v19 = vld [vmem:[%s12861_s29 + $0x1c8] sm:$0xff]  ;;  %v12449_v21 = vld [vmem:[%s12861_s29 + $0xb0] sm:$0xff]  ;;  %v12450_v24 = vld [vmem:[%s12861_s29 + $0xb8] sm:$0xff]  ;;  %2977 = vmatpush.bf16.msrb.mxu1 %v12541_v35 }
  0x17   : > { %v12488_v22 = vld [vmem:[%s12861_s29 + $0x1d0] sm:$0xff]  ;;  %v12432_v23 = vld [vmem:[%s12861_s29 + $0x28] sm:$0xff]  ;;  %v12489_v25 = vld [vmem:[%s12861_s29 + $0x1d8] sm:$0xff]  ;;  %2005 = vmatpush.bf16.msrb.mxu3 %v12465_v34 }
  0x18   : > { %v12433_v26 = vld [vmem:[%s12861_s29 + $0x30] sm:$0xff]  ;;  %v12451_v27 = vld [vmem:[%s12861_s29 + $0xc0] sm:$0xff]  ;;  %v12434_v30 = vld [vmem:[%s12861_s29 + $0x38] sm:$0xff] }
  0x19   : > { %4644 = vmatpush.bf16.msra.mxu0 %v12852_v7  ;;  %v12490_v28 = vld [vmem:[%s12861_s29 + $0x1e0] sm:$0xff]  ;;  %v12452_v31 = vld [vmem:[%s12861_s29 + $0xc8] sm:$0xff]  ;;  %1697 = vmatpush.bf16.msrb.mxu2 %v12502_v33  ;;  %v12453_v38 = vld [vmem:[%s12861_s29 + $0xd0] sm:$0xff] }
  0x1a   : > { %v12466_v29 = vld [vmem:[%s12861_s29 + $0x120] sm:$0xff]  ;;  %v12491_v32 = vld [vmem:[%s12861_s29 + $0x1e8] sm:$0xff]  ;;  %v12492_v40 = vld [vmem:[%s12861_s29 + $0x1f0] sm:$0xff] }
  0x1b   : > { %10197 = vmatmul.msk.bf16.vlgmr.msra.gmra.mxu1 %vm489_vm2, %v12466_v29  ;;  %v12467_v36 = vld [vmem:[%s12861_s29 + $0x128] sm:$0xff]  ;;  %v12435_v37 = vld [vmem:[%s12861_s29 + $0x40] sm:$0xff]  ;;  %v12468_v53 = vld [vmem:[%s12861_s29 + $0x130] sm:$0xff] }
  0x1c   : > { %v12436_v56 = vld [vmem:[%s12861_s29 + $0x48] sm:$0xff]  ;;  %v12454_v57 = vld [vmem:[%s12861_s29 + $0xd8] sm:$0xff] }
  0x1d   : > { %3600 = vmatpush.bf16.msra.mxu2 %v12852_v7  ;;  %v12493_v61 = vld [vmem:[%s12861_s29 + $0x1f8] sm:$0xff] }
  0x24   : > { %9946 = vmatmul.msk.bf16.gmra.mxu0 %vm489_vm2, %v12428_v11  ;;  %9964 = vmatmul.msk.bf16.gmra.mxu2 %vm489_vm2, %v12446_v12 }
  0x26   : > { %10216 = vmatmul.msk.bf16.gmra.mxu3 %vm489_vm2, %v12485_v13 }
  0x2b   : > { %10198 = vmatmul.msk.bf16.gmra.mxu1 %vm489_vm2, %v12467_v36 }
  0x34   : > { %9947 = vmatmul.msk.bf16.gmra.mxu0 %vm489_vm2, %v12429_v14  ;;  %9965 = vmatmul.msk.bf16.gmra.mxu2 %vm489_vm2, %v12447_v15  ;;  %v12469_v15 = vld [vmem:[%s12861_s29 + $0x138] sm:$0xff] }
  0x36   : > { %10217 = vmatmul.msk.bf16.gmra.mxu3 %vm489_vm2, %v12486_v16 }
  0x3b   : > { %10199 = vmatmul.msk.bf16.gmra.mxu1 %vm489_vm2, %v12468_v53 }
  0x44   : > { %9948 = vmatmul.msk.bf16.gmra.mxu0 %vm489_vm2, %v12430_v17  ;;  %9966 = vmatmul.msk.bf16.gmra.mxu2 %vm489_vm2, %v12448_v18  ;;  %v12437_v18 = vld [vmem:[%s12861_s29 + $0x50] sm:$0xff] }
  0x46   : > { %10218 = vmatmul.msk.bf16.gmra.mxu3 %vm489_vm2, %v12487_v19  ;;  %v12455_v19 = vld [vmem:[%s12861_s29 + $0xe0] sm:$0xff] }
  0x4b   : > { %10200 = vmatmul.msk.bf16.gmra.mxu1 %vm489_vm2, %v12469_v15  ;;  %v12496_v15 = vld [vmem:[%s12861_s29 + $0x210] sm:$0xff] }
  0x54   : > { %9949 = vmatmul.msk.bf16.gmra.mxu0 %vm489_vm2, %v12431_v20  ;;  %9967 = vmatmul.msk.bf16.gmra.mxu2 %vm489_vm2, %v12449_v21 }
  0x56   : > { %10219 = vmatmul.msk.bf16.gmra.mxu3 %vm489_vm2, %v12488_v22 }
  0x64   : > { %9950 = vmatmul.msk.bf16.gmra.mxu0 %vm489_vm2, %v12432_v23  ;;  %9968 = vmatmul.msk.bf16.gmra.mxu2 %vm489_vm2, %v12450_v24  ;;  %v12494_v23 = vld [vmem:[%s12861_s29 + $0x200] sm:$0xff] }
  0x66   : > { %10220 = vmatmul.msk.bf16.gmra.mxu3 %vm489_vm2, %v12489_v25 }
  0x74   : > { %9951 = vmatmul.msk.bf16.gmra.mxu0 %vm489_vm2, %v12433_v26  ;;  %9969 = vmatmul.msk.bf16.gmra.mxu2 %vm489_vm2, %v12451_v27 }
  0x76   : > { %10221 = vmatmul.msk.bf16.gmra.mxu3 %vm489_vm2, %v12490_v28 }
  0x84   : > { %9952 = vmatmul.msk.bf16.gmra.mxu0 %vm489_vm2, %v12434_v30  ;;  %9970 = vmatmul.msk.bf16.gmra.mxu2 %vm489_vm2, %v12452_v31 }
  0x86   : > { %10222 = vmatmul.msk.bf16.gmra.mxu3 %vm489_vm2, %v12491_v32 }
  0x91   : > { %v614_v39 = vpop.f32.mrf.mxu0 }
  0x92   : > { %v615_v42 = vadd.f32 %v12934_v41, %v614_v39 }
  0x94   : > { %9953 = vmatmul.msk.bf16.gmra.mxu0 %vm489_vm2, %v12435_v37  ;;  %9971 = vmatmul.msk.bf16.gmra.mxu2 %vm489_vm2, %v12453_v38  ;;  %v794_v46 = vmax.f32 %v615_v42, 0.0 }
  0x96   : > { %10223 = vmatmul.msk.bf16.gmra.mxu3 %vm489_vm2, %v12492_v40  ;;  %v12470_v40 = vld [vmem:[%s12861_s29 + $0x140] sm:$0xff] }
  0x97   : > { %v704_v43 = vpop.f32.mrf.mxu2  ;;  %10201 = vmatmul.msk.bf16.gmra.mxu1 %vm489_vm2, %v12470_v40 }
  0x98   : > { %v705_v50 = vadd.f32 %v12934_v41, %v704_v43 }
  0x99   : > { %v1366_v44 = vpop.f32.mrf.mxu3  ;;  %v616_v45 = vpop.f32.mrf.mxu0 }
  0x9a   : > { %v617_v47 = vadd.f32 %v12934_v41, %v616_v45  ;;  %v1367_v49 = vadd.f32 %v12934_v41, %v1366_v44  ;;  %v830_v62 = vmax.f32 %v705_v50, 0.0  ;;  %v12438_v44 = vld [vmem:[%s12861_s29 + $0x58] sm:$0xff]  ;;  %v12456_v45 = vld [vmem:[%s12861_s29 + $0xe8] sm:$0xff] }
  0x9c   : > { %v795_v48 = vmax.f32 %v617_v47, 0.0  ;;  %v1492_v58 = vmax.f32 %v1367_v49, 0.0  ;;  %v12495_v49 = vld [vmem:[%s12861_s29 + $0x208] sm:$0xff] }
  0x9e   : > { %v12943_v51 = vpack.c.bf16 %v795_v48, %v794_v46 }
  0x9f   : > { %v706_v52 = vpop.f32.mrf.mxu2 }
  0xa0   : > { %v707_v54 = vadd.f32 %v12934_v41, %v706_v52 }
  0xa1   : > { %v1368_v55 = vpop.f32.mrf.mxu3  ;;  %v619_v60 = vpop.f32.mrf.mxu0 }
  0xa2   : > { %v1369_v59 = vadd.f32 %v12934_v41, %v1368_v55  ;;  %v831_v63 = vmax.f32 %v707_v54, 0.0  ;;  %v620_v3 = vadd.f32 %v12934_v41, %v619_v60 }
  0xa4   : > { %v1493_v0 = vmax.f32 %v1369_v59, 0.0  ;;  %v12952_v1 = vpack.c.bf16 %v831_v63, %v830_v62  ;;  %9954 = vmatmul.msk.bf16.gmra.mxu0 %vm489_vm2, %v12436_v56  ;;  %9972 = vmatmul.msk.bf16.gmra.mxu2 %vm489_vm2, %v12454_v57  ;;  %v796_v8 = vmax.f32 %v620_v3, 0.0 }
  0xa6   : > { %v12956_v2 = vpack.c.bf16 %v1493_v0, %v1492_v58  ;;  %10224 = vmatmul.msk.bf16.gmra.mxu3 %vm489_vm2, %v12493_v61 }
  0xa7   : > { %v709_v4 = vpop.f32.mrf.mxu2 }
  0xa8   : > { %v710_v12 = vadd.f32 %v12934_v41, %v709_v4 }
  0xa9   : > { %v1371_v5 = vpop.f32.mrf.mxu3  ;;  %v621_v6 = vpop.f32.mrf.mxu0 }
  0xaa   : > { %v622_v9 = vadd.f32 %v12934_v41, %v621_v6  ;;  %v1372_v11 = vadd.f32 %v12934_v41, %v1371_v5  ;;  %v832_v24 = vmax.f32 %v710_v12, 0.0  ;;  %v12471_v5 = vld [vmem:[%s12861_s29 + $0x148] sm:$0xff] }
  0xab   : > { %10202 = vmatmul.msk.bf16.gmra.mxu1 %vm489_vm2, %v12471_v5 }
  0xac   : > { %v797_v10 = vmax.f32 %v622_v9, 0.0  ;;  %v1494_v20 = vmax.f32 %v1372_v11, 0.0  ;;  %v12439_v9 = vld [vmem:[%s12861_s29 + $0x60] sm:$0xff] }
  0xae   : > { %v12963_v13 = vpack.c.bf16 %v797_v10, %v796_v8  ;;  %v12457_v10 = vld [vmem:[%s12861_s29 + $0xf0] sm:$0xff] }
  0xaf   : > { %v711_v14 = vpop.f32.mrf.mxu2 }
  0xb0   : > { %v712_v16 = vadd.f32 %v12934_v41, %v711_v14 }
  0xb1   : > { %v1373_v17 = vpop.f32.mrf.mxu3  ;;  %v624_v22 = vpop.f32.mrf.mxu0 }
  0xb2   : > { %v1374_v21 = vadd.f32 %v12934_v41, %v1373_v17  ;;  %v833_v25 = vmax.f32 %v712_v16, 0.0  ;;  %v625_v29 = vadd.f32 %v12934_v41, %v624_v22 }
  0xb4   : > { %v1495_v26 = vmax.f32 %v1374_v21, 0.0  ;;  %v12972_v27 = vpack.c.bf16 %v833_v25, %v832_v24  ;;  %9955 = vmatmul.msk.bf16.gmra.mxu0 %vm489_vm2, %v12437_v18  ;;  %9973 = vmatmul.msk.bf16.gmra.mxu2 %vm489_vm2, %v12455_v19  ;;  %v798_v33 = vmax.f32 %v625_v29, 0.0 }
  0xb6   : > { %v12976_v28 = vpack.c.bf16 %v1495_v26, %v1494_v20  ;;  %10225 = vmatmul.msk.bf16.gmra.mxu3 %vm489_vm2, %v12494_v23 }
  0xb7   : > { %v714_v30 = vpop.f32.mrf.mxu2 }
  0xb8   : > { %v715_v37 = vadd.f32 %v12934_v41, %v714_v30 }
  0xb9   : > { %v1376_v31 = vpop.f32.mrf.mxu3  ;;  %v626_v32 = vpop.f32.mrf.mxu0 }
  0xba   : > { %v627_v34 = vadd.f32 %v12934_v41, %v626_v32  ;;  %v1377_v36 = vadd.f32 %v12934_v41, %v1376_v31  ;;  %v834_v50 = vmax.f32 %v715_v37, 0.0  ;;  %v12440_v37 = vld [vmem:[%s12861_s29 + $0x68] sm:$0xff] }
  0xbc   : > { %v799_v35 = vmax.f32 %v627_v34, 0.0  ;;  %v1496_v46 = vmax.f32 %v1377_v36, 0.0  ;;  %v12472_v34 = vld [vmem:[%s12861_s29 + $0x150] sm:$0xff] }
  0xbd   : > { %10203 = vmatmul.msk.bf16.gmra.mxu1 %vm489_vm2, %v12472_v34  ;;  %v13065_v34 = vpop.f32.mrf.mxu1 }
  0xbe   : > { %v12983_v38 = vpack.c.bf16 %v799_v35, %v798_v33 }
  0xbf   : > { %v716_v39 = vpop.f32.mrf.mxu2 }
  0xc0   : > { %v717_v42 = vadd.f32 %v12934_v41, %v716_v39  ;;  %v12458_v39 = vld [vmem:[%s12861_s29 + $0xf8] sm:$0xff] }
  0xc1   : > { %v1378_v43 = vpop.f32.mrf.mxu3  ;;  %v629_v48 = vpop.f32.mrf.mxu0 }
  0xc2   : > { %v1379_v47 = vadd.f32 %v12934_v41, %v1378_v43  ;;  %v835_v52 = vmax.f32 %v717_v42, 0.0  ;;  %v630_v56 = vadd.f32 %v12934_v41, %v629_v48 }
  0xc4   : > { %v1497_v53 = vmax.f32 %v1379_v47, 0.0  ;;  %v12992_v54 = vpack.c.bf16 %v835_v52, %v834_v50  ;;  %9956 = vmatmul.msk.bf16.gmra.mxu0 %vm489_vm2, %v12438_v44  ;;  %9974 = vmatmul.msk.bf16.gmra.mxu2 %vm489_vm2, %v12456_v45  ;;  %v800_v60 = vmax.f32 %v630_v56, 0.0  ;;  %v12497_v44 = vld [vmem:[%s12861_s29 + $0x218] sm:$0xff] }
  0xc6   : > { %v12996_v55 = vpack.c.bf16 %v1497_v53, %v1496_v46  ;;  %10226 = vmatmul.msk.bf16.gmra.mxu3 %vm489_vm2, %v12495_v49 }
  0xc7   : > { %v719_v57 = vpop.f32.mrf.mxu2 }
  0xc8   : > { %v720_v0 = vadd.f32 %v12934_v41, %v719_v57 }
  0xc9   : > { %v1381_v58 = vpop.f32.mrf.mxu3  ;;  %v631_v59 = vpop.f32.mrf.mxu0 }
  0xca   : > { %v632_v61 = vadd.f32 %v12934_v41, %v631_v59  ;;  %v1382_v63 = vadd.f32 %v12934_v41, %v1381_v58  ;;  %v836_v16 = vmax.f32 %v720_v0, 0.0  ;;  %v12473_v0 = vld [vmem:[%s12861_s29 + $0x158] sm:$0xff] }
  0xcc   : > { %v801_v62 = vmax.f32 %v632_v61, 0.0  ;;  %v1498_v11 = vmax.f32 %v1382_v63, 0.0 }
  0xcd   : > { %10204 = vmatmul.msk.bf16.gmra.mxu1 %vm489_vm2, %v12473_v0 }
  0xce   : > { %v13003_v3 = vpack.c.bf16 %v801_v62, %v800_v60 }
  0xcf   : > { %v721_v4 = vpop.f32.mrf.mxu2 }
  0xd0   : > { %v722_v6 = vadd.f32 %v12934_v41, %v721_v4 }
  0xd1   : > { %v1383_v8 = vpop.f32.mrf.mxu3  ;;  %v634_v14 = vpop.f32.mrf.mxu0 }
  0xd2   : > { %v1384_v12 = vadd.f32 %v12934_v41, %v1383_v8  ;;  %v837_v17 = vmax.f32 %v722_v6, 0.0  ;;  %v635_v21 = vadd.f32 %v12934_v41, %v634_v14  ;;  %v12441_v6 = vld [vmem:[%s12861_s29 + $0x70] sm:$0xff]  ;;  %v12459_v8 = vld [vmem:[%s12861_s29 + $0x100] sm:$0xff] }
  0xd4   : > { %v1499_v18 = vmax.f32 %v1384_v12, 0.0  ;;  %v13012_v19 = vpack.c.bf16 %v837_v17, %v836_v16  ;;  %9957 = vmatmul.msk.bf16.gmra.mxu0 %vm489_vm2, %v12439_v9  ;;  %9975 = vmatmul.msk.bf16.gmra.mxu2 %vm489_vm2, %v12457_v10  ;;  %v802_v25 = vmax.f32 %v635_v21, 0.0  ;;  %v12498_v12 = vld [vmem:[%s12861_s29 + $0x220] sm:$0xff] }
  0xd6   : > { %v13016_v20 = vpack.c.bf16 %v1499_v18, %v1498_v11  ;;  %10227 = vmatmul.msk.bf16.gmra.mxu3 %vm489_vm2, %v12496_v15 }
  0xd7   : > { %v724_v22 = vpop.f32.mrf.mxu2 }
  0xd8   : > { %v725_v31 = vadd.f32 %v12934_v41, %v724_v22 }
  0xd9   : > { %v1386_v23 = vpop.f32.mrf.mxu3  ;;  %v636_v24 = vpop.f32.mrf.mxu0 }
  0xda   : > { %v637_v26 = vadd.f32 %v12934_v41, %v636_v24  ;;  %v1387_v30 = vadd.f32 %v12934_v41, %v1386_v23  ;;  %v838_v45 = vmax.f32 %v725_v31, 0.0 }
  0xdc   : > { %v803_v29 = vmax.f32 %v637_v26, 0.0  ;;  %v1500_v40 = vmax.f32 %v1387_v30, 0.0 }
  0xde   : > { %v13023_v32 = vpack.c.bf16 %v803_v29, %v802_v25 }
  0xdf   : > { %v726_v33 = vpop.f32.mrf.mxu2 }
  0xe0   : > { %v727_v35 = vadd.f32 %v12934_v41, %v726_v33 }
  0xe1   : > { %v1388_v36 = vpop.f32.mrf.mxu3  ;;  %v639_v43 = vpop.f32.mrf.mxu0 }
  0xe2   : > { %v1389_v42 = vadd.f32 %v12934_v41, %v1388_v36  ;;  %v839_v46 = vmax.f32 %v727_v35, 0.0  ;;  %v640_v50 = vadd.f32 %v12934_v41, %v639_v43  ;;  %v12474_v36 = vld [vmem:[%s12861_s29 + $0x160] sm:$0xff] }
  0xe3   : > { %10205 = vmatmul.msk.bf16.gmra.mxu1 %vm489_vm2, %v12474_v36 }
  0xe4   : > { %v1501_v47 = vmax.f32 %v1389_v42, 0.0  ;;  %v13032_v48 = vpack.c.bf16 %v839_v46, %v838_v45  ;;  %9958 = vmatmul.msk.bf16.gmra.mxu0 %vm489_vm2, %v12440_v37  ;;  %9976 = vmatmul.msk.bf16.gmra.mxu2 %vm489_vm2, %v12458_v39  ;;  %v804_v57 = vmax.f32 %v640_v50, 0.0  ;;  %v12460_v42 = vld [vmem:[%s12861_s29 + $0x108] sm:$0xff] }
  0xe5   : > { %v12499_v46 = vld [vmem:[%s12861_s29 + $0x228] sm:$0xff] }
  0xe6   : > { %v13036_v49 = vpack.c.bf16 %v1501_v47, %v1500_v40  ;;  %10228 = vmatmul.msk.bf16.gmra.mxu3 %vm489_vm2, %v12497_v44  ;;  %v12442_v40 = vld [vmem:[%s12861_s29 + $0x78] sm:$0xff] }
  0xe7   : > { %v729_v52 = vpop.f32.mrf.mxu2 }
  0xe8   : > { %v730_v61 = vadd.f32 %v12934_v41, %v729_v52 }
  0xe9   : > { %v1391_v53 = vpop.f32.mrf.mxu3  ;;  %v641_v56 = vpop.f32.mrf.mxu0 }
  0xea   : > { %v642_v58 = vadd.f32 %v12934_v41, %v641_v56  ;;  %v1392_v60 = vadd.f32 %v12934_v41, %v1391_v53  ;;  %v840_v14 = vmax.f32 %v730_v61, 0.0 }
  0xec   : > { %v805_v59 = vmax.f32 %v642_v58, 0.0  ;;  %v1502_v9 = vmax.f32 %v1392_v60, 0.0  ;;  %v13082_v58 = vpop.f32.mrf.mxu1 }
  0xee   : > { %v13043_v62 = vpack.c.bf16 %v805_v59, %v804_v57 }
  0xef   : > { %v731_v63 = vpop.f32.mrf.mxu2 }
  0xf0   : > { %v732_v4 = vadd.f32 %v12934_v41, %v731_v63 }
  0xf1   : > { %v1393_v5 = vpop.f32.mrf.mxu3  ;;  %v644_v11 = vpop.f32.mrf.mxu0 }
  0xf2   : > { %v1394_v10 = vadd.f32 %v12934_v41, %v1393_v5  ;;  %v841_v15 = vmax.f32 %v732_v4, 0.0  ;;  %v645_v21 = vadd.f32 %v12934_v41, %v644_v11  ;;  %v12475_v11 = vld [vmem:[%s12861_s29 + $0x168] sm:$0xff] }
  0xf3   : > { %10206 = vmatmul.msk.bf16.gmra.mxu1 %vm489_vm2, %v12475_v11  ;;  %v12501_v11 = vld [vmem:[%s12861_s29 + $0x238] sm:$0xff] }
  0xf4   : > { %v1503_v16 = vmax.f32 %v1394_v10, 0.0  ;;  %v13052_v17 = vpack.c.bf16 %v841_v15, %v840_v14  ;;  %9959 = vmatmul.msk.bf16.gmra.mxu0 %vm489_vm2, %v12441_v6  ;;  %9977 = vmatmul.msk.bf16.gmra.mxu2 %vm489_vm2, %v12459_v8  ;;  %v806_v25 = vmax.f32 %v645_v21, 0.0  ;;  %v12443_v15 = vld [vmem:[%s12861_s29 + $0x80] sm:$0xff] }
  0xf5   : > { %v12464_v21 = vld [vmem:[%s16007_s3] sm:$0xff] }
  0xf6   : > { %v13056_v18 = vpack.c.bf16 %v1503_v16, %v1502_v9  ;;  %10229 = vmatmul.msk.bf16.gmra.mxu3 %vm489_vm2, %v12498_v12  ;;  %v13089_v9 = vpop.f32.mrf.mxu1  ;;  %v12461_v16 = vld [vmem:[%s12861_s29 + $0x110] sm:$0xff] }
  0xf7   : > { %v734_v22 = vpop.f32.mrf.mxu2  ;;  %2006 = vmatpush.bf16.msrb.mxu3 %v12464_v21 }
  0xf8   : > { %v735_v31 = vadd.f32 %v12934_v41, %v734_v22 }
  0xf9   : > { %v1396_v23 = vpop.f32.mrf.mxu3  ;;  %v646_v24 = vpop.f32.mrf.mxu0 }
  0xfa   : > { %v647_v26 = vadd.f32 %v12934_v41, %v646_v24  ;;  %v1397_v30 = vadd.f32 %v12934_v41, %v1396_v23  ;;  %v842_v47 = vmax.f32 %v735_v31, 0.0 }
  0xfc   : > { %v807_v29 = vmax.f32 %v647_v26, 0.0  ;;  %v1504_v43 = vmax.f32 %v1397_v30, 0.0 }
  0xfe   : > { %v13063_v33 = vpack.c.bf16 %v807_v29, %v806_v25  ;;  %v12500_v25 = vld [vmem:[%s12861_s29 + $0x230] sm:$0xff] }
  0xff   : > { %v736_v35 = vpop.f32.mrf.mxu2 }
 0x100   : > { %v737_v37 = vadd.f32 %v12934_v41, %v736_v35 }
 0x101   : > { %v1398_v39 = vpop.f32.mrf.mxu3  ;;  %v649_v45 = vpop.f32.mrf.mxu0 }
 0x102   : > { %v1399_v44 = vadd.f32 %v12934_v41, %v1398_v39  ;;  %v843_v50 = vmax.f32 %v737_v37, 0.0  ;;  %v650_v57 = vadd.f32 %v12934_v41, %v649_v45  ;;  %v13109_v37 = vpop.f32.mrf.mxu1 }
 0x104   : > { %v1505_v52 = vmax.f32 %v1399_v44, 0.0  ;;  %v13074_v53 = vpack.c.bf16 %v843_v50, %v842_v47  ;;  %9960 = vmatmul.msk.bf16.gmra.mxu0 %vm489_vm2, %v12442_v40  ;;  %9978 = vmatmul.msk.bf16.gmra.mxu2 %vm489_vm2, %v12460_v42  ;;  %v808_v63 = vmax.f32 %v650_v57, 0.0  ;;  %v12540_v57 = vld [vmem:[%s16007_s3 + $0x20] sm:$0xff] }
 0x105   : > { %2978 = vmatpush.bf16.msrb.mxu1 %v12540_v57 }
 0x106   : > { %v13078_v56 = vpack.c.bf16 %v1505_v52, %v1504_v43  ;;  %10230 = vmatmul.msk.bf16.gmra.mxu3 %vm489_vm2, %v12499_v46 }
 0x107   : > { %v739_v59 = vpop.f32.mrf.mxu2 }
 0x108   : > { %v740_v6 = vadd.f32 %v12934_v41, %v739_v59 }
 0x109   : > { %v1401_v60 = vpop.f32.mrf.mxu3  ;;  %v651_v61 = vpop.f32.mrf.mxu0 }
 0x10a   : > { %v652_v0 = vadd.f32 %v12934_v41, %v651_v61  ;;  %v1402_v5 = vadd.f32 %v12934_v41, %v1401_v60  ;;  %v844_v26 = vmax.f32 %v740_v6, 0.0  ;;  %v13116_v52 = vpop.f32.mrf.mxu1  ;;  %v12476_v60 = vld [vmem:[%s12861_s29 + $0x170] sm:$0xff] }
 0x10b   : > { %10207 = vmatmul.msk.bf16.gmra.mxu1 %vm489_vm2, %v12476_v60 }
 0x10c   : > { %v809_v4 = vmax.f32 %v652_v0, 0.0  ;;  %v1506_v22 = vmax.f32 %v1402_v5, 0.0  ;;  %v12444_v0 = vld [vmem:[%s12861_s29 + $0x88] sm:$0xff] }
 0x10e   : > { %v13087_v8 = vpack.c.bf16 %v809_v4, %v808_v63  ;;  %v12462_v4 = vld [vmem:[%s12861_s29 + $0x118] sm:$0xff] }
 0x10f   : > { %v741_v10 = vpop.f32.mrf.mxu2 }
 0x110   : > { %v742_v12 = vadd.f32 %v12934_v41, %v741_v10 }
 0x111   : > { %v1403_v14 = vpop.f32.mrf.mxu3  ;;  %v654_v24 = vpop.f32.mrf.mxu0 }
 0x112   : > { %v1404_v23 = vadd.f32 %v12934_v41, %v1403_v14  ;;  %v845_v29 = vmax.f32 %v742_v12, 0.0  ;;  %v655_v36 = vadd.f32 %v12934_v41, %v654_v24 }
 0x114   : > { %v1507_v30 = vmax.f32 %v1404_v23, 0.0  ;;  %v13101_v31 = vpack.c.bf16 %v845_v29, %v844_v26  ;;  %9961 = vmatmul.msk.bf16.gmra.mxu0 %vm489_vm2, %v12443_v15  ;;  %9979 = vmatmul.msk.bf16.gmra.mxu2 %vm489_vm2, %v12461_v16  ;;  %v810_v43 = vmax.f32 %v655_v36, 0.0  ;;  %v13136_v23 = vpop.f32.mrf.mxu1  ;;  %v1277_v29 = vadd.f32 %v12934_v41, %v13065_v34 }
 0x115   : > { %v1279_v36 = vadd.f32 %v12934_v41, %v13082_v58 }
 0x116   : > { %v13105_v35 = vpack.c.bf16 %v1507_v30, %v1506_v22  ;;  %10231 = vmatmul.msk.bf16.gmra.mxu3 %vm489_vm2, %v12500_v25 }
 0x117   : > { %v744_v39 = vpop.f32.mrf.mxu2 }
 0x118   : > { %v745_v47 = vadd.f32 %v12934_v41, %v744_v39 }
 0x119   : > { %v1406_v40 = vpop.f32.mrf.mxu3  ;;  %v656_v42 = vpop.f32.mrf.mxu0 }
 0x11a   : > { %v657_v44 = vadd.f32 %v12934_v41, %v656_v42  ;;  %v1407_v46 = vadd.f32 %v12934_v41, %v1406_v40  ;;  %v846_v12 = vmax.f32 %v745_v47, 0.0 }
 0x11c   : > { %v811_v45 = vmax.f32 %v657_v44, 0.0  ;;  %v1508_v5 = vmax.f32 %v1407_v46, 0.0  ;;  %v1457_v44 = vmax.f32 %v1279_v36, 0.0  ;;  %v13147_v47 = vpop.f32.mrf.mxu1 }
 0x11e   : > { %v13114_v50 = vpack.c.bf16 %v811_v45, %v810_v43  ;;  %v1456_v43 = vmax.f32 %v1277_v29, 0.0 }
 0x11f   : > { %v746_v59 = vpop.f32.mrf.mxu2 }
 0x120   : > { %v747_v61 = vadd.f32 %v12934_v41, %v746_v59  ;;  %v12477_v59 = vld [vmem:[%s12861_s29 + $0x178] sm:$0xff] }
 0x121   : > { %v1408_v63 = vpop.f32.mrf.mxu3  ;;  %v659_v10 = vpop.f32.mrf.mxu0  ;;  %10208 = vmatmul.msk.bf16.gmra.mxu1 %vm489_vm2, %v12477_v59  ;;  %v12478_v59 = vld [vmem:[%s12861_s29 + $0x180] sm:$0xff] }
 0x122   : > { %v1409_v6 = vadd.f32 %v12934_v41, %v1408_v63  ;;  %v847_v14 = vmax.f32 %v747_v61, 0.0  ;;  %v660_v22 = vadd.f32 %v12934_v41, %v659_v10  ;;  %v12504_v61 = vld [vmem:[%s12861_s29 + $0x240] sm:$0xff] }
 0x124   : > { %v1509_v15 = vmax.f32 %v1409_v6, 0.0  ;;  %v13128_v16 = vpack.c.bf16 %v847_v14, %v846_v12  ;;  %9962 = vmatmul.msk.bf16.gmra.mxu0 %vm489_vm2, %v12444_v0  ;;  %9980 = vmatmul.msk.bf16.gmra.mxu2 %vm489_vm2, %v12462_v4  ;;  %v812_v30 = vmax.f32 %v660_v22, 0.0  ;;  %v1528_v4 = vpack.c.bf16 %v1457_v44, %v1456_v43 }
 0x126   : > { %v13132_v21 = vpack.c.bf16 %v1509_v15, %v1508_v5  ;;  %10232 = vmatmul.msk.bf16.gmra.mxu3 %vm489_vm2, %v12501_v11  ;;  %v13164_v15 = vpop.f32.mrf.mxu1 }
 0x127   : > { %v749_v24 = vpop.f32.mrf.mxu2 }
 0x128   : > { %v750_v45 = vadd.f32 %v12934_v41, %v749_v24 }
 0x129   : > { %v1411_v25 = vpop.f32.mrf.mxu3  ;;  %v661_v26 = vpop.f32.mrf.mxu0 }
 0x12a   : > { %v662_v39 = vadd.f32 %v12934_v41, %v661_v26  ;;  %v1412_v42 = vadd.f32 %v12934_v41, %v1411_v25  ;;  %v848_v5 = vmax.f32 %v750_v45, 0.0  ;;  %v1282_v26 = vadd.f32 %v12934_v41, %v13089_v9 }
 0x12c   : > { %v813_v40 = vmax.f32 %v662_v39, 0.0  ;;  %v1510_v58 = vmax.f32 %v1412_v42, 0.0 }
 0x12e   : > { %v13145_v46 = vpack.c.bf16 %v813_v40, %v812_v30  ;;  %v1458_v40 = vmax.f32 %v1282_v26, 0.0  ;;  %v13176_v45 = vpop.f32.mrf.mxu1 }
 0x12f   : > { %v751_v57 = vpop.f32.mrf.mxu2 }
 0x130   : > { %v752_v34 = vadd.f32 %v12934_v41, %v751_v57 }
 0x131   : > { %v1413_v60 = vpop.f32.mrf.mxu3  ;;  %v664_v0 = vpop.f32.mrf.mxu0  ;;  %10209 = vmatmul.msk.bf16.gmra.mxu1 %vm489_vm2, %v12478_v59 }
 0x132   : > { %v1414_v63 = vadd.f32 %v12934_v41, %v1413_v60  ;;  %v849_v6 = vmax.f32 %v752_v34, 0.0  ;;  %v665_v14 = vadd.f32 %v12934_v41, %v664_v0  ;;  %v12505_v60 = vld [vmem:[%s12861_s29 + $0x248] sm:$0xff] }
 0x134   : > { %v1511_v10 = vmax.f32 %v1414_v63, 0.0  ;;  %v13154_v11 = vpack.c.bf16 %v849_v6, %v848_v5  ;;  %10245 = vmatmul.msk.bf16.vlgmr.msrb.gmra.mxu2 %vm1581_vm3, %v1528_v4  ;;  %10541 = vmatmul.msk.bf16.vlgmr.msrb.gmra.mxu0 %vm489_vm2, %v12504_v61  ;;  %v814_v29 = vmax.f32 %v665_v14, 0.0 }
 0x135   : > { %5688 = vmatpush.bf16.msrb.mxu2 %v12852_v7  ;;  %6732 = vmatpush.bf16.msrb.mxu0 %v12852_v7  ;;  %v12510_v7 = vld [vmem:[%s12861_s29 + $0x270] sm:$0xff] }
 0x136   : > { %v13158_v12 = vpack.c.bf16 %v1511_v10, %v1510_v58  ;;  %10289 = vmatmul.msk.bf16.vlgmr.msrb.gmra.mxu3 %vm1581_vm3, %v12943_v51  ;;  %v1284_v51 = vadd.f32 %v12934_v41, %v13109_v37 }
 0x137   : > { %v754_v22 = vpop.f32.mrf.mxu2 }
 0x138   : > { %v1459_v42 = vmax.f32 %v1284_v51, 0.0  ;;  %v755_v43 = vadd.f32 %v12934_v41, %v754_v22  ;;  %v13192_v22 = vpop.f32.mrf.mxu1 }
 0x139   : > { %v1416_v24 = vpop.f32.mrf.mxu3  ;;  %v666_v25 = vpop.f32.mrf.mxu0 }
 0x13a   : > { %v667_v30 = vadd.f32 %v12934_v41, %v666_v25  ;;  %v1417_v39 = vadd.f32 %v12934_v41, %v1416_v24  ;;  %v1529_v63 = vpack.c.bf16 %v1459_v42, %v1458_v40  ;;  %v850_v0 = vmax.f32 %v755_v43, 0.0 }
 0x13c   : > { %v815_v36 = vmax.f32 %v667_v30, 0.0  ;;  %v1512_v37 = vmax.f32 %v1417_v39, 0.0  ;;  %v1289_v30 = vadd.f32 %v12934_v41, %v13136_v23 }
 0x13e   : > { %v13174_v44 = vpack.c.bf16 %v815_v36, %v814_v29  ;;  %v1287_v29 = vadd.f32 %v12934_v41, %v13116_v52  ;;  %v1461_v42 = vmax.f32 %v1289_v30, 0.0 }
 0x13f   : > { %v756_v57 = vpop.f32.mrf.mxu2 }
 0x140   : > { %v757_v9 = vadd.f32 %v12934_v41, %v756_v57  ;;  %v1460_v40 = vmax.f32 %v1287_v29, 0.0  ;;  %v13203_v59 = vpop.f32.mrf.mxu1 }
 0x141   : > { %v1418_v34 = vpop.f32.mrf.mxu3  ;;  %v669_v58 = vpop.f32.mrf.mxu0 }
 0x142   : > { %v1419_v61 = vadd.f32 %v12934_v41, %v1418_v34  ;;  %v851_v4 = vmax.f32 %v757_v9, 0.0  ;;  %v670_v14 = vadd.f32 %v12934_v41, %v669_v58  ;;  %v12479_v34 = vld [vmem:[%s12861_s29 + $0x188] sm:$0xff] }
 0x143   : > { %10210 = vmatmul.msk.bf16.gmra.mxu1 %vm489_vm2, %v12479_v34 }
 0x144   : > { %v1513_v5 = vmax.f32 %v1419_v61, 0.0  ;;  %v13183_v6 = vpack.c.bf16 %v851_v4, %v850_v0  ;;  %10246 = vmatmul.msk.bf16.gmra.mxu2 %vm1581_vm3, %v1529_v63  ;;  %10542 = vmatmul.msk.bf16.gmra.mxu0 %vm489_vm2, %v12505_v60  ;;  %v816_v51 = vmax.f32 %v670_v14, 0.0  ;;  %v1530_v63 = vpack.c.bf16 %v1461_v42, %v1460_v40 }
 0x146   : > { %v13187_v10 = vpack.c.bf16 %v1513_v5, %v1512_v37  ;;  %10290 = vmatmul.msk.bf16.gmra.mxu3 %vm1581_vm3, %v12963_v13  ;;  %v12506_v37 = vld [vmem:[%s12861_s29 + $0x250] sm:$0xff] }
 0x147   : > { %v759_v24 = vpop.f32.mrf.mxu2 }
 0x148   : > { %v760_v43 = vadd.f32 %v12934_v41, %v759_v24 }
 0x149   : > { %v1421_v25 = vpop.f32.mrf.mxu3  ;;  %v671_v26 = vpop.f32.mrf.mxu0 }
 0x14a   : > { %v672_v36 = vadd.f32 %v12934_v41, %v671_v26  ;;  %v1422_v13 = vadd.f32 %v12934_v41, %v1421_v25  ;;  %v852_v0 = vmax.f32 %v760_v43, 0.0  ;;  %v13219_v26 = vpop.f32.mrf.mxu1 }
 0x14c   : > { %v817_v39 = vmax.f32 %v672_v36, 0.0  ;;  %v1514_v23 = vmax.f32 %v1422_v13, 0.0  ;;  %v1292_v36 = vadd.f32 %v12934_v41, %v13147_v47  ;;  %v1294_v13 = vadd.f32 %v12934_v41, %v13164_v15 }
 0x14e   : > { %v13201_v57 = vpack.c.bf16 %v817_v39, %v816_v51  ;;  %v1462_v43 = vmax.f32 %v1292_v36, 0.0 }
 0x14f   : > { %v761_v9 = vpop.f32.mrf.mxu2 }
 0x150   : > { %v762_v52 = vadd.f32 %v12934_v41, %v761_v9  ;;  %v1463_v9 = vmax.f32 %v1294_v13, 0.0 }
 0x151   : > { %v1423_v60 = vpop.f32.mrf.mxu3  ;;  %v674_v58 = vpop.f32.mrf.mxu0 }
 0x152   : > { %v1424_v61 = vadd.f32 %v12934_v41, %v1423_v60  ;;  %v853_v4 = vmax.f32 %v762_v52, 0.0  ;;  %v675_v25 = vadd.f32 %v12934_v41, %v674_v58  ;;  %v13230_v60 = vpop.f32.mrf.mxu1  ;;  %v12507_v58 = vld [vmem:[%s12861_s29 + $0x258] sm:$0xff] }
 0x154   : > { %v1515_v5 = vmax.f32 %v1424_v61, 0.0  ;;  %v13210_v14 = vpack.c.bf16 %v853_v4, %v852_v0  ;;  %10247 = vmatmul.msk.bf16.gmra.mxu2 %vm1581_vm3, %v1530_v63  ;;  %10543 = vmatmul.msk.bf16.gmra.mxu0 %vm489_vm2, %v12506_v37  ;;  %v818_v39 = vmax.f32 %v675_v25, 0.0  ;;  %v1531_v4 = vpack.c.bf16 %v1463_v9, %v1462_v43 }
 0x155   : > { %v1299_v9 = vadd.f32 %v12934_v41, %v13192_v22 }
 0x156   : > { %v13214_v24 = vpack.c.bf16 %v1515_v5, %v1514_v23  ;;  %10291 = vmatmul.msk.bf16.gmra.mxu3 %vm1581_vm3, %v12983_v38  ;;  %v12480_v23 = vld [vmem:[%s12861_s29 + $0x190] sm:$0xff] }
 0x157   : > { %v764_v29 = vpop.f32.mrf.mxu2  ;;  %10211 = vmatmul.msk.bf16.gmra.mxu1 %vm489_vm2, %v12480_v23 }
 0x158   : > { %v765_v34 = vadd.f32 %v12934_v41, %v764_v29 }
 0x159   : > { %v1426_v51 = vpop.f32.mrf.mxu3  ;;  %v676_v30 = vpop.f32.mrf.mxu0 }
 0x15a   : > { %v677_v40 = vadd.f32 %v12934_v41, %v676_v30  ;;  %v1427_v38 = vadd.f32 %v12934_v41, %v1426_v51  ;;  %v854_v5 = vmax.f32 %v765_v34, 0.0 }
 0x15c   : > { %v819_v42 = vmax.f32 %v677_v40, 0.0  ;;  %v1516_v15 = vmax.f32 %v1427_v38, 0.0  ;;  %v1297_v38 = vadd.f32 %v12934_v41, %v13176_v45 }
 0x15e   : > { %v13228_v52 = vpack.c.bf16 %v819_v42, %v818_v39  ;;  %v13246_v39 = vpop.f32.mrf.mxu1  ;;  %v1464_v23 = vmax.f32 %v1297_v38, 0.0 }
 0x15f   : > { %v766_v37 = vpop.f32.mrf.mxu2 }
 0x160   : > { %v767_v47 = vadd.f32 %v12934_v41, %v766_v37 }
 0x161   : > { %v1428_v61 = vpop.f32.mrf.mxu3  ;;  %v679_v0 = vpop.f32.mrf.mxu0 }
 0x162   : > { %v1429_v63 = vadd.f32 %v12934_v41, %v1428_v61  ;;  %v855_v25 = vmax.f32 %v767_v47, 0.0  ;;  %v680_v36 = vadd.f32 %v12934_v41, %v679_v0  ;;  %v1465_v47 = vmax.f32 %v1299_v9, 0.0  ;;  %v12481_v0 = vld [vmem:[%s12861_s29 + $0x198] sm:$0xff] }
 0x164   : > { %v1517_v29 = vmax.f32 %v1429_v63, 0.0  ;;  %v13237_v51 = vpack.c.bf16 %v855_v25, %v854_v5  ;;  %10248 = vmatmul.msk.bf16.gmra.mxu2 %vm1581_vm3, %v1531_v4  ;;  %10544 = vmatmul.msk.bf16.gmra.mxu0 %vm489_vm2, %v12507_v58  ;;  %v820_v43 = vmax.f32 %v680_v36, 0.0  ;;  %v12508_v5 = vld [vmem:[%s12861_s29 + $0x260] sm:$0xff]  ;;  %v1532_v36 = vpack.c.bf16 %v1465_v47, %v1464_v23 }
 0x165   : > { %v1302_v47 = vadd.f32 %v12934_v41, %v13203_v59 }
 0x166   : > { %v13241_v30 = vpack.c.bf16 %v1517_v29, %v1516_v15  ;;  %10292 = vmatmul.msk.bf16.gmra.mxu3 %vm1581_vm3, %v13003_v3  ;;  %v13257_v15 = vpop.f32.mrf.mxu1 }
 0x167   : > { %v769_v13 = vpop.f32.mrf.mxu2  ;;  %10212 = vmatmul.msk.bf16.gmra.mxu1 %vm489_vm2, %v12481_v0 }
 0x168   : > { %v770_v61 = vadd.f32 %v12934_v41, %v769_v13 }
 0x169   : > { %v1431_v40 = vpop.f32.mrf.mxu3  ;;  %v681_v42 = vpop.f32.mrf.mxu0 }
 0x16a   : > { %v682_v34 = vadd.f32 %v12934_v41, %v681_v42  ;;  %v1432_v3 = vadd.f32 %v12934_v41, %v1431_v40  ;;  %v856_v40 = vmax.f32 %v770_v61, 0.0 }
 0x16c   : > { %v821_v37 = vmax.f32 %v682_v34, 0.0  ;;  %v1518_v22 = vmax.f32 %v1432_v3, 0.0 }
 0x16e   : > { %v13255_v58 = vpack.c.bf16 %v821_v37, %v820_v43  ;;  %v13273_v34 = vpop.f32.mrf.mxu1 }
 0x16f   : > { %v771_v63 = vpop.f32.mrf.mxu2 }
 0x170   : > { %v772_v45 = vadd.f32 %v12934_v41, %v771_v63  ;;  %v1304_v63 = vadd.f32 %v12934_v41, %v13219_v26 }
 0x171   : > { %v1433_v4 = vpop.f32.mrf.mxu3  ;;  %v684_v29 = vpop.f32.mrf.mxu0 }
 0x172   : > { %v1434_v25 = vadd.f32 %v12934_v41, %v1433_v4  ;;  %v857_v42 = vmax.f32 %v772_v45, 0.0  ;;  %v685_v9 = vadd.f32 %v12934_v41, %v684_v29  ;;  %v1466_v4 = vmax.f32 %v1302_v47, 0.0 }
 0x174   : > { %v1519_v13 = vmax.f32 %v1434_v25, 0.0  ;;  %v13264_v38 = vpack.c.bf16 %v857_v42, %v856_v40  ;;  %10249 = vmatmul.msk.bf16.gmra.mxu2 %vm1581_vm3, %v1532_v36  ;;  %10545 = vmatmul.msk.bf16.gmra.mxu0 %vm489_vm2, %v12508_v5  ;;  %v822_v61 = vmax.f32 %v685_v9, 0.0  ;;  %v1467_v5 = vmax.f32 %v1304_v63, 0.0  ;;  %v12482_v40 = vld [vmem:[%s12861_s29 + $0x1a0] sm:$0xff] }
 0x176   : > { %16013 = vst [vmem:[#allocation3_spill] sm:$0xff] %v13264_v38  ;;  %v13268_v43 = vpack.c.bf16 %v1519_v13, %v1518_v22  ;;  %10293 = vmatmul.msk.bf16.gmra.mxu3 %vm1581_vm3, %v13023_v32  ;;  %v13284_v29 = vpop.f32.mrf.mxu1  ;;  %v12509_v13 = vld [vmem:[%s12861_s29 + $0x268] sm:$0xff] }
 0x177   : > { %v774_v37 = vpop.f32.mrf.mxu2  ;;  %10213 = vmatmul.msk.bf16.gmra.mxu1 %vm489_vm2, %v12482_v40 }
 0x178   : > { %16014 = vst [vmem:[#allocation4_spill] sm:$0xff] %v13268_v43  ;;  %v775_v22 = vadd.f32 %v12934_v41, %v774_v37 }
 0x179   : > { %v1436_v3 = vpop.f32.mrf.mxu3  ;;  %v686_v23 = vpop.f32.mrf.mxu0 }
 0x17a   : > { %v687_v0 = vadd.f32 %v12934_v41, %v686_v23  ;;  %v1437_v32 = vadd.f32 %v12934_v41, %v1436_v3  ;;  %v1533_v3 = vpack.c.bf16 %v1467_v5, %v1466_v4  ;;  %v858_v47 = vmax.f32 %v775_v22, 0.0 }
 0x17c   : > { %v823_v45 = vmax.f32 %v687_v0, 0.0  ;;  %v1520_v26 = vmax.f32 %v1437_v32, 0.0 }
 0x17e   : > { %v13282_v25 = vpack.c.bf16 %v823_v45, %v822_v61  ;;  %v13300_v32 = vpop.f32.mrf.mxu1 }
 0x17f   : > { %v776_v36 = vpop.f32.mrf.mxu2 }
 0x180   : > { %v777_v59 = vadd.f32 %v12934_v41, %v776_v36  ;;  %v1307_v36 = vadd.f32 %v12934_v41, %v13230_v60 }
 0x181   : > { %v1438_v42 = vpop.f32.mrf.mxu3  ;;  %v689_v23 = vpop.f32.mrf.mxu0 }
 0x182   : > { %v1439_v9 = vadd.f32 %v12934_v41, %v1438_v42  ;;  %v859_v63 = vmax.f32 %v777_v59, 0.0  ;;  %v690_v45 = vadd.f32 %v12934_v41, %v689_v23  ;;  %v1309_v59 = vadd.f32 %v12934_v41, %v13246_v39 }
 0x184   : > { %v1521_v37 = vmax.f32 %v1439_v9, 0.0  ;;  %v13291_v61 = vpack.c.bf16 %v859_v63, %v858_v47  ;;  %10250 = vmatmul.msk.bf16.gmra.mxu2 %vm1581_vm3, %v1533_v3  ;;  %10546 = vmatmul.msk.bf16.gmra.mxu0 %vm489_vm2, %v12509_v13  ;;  %v824_v40 = vmax.f32 %v690_v45, 0.0  ;;  %v1469_v9 = vmax.f32 %v1309_v59, 0.0 }
 0x186   : > { %16015 = vst [vmem:[#allocation5_spill] sm:$0xff] %v13291_v61  ;;  %v13295_v0 = vpack.c.bf16 %v1521_v37, %v1520_v26  ;;  %10294 = vmatmul.msk.bf16.gmra.mxu3 %vm1581_vm3, %v13043_v62  ;;  %v1468_v26 = vmax.f32 %v1307_v36, 0.0  ;;  %v13311_v47 = vpop.f32.mrf.mxu1  ;;  %v12483_v37 = vld [vmem:[%s12861_s29 + $0x1a8] sm:$0xff] }
 0x187   : > { %v779_v4 = vpop.f32.mrf.mxu2  ;;  %10214 = vmatmul.msk.bf16.gmra.mxu1 %vm489_vm2, %v12483_v37 }
 0x188   : > { %16016 = vst [vmem:[#allocation6_spill] sm:$0xff] %v13295_v0  ;;  %v780_v23 = vadd.f32 %v12934_v41, %v779_v4 }
 0x189   : > { %v1441_v5 = vpop.f32.mrf.mxu3  ;;  %v691_v22 = vpop.f32.mrf.mxu0 }
 0x18a   : > { %v692_v42 = vadd.f32 %v12934_v41, %v691_v22  ;;  %v1442_v62 = vadd.f32 %v12934_v41, %v1441_v5  ;;  %v1534_v5 = vpack.c.bf16 %v1469_v9, %v1468_v26  ;;  %v860_v36 = vmax.f32 %v780_v23, 0.0 }
 0x18c   : > { %v825_v13 = vmax.f32 %v692_v42, 0.0  ;;  %v1522_v39 = vmax.f32 %v1442_v62, 0.0 }
 0x18e   : > { %v13309_v3 = vpack.c.bf16 %v825_v13, %v824_v40  ;;  %v13332_v26 = vpop.f32.mrf.mxu1 }
 0x18f   : > { %v781_v63 = vpop.f32.mrf.mxu2 }
 0x190   : > { %v782_v60 = vadd.f32 %v12934_v41, %v781_v63 }
 0x191   : > { %v1443_v45 = vpop.f32.mrf.mxu3  ;;  %v694_v42 = vpop.f32.mrf.mxu0 }
 0x192   : > { %v1444_v22 = vadd.f32 %v12934_v41, %v1443_v45  ;;  %v861_v59 = vmax.f32 %v782_v60, 0.0  ;;  %v13329_v41 = vld [vmem:[%s16006_s2] ss:$0 sm:$0xff] }
 0x193   : > { %v695_v62 = vadd.f32 %v13329_v41, %v694_v42 }
 0x194   : > { %v1523_v4 = vmax.f32 %v1444_v22, 0.0  ;;  %v13318_v40 = vpack.c.bf16 %v861_v59, %v860_v36  ;;  %10251 = vmatmul.msk.bf16.gmra.mxu2 %vm1581_vm3, %v1534_v5  ;;  %10547 = vmatmul.msk.bf16.gmra.mxu0 %vm489_vm2, %v12510_v7  ;;  %v1312_v7 = vadd.f32 %v13329_v41, %v13257_v15 }
 0x195   : > { %v826_v37 = vmax.f32 %v695_v62, 0.0 }
 0x196   : > { %16017 = vst [vmem:[#allocation7_spill] sm:$0xff] %v13318_v40  ;;  %v13322_v13 = vpack.c.bf16 %v1523_v4, %v1522_v39  ;;  %10295 = vmatmul.msk.bf16.gmra.mxu3 %vm1581_vm3, %v13063_v33  ;;  %v1314_v33 = vadd.f32 %v13329_v41, %v13273_v34  ;;  %v1470_v22 = vmax.f32 %v1312_v7, 0.0  ;;  %v13343_v59 = vpop.f32.mrf.mxu1  ;;  %v12511_v40 = vld [vmem:[%s12861_s29 + $0x278] sm:$0xff] }
 0x197   : > { %v784_v9 = vpop.f32.mrf.mxu2 }
 0x198   : > { %16018 = vst [vmem:[#allocation8_spill] sm:$0xff] %v13322_v13  ;;  %v1471_v42 = vmax.f32 %v1314_v33, 0.0  ;;  %v785_v5 = vadd.f32 %v13329_v41, %v784_v9 }
 0x199   : > { %v1446_v23 = vpop.f32.mrf.mxu3  ;;  %v696_v63 = vpop.f32.mrf.mxu0 }
 0x19a   : > { %v697_v60 = vadd.f32 %v13329_v41, %v696_v63  ;;  %v1447_v39 = vadd.f32 %v13329_v41, %v1446_v23  ;;  %v862_v61 = vmax.f32 %v785_v5, 0.0 }
 0x19c   : > { %v827_v45 = vmax.f32 %v697_v60, 0.0  ;;  %v1524_v13 = vmax.f32 %v1447_v39, 0.0  ;;  %v1535_v60 = vpack.c.bf16 %v1471_v42, %v1470_v22 }
 0x19e   : > { %v13341_v36 = vpack.c.bf16 %v827_v45, %v826_v37  ;;  %v12579_v37 = vld [vmem:[%s16007_s3 + $0x38] sm:$0xff]  ;;  %v13360_v22 = vpop.f32.mrf.mxu1 }
 0x19f   : > { %v786_v4 = vpop.f32.mrf.mxu2  ;;  %4021 = vmatpush.bf16.msra.mxu3 %v12579_v37 }
 0x1a0   : > { %v787_v15 = vadd.f32 %v13329_v41, %v786_v4 }
 0x1a1   : > { %v1448_v62 = vpop.f32.mrf.mxu3  ;;  %v699_v63 = vpop.f32.mrf.mxu0 }
 0x1a2   : > { %v1449_v34 = vadd.f32 %v13329_v41, %v1448_v62  ;;  %v863_v23 = vmax.f32 %v787_v15, 0.0  ;;  %v700_v45 = vadd.f32 %v13329_v41, %v699_v63 }
 0x1a4   : > { %v1525_v7 = vmax.f32 %v1449_v34, 0.0  ;;  %v13348_v33 = vpack.c.bf16 %v863_v23, %v862_v61  ;;  %10252 = vmatmul.msk.bf16.gmra.mxu2 %vm1581_vm3, %v1535_v60  ;;  %10548 = vmatmul.msk.bf16.gmra.mxu0 %vm489_vm2, %v12511_v40  ;;  %v1317_v40 = vadd.f32 %v13329_v41, %v13284_v29  ;;  %v12617_v23 = vld [vmem:[%s16007_s3 + $0x48] sm:$0xff] }
 0x1a5   : > { %5065 = vmatpush.bf16.msra.mxu1 %v12617_v23 }
 0x1a6   : > { %16019 = vst [vmem:[#allocation9_spill] sm:$0xff] %v13348_v33  ;;  %v13352_v9 = vpack.c.bf16 %v1525_v7, %v1524_v13  ;;  %10296 = vmatmul.msk.bf16.gmra.mxu3 %vm1581_vm3, %v13087_v8  ;;  %v828_v13 = vmax.f32 %v700_v45, 0.0  ;;  %v1319_v8 = vadd.f32 %v13329_v41, %v13300_v32  ;;  %v1472_v62 = vmax.f32 %v1317_v40, 0.0  ;;  %v12512_v32 = vld [vmem:[%s12861_s29 + $0x280] sm:$0xff]  ;;  %v13377_v40 = vpop.f32.mrf.mxu1 }
 0x1a7   : > { %v789_v39 = vpop.f32.mrf.mxu2 }
 0x1a8   : > { %16020 = vst [vmem:[#allocation10_spill] sm:$0xff] %v13352_v9  ;;  %v1473_v34 = vmax.f32 %v1319_v8, 0.0  ;;  %v790_v63 = vadd.f32 %v13329_v41, %v789_v39 }
 0x1a9   : > { %v1451_v61 = vpop.f32.mrf.mxu3  ;;  %v701_v42 = vpop.f32.mrf.mxu0 }
 0x1aa   : > { %v702_v5 = vadd.f32 %v13329_v41, %v701_v42  ;;  %v1452_v15 = vadd.f32 %v13329_v41, %v1451_v61  ;;  %v1536_v8 = vpack.c.bf16 %v1473_v34, %v1472_v62  ;;  %v864_v39 = vmax.f32 %v790_v63, 0.0 }
 0x1ab   : > { %v1322_v63 = vadd.f32 %v13329_v41, %v13311_v47 }
 0x1ac   : > { %v829_v4 = vmax.f32 %v702_v5, 0.0  ;;  %v1526_v45 = vmax.f32 %v1452_v15, 0.0 }
 0x1ae   : > { %v13369_v60 = vpack.c.bf16 %v829_v4, %v828_v13 }
 0x1af   : > { %v791_v29 = vpop.f32.mrf.mxu2 }
 0x1b0   : > { %v792_v7 = vadd.f32 %v13329_v41, %v791_v29 }
 0x1b1   : > { %v1453_v37 = vpop.f32.mrf.mxu3  ;;  %v2558_v61 = vpop.f32.mrf.mxu0 }
 0x1b2   : > { %v1454_v42 = vadd.f32 %v13329_v41, %v1453_v37  ;;  %v865_v13 = vmax.f32 %v792_v7, 0.0  ;;  %v2559_v15 = vadd.f32 %v13329_v41, %v2558_v61 }
 0x1b4   : > { %v1527_v5 = vmax.f32 %v1454_v42, 0.0  ;;  %v13379_v4 = vpack.c.bf16 %v865_v13, %v864_v39  ;;  %10253 = vmatmul.msk.bf16.gmra.mxu2 %vm1581_vm3, %v1536_v8  ;;  %10549 = vmatmul.msk.bf16.gmra.mxu0 %vm489_vm2, %v12512_v32  ;;  %v2738_v7 = vmax.f32 %v2559_v15, 0.0  ;;  %v1324_v32 = vadd.f32 %v13329_v41, %v13332_v26  ;;  %v1333_v42 = vpop.f32.mrf.mxu1 }
 0x1b6   : > { %16021 = vst [vmem:[#allocation11_spill] sm:$0xff] %v13379_v4  ;;  %v13383_v29 = vpack.c.bf16 %v1527_v5, %v1526_v45  ;;  %10297 = vmatmul.msk.bf16.gmra.mxu3 %vm1581_vm3, %v13114_v50  ;;  %v1474_v50 = vmax.f32 %v1322_v63, 0.0  ;;  %v1475_v39 = vmax.f32 %v1324_v32, 0.0 }
 0x1b7   : > { %v1699_v23 = vpop.f32.mrf.mxu2 }
 0x1b8   : > { %16022 = vst [vmem:[#allocation12_spill] sm:$0xff] %v13383_v29  ;;  %v1537_v47 = vpack.c.bf16 %v1475_v39, %v1474_v50  ;;  %v1329_v50 = vadd.f32 %v13329_v41, %v13360_v22 }
 0x1b9   : > { %v2008_v37 = vpop.f32.mrf.mxu3  ;;  %v2560_v34 = vpop.f32.mrf.mxu0 }
 0x1ba   : > { %v13388_v62 = vadd.f32 %v2008_v37, %v1699_v23  ;;  %v2561_v45 = vadd.f32 %v13329_v41, %v2560_v34  ;;  %v12513_v23 = vld [vmem:[%s12861_s29 + $0x288] sm:$0xff] }
 0x1bc   : > { %v2739_v8 = vmax.f32 %v2561_v45, 0.0  ;;  %v1336_v26 = vpop.f32.mrf.mxu1  ;;  %v1327_v45 = vadd.f32 %v13329_v41, %v13343_v59 }
 0x1be   : > { %v2810_v61 = vpack.c.bf16 %v2739_v8, %v2738_v7 }
 0x1bf   : > { %v1701_v13 = vpop.f32.mrf.mxu2 }
 0x1c0   : > { %10589 = vmatmul.msk.bf16.vlgmr.msrb.gmra.mxu1 %vm1581_vm3, %v2810_v61 }
 0x1c1   : > { %v2010_v5 = vpop.f32.mrf.mxu3  ;;  %v2563_v4 = vpop.f32.mrf.mxu0 }
 0x1c2   : > { %v13397_v37 = vadd.f32 %v2010_v5, %v1701_v13  ;;  %v2564_v15 = vadd.f32 %v13329_v41, %v2563_v4  ;;  %v1477_v13 = vmax.f32 %v1329_v50, 0.0 }
 0x1c4   : > { %10254 = vmatmul.msk.bf16.gmra.mxu2 %vm1581_vm3, %v1537_v47  ;;  %10550 = vmatmul.msk.bf16.gmra.mxu0 %vm489_vm2, %v12513_v23  ;;  %v2740_v8 = vmax.f32 %v2564_v15, 0.0  ;;  %v1338_v23 = vpop.f32.mrf.mxu1 }
 0x1c6   : > { %10298 = vmatmul.msk.bf16.gmra.mxu3 %vm1581_vm3, %v13145_v46  ;;  %v1476_v46 = vmax.f32 %v1327_v45, 0.0 }
 0x1c7   : > { %v1704_v34 = vpop.f32.mrf.mxu2 }
 0x1c8   : > { %v1538_v59 = vpack.c.bf16 %v1477_v13, %v1476_v46  ;;  %v1334_v46 = vadd.f32 %v13329_v41, %v1333_v42 }
 0x1c9   : > { %v2013_v63 = vpop.f32.mrf.mxu3  ;;  %v2565_v32 = vpop.f32.mrf.mxu0 }
 0x1ca   : > { %v13404_v7 = vadd.f32 %v2013_v63, %v1704_v34  ;;  %v2566_v39 = vadd.f32 %v13329_v41, %v2565_v32  ;;  %v12514_v34 = vld [vmem:[%s12861_s29 + $0x290] sm:$0xff] }
 0x1cc   : > { %v2741_v61 = vmax.f32 %v2566_v39, 0.0  ;;  %v1341_v50 = vpop.f32.mrf.mxu1  ;;  %v1332_v39 = vadd.f32 %v13329_v41, %v13377_v40 }
 0x1ce   : > { %v2811_v5 = vpack.c.bf16 %v2741_v61, %v2740_v8 }
 0x1cf   : > { %v1706_v4 = vpop.f32.mrf.mxu2 }
 0x1d0   : > { %10590 = vmatmul.msk.bf16.gmra.mxu1 %vm1581_vm3, %v2811_v5 }
 0x1d1   : > { %v2015_v47 = vpop.f32.mrf.mxu3  ;;  %v2568_v29 = vpop.f32.mrf.mxu0 }
 0x1d2   : > { %v13413_v63 = vadd.f32 %v2015_v47, %v1706_v4  ;;  %v2569_v22 = vadd.f32 %v13329_v41, %v2568_v29  ;;  %v1478_v4 = vmax.f32 %v1332_v39, 0.0 }
 0x1d4   : > { %10255 = vmatmul.msk.bf16.gmra.mxu2 %vm1581_vm3, %v1538_v59  ;;  %10551 = vmatmul.msk.bf16.gmra.mxu0 %vm489_vm2, %v12514_v34  ;;  %v2742_v61 = vmax.f32 %v2569_v22, 0.0  ;;  %v12515_v59 = vld [vmem:[%s12861_s29 + $0x298] sm:$0xff]  ;;  %v1343_v9 = vpop.f32.mrf.mxu1 }
 0x1d6   : > { %10299 = vmatmul.msk.bf16.gmra.mxu3 %vm1581_vm3, %v13174_v44  ;;  %v1479_v44 = vmax.f32 %v1334_v46, 0.0 }
 0x1d7   : > { %v1709_v15 = vpop.f32.mrf.mxu2 }
 0x1d8   : > { %v1539_v33 = vpack.c.bf16 %v1479_v44, %v1478_v4 }
 0x1d9   : > { %v2018_v32 = vpop.f32.mrf.mxu3  ;;  %v2570_v8 = vpop.f32.mrf.mxu0 }
 0x1da   : > { %v13420_v45 = vadd.f32 %v2018_v32, %v1709_v15  ;;  %v2571_v13 = vadd.f32 %v13329_v41, %v2570_v8 }
 0x1dc   : > { %v2743_v5 = vmax.f32 %v2571_v13, 0.0  ;;  %v1339_v13 = vadd.f32 %v13329_v41, %v1338_v23  ;;  %v1346_v4 = vpop.f32.mrf.mxu1 }
 0x1de   : > { %v2812_v47 = vpack.c.bf16 %v2743_v5, %v2742_v61  ;;  %v1337_v61 = vadd.f32 %v13329_v41, %v1336_v26 }
 0x1df   : > { %v1711_v29 = vpop.f32.mrf.mxu2 }
 0x1e0   : > { %10591 = vmatmul.msk.bf16.gmra.mxu1 %vm1581_vm3, %v2812_v47  ;;  %v1480_v44 = vmax.f32 %v1337_v61, 0.0  ;;  %v1481_v47 = vmax.f32 %v1339_v13, 0.0  ;;  %v1342_v13 = vadd.f32 %v13329_v41, %v1341_v50 }
 0x1e1   : > { %v2020_v34 = vpop.f32.mrf.mxu3  ;;  %v2573_v32 = vpop.f32.mrf.mxu0 }
 0x1e2   : > { %v13428_v15 = vadd.f32 %v2020_v34, %v1711_v29  ;;  %v2574_v40 = vadd.f32 %v13329_v41, %v2573_v32 }
 0x1e4   : > { %10256 = vmatmul.msk.bf16.gmra.mxu2 %vm1581_vm3, %v1539_v33  ;;  %10552 = vmatmul.msk.bf16.gmra.mxu0 %vm489_vm2, %v12515_v59  ;;  %v2744_v46 = vmax.f32 %v2574_v40, 0.0  ;;  %v12516_v59 = vld [vmem:[%s12861_s29 + $0x2a0] sm:$0xff]  ;;  %v1348_v40 = vpop.f32.mrf.mxu1 }
 0x1e6   : > { %10300 = vmatmul.msk.bf16.gmra.mxu3 %vm1581_vm3, %v13201_v57 }
 0x1e7   : > { %v1714_v42 = vpop.f32.mrf.mxu2 }
 0x1e9   : > { %v2023_v22 = vpop.f32.mrf.mxu3  ;;  %v2575_v39 = vpop.f32.mrf.mxu0 }
 0x1ea   : > { %v13435_v8 = vadd.f32 %v2023_v22, %v1714_v42  ;;  %v2576_v33 = vadd.f32 %v13329_v41, %v2575_v39  ;;  %v1540_v22 = vpack.c.bf16 %v1481_v47, %v1480_v44 }
 0x1ec   : > { %v2745_v5 = vmax.f32 %v2576_v33, 0.0 }
 0x1ee   : > { %v2813_v57 = vpack.c.bf16 %v2745_v5, %v2744_v46  ;;  %v1344_v5 = vadd.f32 %v13329_v41, %v1343_v9 }
 0x1ef   : > { %v1716_v29 = vpop.f32.mrf.mxu2 }
 0x1f0   : > { %10592 = vmatmul.msk.bf16.gmra.mxu1 %vm1581_vm3, %v2813_v57  ;;  %v1482_v57 = vmax.f32 %v1342_v13, 0.0 }
 0x1f1   : > { %v2025_v34 = vpop.f32.mrf.mxu3  ;;  %v2578_v42 = vpop.f32.mrf.mxu0 }
 0x1f2   : > { %v13442_v32 = vadd.f32 %v2025_v34, %v1716_v29  ;;  %v2579_v26 = vadd.f32 %v13329_v41, %v2578_v42  ;;  %v1483_v29 = vmax.f32 %v1344_v5, 0.0  ;;  %v12517_v42 = vld [vmem:[%s12861_s29 + $0x2a8] sm:$0xff] }
 0x1f4   : > { %10257 = vmatmul.msk.bf16.gmra.mxu2 %vm1581_vm3, %v1540_v22  ;;  %10553 = vmatmul.msk.bf16.gmra.mxu0 %vm489_vm2, %v12516_v59  ;;  %v2746_v33 = vmax.f32 %v2579_v26, 0.0  ;;  %v1541_v0 = vpack.c.bf16 %v1483_v29, %v1482_v57 }
 0x1f6   : > { %10301 = vmatmul.msk.bf16.gmra.mxu3 %vm1581_vm3, %v13228_v52 }
 0x1f7   : > { %v1719_v23 = vpop.f32.mrf.mxu2 }
 0x1f9   : > { %v2028_v39 = vpop.f32.mrf.mxu3  ;;  %v2580_v46 = vpop.f32.mrf.mxu0 }
 0x1fa   : > { %v13449_v61 = vadd.f32 %v2028_v39, %v1719_v23  ;;  %v2581_v44 = vadd.f32 %v13329_v41, %v2580_v46  ;;  %v1351_v39 = vpop.f32.mrf.mxu1 }
 0x1fc   : > { %v2747_v47 = vmax.f32 %v2581_v44, 0.0  ;;  %v1349_v44 = vadd.f32 %v13329_v41, %v1348_v40 }
 0x1fe   : > { %v2814_v52 = vpack.c.bf16 %v2747_v47, %v2746_v33  ;;  %v1347_v33 = vadd.f32 %v13329_v41, %v1346_v4 }
 0x1ff   : > { %v1721_v34 = vpop.f32.mrf.mxu2 }
 0x200   : > { %10593 = vmatmul.msk.bf16.gmra.mxu1 %vm1581_vm3, %v2814_v52  ;;  %v1484_v29 = vmax.f32 %v1347_v33, 0.0  ;;  %v1485_v52 = vmax.f32 %v1349_v44, 0.0  ;;  %v1352_v44 = vadd.f32 %v13329_v41, %v1351_v39 }
 0x201   : > { %v2030_v59 = vpop.f32.mrf.mxu3  ;;  %v2583_v23 = vpop.f32.mrf.mxu0 }
 0x202   : > { %v13456_v22 = vadd.f32 %v2030_v59, %v1721_v34  ;;  %v2584_v9 = vadd.f32 %v13329_v41, %v2583_v23  ;;  %v1353_v47 = vpop.f32.mrf.mxu1 }
 0x204   : > { %10258 = vmatmul.msk.bf16.gmra.mxu2 %vm1581_vm3, %v1541_v0  ;;  %10554 = vmatmul.msk.bf16.gmra.mxu0 %vm489_vm2, %v12517_v42  ;;  %v2748_v5 = vmax.f32 %v2584_v9, 0.0  ;;  %v12518_v42 = vld [vmem:[%s12861_s29 + $0x2b0] sm:$0xff] }
 0x206   : > { %10302 = vmatmul.msk.bf16.gmra.mxu3 %vm1581_vm3, %v13255_v58 }
 0x207   : > { %v1724_v50 = vpop.f32.mrf.mxu2 }
 0x209   : > { %v2033_v26 = vpop.f32.mrf.mxu3  ;;  %v2585_v13 = vpop.f32.mrf.mxu0 }
 0x20a   : > { %v13463_v46 = vadd.f32 %v2033_v26, %v1724_v50  ;;  %v2586_v0 = vadd.f32 %v13329_v41, %v2585_v13  ;;  %v1542_v26 = vpack.c.bf16 %v1485_v52, %v1484_v29  ;;  %v1356_v4 = vpop.f32.mrf.mxu1 }
 0x20c   : > { %v2749_v57 = vmax.f32 %v2586_v0, 0.0 }
 0x20e   : > { %v2815_v58 = vpack.c.bf16 %v2749_v57, %v2748_v5  ;;  %v1354_v57 = vadd.f32 %v13329_v41, %v1353_v47 }
 0x20f   : > { %v1726_v34 = vpop.f32.mrf.mxu2 }
 0x210   : > { %10594 = vmatmul.msk.bf16.gmra.mxu1 %vm1581_vm3, %v2815_v58  ;;  %v1486_v58 = vmax.f32 %v1352_v44, 0.0 }
 0x211   : > { %v2035_v59 = vpop.f32.mrf.mxu3  ;;  %v2588_v50 = vpop.f32.mrf.mxu0 }
 0x212   : > { %v13470_v23 = vadd.f32 %v2035_v59, %v1726_v34  ;;  %v2589_v40 = vadd.f32 %v13329_v41, %v2588_v50  ;;  %v1487_v34 = vmax.f32 %v1354_v57, 0.0  ;;  %v1357_v57 = vadd.f32 %v13329_v41, %v1356_v4 }
 0x214   : > { %10259 = vmatmul.msk.bf16.gmra.mxu2 %vm1581_vm3, %v1542_v26  ;;  %10555 = vmatmul.msk.bf16.gmra.mxu0 %vm489_vm2, %v12518_v42  ;;  %v2750_v0 = vmax.f32 %v2589_v40, 0.0  ;;  %v1358_v42 = vpop.f32.mrf.mxu1  ;;  %v12519_v26 = vld [vmem:[%s12861_s29 + $0x2b8] sm:$0xff]  ;;  %v1543_v38 = vpack.c.bf16 %v1487_v34, %v1486_v58  ;;  %v1488_v34 = vmax.f32 %v1357_v57, 0.0 }
 0x216   : > { %10303 = vmatmul.msk.bf16.gmra.mxu3 %vm1581_vm3, %v13282_v25 }
 0x217   : > { %v1729_v9 = vpop.f32.mrf.mxu2 }
 0x219   : > { %v2038_v13 = vpop.f32.mrf.mxu3  ;;  %v2590_v5 = vpop.f32.mrf.mxu0 }
 0x21a   : > { %v13477_v33 = vadd.f32 %v2038_v13, %v1729_v9  ;;  %v2591_v29 = vadd.f32 %v13329_v41, %v2590_v5 }
 0x21c   : > { %v2751_v52 = vmax.f32 %v2591_v29, 0.0 }
 0x21e   : > { %v2816_v25 = vpack.c.bf16 %v2751_v52, %v2750_v0  ;;  %v1361_v0 = vpop.f32.mrf.mxu1  ;;  %v1359_v52 = vadd.f32 %v13329_v41, %v1358_v42 }
 0x21f   : > { %v1731_v59 = vpop.f32.mrf.mxu2 }
 0x220   : > { %10595 = vmatmul.msk.bf16.gmra.mxu1 %vm1581_vm3, %v2816_v25  ;;  %v1489_v25 = vmax.f32 %v1359_v52, 0.0 }
 0x221   : > { %v2040_v50 = vpop.f32.mrf.mxu3  ;;  %v2593_v13 = vpop.f32.mrf.mxu0 }
 0x222   : > { %v13484_v9 = vadd.f32 %v2040_v50, %v1731_v59  ;;  %v2594_v39 = vadd.f32 %v13329_v41, %v2593_v13 }
 0x224   : > { %10260 = vmatmul.msk.bf16.gmra.mxu2 %vm1581_vm3, %v1543_v38  ;;  %10556 = vmatmul.msk.bf16.gmra.mxu0 %vm489_vm2, %v12519_v26  ;;  %v2752_v29 = vmax.f32 %v2594_v39, 0.0  ;;  %v12520_v26 = vld [vmem:[%s12861_s29 + $0x2c0] sm:$0xff] }
 0x226   : > { %10304 = vmatmul.msk.bf16.gmra.mxu3 %vm1581_vm3, %v13309_v3  ;;  %v1363_v43 = vpop.f32.mrf.mxu1 }
 0x227   : > { %v1734_v47 = vpop.f32.mrf.mxu2 }
 0x229   : > { %v2043_v40 = vpop.f32.mrf.mxu3  ;;  %v2595_v44 = vpop.f32.mrf.mxu0 }
 0x22a   : > { %v13491_v5 = vadd.f32 %v2043_v40, %v1734_v47  ;;  %v2596_v38 = vadd.f32 %v13329_v41, %v2595_v44  ;;  %v1544_v40 = vpack.c.bf16 %v1489_v25, %v1488_v34 }
 0x22c   : > { %v2753_v58 = vmax.f32 %v2596_v38, 0.0  ;;  %v1364_v38 = vadd.f32 %v13329_v41, %v1363_v43 }
 0x22e   : > { %v2817_v3 = vpack.c.bf16 %v2753_v58, %v2752_v29  ;;  %v1362_v29 = vadd.f32 %v13329_v41, %v1361_v0 }
 0x22f   : > { %v1736_v59 = vpop.f32.mrf.mxu2 }
 0x230   : > { %10596 = vmatmul.msk.bf16.gmra.mxu1 %vm1581_vm3, %v2817_v3  ;;  %v1490_v3 = vmax.f32 %v1362_v29, 0.0 }
 0x231   : > { %v2045_v50 = vpop.f32.mrf.mxu3  ;;  %v2598_v47 = vpop.f32.mrf.mxu0 }
 0x232   : > { %v13498_v13 = vadd.f32 %v2045_v50, %v1736_v59  ;;  %v2599_v4 = vadd.f32 %v13329_v41, %v2598_v47  ;;  %v1491_v59 = vmax.f32 %v1364_v38, 0.0 }
 0x234   : > { %10261 = vmatmul.msk.bf16.gmra.mxu2 %vm1581_vm3, %v1544_v40  ;;  %10557 = vmatmul.msk.bf16.gmra.mxu0 %vm489_vm2, %v12520_v26  ;;  %v2754_v52 = vmax.f32 %v2599_v4, 0.0  ;;  %v12521_v40 = vld [vmem:[%s12861_s29 + $0x2c8] sm:$0xff]  ;;  %v1545_v4 = vpack.c.bf16 %v1491_v59, %v1490_v3 }
 0x236   : > { %10305 = vmatmul.msk.bf16.gmra.mxu3 %vm1581_vm3, %v13341_v36 }
 0x237   : > { %v1739_v42 = vpop.f32.mrf.mxu2 }
 0x239   : > { %v2048_v39 = vpop.f32.mrf.mxu3  ;;  %v2600_v57 = vpop.f32.mrf.mxu0 }
 0x23a   : > { %v13505_v44 = vadd.f32 %v2048_v39, %v1739_v42  ;;  %v2601_v58 = vadd.f32 %v13329_v41, %v2600_v57 }
 0x23c   : > { %v2755_v34 = vmax.f32 %v2601_v58, 0.0 }
 0x23d   : > { %v2980_v25 = vpop.f32.mrf.mxu1 }
 0x23e   : > { %v2818_v36 = vpack.c.bf16 %v2755_v34, %v2754_v52  ;;  %v13511_v50 = vadd.f32 %v2980_v25, %v13388_v62 }
 0x23f   : > { %v1741_v26 = vpop.f32.mrf.mxu2 }
 0x240   : > { %10597 = vmatmul.msk.bf16.gmra.mxu1 %vm1581_vm3, %v2818_v36 }
 0x241   : > { %v2050_v47 = vpop.f32.mrf.mxu3  ;;  %v2603_v0 = vpop.f32.mrf.mxu0 }
 0x242   : > { %v13515_v42 = vadd.f32 %v2050_v47, %v1741_v26  ;;  %v2604_v62 = vadd.f32 %v13329_v41, %v2603_v0 }
 0x244   : > { %10262 = vmatmul.msk.bf16.gmra.mxu2 %vm1581_vm3, %v1545_v4  ;;  %10558 = vmatmul.msk.bf16.gmra.mxu0 %vm489_vm2, %v12521_v40  ;;  %v2756_v58 = vmax.f32 %v2604_v62, 0.0 }
 0x245   : > { %v2982_v43 = vpop.f32.mrf.mxu1 }
 0x246   : > { %10306 = vmatmul.msk.bf16.gmra.mxu3 %vm1581_vm3, %v13369_v60  ;;  %v13523_v39 = vadd.f32 %v2982_v43, %v13397_v37  ;;  %v12522_v37 = vld [vmem:[%s12861_s29 + $0x2d0] sm:$0xff] }
 0x247   : > { %v1744_v57 = vpop.f32.mrf.mxu2 }
 0x249   : > { %v2053_v29 = vpop.f32.mrf.mxu3  ;;  %v2605_v38 = vpop.f32.mrf.mxu0 }
 0x24a   : > { %v13525_v52 = vadd.f32 %v2053_v29, %v1744_v57  ;;  %v2606_v34 = vadd.f32 %v13329_v41, %v2605_v38 }
 0x24c   : > { %v2757_v25 = vmax.f32 %v2606_v34, 0.0 }
 0x24d   : > { %v2985_v3 = vpop.f32.mrf.mxu1 }
 0x24e   : > { %v2819_v59 = vpack.c.bf16 %v2757_v25, %v2756_v58  ;;  %v13529_v60 = vadd.f32 %v2985_v3, %v13404_v7 }
 0x24f   : > { %v1746_v36 = vpop.f32.mrf.mxu2 }
 0x250   : > { %10598 = vmatmul.msk.bf16.gmra.mxu1 %vm1581_vm3, %v2819_v59 }
 0x251   : > { %v2055_v26 = vpop.f32.mrf.mxu3  ;;  %v2608_v40 = vpop.f32.mrf.mxu0 }
 0x252   : > { %v13533_v47 = vadd.f32 %v2055_v26, %v1746_v36  ;;  %v2609_v7 = vadd.f32 %v13329_v41, %v2608_v40 }
 0x254   : > { %10263 = vmatmul.msk.bf16.gmra.mxu2 %vm1581_vm3, %v12956_v2  ;;  %10559 = vmatmul.msk.bf16.gmra.mxu0 %vm489_vm2, %v12522_v37  ;;  %v2758_v38 = vmax.f32 %v2609_v7, 0.0 }
 0x255   : > { %v2987_v0 = vpop.f32.mrf.mxu1 }
 0x256   : > { %10307 = vmatmul.msk.bf16.gmra.mxu3 %vm1581_vm3, %v12952_v1  ;;  %v13542_v4 = vadd.f32 %v2987_v0, %v13413_v63  ;;  %v12523_v63 = vld [vmem:[%s12861_s29 + $0x2d8] sm:$0xff] }
 0x257   : > { %v1749_v43 = vpop.f32.mrf.mxu2 }
 0x259   : > { %v2058_v62 = vpop.f32.mrf.mxu3  ;;  %v2610_v29 = vpop.f32.mrf.mxu0 }
 0x25a   : > { %v13544_v57 = vadd.f32 %v2058_v62, %v1749_v43  ;;  %v2611_v2 = vadd.f32 %v13329_v41, %v2610_v29 }
 0x25c   : > { %v2759_v58 = vmax.f32 %v2611_v2, 0.0 }
 0x25d   : > { %v2990_v34 = vpop.f32.mrf.mxu1 }
 0x25e   : > { %v2820_v25 = vpack.c.bf16 %v2759_v58, %v2758_v38  ;;  %v13548_v1 = vadd.f32 %v2990_v34, %v13420_v45 }
 0x25f   : > { %v1751_v3 = vpop.f32.mrf.mxu2 }
 0x260   : > { %10599 = vmatmul.msk.bf16.gmra.mxu1 %vm1581_vm3, %v2820_v25 }
 0x261   : > { %v2060_v59 = vpop.f32.mrf.mxu3  ;;  %v2613_v26 = vpop.f32.mrf.mxu0 }
 0x262   : > { %v13552_v36 = vadd.f32 %v2060_v59, %v1751_v3  ;;  %v2614_v45 = vadd.f32 %v13329_v41, %v2613_v26 }
 0x264   : > { %10264 = vmatmul.msk.bf16.gmra.mxu2 %vm1581_vm3, %v12976_v28  ;;  %10560 = vmatmul.msk.bf16.gmra.mxu0 %vm489_vm2, %v12523_v63  ;;  %v2760_v29 = vmax.f32 %v2614_v45, 0.0 }
 0x265   : > { %v2992_v37 = vpop.f32.mrf.mxu1 }
 0x266   : > { %10308 = vmatmul.msk.bf16.gmra.mxu3 %vm1581_vm3, %v12972_v27  ;;  %v13561_v40 = vadd.f32 %v2992_v37, %v13428_v15  ;;  %v12524_v15 = vld [vmem:[%s12861_s29 + $0x2e0] sm:$0xff] }
 0x267   : > { %v1754_v0 = vpop.f32.mrf.mxu2 }
 0x269   : > { %v2063_v7 = vpop.f32.mrf.mxu3  ;;  %v2615_v62 = vpop.f32.mrf.mxu0 }
 0x26a   : > { %v13563_v43 = vadd.f32 %v2063_v7, %v1754_v0  ;;  %v2616_v28 = vadd.f32 %v13329_v41, %v2615_v62 }
 0x26c   : > { %v2761_v38 = vmax.f32 %v2616_v28, 0.0 }
 0x26d   : > { %v2995_v2 = vpop.f32.mrf.mxu1 }
 0x26e   : > { %v2821_v58 = vpack.c.bf16 %v2761_v38, %v2760_v29  ;;  %v13567_v27 = vadd.f32 %v2995_v2, %v13435_v8 }
 0x26f   : > { %v1756_v34 = vpop.f32.mrf.mxu2 }
 0x270   : > { %10600 = vmatmul.msk.bf16.gmra.mxu1 %vm1581_vm3, %v2821_v58 }
 0x271   : > { %v2065_v25 = vpop.f32.mrf.mxu3  ;;  %v2618_v59 = vpop.f32.mrf.mxu0 }
 0x272   : > { %v13571_v3 = vadd.f32 %v2065_v25, %v1756_v34  ;;  %v2619_v8 = vadd.f32 %v13329_v41, %v2618_v59 }
 0x274   : > { %10265 = vmatmul.msk.bf16.gmra.mxu2 %vm1581_vm3, %v12996_v55  ;;  %10561 = vmatmul.msk.bf16.gmra.mxu0 %vm489_vm2, %v12524_v15  ;;  %v2762_v62 = vmax.f32 %v2619_v8, 0.0 }
 0x275   : > { %v2997_v63 = vpop.f32.mrf.mxu1 }
 0x276   : > { %10309 = vmatmul.msk.bf16.gmra.mxu3 %vm1581_vm3, %v12992_v54  ;;  %v13580_v26 = vadd.f32 %v2997_v63, %v13442_v32  ;;  %v12525_v32 = vld [vmem:[%s12861_s29 + $0x2e8] sm:$0xff] }
 0x277   : > { %v1759_v37 = vpop.f32.mrf.mxu2 }
 0x279   : > { %v2068_v45 = vpop.f32.mrf.mxu3  ;;  %v2620_v7 = vpop.f32.mrf.mxu0 }
 0x27a   : > { %v13582_v0 = vadd.f32 %v2068_v45, %v1759_v37  ;;  %v2621_v55 = vadd.f32 %v13329_v41, %v2620_v7 }
 0x27c   : > { %v2763_v29 = vmax.f32 %v2621_v55, 0.0 }
 0x27d   : > { %v3000_v28 = vpop.f32.mrf.mxu1 }
 0x27e   : > { %v2822_v38 = vpack.c.bf16 %v2763_v29, %v2762_v62  ;;  %v13586_v54 = vadd.f32 %v3000_v28, %v13449_v61 }
 0x27f   : > { %v1761_v2 = vpop.f32.mrf.mxu2 }
 0x280   : > { %10601 = vmatmul.msk.bf16.gmra.mxu1 %vm1581_vm3, %v2822_v38 }
 0x281   : > { %v2070_v58 = vpop.f32.mrf.mxu3  ;;  %v2623_v25 = vpop.f32.mrf.mxu0 }
 0x282   : > { %v13590_v34 = vadd.f32 %v2070_v58, %v1761_v2  ;;  %v2624_v61 = vadd.f32 %v13329_v41, %v2623_v25 }
 0x284   : > { %10266 = vmatmul.msk.bf16.gmra.mxu2 %vm1581_vm3, %v13016_v20  ;;  %10562 = vmatmul.msk.bf16.gmra.mxu0 %vm489_vm2, %v12525_v32  ;;  %v2764_v7 = vmax.f32 %v2624_v61, 0.0 }
 0x285   : > { %v3002_v15 = vpop.f32.mrf.mxu1 }
 0x286   : > { %10310 = vmatmul.msk.bf16.gmra.mxu3 %vm1581_vm3, %v13012_v19  ;;  %v13599_v59 = vadd.f32 %v3002_v15, %v13456_v22  ;;  %v12526_v22 = vld [vmem:[%s12861_s29 + $0x2f0] sm:$0xff] }
 0x287   : > { %v1764_v63 = vpop.f32.mrf.mxu2 }
 0x289   : > { %v2073_v8 = vpop.f32.mrf.mxu3  ;;  %v2625_v45 = vpop.f32.mrf.mxu0 }
 0x28a   : > { %v13601_v37 = vadd.f32 %v2073_v8, %v1764_v63  ;;  %v2626_v20 = vadd.f32 %v13329_v41, %v2625_v45 }
 0x28c   : > { %v2765_v62 = vmax.f32 %v2626_v20, 0.0 }
 0x28d   : > { %v3005_v55 = vpop.f32.mrf.mxu1 }
 0x28e   : > { %v2823_v29 = vpack.c.bf16 %v2765_v62, %v2764_v7  ;;  %v13605_v19 = vadd.f32 %v3005_v55, %v13463_v46 }
 0x28f   : > { %v1766_v28 = vpop.f32.mrf.mxu2 }
 0x290   : > { %10602 = vmatmul.msk.bf16.gmra.mxu1 %vm1581_vm3, %v2823_v29 }
 0x291   : > { %v2075_v38 = vpop.f32.mrf.mxu3  ;;  %v2628_v58 = vpop.f32.mrf.mxu0 }
 0x292   : > { %v13609_v2 = vadd.f32 %v2075_v38, %v1766_v28  ;;  %v2629_v46 = vadd.f32 %v13329_v41, %v2628_v58 }
 0x294   : > { %10267 = vmatmul.msk.bf16.gmra.mxu2 %vm1581_vm3, %v13036_v49  ;;  %10563 = vmatmul.msk.bf16.gmra.mxu0 %vm489_vm2, %v12526_v22  ;;  %v2766_v45 = vmax.f32 %v2629_v46, 0.0 }
 0x295   : > { %v3007_v32 = vpop.f32.mrf.mxu1 }
 0x296   : > { %10311 = vmatmul.msk.bf16.gmra.mxu3 %vm1581_vm3, %v13032_v48  ;;  %v13618_v25 = vadd.f32 %v3007_v32, %v13470_v23  ;;  %v12527_v23 = vld [vmem:[%s12861_s29 + $0x2f8] sm:$0xff] }
 0x297   : > { %v1769_v15 = vpop.f32.mrf.mxu2 }
 0x299   : > { %v2078_v61 = vpop.f32.mrf.mxu3  ;;  %v2630_v8 = vpop.f32.mrf.mxu0 }
 0x29a   : > { %v13620_v63 = vadd.f32 %v2078_v61, %v1769_v15  ;;  %v2631_v49 = vadd.f32 %v13329_v41, %v2630_v8 }
 0x29c   : > { %v2767_v7 = vmax.f32 %v2631_v49, 0.0 }
 0x29d   : > { %v3010_v20 = vpop.f32.mrf.mxu1 }
 0x29e   : > { %v2824_v62 = vpack.c.bf16 %v2767_v7, %v2766_v45  ;;  %v13624_v48 = vadd.f32 %v3010_v20, %v13477_v33 }
 0x29f   : > { %v1771_v55 = vpop.f32.mrf.mxu2 }
 0x2a0   : > { %10603 = vmatmul.msk.bf16.gmra.mxu1 %vm1581_vm3, %v2824_v62 }
 0x2a1   : > { %v2080_v29 = vpop.f32.mrf.mxu3  ;;  %v2633_v38 = vpop.f32.mrf.mxu0 }
 0x2a2   : > { %v13628_v28 = vadd.f32 %v2080_v29, %v1771_v55  ;;  %v2634_v33 = vadd.f32 %v13329_v41, %v2633_v38 }
 0x2a4   : > { %10268 = vmatmul.msk.bf16.gmra.mxu2 %vm1581_vm3, %v13056_v18  ;;  %10564 = vmatmul.msk.bf16.gmra.mxu0 %vm489_vm2, %v12527_v23  ;;  %v2768_v8 = vmax.f32 %v2634_v33, 0.0 }
 0x2a5   : > { %v3012_v22 = vpop.f32.mrf.mxu1 }
 0x2a6   : > { %10312 = vmatmul.msk.bf16.gmra.mxu3 %vm1581_vm3, %v13052_v17  ;;  %v13637_v58 = vadd.f32 %v3012_v22, %v13484_v9  ;;  %v12528_v9 = vld [vmem:[%s12861_s29 + $0x300] sm:$0xff] }
 0x2a7   : > { %v1774_v32 = vpop.f32.mrf.mxu2 }
 0x2a9   : > { %v2083_v46 = vpop.f32.mrf.mxu3  ;;  %v2635_v61 = vpop.f32.mrf.mxu0 }
 0x2aa   : > { %v13639_v15 = vadd.f32 %v2083_v46, %v1774_v32  ;;  %v2636_v18 = vadd.f32 %v13329_v41, %v2635_v61 }
 0x2ac   : > { %v2769_v45 = vmax.f32 %v2636_v18, 0.0 }
 0x2ad   : > { %v3015_v49 = vpop.f32.mrf.mxu1 }
 0x2ae   : > { %v2825_v7 = vpack.c.bf16 %v2769_v45, %v2768_v8  ;;  %v13643_v17 = vadd.f32 %v3015_v49, %v13491_v5 }
 0x2af   : > { %v1776_v20 = vpop.f32.mrf.mxu2 }
 0x2b0   : > { %10604 = vmatmul.msk.bf16.gmra.mxu1 %vm1581_vm3, %v2825_v7 }
 0x2b1   : > { %v2085_v62 = vpop.f32.mrf.mxu3  ;;  %v2638_v29 = vpop.f32.mrf.mxu0 }
 0x2b2   : > { %v13647_v55 = vadd.f32 %v2085_v62, %v1776_v20  ;;  %v2639_v5 = vadd.f32 %v13329_v41, %v2638_v29 }
 0x2b4   : > { %10269 = vmatmul.msk.bf16.gmra.mxu2 %vm1581_vm3, %v13078_v56  ;;  %10565 = vmatmul.msk.bf16.gmra.mxu0 %vm489_vm2, %v12528_v9  ;;  %v2770_v61 = vmax.f32 %v2639_v5, 0.0 }
 0x2b5   : > { %v3017_v23 = vpop.f32.mrf.mxu1 }
 0x2b6   : > { %10313 = vmatmul.msk.bf16.gmra.mxu3 %vm1581_vm3, %v13074_v53  ;;  %v13656_v38 = vadd.f32 %v3017_v23, %v13498_v13  ;;  %v12529_v13 = vld [vmem:[%s12861_s29 + $0x308] sm:$0xff]  ;;  %v12578_v23 = vld [vmem:[%s16007_s3 + $0x30] sm:$0xff] }
 0x2b7   : > { %v1779_v22 = vpop.f32.mrf.mxu2  ;;  %4022 = vmatpush.bf16.msra.mxu3 %v12578_v23 }
 0x2b9   : > { %v2088_v33 = vpop.f32.mrf.mxu3  ;;  %v2640_v46 = vpop.f32.mrf.mxu0 }
 0x2ba   : > { %v13658_v32 = vadd.f32 %v2088_v33, %v1779_v22  ;;  %v2641_v56 = vadd.f32 %v13329_v41, %v2640_v46 }
 0x2bc   : > { %v2771_v8 = vmax.f32 %v2641_v56, 0.0 }
 0x2bd   : > { %v3020_v18 = vpop.f32.mrf.mxu1 }
 0x2be   : > { %v2826_v45 = vpack.c.bf16 %v2771_v8, %v2770_v61  ;;  %v13662_v53 = vadd.f32 %v3020_v18, %v13505_v44  ;;  %v12616_v18 = vld [vmem:[%s16007_s3 + $0x40] sm:$0xff] }
 0x2bf   : > { %v1781_v49 = vpop.f32.mrf.mxu2  ;;  %5066 = vmatpush.bf16.msra.mxu1 %v12616_v18 }
 0x2c0   : > { %10605 = vmatmul.msk.bf16.gmra.mxu1 %vm1581_vm3, %v2826_v45 }
 0x2c1   : > { %v2090_v7 = vpop.f32.mrf.mxu3  ;;  %v2643_v62 = vpop.f32.mrf.mxu0 }
 0x2c2   : > { %v13666_v20 = vadd.f32 %v2090_v7, %v1781_v49  ;;  %v2644_v44 = vadd.f32 %v13329_v41, %v2643_v62  ;;  %v12530_v7 = vld [vmem:[%s12861_s29 + $0x310] sm:$0xff] }
 0x2c4   : > { %10270 = vmatmul.msk.bf16.gmra.mxu2 %vm1581_vm3, %v13105_v35  ;;  %10566 = vmatmul.msk.bf16.gmra.mxu0 %vm489_vm2, %v12529_v13  ;;  %v2772_v46 = vmax.f32 %v2644_v44, 0.0 }
 0x2c5   : > { %v3022_v9 = vpop.f32.mrf.mxu1 }
 0x2c6   : > { %10314 = vmatmul.msk.bf16.gmra.mxu3 %vm1581_vm3, %v13101_v31  ;;  %v13675_v29 = vadd.f32 %v3022_v9, %v13515_v42 }
 0x2c7   : > { %v1784_v5 = vpop.f32.mrf.mxu2 }
 0x2c9   : > { %v2093_v22 = vpop.f32.mrf.mxu3  ;;  %v2645_v33 = vpop.f32.mrf.mxu0 }
 0x2ca   : > { %v13680_v35 = vadd.f32 %v2093_v22, %v1784_v5  ;;  %v2646_v31 = vadd.f32 %v13329_v41, %v2645_v33 }
 0x2cc   : > { %v2773_v61 = vmax.f32 %v2646_v31, 0.0 }
 0x2cd   : > { %v3025_v56 = vpop.f32.mrf.mxu1 }
 0x2ce   : > { %v2827_v8 = vpack.c.bf16 %v2773_v61, %v2772_v46  ;;  %v13684_v42 = vadd.f32 %v3025_v56, %v13525_v52 }
 0x2cf   : > { %v1786_v45 = vpop.f32.mrf.mxu2 }
 0x2d0   : > { %10606 = vmatmul.msk.bf16.gmra.mxu1 %vm1581_vm3, %v2827_v8 }
 0x2d1   : > { %v2095_v49 = vpop.f32.mrf.mxu3  ;;  %v2648_v62 = vpop.f32.mrf.mxu0 }
 0x2d2   : > { %v13691_v13 = vadd.f32 %v2095_v49, %v1786_v45  ;;  %v2649_v9 = vadd.f32 %v13329_v41, %v2648_v62 }
 0x2d4   : > { %10271 = vmatmul.msk.bf16.gmra.mxu2 %vm1581_vm3, %v13132_v21  ;;  %10567 = vmatmul.msk.bf16.gmra.mxu0 %vm489_vm2, %v12530_v7  ;;  %v2774_v46 = vmax.f32 %v2649_v9, 0.0 }
 0x2d5   : > { %v3027_v52 = vpop.f32.mrf.mxu1 }
 0x2d6   : > { %10315 = vmatmul.msk.bf16.gmra.mxu3 %vm1581_vm3, %v13128_v16  ;;  %v13700_v44 = vadd.f32 %v3027_v52, %v13533_v47  ;;  %v12531_v47 = vld [vmem:[%s12861_s29 + $0x318] sm:$0xff] }
 0x2d7   : > { %v1789_v23 = vpop.f32.mrf.mxu2 }
 0x2d9   : > { %v2098_v5 = vpop.f32.mrf.mxu3  ;;  %v2650_v33 = vpop.f32.mrf.mxu0 }
 0x2da   : > { %v13702_v22 = vadd.f32 %v2098_v5, %v1789_v23  ;;  %v2651_v21 = vadd.f32 %v13329_v41, %v2650_v33 }
 0x2dc   : > { %v2775_v31 = vmax.f32 %v2651_v21, 0.0 }
 0x2dd   : > { %v3030_v61 = vpop.f32.mrf.mxu1 }
 0x2de   : > { %v2828_v56 = vpack.c.bf16 %v2775_v31, %v2774_v46  ;;  %v13706_v16 = vadd.f32 %v3030_v61, %v13544_v57  ;;  %v13720_v57 = vld [vmem:[%s16006_s2] ss:$0 sm:$0xff] }
 0x2df   : > { %v1791_v8 = vpop.f32.mrf.mxu2 }
 0x2e0   : > { %10607 = vmatmul.msk.bf16.gmra.mxu1 %vm1581_vm3, %v2828_v56 }
 0x2e1   : > { %v2100_v18 = vpop.f32.mrf.mxu3  ;;  %v2653_v49 = vpop.f32.mrf.mxu0 }
 0x2e2   : > { %v13710_v45 = vadd.f32 %v2100_v18, %v1791_v8  ;;  %v2654_v7 = vadd.f32 %v13720_v57, %v2653_v49 }
 0x2e4   : > { %10272 = vmatmul.msk.bf16.gmra.mxu2 %vm1581_vm3, %v13158_v12  ;;  %10568 = vmatmul.msk.bf16.gmra.mxu0 %vm489_vm2, %v12531_v47  ;;  %v2776_v5 = vmax.f32 %v2654_v7, 0.0 }
 0x2e5   : > { %v3032_v41 = vpop.f32.mrf.mxu1 }
 0x2e6   : > { %10316 = vmatmul.msk.bf16.gmra.mxu3 %vm1581_vm3, %v13154_v11  ;;  %v13724_v62 = vadd.f32 %v3032_v41, %v13552_v36  ;;  %v12532_v36 = vld [vmem:[%s12861_s29 + $0x320] sm:$0xff] }
 0x2e7   : > { %v1794_v52 = vpop.f32.mrf.mxu2 }
 0x2e9   : > { %v2103_v9 = vpop.f32.mrf.mxu3  ;;  %v2655_v23 = vpop.f32.mrf.mxu0 }
 0x2ea   : > { %v13726_v12 = vadd.f32 %v2103_v9, %v1794_v52  ;;  %v2656_v11 = vadd.f32 %v13720_v57, %v2655_v23 }
 0x2ec   : > { %v2777_v33 = vmax.f32 %v2656_v11, 0.0 }
 0x2ed   : > { %v3035_v46 = vpop.f32.mrf.mxu1 }
 0x2ee   : > { %v2829_v21 = vpack.c.bf16 %v2777_v33, %v2776_v5  ;;  %v13730_v31 = vadd.f32 %v3035_v46, %v13563_v43 }
 0x2ef   : > { %v1796_v61 = vpop.f32.mrf.mxu2 }
 0x2f0   : > { %10608 = vmatmul.msk.bf16.gmra.mxu1 %vm1581_vm3, %v2829_v21 }
 0x2f1   : > { %v2105_v56 = vpop.f32.mrf.mxu3  ;;  %v2658_v18 = vpop.f32.mrf.mxu0 }
 0x2f2   : > { %v13734_v8 = vadd.f32 %v2105_v56, %v1796_v61  ;;  %v2659_v43 = vadd.f32 %v13720_v57, %v2658_v18 }
 0x2f4   : > { %10273 = vmatmul.msk.bf16.gmra.mxu2 %vm1581_vm3, %v13187_v10  ;;  %10569 = vmatmul.msk.bf16.gmra.mxu0 %vm489_vm2, %v12532_v36  ;;  %v2778_v23 = vmax.f32 %v2659_v43, 0.0 }
 0x2f5   : > { %v3037_v47 = vpop.f32.mrf.mxu1 }
 0x2f6   : > { %10317 = vmatmul.msk.bf16.gmra.mxu3 %vm1581_vm3, %v13183_v6  ;;  %v13743_v49 = vadd.f32 %v3037_v47, %v13571_v3  ;;  %v12533_v3 = vld [vmem:[%s12861_s29 + $0x328] sm:$0xff] }
 0x2f7   : > { %v1799_v41 = vpop.f32.mrf.mxu2 }
 0x2f8   : > { %16023 = vst [vmem:[#allocation13_spill] sm:$0xff] %v13743_v49 }
 0x2f9   : > { %v2108_v7 = vpop.f32.mrf.mxu3  ;;  %v2660_v9 = vpop.f32.mrf.mxu0 }
 0x2fa   : > { %v13745_v52 = vadd.f32 %v2108_v7, %v1799_v41  ;;  %v2661_v10 = vadd.f32 %v13720_v57, %v2660_v9 }
 0x2fc   : > { %v2779_v5 = vmax.f32 %v2661_v10, 0.0 }
 0x2fd   : > { %v3040_v11 = vpop.f32.mrf.mxu1 }
 0x2fe   : > { %v2830_v33 = vpack.c.bf16 %v2779_v5, %v2778_v23  ;;  %v13749_v6 = vadd.f32 %v3040_v11, %v13582_v0 }
 0x2ff   : > { %v1801_v46 = vpop.f32.mrf.mxu2 }
 0x300   : > { %16024 = vst [vmem:[#allocation14_spill] sm:$0xff] %v13749_v6  ;;  %10609 = vmatmul.msk.bf16.gmra.mxu1 %vm1581_vm3, %v2830_v33 }
 0x301   : > { %v2110_v21 = vpop.f32.mrf.mxu3  ;;  %v2663_v56 = vpop.f32.mrf.mxu0 }
 0x302   : > { %v13753_v61 = vadd.f32 %v2110_v21, %v1801_v46  ;;  %v2664_v0 = vadd.f32 %v13720_v57, %v2663_v56 }
 0x304   : > { %10274 = vmatmul.msk.bf16.gmra.mxu2 %vm1581_vm3, %v13214_v24  ;;  %10570 = vmatmul.msk.bf16.gmra.mxu0 %vm489_vm2, %v12533_v3  ;;  %v2780_v9 = vmax.f32 %v2664_v0, 0.0 }
 0x305   : > { %v3042_v36 = vpop.f32.mrf.mxu1 }
 0x306   : > { %10318 = vmatmul.msk.bf16.gmra.mxu3 %vm1581_vm3, %v13210_v14  ;;  %v13762_v18 = vadd.f32 %v3042_v36, %v13590_v34  ;;  %v12534_v34 = vld [vmem:[%s12861_s29 + $0x330] sm:$0xff] }
 0x307   : > { %v1804_v47 = vpop.f32.mrf.mxu2 }
 0x308   : > { %16025 = vst [vmem:[#allocation15_spill] sm:$0xff] %v13762_v18 }
 0x309   : > { %v2113_v43 = vpop.f32.mrf.mxu3  ;;  %v2665_v7 = vpop.f32.mrf.mxu0 }
 0x30a   : > { %v13764_v41 = vadd.f32 %v2113_v43, %v1804_v47  ;;  %v2666_v24 = vadd.f32 %v13720_v57, %v2665_v7 }
 0x30c   : > { %v2781_v23 = vmax.f32 %v2666_v24, 0.0 }
 0x30d   : > { %v3045_v10 = vpop.f32.mrf.mxu1 }
 0x30e   : > { %v2831_v5 = vpack.c.bf16 %v2781_v23, %v2780_v9  ;;  %v13768_v14 = vadd.f32 %v3045_v10, %v13601_v37 }
 0x30f   : > { %v1806_v11 = vpop.f32.mrf.mxu2 }
 0x310   : > { %16026 = vst [vmem:[#allocation16_spill] sm:$0xff] %v13768_v14  ;;  %10610 = vmatmul.msk.bf16.gmra.mxu1 %vm1581_vm3, %v2831_v5 }
 0x311   : > { %v2115_v33 = vpop.f32.mrf.mxu3  ;;  %v2668_v21 = vpop.f32.mrf.mxu0 }
 0x312   : > { %v13772_v46 = vadd.f32 %v2115_v33, %v1806_v11  ;;  %v2669_v37 = vadd.f32 %v13720_v57, %v2668_v21  ;;  %v16030_v21 = vld [vmem:[#allocation3_spill] sm:$0xff] }
 0x314   : > { %10275 = vmatmul.msk.bf16.gmra.mxu2 %vm1581_vm3, %v13241_v30  ;;  %10571 = vmatmul.msk.bf16.gmra.mxu0 %vm489_vm2, %v12534_v34  ;;  %v2782_v7 = vmax.f32 %v2669_v37, 0.0  ;;  %v16029_v34 = vld [vmem:[#allocation4_spill] sm:$0xff] }
 0x315   : > { %v3047_v3 = vpop.f32.mrf.mxu1 }
 0x316   : > { %10319 = vmatmul.msk.bf16.gmra.mxu3 %vm1581_vm3, %v13237_v51  ;;  %v13781_v56 = vadd.f32 %v3047_v3, %v13609_v2  ;;  %v12535_v2 = vld [vmem:[%s12861_s29 + $0x338] sm:$0xff] }
 0x317   : > { %v1809_v36 = vpop.f32.mrf.mxu2 }
 0x318   : > { %16027 = vst [vmem:[#allocation17_spill] sm:$0xff] %v13781_v56 }
 0x319   : > { %v2118_v0 = vpop.f32.mrf.mxu3  ;;  %v2670_v43 = vpop.f32.mrf.mxu0 }
 0x31a   : > { %v13783_v47 = vadd.f32 %v2118_v0, %v1809_v36  ;;  %v2671_v30 = vadd.f32 %v13720_v57, %v2670_v43 }
 0x31c   : > { %v2783_v9 = vmax.f32 %v2671_v30, 0.0 }
 0x31d   : > { %v3050_v24 = vpop.f32.mrf.mxu1 }
 0x31e   : > { %v2832_v23 = vpack.c.bf16 %v2783_v9, %v2782_v7  ;;  %v13787_v51 = vadd.f32 %v3050_v24, %v13620_v63 }
 0x31f   : > { %v1811_v10 = vpop.f32.mrf.mxu2 }
 0x320   : > { %16028 = vst [vmem:[#allocation18_spill] sm:$0xff] %v13787_v51  ;;  %10611 = vmatmul.msk.bf16.gmra.mxu1 %vm1581_vm3, %v2832_v23 }
 0x321   : > { %v2120_v5 = vpop.f32.mrf.mxu3  ;;  %v2673_v33 = vpop.f32.mrf.mxu0 }
 0x322   : > { %v13791_v11 = vadd.f32 %v2120_v5, %v1811_v10  ;;  %v2674_v63 = vadd.f32 %v13720_v57, %v2673_v33 }
 0x324   : > { %10276 = vmatmul.msk.bf16.gmra.mxu2 %vm1581_vm3, %v16029_v34  ;;  %10572 = vmatmul.msk.bf16.gmra.mxu0 %vm489_vm2, %v12535_v2  ;;  %v2784_v30 = vmax.f32 %v2674_v63, 0.0  ;;  %v16034_v63 = vld [vmem:[#allocation5_spill] sm:$0xff] }
 0x325   : > { %v3052_v3 = vpop.f32.mrf.mxu1 }
 0x326   : > { %10320 = vmatmul.msk.bf16.gmra.mxu3 %vm1581_vm3, %v16030_v21  ;;  %v13800_v37 = vadd.f32 %v3052_v3, %v13628_v28  ;;  %v12536_v28 = vld [vmem:[%s12861_s29 + $0x340] sm:$0xff] }
 0x327   : > { %v1814_v36 = vpop.f32.mrf.mxu2  ;;  %v16033_v3 = vld [vmem:[#allocation6_spill] sm:$0xff] }
 0x328   : > { %16031 = vst [vmem:[#allocation4_spill] sm:$0xff] %v13800_v37 }
 0x329   : > { %v2123_v0 = vpop.f32.mrf.mxu3  ;;  %v2675_v7 = vpop.f32.mrf.mxu0 }
 0x32a   : > { %v13802_v43 = vadd.f32 %v2123_v0, %v1814_v36  ;;  %v2676_v9 = vadd.f32 %v13720_v57, %v2675_v7 }
 0x32c   : > { %v2785_v24 = vmax.f32 %v2676_v9, 0.0 }
 0x32d   : > { %v3055_v23 = vpop.f32.mrf.mxu1 }
 0x32e   : > { %v2833_v10 = vpack.c.bf16 %v2785_v24, %v2784_v30  ;;  %v13806_v5 = vadd.f32 %v3055_v23, %v13639_v15 }
 0x32f   : > { %v1816_v2 = vpop.f32.mrf.mxu2 }
 0x330   : > { %16032 = vst [vmem:[#allocation3_spill] sm:$0xff] %v13806_v5  ;;  %10612 = vmatmul.msk.bf16.gmra.mxu1 %vm1581_vm3, %v2833_v10 }
 0x331   : > { %v2125_v34 = vpop.f32.mrf.mxu3  ;;  %v2678_v21 = vpop.f32.mrf.mxu0 }
 0x332   : > { %v13810_v33 = vadd.f32 %v2125_v34, %v1816_v2  ;;  %v2679_v15 = vadd.f32 %v13720_v57, %v2678_v21 }
 0x334   : > { %10277 = vmatmul.msk.bf16.gmra.mxu2 %vm1581_vm3, %v16033_v3  ;;  %10573 = vmatmul.msk.bf16.gmra.mxu0 %vm489_vm2, %v12536_v28  ;;  %v2786_v23 = vmax.f32 %v2679_v15, 0.0  ;;  %v16038_v15 = vld [vmem:[#allocation7_spill] sm:$0xff] }
 0x335   : > { %v3057_v36 = vpop.f32.mrf.mxu1 }
 0x336   : > { %10321 = vmatmul.msk.bf16.gmra.mxu3 %vm1581_vm3, %v16034_v63  ;;  %v13819_v0 = vadd.f32 %v3057_v36, %v13647_v55  ;;  %v12537_v55 = vld [vmem:[%s12861_s29 + $0x348] sm:$0xff] }
 0x337   : > { %v1819_v7 = vpop.f32.mrf.mxu2 }
 0x338   : > { %16035 = vst [vmem:[#allocation6_spill] sm:$0xff] %v13819_v0 }
 0x339   : > { %v2128_v30 = vpop.f32.mrf.mxu3  ;;  %v2680_v24 = vpop.f32.mrf.mxu0 }
 0x33a   : > { %v13821_v9 = vadd.f32 %v2128_v30, %v1819_v7  ;;  %v2681_v10 = vadd.f32 %v13720_v57, %v2680_v24  ;;  %v16037_v7 = vld [vmem:[#allocation8_spill] sm:$0xff] }
 0x33c   : > { %v2787_v2 = vmax.f32 %v2681_v10, 0.0 }
 0x33d   : > { %v3060_v34 = vpop.f32.mrf.mxu1 }
 0x33e   : > { %v2834_v28 = vpack.c.bf16 %v2787_v2, %v2786_v23  ;;  %v13825_v3 = vadd.f32 %v3060_v34, %v13658_v32 }
 0x33f   : > { %v13827_v63 = vpop.f32.mrf.mxu2 }
 0x340   : > { %16036 = vst [vmem:[#allocation5_spill] sm:$0xff] %v13825_v3  ;;  %10613 = vmatmul.msk.bf16.gmra.mxu1 %vm1581_vm3, %v2834_v28 }
 0x341   : > { %v13829_v21 = vpop.f32.mrf.mxu3  ;;  %v2683_v36 = vpop.f32.mrf.mxu0 }
 0x342   : > { %v2684_v32 = vadd.f32 %v13720_v57, %v2683_v36 }
 0x344   : > { %10278 = vmatmul.msk.bf16.gmra.mxu2 %vm1581_vm3, %v16037_v7  ;;  %10574 = vmatmul.msk.bf16.gmra.mxu0 %vm489_vm2, %v12537_v55  ;;  %v2788_v28 = vmax.f32 %v2684_v32, 0.0  ;;  %v16042_v32 = vld [vmem:[#allocation9_spill] sm:$0xff] }
 0x345   : > { %v3062_v30 = vpop.f32.mrf.mxu1 }
 0x346   : > { %10322 = vmatmul.msk.bf16.gmra.mxu3 %vm1581_vm3, %v16038_v15  ;;  %v13840_v24 = vadd.f32 %v3062_v30, %v13666_v20  ;;  %v12538_v20 = vld [vmem:[%s12861_s29 + $0x350] sm:$0xff] }
 0x347   : > { %v1824_v23 = vpop.f32.mrf.mxu2 }
 0x348   : > { %16039 = vst [vmem:[#allocation8_spill] sm:$0xff] %v13840_v24 }
 0x349   : > { %v2133_v10 = vpop.f32.mrf.mxu3  ;;  %v2685_v34 = vpop.f32.mrf.mxu0 }
 0x34a   : > { %v13842_v2 = vadd.f32 %v2133_v10, %v1824_v23  ;;  %v2686_v7 = vadd.f32 %v13720_v57, %v2685_v34  ;;  %v16041_v23 = vld [vmem:[#allocation10_spill] sm:$0xff] }
 0x34c   : > { %v2789_v3 = vmax.f32 %v2686_v7, 0.0 }
 0x34d   : > { %v3065_v55 = vpop.f32.mrf.mxu1 }
 0x34e   : > { %v2835_v0 = vpack.c.bf16 %v2789_v3, %v2788_v28  ;;  %v13846_v15 = vadd.f32 %v3065_v55, %v13680_v35 }
 0x34f   : > { %v13848_v5 = vpop.f32.mrf.mxu2 }
 0x350   : > { %16040 = vst [vmem:[#allocation7_spill] sm:$0xff] %v13846_v15  ;;  %10614 = vmatmul.msk.bf16.gmra.mxu1 %vm1581_vm3, %v2835_v0 }
 0x351   : > { %v13850_v36 = vpop.f32.mrf.mxu3  ;;  %v2688_v30 = vpop.f32.mrf.mxu0 }
 0x352   : > { %v2689_v35 = vadd.f32 %v13720_v57, %v2688_v30 }
 0x354   : > { %10279 = vmatmul.msk.bf16.gmra.mxu2 %vm1581_vm3, %v16041_v23  ;;  %10575 = vmatmul.msk.bf16.gmra.mxu0 %vm489_vm2, %v12538_v20  ;;  %v2790_v55 = vmax.f32 %v2689_v35, 0.0  ;;  %v16046_v35 = vld [vmem:[#allocation11_spill] sm:$0xff] }
 0x355   : > { %v3067_v3 = vpop.f32.mrf.mxu1 }
 0x356   : > { %10323 = vmatmul.msk.bf16.gmra.mxu3 %vm1581_vm3, %v16042_v32  ;;  %v13861_v10 = vadd.f32 %v3067_v3, %v13691_v13  ;;  %v12539_v13 = vld [vmem:[%s12861_s29 + $0x358] sm:$0xff] }
 0x357   : > { %v1829_v34 = vpop.f32.mrf.mxu2 }
 0x358   : > { %16043 = vst [vmem:[#allocation10_spill] sm:$0xff] %v13861_v10 }
 0x359   : > { %v2138_v28 = vpop.f32.mrf.mxu3  ;;  %v2690_v7 = vpop.f32.mrf.mxu0 }
 0x35a   : > { %v13863_v0 = vadd.f32 %v2138_v28, %v1829_v34  ;;  %v2691_v23 = vadd.f32 %v13720_v57, %v2690_v7  ;;  %v16045_v34 = vld [vmem:[#allocation12_spill] sm:$0xff] }
 0x35c   : > { %v2791_v15 = vmax.f32 %v2691_v23, 0.0 }
 0x35d   : > { %v3070_v20 = vpop.f32.mrf.mxu1 }
 0x35e   : > { %v2836_v24 = vpack.c.bf16 %v2791_v15, %v2790_v55  ;;  %v13867_v32 = vadd.f32 %v3070_v20, %v13702_v22 }
 0x35f   : > { %v13869_v37 = vpop.f32.mrf.mxu2 }
 0x360   : > { %16044 = vst [vmem:[#allocation9_spill] sm:$0xff] %v13867_v32  ;;  %10615 = vmatmul.msk.bf16.gmra.mxu1 %vm1581_vm3, %v2836_v24 }
 0x361   : > { %v13871_v30 = vpop.f32.mrf.mxu3  ;;  %v2693_v3 = vpop.f32.mrf.mxu0 }
 0x362   : > { %v2694_v22 = vadd.f32 %v13720_v57, %v2693_v3 }
 0x364   : > { %10280 = vmatmul.msk.bf16.gmra.mxu2 %vm1581_vm3, %v16045_v34  ;;  %10576 = vmatmul.msk.bf16.gmra.mxu0 %vm489_vm2, %v12539_v13  ;;  %v2792_v20 = vmax.f32 %v2694_v22, 0.0 }
 0x365   : > { %v3072_v15 = vpop.f32.mrf.mxu1 }
 0x366   : > { %10324 = vmatmul.msk.bf16.gmra.mxu3 %vm1581_vm3, %v16046_v35  ;;  %v13882_v28 = vadd.f32 %v3072_v15, %v13710_v45  ;;  %v12542_v45 = vld [vmem:[%s12861_s29 + $0x360] sm:$0xff] }
 0x367   : > { %v1834_v7 = vpop.f32.mrf.mxu2  ;;  %v12580_v15 = vld [vmem:[%s12861_s29 + $0x480] sm:$0xff] }
 0x368   : > { %16047 = vst [vmem:[#allocation12_spill] sm:$0xff] %v13882_v28 }
 0x369   : > { %v2143_v24 = vpop.f32.mrf.mxu3  ;;  %v2695_v23 = vpop.f32.mrf.mxu0 }
 0x36a   : > { %v13884_v55 = vadd.f32 %v2143_v24, %v1834_v7  ;;  %v2696_v34 = vadd.f32 %v13720_v57, %v2695_v23  ;;  %v16049_v24 = vld [vmem:[#allocation2_spill] sm:$0xff] }
 0x36c   : > { %v2793_v13 = vmax.f32 %v2696_v34, 0.0 }
 0x36d   : > { %v3075_v32 = vpop.f32.mrf.mxu1 }
 0x36e   : > { %v2837_v10 = vpack.c.bf16 %v2793_v13, %v2792_v20  ;;  %v13888_v35 = vadd.f32 %v3075_v32, %v13726_v12 }
 0x36f   : > { %v13890_v51 = vpop.f32.mrf.mxu2 }
 0x370   : > { %16048 = vst [vmem:[#allocation11_spill] sm:$0xff] %v13888_v35  ;;  %10616 = vmatmul.msk.bf16.gmra.mxu1 %vm1581_vm3, %v2837_v10 }
 0x371   : > { %v13892_v3 = vpop.f32.mrf.mxu3  ;;  %v2698_v7 = vpop.f32.mrf.mxu0 }
 0x372   : > { %v2699_v12 = vadd.f32 %v13720_v57, %v2698_v7 }
 0x374   : > { %10841 = vmatmul.msk.bf16.vlgmr.msra.gmra.mxu2 %vm489_vm2, %v12542_v45  ;;  %11141 = vmatmul.msk.bf16.vlgmr.msra.gmra.mxu0 %vm489_vm2, %v12580_v15  ;;  %v2794_v13 = vmax.f32 %v2699_v12, 0.0 }
 0x375   : > { %v3077_v22 = vpop.f32.mrf.mxu1  ;;  %7776 = vmatpush.bf16.msra.mxu2 %v16049_v24  ;;  %8820 = vmatpush.bf16.msra.mxu0 %v16049_v24 }
 0x376   : > { %v13903_v32 = vadd.f32 %v3077_v22, %v13734_v8  ;;  %v12543_v8 = vld [vmem:[%s12861_s29 + $0x368] sm:$0xff] }
 0x377   : > { %v1839_v10 = vpop.f32.mrf.mxu2  ;;  %v12581_v22 = vld [vmem:[%s12861_s29 + $0x488] sm:$0xff] }
 0x378   : > { %16050 = vst [vmem:[#allocation2_spill] sm:$0xff] %v13903_v32 }
 0x379   : > { %v2148_v23 = vpop.f32.mrf.mxu3  ;;  %v2700_v34 = vpop.f32.mrf.mxu0 }
 0x37a   : > { %v13905_v20 = vadd.f32 %v2148_v23, %v1839_v10  ;;  %v2701_v45 = vadd.f32 %v13720_v57, %v2700_v34 }
 0x37c   : > { %v2795_v15 = vmax.f32 %v2701_v45, 0.0 }
 0x37d   : > { %v3080_v35 = vpop.f32.mrf.mxu1 }
 0x37e   : > { %v2838_v28 = vpack.c.bf16 %v2795_v15, %v2794_v13  ;;  %v13909_v24 = vadd.f32 %v3080_v35, %v13745_v52 }
 0x37f   : > { %v13911_v56 = vpop.f32.mrf.mxu2 }
 0x380   : > { %16051 = vst [vmem:[#allocation19_spill] sm:$0xff] %v13909_v24  ;;  %10617 = vmatmul.msk.bf16.gmra.mxu1 %vm1581_vm3, %v2838_v28 }
 0x381   : > { %v13913_v7 = vpop.f32.mrf.mxu3  ;;  %v2703_v10 = vpop.f32.mrf.mxu0 }
 0x382   : > { %v2704_v23 = vadd.f32 %v13720_v57, %v2703_v10 }
 0x384   : > { %10842 = vmatmul.msk.bf16.gmra.mxu2 %vm489_vm2, %v12543_v8  ;;  %11142 = vmatmul.msk.bf16.gmra.mxu0 %vm489_vm2, %v12581_v22  ;;  %v2796_v45 = vmax.f32 %v2704_v23, 0.0 }
 0x385   : > { %v3082_v12 = vpop.f32.mrf.mxu1 }
 0x386   : > { %v13922_v52 = vadd.f32 %v3082_v12, %v13753_v61  ;;  %v12544_v61 = vld [vmem:[%s12861_s29 + $0x370] sm:$0xff] }
 0x387   : > { %v1844_v35 = vpop.f32.mrf.mxu2  ;;  %v12582_v12 = vld [vmem:[%s12861_s29 + $0x490] sm:$0xff] }
 0x388   : > { %16052 = vst [vmem:[#allocation20_spill] sm:$0xff] %v13922_v52 }
 0x389   : > { %v2153_v34 = vpop.f32.mrf.mxu3  ;;  %v2705_v28 = vpop.f32.mrf.mxu0 }
 0x38a   : > { %v13924_v13 = vadd.f32 %v2153_v34, %v1844_v35  ;;  %v2706_v15 = vadd.f32 %v13720_v57, %v2705_v28 }
 0x38c   : > { %v2797_v24 = vmax.f32 %v2706_v15, 0.0 }
 0x38d   : > { %v3085_v8 = vpop.f32.mrf.mxu1 }
 0x38e   : > { %v2839_v32 = vpack.c.bf16 %v2797_v24, %v2796_v45  ;;  %v13928_v22 = vadd.f32 %v3085_v8, %v13764_v41 }
 0x38f   : > { %v13930_v14 = vpop.f32.mrf.mxu2 }
 0x390   : > { %16053 = vst [vmem:[#allocation21_spill] sm:$0xff] %v13928_v22  ;;  %10618 = vmatmul.msk.bf16.gmra.mxu1 %vm1581_vm3, %v2839_v32 }
 0x391   : > { %v13932_v10 = vpop.f32.mrf.mxu3  ;;  %v2708_v35 = vpop.f32.mrf.mxu0 }
 0x392   : > { %v2709_v24 = vadd.f32 %v13720_v57, %v2708_v35 }
 0x394   : > { %10843 = vmatmul.msk.bf16.gmra.mxu2 %vm489_vm2, %v12544_v61  ;;  %11143 = vmatmul.msk.bf16.gmra.mxu0 %vm489_vm2, %v12582_v12  ;;  %v2798_v15 = vmax.f32 %v2709_v24, 0.0 }
 0x395   : > { %v3087_v23 = vpop.f32.mrf.mxu1 }
 0x396   : > { %v13941_v41 = vadd.f32 %v3087_v23, %v13772_v46  ;;  %v12545_v46 = vld [vmem:[%s12861_s29 + $0x378] sm:$0xff] }
 0x397   : > { %v1849_v34 = vpop.f32.mrf.mxu2  ;;  %v12583_v23 = vld [vmem:[%s12861_s29 + $0x498] sm:$0xff] }
 0x398   : > { %16054 = vst [vmem:[#allocation22_spill] sm:$0xff] %v13941_v41 }
 0x399   : > { %v2158_v28 = vpop.f32.mrf.mxu3  ;;  %v2710_v32 = vpop.f32.mrf.mxu0 }
 0x39a   : > { %v13943_v45 = vadd.f32 %v2158_v28, %v1849_v34  ;;  %v2711_v8 = vadd.f32 %v13720_v57, %v2710_v32 }
 0x39c   : > { %v2799_v22 = vmax.f32 %v2711_v8, 0.0 }
 0x39d   : > { %v3090_v61 = vpop.f32.mrf.mxu1 }
 0x39e   : > { %v2840_v52 = vpack.c.bf16 %v2799_v22, %v2798_v15  ;;  %v13947_v12 = vadd.f32 %v3090_v61, %v13783_v47 }
 0x39f   : > { %v13949_v18 = vpop.f32.mrf.mxu2 }
 0x3a0   : > { %16055 = vst [vmem:[#allocation23_spill] sm:$0xff] %v13947_v12  ;;  %10619 = vmatmul.msk.bf16.gmra.mxu1 %vm1581_vm3, %v2840_v52 }
 0x3a1   : > { %v13951_v35 = vpop.f32.mrf.mxu3  ;;  %v2713_v34 = vpop.f32.mrf.mxu0 }
 0x3a2   : > { %v2714_v22 = vadd.f32 %v13720_v57, %v2713_v34 }
 0x3a4   : > { %10844 = vmatmul.msk.bf16.gmra.mxu2 %vm489_vm2, %v12545_v46  ;;  %11144 = vmatmul.msk.bf16.gmra.mxu0 %vm489_vm2, %v12583_v23  ;;  %v2800_v8 = vmax.f32 %v2714_v22, 0.0 }
 0x3a5   : > { %v3092_v24 = vpop.f32.mrf.mxu1 }
 0x3a6   : > { %v13960_v47 = vadd.f32 %v3092_v24, %v13791_v11  ;;  %v12546_v11 = vld [vmem:[%s12861_s29 + $0x380] sm:$0xff] }
 0x3a7   : > { %v1854_v28 = vpop.f32.mrf.mxu2  ;;  %v12584_v24 = vld [vmem:[%s12861_s29 + $0x4a0] sm:$0xff] }
 0x3a8   : > { %16056 = vst [vmem:[#allocation24_spill] sm:$0xff] %v13960_v47 }
 0x3a9   : > { %v2163_v32 = vpop.f32.mrf.mxu3  ;;  %v2715_v52 = vpop.f32.mrf.mxu0 }
 0x3aa   : > { %v13962_v15 = vadd.f32 %v2163_v32, %v1854_v28  ;;  %v2716_v61 = vadd.f32 %v13720_v57, %v2715_v52 }
 0x3ac   : > { %v2801_v12 = vmax.f32 %v2716_v61, 0.0 }
 0x3ad   : > { %v3095_v46 = vpop.f32.mrf.mxu1 }
 0x3ae   : > { %v2841_v41 = vpack.c.bf16 %v2801_v12, %v2800_v8  ;;  %v13966_v23 = vadd.f32 %v3095_v46, %v13802_v43 }
 0x3af   : > { %v13968_v6 = vpop.f32.mrf.mxu2 }
 0x3b0   : > { %16057 = vst [vmem:[#allocation25_spill] sm:$0xff] %v13966_v23  ;;  %10620 = vmatmul.msk.bf16.gmra.mxu1 %vm1581_vm3, %v2841_v41 }
 0x3b1   : > { %v13970_v34 = vpop.f32.mrf.mxu3  ;;  %v2718_v28 = vpop.f32.mrf.mxu0 }
 0x3b2   : > { %v2719_v12 = vadd.f32 %v13720_v57, %v2718_v28 }
 0x3b4   : > { %10845 = vmatmul.msk.bf16.gmra.mxu2 %vm489_vm2, %v12546_v11  ;;  %11145 = vmatmul.msk.bf16.gmra.mxu0 %vm489_vm2, %v12584_v24  ;;  %v2802_v61 = vmax.f32 %v2719_v12, 0.0  ;;  %v2131_v12 = vadd.f32 %v13829_v21, %v13827_v63 }
 0x3b5   : > { %v3097_v22 = vpop.f32.mrf.mxu1 }
 0x3b6   : > { %v13979_v43 = vadd.f32 %v3097_v22, %v13810_v33  ;;  %v12547_v33 = vld [vmem:[%s12861_s29 + $0x388] sm:$0xff] }
 0x3b7   : > { %v1859_v32 = vpop.f32.mrf.mxu2  ;;  %v12585_v22 = vld [vmem:[%s12861_s29 + $0x4a8] sm:$0xff] }
 0x3b8   : > { %16058 = vst [vmem:[#allocation26_spill] sm:$0xff] %v13979_v43 }
 0x3b9   : > { %v2168_v52 = vpop.f32.mrf.mxu3  ;;  %v2720_v41 = vpop.f32.mrf.mxu0 }
 0x3ba   : > { %v13981_v8 = vadd.f32 %v2168_v52, %v1859_v32  ;;  %v2721_v46 = vadd.f32 %v13720_v57, %v2720_v41 }
 0x3bc   : > { %v2803_v23 = vmax.f32 %v2721_v46, 0.0 }
 0x3bd   : > { %v3100_v11 = vpop.f32.mrf.mxu1 }
 0x3be   : > { %v2842_v47 = vpack.c.bf16 %v2803_v23, %v2802_v61  ;;  %v13985_v24 = vadd.f32 %v3100_v11, %v13821_v9 }
 0x3bf   : > { %v13987_v49 = vpop.f32.mrf.mxu2 }
 0x3c0   : > { %16059 = vst [vmem:[#allocation27_spill] sm:$0xff] %v13985_v24  ;;  %10621 = vmatmul.msk.bf16.gmra.mxu1 %vm1581_vm3, %v2842_v47 }
 0x3c1   : > { %v13989_v28 = vpop.f32.mrf.mxu3  ;;  %v2723_v32 = vpop.f32.mrf.mxu0 }
 0x3c2   : > { %v2724_v9 = vadd.f32 %v13720_v57, %v2723_v32 }
 0x3c4   : > { %10846 = vmatmul.msk.bf16.gmra.mxu2 %vm489_vm2, %v12547_v33  ;;  %11146 = vmatmul.msk.bf16.gmra.mxu0 %vm489_vm2, %v12585_v22  ;;  %v2804_v11 = vmax.f32 %v2724_v9, 0.0  ;;  %v2136_v9 = vadd.f32 %v13850_v36, %v13848_v5 }
 0x3c5   : > { %v3102_v23 = vpop.f32.mrf.mxu1 }
 0x3c6   : > { %v13999_v52 = vadd.f32 %v3102_v23, %v2131_v12  ;;  %v12548_v12 = vld [vmem:[%s12861_s29 + $0x390] sm:$0xff] }
 0x3c7   : > { %v1864_v41 = vpop.f32.mrf.mxu2  ;;  %v12586_v23 = vld [vmem:[%s12861_s29 + $0x4b0] sm:$0xff] }
 0x3c8   : > { %16060 = vst [vmem:[#allocation28_spill] sm:$0xff] %v13999_v52 }
 0x3c9   : > { %v2173_v61 = vpop.f32.mrf.mxu3  ;;  %v2725_v46 = vpop.f32.mrf.mxu0 }
 0x3ca   : > { %v14001_v47 = vadd.f32 %v2173_v61, %v1864_v41  ;;  %v2726_v24 = vadd.f32 %v13720_v57, %v2725_v46 }
 0x3cc   : > { %v2805_v63 = vmax.f32 %v2726_v24, 0.0 }
 0x3cd   : > { %v3105_v21 = vpop.f32.mrf.mxu1 }
 0x3ce   : > { %v2843_v33 = vpack.c.bf16 %v2805_v63, %v2804_v11  ;;  %v14005_v22 = vadd.f32 %v3105_v21, %v13842_v2 }
 0x3cf   : > { %v14007_v43 = vpop.f32.mrf.mxu2 }
 0x3d0   : > { %16061 = vst [vmem:[#allocation29_spill] sm:$0xff] %v14005_v22  ;;  %10622 = vmatmul.msk.bf16.gmra.mxu1 %vm1581_vm3, %v2843_v33 }
 0x3d1   : > { %v14009_v32 = vpop.f32.mrf.mxu3  ;;  %v2728_v41 = vpop.f32.mrf.mxu0 }
 0x3d2   : > { %v2729_v2 = vadd.f32 %v13720_v57, %v2728_v41 }
 0x3d4   : > { %10847 = vmatmul.msk.bf16.gmra.mxu2 %vm489_vm2, %v12548_v12  ;;  %11147 = vmatmul.msk.bf16.gmra.mxu0 %vm489_vm2, %v12586_v23  ;;  %v2806_v33 = vmax.f32 %v2729_v2, 0.0  ;;  %v2141_v2 = vadd.f32 %v13871_v30, %v13869_v37 }
 0x3d5   : > { %v3107_v24 = vpop.f32.mrf.mxu1 }
 0x3d6   : > { %v14019_v61 = vadd.f32 %v3107_v24, %v2136_v9  ;;  %v12549_v9 = vld [vmem:[%s12861_s29 + $0x398] sm:$0xff] }
 0x3d7   : > { %v1869_v46 = vpop.f32.mrf.mxu2  ;;  %v12587_v24 = vld [vmem:[%s12861_s29 + $0x4b8] sm:$0xff] }
 0x3d9   : > { %v2178_v11 = vpop.f32.mrf.mxu3  ;;  %v2730_v21 = vpop.f32.mrf.mxu0 }
 0x3da   : > { %v14021_v63 = vadd.f32 %v2178_v11, %v1869_v46  ;;  %v2731_v22 = vadd.f32 %v13720_v57, %v2730_v21  ;;  %v12655_v21 = vld [vmem:[%s16007_s3 + $0x58] sm:$0xff] }
 0x3db   : > { %6109 = vmatpush.bf16.msrb.mxu3 %v12655_v21  ;;  %v12550_v21 = vld [vmem:[%s12861_s29 + $0x3a0] sm:$0xff] }
 0x3dc   : > { %v2807_v5 = vmax.f32 %v2731_v22, 0.0 }
 0x3dd   : > { %v3110_v36 = vpop.f32.mrf.mxu1 }
 0x3de   : > { %v2844_v12 = vpack.c.bf16 %v2807_v5, %v2806_v33  ;;  %v14025_v23 = vadd.f32 %v3110_v36, %v13863_v0 }
 0x3df   : > { %v14027_v52 = vpop.f32.mrf.mxu2 }
 0x3e0   : > { %16062 = vst [vmem:[#allocation30_spill] sm:$0xff] %v14025_v23  ;;  %10623 = vmatmul.msk.bf16.gmra.mxu1 %vm1581_vm3, %v2844_v12 }
 0x3e1   : > { %v14029_v41 = vpop.f32.mrf.mxu3  ;;  %v2733_v46 = vpop.f32.mrf.mxu0 }
 0x3e2   : > { %v2734_v0 = vadd.f32 %v13720_v57, %v2733_v46 }
 0x3e4   : > { %10848 = vmatmul.msk.bf16.gmra.mxu2 %vm489_vm2, %v12549_v9  ;;  %11148 = vmatmul.msk.bf16.gmra.mxu0 %vm489_vm2, %v12587_v24  ;;  %v2808_v30 = vmax.f32 %v2734_v0, 0.0  ;;  %v2146_v0 = vadd.f32 %v13892_v3, %v13890_v51 }
 0x3e5   : > { %v3112_v22 = vpop.f32.mrf.mxu1 }
 0x3e6   : > { %v14039_v11 = vadd.f32 %v3112_v22, %v2141_v2  ;;  %v12693_v22 = vld [vmem:[%s16007_s3 + $0x68] sm:$0xff] }
 0x3e7   : > { %v1874_v33 = vpop.f32.mrf.mxu2  ;;  %7153 = vmatpush.bf16.msrb.mxu1 %v12693_v22 }
 0x3e8   : > { %16063 = vst [vmem:[#allocation31_spill] sm:$0xff] %v14039_v11 }
 0x3e9   : > { %v2183_v5 = vpop.f32.mrf.mxu3  ;;  %v2735_v37 = vpop.f32.mrf.mxu0 }
 0x3ea   : > { %v14044_v36 = vadd.f32 %v2183_v5, %v1874_v33  ;;  %v2736_v12 = vadd.f32 %v13720_v57, %v2735_v37  ;;  %v12588_v33 = vld [vmem:[%s12861_s29 + $0x4c0] sm:$0xff] }
 0x3ec   : > { %v2809_v9 = vmax.f32 %v2736_v12, 0.0 }
 0x3ed   : > { %v3115_v24 = vpop.f32.mrf.mxu1 }
 0x3ee   : > { %v2845_v46 = vpack.c.bf16 %v2809_v9, %v2808_v30  ;;  %v14048_v2 = vadd.f32 %v3115_v24, %v13884_v55 }
 0x3ef   : > { %v14053_v11 = vpop.f32.mrf.mxu2 }
 0x3f0   : > { %16064 = vst [vmem:[#allocation32_spill] sm:$0xff] %v14048_v2  ;;  %10624 = vmatmul.msk.bf16.gmra.mxu1 %vm1581_vm3, %v2845_v46 }
 0x3f1   : > { %v4646_v5 = vpop.f32.mrf.mxu0 }
 0x3f2   : > { %v4647_v37 = vadd.f32 %v13720_v57, %v4646_v5  ;;  %v12551_v5 = vld [vmem:[%s12861_s29 + $0x3a8] sm:$0xff] }
 0x3f4   : > { %10849 = vmatmul.msk.bf16.gmra.mxu2 %vm489_vm2, %v12550_v21  ;;  %11149 = vmatmul.msk.bf16.gmra.mxu0 %vm489_vm2, %v12588_v33  ;;  %v4826_v24 = vmax.f32 %v4647_v37, 0.0 }
 0x3f5   : > { %v3117_v55 = vpop.f32.mrf.mxu1 }
 0x3f6   : > { %v14063_v30 = vadd.f32 %v3117_v55, %v2146_v0  ;;  %v12589_v0 = vld [vmem:[%s12861_s29 + $0x4c8] sm:$0xff] }
 0x3f7   : > { %v3602_v12 = vpop.f32.mrf.mxu2 }
 0x3f8   : > { %16065 = vst [vmem:[#allocation33_spill] sm:$0xff] %v14063_v30  ;;  %v3603_v51 = vadd.f32 %v13720_v57, %v3602_v12 }
 0x3f9   : > { %v4648_v9 = vpop.f32.mrf.mxu0 }
 0x3fa   : > { %v4649_v46 = vadd.f32 %v13720_v57, %v4648_v9  ;;  %v3782_v30 = vmax.f32 %v3603_v51, 0.0  ;;  %v2151_v9 = vadd.f32 %v13913_v7, %v13911_v56 }
 0x3fc   : > { %v4827_v22 = vmax.f32 %v4649_v46, 0.0 }
 0x3fd   : > { %v3120_v2 = vpop.f32.mrf.mxu1 }
 0x3fe   : > { %v4898_v3 = vpack.c.bf16 %v4827_v22, %v4826_v24  ;;  %v14068_v21 = vadd.f32 %v3120_v2, %v13905_v20 }
 0x3ff   : > { %v3604_v33 = vpop.f32.mrf.mxu2 }
 0x400   : > { %v3605_v23 = vadd.f32 %v13720_v57, %v3604_v33  ;;  %11189 = vmatmul.msk.bf16.vlgmr.msra.gmra.mxu1 %vm1581_vm3, %v4898_v3 }
 0x401   : > { %v4651_v55 = vpop.f32.mrf.mxu0 }
 0x402   : > { %v3783_v37 = vmax.f32 %v3605_v23, 0.0  ;;  %v4652_v2 = vadd.f32 %v13720_v57, %v4651_v55  ;;  %v12552_v55 = vld [vmem:[%s12861_s29 + $0x3b0] sm:$0xff] }
 0x404   : > { %v3854_v46 = vpack.c.bf16 %v3783_v37, %v3782_v30  ;;  %10850 = vmatmul.msk.bf16.gmra.mxu2 %vm489_vm2, %v12551_v5  ;;  %11150 = vmatmul.msk.bf16.gmra.mxu0 %vm489_vm2, %v12589_v0  ;;  %v4828_v23 = vmax.f32 %v4652_v2, 0.0  ;;  %v12590_v37 = vld [vmem:[%s12861_s29 + $0x4d0] sm:$0xff]  ;;  %v2156_v2 = vadd.f32 %v13932_v10, %v13930_v14 }
 0x405   : > { %v3122_v20 = vpop.f32.mrf.mxu1 }
 0x406   : > { %v14079_v12 = vadd.f32 %v3122_v20, %v2151_v9  ;;  %10889 = vmatmul.msk.bf16.vlgmr.msra.gmra.mxu3 %vm1581_vm3, %v3854_v46 }
 0x407   : > { %v3607_v24 = vpop.f32.mrf.mxu2 }
 0x408   : > { %v3608_v30 = vadd.f32 %v13720_v57, %v3607_v24 }
 0x409   : > { %v4653_v22 = vpop.f32.mrf.mxu0 }
 0x40a   : > { %v4654_v51 = vadd.f32 %v13720_v57, %v4653_v22  ;;  %v3784_v46 = vmax.f32 %v3608_v30, 0.0 }
 0x40c   : > { %v4829_v56 = vmax.f32 %v4654_v51, 0.0 }
 0x40d   : > { %v3125_v7 = vpop.f32.mrf.mxu1 }
 0x40e   : > { %v4899_v3 = vpack.c.bf16 %v4829_v56, %v4828_v23  ;;  %v14085_v33 = vadd.f32 %v3125_v7, %v13924_v13 }
 0x40f   : > { %v3609_v5 = vpop.f32.mrf.mxu2 }
 0x410   : > { %v3610_v0 = vadd.f32 %v13720_v57, %v3609_v5  ;;  %11190 = vmatmul.msk.bf16.gmra.mxu1 %vm1581_vm3, %v4899_v3 }
 0x411   : > { %v4656_v9 = vpop.f32.mrf.mxu0 }
 0x412   : > { %v3785_v20 = vmax.f32 %v3610_v0, 0.0  ;;  %v4657_v24 = vadd.f32 %v13720_v57, %v4656_v9  ;;  %v12553_v9 = vld [vmem:[%s12861_s29 + $0x3b8] sm:$0xff] }
 0x414   : > { %v3855_v22 = vpack.c.bf16 %v3785_v20, %v3784_v46  ;;  %10851 = vmatmul.msk.bf16.gmra.mxu2 %vm489_vm2, %v12552_v55  ;;  %11151 = vmatmul.msk.bf16.gmra.mxu0 %vm489_vm2, %v12590_v37  ;;  %v4830_v7 = vmax.f32 %v4657_v24, 0.0  ;;  %v12591_v46 = vld [vmem:[%s12861_s29 + $0x4d8] sm:$0xff] }
 0x415   : > { %v3127_v13 = vpop.f32.mrf.mxu1 }
 0x416   : > { %v14096_v23 = vadd.f32 %v3127_v13, %v2156_v2  ;;  %10890 = vmatmul.msk.bf16.gmra.mxu3 %vm1581_vm3, %v3855_v22  ;;  %v2161_v13 = vadd.f32 %v13951_v35, %v13949_v18 }
 0x417   : > { %v3612_v51 = vpop.f32.mrf.mxu2 }
 0x418   : > { %v3613_v3 = vadd.f32 %v13720_v57, %v3612_v51 }
 0x419   : > { %v4658_v56 = vpop.f32.mrf.mxu0 }
 0x41a   : > { %v4659_v30 = vadd.f32 %v13720_v57, %v4658_v56  ;;  %v3786_v2 = vmax.f32 %v3613_v3, 0.0 }
 0x41c   : > { %v4831_v14 = vmax.f32 %v4659_v30, 0.0 }
 0x41d   : > { %v3130_v10 = vpop.f32.mrf.mxu1 }
 0x41e   : > { %v4900_v5 = vpack.c.bf16 %v4831_v14, %v4830_v7  ;;  %v14102_v0 = vadd.f32 %v3130_v10, %v13943_v45 }
 0x41f   : > { %v3614_v55 = vpop.f32.mrf.mxu2 }
 0x420   : > { %v3615_v37 = vadd.f32 %v13720_v57, %v3614_v55  ;;  %11191 = vmatmul.msk.bf16.gmra.mxu1 %vm1581_vm3, %v4900_v5 }
 0x421   : > { %v4661_v20 = vpop.f32.mrf.mxu0 }
 0x422   : > { %v3787_v22 = vmax.f32 %v3615_v37, 0.0  ;;  %v4662_v51 = vadd.f32 %v13720_v57, %v4661_v20  ;;  %v12592_v20 = vld [vmem:[%s12861_s29 + $0x4e0] sm:$0xff] }
 0x424   : > { %v3856_v24 = vpack.c.bf16 %v3787_v22, %v3786_v2  ;;  %10852 = vmatmul.msk.bf16.gmra.mxu2 %vm489_vm2, %v12553_v9  ;;  %11152 = vmatmul.msk.bf16.gmra.mxu0 %vm489_vm2, %v12591_v46  ;;  %v4832_v14 = vmax.f32 %v4662_v51, 0.0  ;;  %v12554_v46 = vld [vmem:[%s12861_s29 + $0x3c0] sm:$0xff] }
 0x425   : > { %v3132_v45 = vpop.f32.mrf.mxu1 }
 0x426   : > { %v14113_v56 = vadd.f32 %v3132_v45, %v2161_v13  ;;  %10891 = vmatmul.msk.bf16.gmra.mxu3 %vm1581_vm3, %v3856_v24  ;;  %v2166_v24 = vadd.f32 %v13970_v34, %v13968_v6 }
 0x427   : > { %v3617_v7 = vpop.f32.mrf.mxu2 }
 0x428   : > { %v3618_v3 = vadd.f32 %v13720_v57, %v3617_v7 }
 0x429   : > { %v4663_v30 = vpop.f32.mrf.mxu0 }
 0x42a   : > { %v4664_v10 = vadd.f32 %v13720_v57, %v4663_v30  ;;  %v3788_v22 = vmax.f32 %v3618_v3, 0.0 }
 0x42c   : > { %v4833_v18 = vmax.f32 %v4664_v10, 0.0 }
 0x42d   : > { %v3135_v35 = vpop.f32.mrf.mxu1 }
 0x42e   : > { %v4901_v5 = vpack.c.bf16 %v4833_v18, %v4832_v14  ;;  %v14119_v55 = vadd.f32 %v3135_v35, %v13962_v15 }
 0x42f   : > { %v3619_v37 = vpop.f32.mrf.mxu2 }
 0x430   : > { %v3620_v9 = vadd.f32 %v13720_v57, %v3619_v37  ;;  %11192 = vmatmul.msk.bf16.gmra.mxu1 %vm1581_vm3, %v4901_v5 }
 0x431   : > { %v4666_v2 = vpop.f32.mrf.mxu0 }
 0x432   : > { %v3789_v13 = vmax.f32 %v3620_v9, 0.0  ;;  %v4667_v51 = vadd.f32 %v13720_v57, %v4666_v2 }
 0x434   : > { %v3857_v45 = vpack.c.bf16 %v3789_v13, %v3788_v22  ;;  %10853 = vmatmul.msk.bf16.gmra.mxu2 %vm489_vm2, %v12554_v46  ;;  %11153 = vmatmul.msk.bf16.gmra.mxu0 %vm489_vm2, %v12592_v20  ;;  %v4834_v10 = vmax.f32 %v4667_v51, 0.0  ;;  %v12555_v46 = vld [vmem:[%s12861_s29 + $0x3c8] sm:$0xff] }
 0x435   : > { %v3137_v15 = vpop.f32.mrf.mxu1  ;;  %v12593_v20 = vld [vmem:[%s12861_s29 + $0x4e8] sm:$0xff] }
 0x436   : > { %v14130_v7 = vadd.f32 %v3137_v15, %v2166_v24  ;;  %10892 = vmatmul.msk.bf16.gmra.mxu3 %vm1581_vm3, %v3857_v45  ;;  %v2171_v24 = vadd.f32 %v13989_v28, %v13987_v49 }
 0x437   : > { %v3622_v30 = vpop.f32.mrf.mxu2 }
 0x438   : > { %v3623_v35 = vadd.f32 %v13720_v57, %v3622_v30 }
 0x439   : > { %v4668_v14 = vpop.f32.mrf.mxu0 }
 0x43a   : > { %v4669_v18 = vadd.f32 %v13720_v57, %v4668_v14  ;;  %v3790_v22 = vmax.f32 %v3623_v35, 0.0 }
 0x43c   : > { %v4835_v6 = vmax.f32 %v4669_v18, 0.0 }
 0x43d   : > { %v3140_v34 = vpop.f32.mrf.mxu1 }
 0x43e   : > { %v4902_v3 = vpack.c.bf16 %v4835_v6, %v4834_v10  ;;  %v14136_v5 = vadd.f32 %v3140_v34, %v13981_v8 }
 0x43f   : > { %v3624_v37 = vpop.f32.mrf.mxu2 }
 0x440   : > { %v3625_v9 = vadd.f32 %v13720_v57, %v3624_v37  ;;  %11193 = vmatmul.msk.bf16.gmra.mxu1 %vm1581_vm3, %v4902_v3 }
 0x441   : > { %v4671_v2 = vpop.f32.mrf.mxu0 }
 0x442   : > { %v3791_v13 = vmax.f32 %v3625_v9, 0.0  ;;  %v4672_v15 = vadd.f32 %v13720_v57, %v4671_v2  ;;  %v12556_v9 = vld [vmem:[%s12861_s29 + $0x3d0] sm:$0xff] }
 0x444   : > { %v3858_v45 = vpack.c.bf16 %v3791_v13, %v3790_v22  ;;  %10854 = vmatmul.msk.bf16.gmra.mxu2 %vm489_vm2, %v12555_v46  ;;  %11154 = vmatmul.msk.bf16.gmra.mxu0 %vm489_vm2, %v12593_v20  ;;  %v4836_v10 = vmax.f32 %v4672_v15, 0.0  ;;  %v12594_v46 = vld [vmem:[%s12861_s29 + $0x4f0] sm:$0xff]  ;;  %v2176_v13 = vadd.f32 %v14009_v32, %v14007_v43 }
 0x445   : > { %v3142_v8 = vpop.f32.mrf.mxu1 }
 0x446   : > { %v14147_v51 = vadd.f32 %v3142_v8, %v2171_v24  ;;  %10893 = vmatmul.msk.bf16.gmra.mxu3 %vm1581_vm3, %v3858_v45 }
 0x447   : > { %v3627_v30 = vpop.f32.mrf.mxu2 }
 0x448   : > { %v3628_v6 = vadd.f32 %v13720_v57, %v3627_v30 }
 0x449   : > { %v4673_v14 = vpop.f32.mrf.mxu0 }
 0x44a   : > { %v4674_v18 = vadd.f32 %v13720_v57, %v4673_v14  ;;  %v3792_v2 = vmax.f32 %v3628_v6, 0.0 }
 0x44c   : > { %v4837_v49 = vmax.f32 %v4674_v18, 0.0 }
 0x44d   : > { %v3145_v28 = vpop.f32.mrf.mxu1 }
 0x44e   : > { %v4903_v34 = vpack.c.bf16 %v4837_v49, %v4836_v10  ;;  %v14153_v35 = vadd.f32 %v3145_v28, %v14001_v47 }
 0x44f   : > { %v3629_v3 = vpop.f32.mrf.mxu2 }
 0x450   : > { %v3630_v37 = vadd.f32 %v13720_v57, %v3629_v3  ;;  %11194 = vmatmul.msk.bf16.gmra.mxu1 %vm1581_vm3, %v4903_v34  ;;  %v14166_v57 = vld [vmem:[%s16006_s2] ss:$0 sm:$0xff]  ;;  %v12557_v3 = vld [vmem:[%s12861_s29 + $0x3d8] sm:$0xff] }
 0x451   : > { %v4676_v20 = vpop.f32.mrf.mxu0 }
 0x452   : > { %v3793_v22 = vmax.f32 %v3630_v37, 0.0  ;;  %v4677_v45 = vadd.f32 %v14166_v57, %v4676_v20  ;;  %v12595_v37 = vld [vmem:[%s12861_s29 + $0x4f8] sm:$0xff] }
 0x454   : > { %v3859_v24 = vpack.c.bf16 %v3793_v22, %v3792_v2  ;;  %10855 = vmatmul.msk.bf16.gmra.mxu2 %vm489_vm2, %v12556_v9  ;;  %11155 = vmatmul.msk.bf16.gmra.mxu0 %vm489_vm2, %v12594_v46  ;;  %v4838_v15 = vmax.f32 %v4677_v45, 0.0  ;;  %v2181_v2 = vadd.f32 %v14029_v41, %v14027_v52 }
 0x455   : > { %v3147_v47 = vpop.f32.mrf.mxu1 }
 0x456   : > { %v14169_v8 = vadd.f32 %v3147_v47, %v2176_v13  ;;  %10894 = vmatmul.msk.bf16.gmra.mxu3 %vm1581_vm3, %v3859_v24 }
 0x457   : > { %v3632_v43 = vpop.f32.mrf.mxu2 }
 0x458   : > { %v3633_v18 = vadd.f32 %v14166_v57, %v3632_v43 }
 0x459   : > { %v4678_v32 = vpop.f32.mrf.mxu0 }
 0x45a   : > { %v4679_v30 = vadd.f32 %v14166_v57, %v4678_v32  ;;  %v3794_v46 = vmax.f32 %v3633_v18, 0.0 }
 0x45c   : > { %v4839_v14 = vmax.f32 %v4679_v30, 0.0 }
 0x45d   : > { %v3150_v10 = vpop.f32.mrf.mxu1 }
 0x45e   : > { %v4904_v49 = vpack.c.bf16 %v4839_v14, %v4838_v15  ;;  %v14175_v28 = vadd.f32 %v3150_v10, %v14021_v63 }
 0x45f   : > { %v3634_v6 = vpop.f32.mrf.mxu2 }
 0x460   : > { %v3635_v34 = vadd.f32 %v14166_v57, %v3634_v6  ;;  %11195 = vmatmul.msk.bf16.gmra.mxu1 %vm1581_vm3, %v4904_v49  ;;  %v12558_v49 = vld [vmem:[%s12861_s29 + $0x3e0] sm:$0xff] }
 0x461   : > { %v4681_v9 = vpop.f32.mrf.mxu0  ;;  %v12596_v6 = vld [vmem:[%s12861_s29 + $0x500] sm:$0xff] }
 0x462   : > { %v3795_v20 = vmax.f32 %v3635_v34, 0.0  ;;  %v4682_v13 = vadd.f32 %v14166_v57, %v4681_v9  ;;  %v2185_v34 = vpop.f32.mrf.mxu3 }
 0x464   : > { %v3860_v22 = vpack.c.bf16 %v3795_v20, %v3794_v46  ;;  %10856 = vmatmul.msk.bf16.gmra.mxu2 %vm489_vm2, %v12557_v3  ;;  %11156 = vmatmul.msk.bf16.gmra.mxu0 %vm489_vm2, %v12595_v37  ;;  %v4840_v43 = vmax.f32 %v4682_v13, 0.0  ;;  %v2186_v46 = vadd.f32 %v2185_v34, %v14053_v11 }
 0x465   : > { %v3152_v63 = vpop.f32.mrf.mxu1 }
 0x466   : > { %v14186_v24 = vadd.f32 %v3152_v63, %v2181_v2  ;;  %10895 = vmatmul.msk.bf16.gmra.mxu3 %vm1581_vm3, %v3860_v22 }
 0x467   : > { %v3637_v47 = vpop.f32.mrf.mxu2 }
 0x468   : > { %v3638_v15 = vadd.f32 %v14166_v57, %v3637_v47 }
 0x469   : > { %v4683_v45 = vpop.f32.mrf.mxu0 }
 0x46a   : > { %v4684_v32 = vadd.f32 %v14166_v57, %v4683_v45  ;;  %v3796_v37 = vmax.f32 %v3638_v15, 0.0 }
 0x46c   : > { %v4841_v52 = vmax.f32 %v4684_v32, 0.0 }
 0x46d   : > { %v3155_v41 = vpop.f32.mrf.mxu1 }
 0x46e   : > { %v4905_v30 = vpack.c.bf16 %v4841_v52, %v4840_v43  ;;  %v14192_v14 = vadd.f32 %v3155_v41, %v14044_v36 }
 0x46f   : > { %v3639_v10 = vpop.f32.mrf.mxu2 }
 0x470   : > { %v3640_v18 = vadd.f32 %v14166_v57, %v3639_v10  ;;  %11196 = vmatmul.msk.bf16.gmra.mxu1 %vm1581_vm3, %v4905_v30  ;;  %v12559_v30 = vld [vmem:[%s12861_s29 + $0x3e8] sm:$0xff] }
 0x471   : > { %v4686_v3 = vpop.f32.mrf.mxu0  ;;  %v12597_v10 = vld [vmem:[%s12861_s29 + $0x508] sm:$0xff] }
 0x472   : > { %v3797_v9 = vmax.f32 %v3640_v18, 0.0  ;;  %v4687_v2 = vadd.f32 %v14166_v57, %v4686_v3 }
 0x474   : > { %v3861_v20 = vpack.c.bf16 %v3797_v9, %v3796_v37  ;;  %10857 = vmatmul.msk.bf16.gmra.mxu2 %vm489_vm2, %v12558_v49  ;;  %11157 = vmatmul.msk.bf16.gmra.mxu0 %vm489_vm2, %v12596_v6  ;;  %v4842_v47 = vmax.f32 %v4687_v2, 0.0 }
 0x475   : > { %v3157_v36 = vpop.f32.mrf.mxu1 }
 0x476   : > { %v14202_v22 = vadd.f32 %v3157_v36, %v2186_v46  ;;  %10896 = vmatmul.msk.bf16.gmra.mxu3 %vm1581_vm3, %v3861_v20 }
 0x477   : > { %v3642_v63 = vpop.f32.mrf.mxu2 }
 0x478   : > { %v3643_v32 = vadd.f32 %v14166_v57, %v3642_v63 }
 0x479   : > { %v4688_v13 = vpop.f32.mrf.mxu0 }
 0x47a   : > { %v4689_v45 = vadd.f32 %v14166_v57, %v4688_v13  ;;  %v3798_v49 = vmax.f32 %v3643_v32, 0.0 }
 0x47c   : > { %v4843_v11 = vmax.f32 %v4689_v45, 0.0 }
 0x47d   : > { %v5068_v43 = vpop.f32.mrf.mxu1 }
 0x47e   : > { %v4906_v52 = vpack.c.bf16 %v4843_v11, %v4842_v47 }
 0x47f   : > { %v3644_v41 = vpop.f32.mrf.mxu2 }
 0x480   : > { %v3645_v15 = vadd.f32 %v14166_v57, %v3644_v41  ;;  %11197 = vmatmul.msk.bf16.gmra.mxu1 %vm1581_vm3, %v4906_v52 }
 0x481   : > { %v4691_v18 = vpop.f32.mrf.mxu0 }
 0x482   : > { %v3799_v6 = vmax.f32 %v3645_v15, 0.0  ;;  %v4692_v37 = vadd.f32 %v14166_v57, %v4691_v18  ;;  %v12560_v15 = vld [vmem:[%s12861_s29 + $0x3f0] sm:$0xff] }
 0x484   : > { %v3862_v34 = vpack.c.bf16 %v3799_v6, %v3798_v49  ;;  %10858 = vmatmul.msk.bf16.gmra.mxu2 %vm489_vm2, %v12559_v30  ;;  %11158 = vmatmul.msk.bf16.gmra.mxu0 %vm489_vm2, %v12597_v10  ;;  %v4844_v36 = vmax.f32 %v4692_v37, 0.0  ;;  %v12598_v30 = vld [vmem:[%s12861_s29 + $0x510] sm:$0xff] }
 0x485   : > { %v5070_v3 = vpop.f32.mrf.mxu1 }
 0x486   : > { %10897 = vmatmul.msk.bf16.gmra.mxu3 %vm1581_vm3, %v3862_v34 }
 0x487   : > { %v3647_v9 = vpop.f32.mrf.mxu2 }
 0x488   : > { %v3648_v11 = vadd.f32 %v14166_v57, %v3647_v9 }
 0x489   : > { %v4024_v46 = vpop.f32.mrf.mxu3  ;;  %v4693_v20 = vpop.f32.mrf.mxu0 }
 0x48a   : > { %v4204_v2 = vadd.f32 %v4024_v46, %v13511_v50  ;;  %v4694_v63 = vadd.f32 %v14166_v57, %v4693_v20  ;;  %v3800_v49 = vmax.f32 %v3648_v11, 0.0 }
 0x48c   : > { %v4845_v13 = vmax.f32 %v4694_v63, 0.0  ;;  %v14217_v47 = vadd.f32 %v5068_v43, %v4204_v2 }
 0x48d   : > { %v5073_v45 = vpop.f32.mrf.mxu1 }
 0x48e   : > { %v4907_v32 = vpack.c.bf16 %v4845_v13, %v4844_v36 }
 0x48f   : > { %v3649_v52 = vpop.f32.mrf.mxu2 }
 0x490   : > { %v3650_v41 = vadd.f32 %v14166_v57, %v3649_v52  ;;  %11198 = vmatmul.msk.bf16.gmra.mxu1 %vm1581_vm3, %v4907_v32 }
 0x491   : > { %v4026_v10 = vpop.f32.mrf.mxu3  ;;  %v4696_v18 = vpop.f32.mrf.mxu0 }
 0x492   : > { %v3801_v50 = vmax.f32 %v3650_v41, 0.0  ;;  %v4205_v6 = vadd.f32 %v4026_v10, %v13523_v39  ;;  %v4697_v9 = vadd.f32 %v14166_v57, %v4696_v18  ;;  %v12599_v10 = vld [vmem:[%s12861_s29 + $0x518] sm:$0xff] }
 0x494   : > { %v3863_v34 = vpack.c.bf16 %v3801_v50, %v3800_v49  ;;  %10859 = vmatmul.msk.bf16.gmra.mxu2 %vm489_vm2, %v12560_v15  ;;  %11159 = vmatmul.msk.bf16.gmra.mxu0 %vm489_vm2, %v12598_v30  ;;  %v14227_v43 = vadd.f32 %v5070_v3, %v4205_v6  ;;  %v4846_v2 = vmax.f32 %v4697_v9, 0.0  ;;  %v12561_v30 = vld [vmem:[%s12861_s29 + $0x3f8] sm:$0xff] }
 0x495   : > { %v5075_v37 = vpop.f32.mrf.mxu1 }
 0x496   : > { %10898 = vmatmul.msk.bf16.gmra.mxu3 %vm1581_vm3, %v3863_v34 }
 0x497   : > { %v3652_v46 = vpop.f32.mrf.mxu2 }
 0x498   : > { %v3653_v32 = vadd.f32 %v14166_v57, %v3652_v46 }
 0x499   : > { %v4029_v20 = vpop.f32.mrf.mxu3  ;;  %v4698_v36 = vpop.f32.mrf.mxu0 }
 0x49a   : > { %v4206_v39 = vadd.f32 %v4029_v20, %v13529_v60  ;;  %v4699_v63 = vadd.f32 %v14166_v57, %v4698_v36  ;;  %v3802_v50 = vmax.f32 %v3653_v32, 0.0 }
 0x49c   : > { %v4847_v13 = vmax.f32 %v4699_v63, 0.0  ;;  %v14233_v11 = vadd.f32 %v5073_v45, %v4206_v39 }
 0x49d   : > { %v5078_v3 = vpop.f32.mrf.mxu1 }
 0x49e   : > { %v4908_v52 = vpack.c.bf16 %v4847_v13, %v4846_v2 }
 0x49f   : > { %v3654_v41 = vpop.f32.mrf.mxu2 }
 0x4a0   : > { %v3655_v15 = vadd.f32 %v14166_v57, %v3654_v41  ;;  %11199 = vmatmul.msk.bf16.gmra.mxu1 %vm1581_vm3, %v4908_v52 }
 0x4a1   : > { %v4031_v18 = vpop.f32.mrf.mxu3  ;;  %v4701_v49 = vpop.f32.mrf.mxu0 }
 0x4a2   : > { %v3803_v60 = vmax.f32 %v3655_v15, 0.0  ;;  %v4207_v6 = vadd.f32 %v4031_v18, %v13542_v4  ;;  %v4702_v46 = vadd.f32 %v14166_v57, %v4701_v49  ;;  %v12600_v18 = vld [vmem:[%s12861_s29 + $0x520] sm:$0xff] }
 0x4a4   : > { %v3864_v34 = vpack.c.bf16 %v3803_v60, %v3802_v50  ;;  %10860 = vmatmul.msk.bf16.gmra.mxu2 %vm489_vm2, %v12561_v30  ;;  %11160 = vmatmul.msk.bf16.gmra.mxu0 %vm489_vm2, %v12599_v10  ;;  %v14243_v45 = vadd.f32 %v5075_v37, %v4207_v6  ;;  %v4848_v39 = vmax.f32 %v4702_v46, 0.0  ;;  %v12562_v10 = vld [vmem:[%s12861_s29 + $0x400] sm:$0xff] }
 0x4a5   : > { %v5080_v9 = vpop.f32.mrf.mxu1 }
 0x4a6   : > { %10899 = vmatmul.msk.bf16.gmra.mxu3 %vm1581_vm3, %v3864_v34 }
 0x4a7   : > { %v3657_v20 = vpop.f32.mrf.mxu2 }
 0x4a8   : > { %v3658_v52 = vadd.f32 %v14166_v57, %v3657_v20 }
 0x4a9   : > { %v4034_v36 = vpop.f32.mrf.mxu3  ;;  %v4703_v2 = vpop.f32.mrf.mxu0 }
 0x4aa   : > { %v4208_v4 = vadd.f32 %v4034_v36, %v13548_v1  ;;  %v4704_v63 = vadd.f32 %v14166_v57, %v4703_v2  ;;  %v3804_v60 = vmax.f32 %v3658_v52, 0.0 }
 0x4ac   : > { %v4849_v13 = vmax.f32 %v4704_v63, 0.0  ;;  %v14249_v32 = vadd.f32 %v5078_v3, %v4208_v4 }
 0x4ad   : > { %v5083_v37 = vpop.f32.mrf.mxu1 }
 0x4ae   : > { %v4909_v41 = vpack.c.bf16 %v4849_v13, %v4848_v39 }
 0x4af   : > { %v3659_v15 = vpop.f32.mrf.mxu2 }
 0x4b0   : > { %v3660_v30 = vadd.f32 %v14166_v57, %v3659_v15  ;;  %11200 = vmatmul.msk.bf16.gmra.mxu1 %vm1581_vm3, %v4909_v41 }
 0x4b1   : > { %v4036_v49 = vpop.f32.mrf.mxu3  ;;  %v4706_v50 = vpop.f32.mrf.mxu0 }
 0x4b2   : > { %v3805_v1 = vmax.f32 %v3660_v30, 0.0  ;;  %v4209_v6 = vadd.f32 %v4036_v49, %v13561_v40  ;;  %v4707_v20 = vadd.f32 %v14166_v57, %v4706_v50  ;;  %v12601_v49 = vld [vmem:[%s12861_s29 + $0x528] sm:$0xff] }
 0x4b4   : > { %v3865_v34 = vpack.c.bf16 %v3805_v1, %v3804_v60  ;;  %10861 = vmatmul.msk.bf16.gmra.mxu2 %vm489_vm2, %v12562_v10  ;;  %11161 = vmatmul.msk.bf16.gmra.mxu0 %vm489_vm2, %v12600_v18  ;;  %v14259_v3 = vadd.f32 %v5080_v9, %v4209_v6  ;;  %v4850_v4 = vmax.f32 %v4707_v20, 0.0  ;;  %v12563_v18 = vld [vmem:[%s12861_s29 + $0x408] sm:$0xff] }
 0x4b5   : > { %v5085_v46 = vpop.f32.mrf.mxu1 }
 0x4b6   : > { %10900 = vmatmul.msk.bf16.gmra.mxu3 %vm1581_vm3, %v3865_v34 }
 0x4b7   : > { %v3662_v36 = vpop.f32.mrf.mxu2 }
 0x4b8   : > { %v3663_v41 = vadd.f32 %v14166_v57, %v3662_v36 }
 0x4b9   : > { %v4039_v2 = vpop.f32.mrf.mxu3  ;;  %v4708_v39 = vpop.f32.mrf.mxu0 }
 0x4ba   : > { %v4210_v40 = vadd.f32 %v4039_v2, %v13567_v27  ;;  %v4709_v63 = vadd.f32 %v14166_v57, %v4708_v39  ;;  %v3806_v1 = vmax.f32 %v3663_v41, 0.0 }
 0x4bc   : > { %v4851_v13 = vmax.f32 %v4709_v63, 0.0  ;;  %v14265_v52 = vadd.f32 %v5083_v37, %v4210_v40 }
 0x4bd   : > { %v5088_v9 = vpop.f32.mrf.mxu1 }
 0x4be   : > { %v4910_v15 = vpack.c.bf16 %v4851_v13, %v4850_v4 }
 0x4bf   : > { %v3664_v30 = vpop.f32.mrf.mxu2 }
 0x4c0   : > { %v3665_v10 = vadd.f32 %v14166_v57, %v3664_v30  ;;  %11201 = vmatmul.msk.bf16.gmra.mxu1 %vm1581_vm3, %v4910_v15 }
 0x4c1   : > { %v4041_v50 = vpop.f32.mrf.mxu3  ;;  %v4711_v60 = vpop.f32.mrf.mxu0 }
 0x4c2   : > { %v3807_v27 = vmax.f32 %v3665_v10, 0.0  ;;  %v4211_v6 = vadd.f32 %v4041_v50, %v13580_v26  ;;  %v4712_v36 = vadd.f32 %v14166_v57, %v4711_v60  ;;  %v12602_v50 = vld [vmem:[%s12861_s29 + $0x530] sm:$0xff] }
 0x4c4   : > { %v3866_v34 = vpack.c.bf16 %v3807_v27, %v3806_v1  ;;  %10862 = vmatmul.msk.bf16.gmra.mxu2 %vm489_vm2, %v12563_v18  ;;  %11162 = vmatmul.msk.bf16.gmra.mxu0 %vm489_vm2, %v12601_v49  ;;  %v14275_v37 = vadd.f32 %v5085_v46, %v4211_v6  ;;  %v4852_v40 = vmax.f32 %v4712_v36, 0.0  ;;  %v12564_v49 = vld [vmem:[%s12861_s29 + $0x410] sm:$0xff] }
 0x4c5   : > { %v5090_v20 = vpop.f32.mrf.mxu1 }
 0x4c6   : > { %10901 = vmatmul.msk.bf16.gmra.mxu3 %vm1581_vm3, %v3866_v34 }
 0x4c7   : > { %v3667_v2 = vpop.f32.mrf.mxu2 }
 0x4c8   : > { %v3668_v15 = vadd.f32 %v14166_v57, %v3667_v2 }
 0x4c9   : > { %v4044_v39 = vpop.f32.mrf.mxu3  ;;  %v4713_v4 = vpop.f32.mrf.mxu0 }
 0x4ca   : > { %v4212_v26 = vadd.f32 %v4044_v39, %v13586_v54  ;;  %v4714_v63 = vadd.f32 %v14166_v57, %v4713_v4  ;;  %v3808_v27 = vmax.f32 %v3668_v15, 0.0 }
 0x4cc   : > { %v4853_v13 = vmax.f32 %v4714_v63, 0.0  ;;  %v14281_v41 = vadd.f32 %v5088_v9, %v4212_v26 }
 0x4cd   : > { %v5093_v46 = vpop.f32.mrf.mxu1 }
 0x4ce   : > { %v4911_v30 = vpack.c.bf16 %v4853_v13, %v4852_v40 }
 0x4cf   : > { %v3669_v10 = vpop.f32.mrf.mxu2 }
 0x4d0   : > { %v3670_v18 = vadd.f32 %v14166_v57, %v3669_v10  ;;  %11202 = vmatmul.msk.bf16.gmra.mxu1 %vm1581_vm3, %v4911_v30 }
 0x4d1   : > { %v4046_v60 = vpop.f32.mrf.mxu3  ;;  %v4716_v1 = vpop.f32.mrf.mxu0 }
 0x4d2   : > { %v3809_v54 = vmax.f32 %v3670_v18, 0.0  ;;  %v4213_v6 = vadd.f32 %v4046_v60, %v13599_v59  ;;  %v4717_v2 = vadd.f32 %v14166_v57, %v4716_v1  ;;  %v12603_v60 = vld [vmem:[%s12861_s29 + $0x538] sm:$0xff] }
 0x4d4   : > { %v3867_v34 = vpack.c.bf16 %v3809_v54, %v3808_v27  ;;  %10863 = vmatmul.msk.bf16.gmra.mxu2 %vm489_vm2, %v12564_v49  ;;  %11163 = vmatmul.msk.bf16.gmra.mxu0 %vm489_vm2, %v12602_v50  ;;  %v14291_v9 = vadd.f32 %v5090_v20, %v4213_v6  ;;  %v4854_v26 = vmax.f32 %v4717_v2, 0.0  ;;  %v12565_v50 = vld [vmem:[%s12861_s29 + $0x418] sm:$0xff] }
 0x4d5   : > { %v5095_v36 = vpop.f32.mrf.mxu1 }
 0x4d6   : > { %10902 = vmatmul.msk.bf16.gmra.mxu3 %vm1581_vm3, %v3867_v34 }
 0x4d7   : > { %v3672_v39 = vpop.f32.mrf.mxu2 }
 0x4d8   : > { %v3673_v30 = vadd.f32 %v14166_v57, %v3672_v39 }
 0x4d9   : > { %v4049_v4 = vpop.f32.mrf.mxu3  ;;  %v4718_v40 = vpop.f32.mrf.mxu0 }
 0x4da   : > { %v4214_v59 = vadd.f32 %v4049_v4, %v13605_v19  ;;  %v4719_v63 = vadd.f32 %v14166_v57, %v4718_v40  ;;  %v3810_v54 = vmax.f32 %v3673_v30, 0.0 }
 0x4dc   : > { %v4855_v13 = vmax.f32 %v4719_v63, 0.0  ;;  %v14297_v15 = vadd.f32 %v5093_v46, %v4214_v59 }
 0x4dd   : > { %v5098_v20 = vpop.f32.mrf.mxu1 }
 0x4de   : > { %v4912_v10 = vpack.c.bf16 %v4855_v13, %v4854_v26 }
 0x4df   : > { %v3674_v18 = vpop.f32.mrf.mxu2 }
 0x4e0   : > { %v3675_v49 = vadd.f32 %v14166_v57, %v3674_v18  ;;  %11203 = vmatmul.msk.bf16.gmra.mxu1 %vm1581_vm3, %v4912_v10 }
 0x4e1   : > { %v4051_v1 = vpop.f32.mrf.mxu3  ;;  %v4721_v27 = vpop.f32.mrf.mxu0 }
 0x4e2   : > { %v3811_v19 = vmax.f32 %v3675_v49, 0.0  ;;  %v4215_v6 = vadd.f32 %v4051_v1, %v13618_v25  ;;  %v4722_v39 = vadd.f32 %v14166_v57, %v4721_v27  ;;  %v12604_v1 = vld [vmem:[%s12861_s29 + $0x540] sm:$0xff] }
 0x4e4   : > { %v3868_v34 = vpack.c.bf16 %v3811_v19, %v3810_v54  ;;  %10864 = vmatmul.msk.bf16.gmra.mxu2 %vm489_vm2, %v12565_v50  ;;  %11164 = vmatmul.msk.bf16.gmra.mxu0 %vm489_vm2, %v12603_v60  ;;  %v14307_v46 = vadd.f32 %v5095_v36, %v4215_v6  ;;  %v4856_v59 = vmax.f32 %v4722_v39, 0.0  ;;  %v12566_v60 = vld [vmem:[%s12861_s29 + $0x420] sm:$0xff] }
 0x4e5   : > { %v5100_v2 = vpop.f32.mrf.mxu1 }
 0x4e6   : > { %10903 = vmatmul.msk.bf16.gmra.mxu3 %vm1581_vm3, %v3868_v34 }
 0x4e7   : > { %v3677_v4 = vpop.f32.mrf.mxu2 }
 0x4e8   : > { %v3678_v10 = vadd.f32 %v14166_v57, %v3677_v4 }
 0x4e9   : > { %v4054_v40 = vpop.f32.mrf.mxu3  ;;  %v4723_v26 = vpop.f32.mrf.mxu0 }
 0x4ea   : > { %v4216_v25 = vadd.f32 %v4054_v40, %v13624_v48  ;;  %v4724_v63 = vadd.f32 %v14166_v57, %v4723_v26  ;;  %v3812_v19 = vmax.f32 %v3678_v10, 0.0 }
 0x4ec   : > { %v4857_v13 = vmax.f32 %v4724_v63, 0.0  ;;  %v14313_v30 = vadd.f32 %v5098_v20, %v4216_v25 }
 0x4ed   : > { %v5103_v36 = vpop.f32.mrf.mxu1 }
 0x4ee   : > { %v4913_v18 = vpack.c.bf16 %v4857_v13, %v4856_v59 }
 0x4ef   : > { %v3679_v49 = vpop.f32.mrf.mxu2 }
 0x4f0   : > { %v3680_v50 = vadd.f32 %v14166_v57, %v3679_v49  ;;  %11204 = vmatmul.msk.bf16.gmra.mxu1 %vm1581_vm3, %v4913_v18 }
 0x4f1   : > { %v4056_v27 = vpop.f32.mrf.mxu3  ;;  %v4726_v54 = vpop.f32.mrf.mxu0 }
 0x4f2   : > { %v3813_v48 = vmax.f32 %v3680_v50, 0.0  ;;  %v4217_v6 = vadd.f32 %v4056_v27, %v13637_v58  ;;  %v4727_v4 = vadd.f32 %v14166_v57, %v4726_v54  ;;  %v12605_v27 = vld [vmem:[%s12861_s29 + $0x548] sm:$0xff] }
 0x4f4   : > { %v3869_v34 = vpack.c.bf16 %v3813_v48, %v3812_v19  ;;  %10865 = vmatmul.msk.bf16.gmra.mxu2 %vm489_vm2, %v12566_v60  ;;  %11165 = vmatmul.msk.bf16.gmra.mxu0 %vm489_vm2, %v12604_v1  ;;  %v14323_v20 = vadd.f32 %v5100_v2, %v4217_v6  ;;  %v4858_v25 = vmax.f32 %v4727_v4, 0.0  ;;  %v12567_v1 = vld [vmem:[%s12861_s29 + $0x428] sm:$0xff] }
 0x4f5   : > { %v5105_v39 = vpop.f32.mrf.mxu1 }
 0x4f6   : > { %10904 = vmatmul.msk.bf16.gmra.mxu3 %vm1581_vm3, %v3869_v34 }
 0x4f7   : > { %v3682_v40 = vpop.f32.mrf.mxu2 }
 0x4f8   : > { %v3683_v18 = vadd.f32 %v14166_v57, %v3682_v40 }
 0x4f9   : > { %v4059_v26 = vpop.f32.mrf.mxu3  ;;  %v4728_v59 = vpop.f32.mrf.mxu0 }
 0x4fa   : > { %v4218_v58 = vadd.f32 %v4059_v26, %v13643_v17  ;;  %v4729_v63 = vadd.f32 %v14166_v57, %v4728_v59  ;;  %v3814_v48 = vmax.f32 %v3683_v18, 0.0  ;;  %v12654_v26 = vld [vmem:[%s16007_s3 + $0x50] sm:$0xff] }
 0x4fb   : > { %6110 = vmatpush.bf16.msrb.mxu3 %v12654_v26 }
 0x4fc   : > { %v4859_v13 = vmax.f32 %v4729_v63, 0.0  ;;  %v14329_v10 = vadd.f32 %v5103_v36, %v4218_v58 }
 0x4fd   : > { %v5108_v2 = vpop.f32.mrf.mxu1 }
 0x4fe   : > { %v4914_v49 = vpack.c.bf16 %v4859_v13, %v4858_v25 }
 0x4ff   : > { %v3684_v50 = vpop.f32.mrf.mxu2 }
 0x500   : > { %v3685_v60 = vadd.f32 %v14166_v57, %v3684_v50  ;;  %11205 = vmatmul.msk.bf16.gmra.mxu1 %vm1581_vm3, %v4914_v49 }
 0x501   : > { %v4061_v54 = vpop.f32.mrf.mxu3  ;;  %v4731_v19 = vpop.f32.mrf.mxu0 }
 0x502   : > { %v3815_v17 = vmax.f32 %v3685_v60, 0.0  ;;  %v4219_v6 = vadd.f32 %v4061_v54, %v13656_v38  ;;  %v4732_v40 = vadd.f32 %v14166_v57, %v4731_v19  ;;  %v12568_v19 = vld [vmem:[%s12861_s29 + $0x430] sm:$0xff] }
 0x504   : > { %v3870_v34 = vpack.c.bf16 %v3815_v17, %v3814_v48  ;;  %10866 = vmatmul.msk.bf16.gmra.mxu2 %vm489_vm2, %v12567_v1  ;;  %11166 = vmatmul.msk.bf16.gmra.mxu0 %vm489_vm2, %v12605_v27  ;;  %v14339_v36 = vadd.f32 %v5105_v39, %v4219_v6  ;;  %v4860_v58 = vmax.f32 %v4732_v40, 0.0  ;;  %v12692_v1 = vld [vmem:[%s16007_s3 + $0x60] sm:$0xff] }
 0x505   : > { %v5110_v4 = vpop.f32.mrf.mxu1  ;;  %7154 = vmatpush.bf16.msrb.mxu1 %v12692_v1 }
 0x506   : > { %10905 = vmatmul.msk.bf16.gmra.mxu3 %vm1581_vm3, %v3870_v34 }
 0x507   : > { %v3687_v59 = vpop.f32.mrf.mxu2 }
 0x508   : > { %v3688_v50 = vadd.f32 %v14166_v57, %v3687_v59 }
 0x509   : > { %v4064_v38 = vpop.f32.mrf.mxu3  ;;  %v4733_v25 = vpop.f32.mrf.mxu0 }
 0x50a   : > { %v4220_v63 = vadd.f32 %v4064_v38, %v13662_v53  ;;  %v4734_v39 = vadd.f32 %v14166_v57, %v4733_v25  ;;  %v12606_v53 = vld [vmem:[%s12861_s29 + $0x550] sm:$0xff] }
 0x50c   : > { %v4861_v13 = vmax.f32 %v4734_v39, 0.0  ;;  %v14348_v18 = vadd.f32 %v5108_v2, %v4220_v63  ;;  %v3816_v2 = vmax.f32 %v3688_v50, 0.0 }
 0x50d   : > { %v5113_v49 = vpop.f32.mrf.mxu1 }
 0x50e   : > { %v4915_v60 = vpack.c.bf16 %v4861_v13, %v4860_v58 }
 0x50f   : > { %v3689_v27 = vpop.f32.mrf.mxu2 }
 0x510   : > { %v3690_v54 = vadd.f32 %v14166_v57, %v3689_v27  ;;  %11206 = vmatmul.msk.bf16.gmra.mxu1 %vm1581_vm3, %v4915_v60 }
 0x511   : > { %v4066_v48 = vpop.f32.mrf.mxu3  ;;  %v4736_v17 = vpop.f32.mrf.mxu0 }
 0x512   : > { %v3817_v6 = vmax.f32 %v3690_v54, 0.0  ;;  %v4221_v34 = vadd.f32 %v4066_v48, %v13675_v29  ;;  %v4737_v38 = vadd.f32 %v14166_v57, %v4736_v17  ;;  %v12607_v48 = vld [vmem:[%s12861_s29 + $0x558] sm:$0xff] }
 0x514   : > { %v3871_v40 = vpack.c.bf16 %v3817_v6, %v3816_v2  ;;  %10867 = vmatmul.msk.bf16.gmra.mxu2 %vm489_vm2, %v12568_v19  ;;  %11167 = vmatmul.msk.bf16.gmra.mxu0 %vm489_vm2, %v12606_v53  ;;  %v14361_v26 = vadd.f32 %v5110_v4, %v4221_v34  ;;  %v4862_v39 = vmax.f32 %v4737_v38, 0.0  ;;  %v12569_v53 = vld [vmem:[%s12861_s29 + $0x438] sm:$0xff] }
 0x515   : > { %v5115_v59 = vpop.f32.mrf.mxu1 }
 0x516   : > { %10906 = vmatmul.msk.bf16.gmra.mxu3 %vm1581_vm3, %v3871_v40 }
 0x517   : > { %v3692_v25 = vpop.f32.mrf.mxu2 }
 0x518   : > { %v3693_v1 = vadd.f32 %v14166_v57, %v3692_v25 }
 0x519   : > { %v4069_v58 = vpop.f32.mrf.mxu3  ;;  %v4738_v63 = vpop.f32.mrf.mxu0 }
 0x51a   : > { %v4222_v29 = vadd.f32 %v4069_v58, %v13684_v42  ;;  %v4739_v13 = vadd.f32 %v14166_v57, %v4738_v63  ;;  %v3818_v6 = vmax.f32 %v3693_v1, 0.0 }
 0x51c   : > { %v4863_v50 = vmax.f32 %v4739_v13, 0.0  ;;  %v14367_v60 = vadd.f32 %v5113_v49, %v4222_v29 }
 0x51d   : > { %v5118_v4 = vpop.f32.mrf.mxu1 }
 0x51e   : > { %v4916_v27 = vpack.c.bf16 %v4863_v50, %v4862_v39 }
 0x51f   : > { %v3694_v54 = vpop.f32.mrf.mxu2 }
 0x520   : > { %v3695_v19 = vadd.f32 %v14166_v57, %v3694_v54  ;;  %11207 = vmatmul.msk.bf16.gmra.mxu1 %vm1581_vm3, %v4916_v27 }
 0x521   : > { %v4071_v17 = vpop.f32.mrf.mxu3  ;;  %v4741_v2 = vpop.f32.mrf.mxu0 }
 0x522   : > { %v3819_v42 = vmax.f32 %v3695_v19, 0.0  ;;  %v4223_v34 = vadd.f32 %v4071_v17, %v13700_v44  ;;  %v4742_v25 = vadd.f32 %v14166_v57, %v4741_v2  ;;  %v12608_v17 = vld [vmem:[%s12861_s29 + $0x560] sm:$0xff] }
 0x524   : > { %v3872_v40 = vpack.c.bf16 %v3819_v42, %v3818_v6  ;;  %10868 = vmatmul.msk.bf16.gmra.mxu2 %vm489_vm2, %v12569_v53  ;;  %11168 = vmatmul.msk.bf16.gmra.mxu0 %vm489_vm2, %v12607_v48  ;;  %v14377_v49 = vadd.f32 %v5115_v59, %v4223_v34  ;;  %v4864_v29 = vmax.f32 %v4742_v25, 0.0  ;;  %v12570_v48 = vld [vmem:[%s12861_s29 + $0x440] sm:$0xff] }
 0x525   : > { %v5120_v38 = vpop.f32.mrf.mxu1 }
 0x526   : > { %10907 = vmatmul.msk.bf16.gmra.mxu3 %vm1581_vm3, %v3872_v40 }
 0x527   : > { %v3697_v58 = vpop.f32.mrf.mxu2 }
 0x528   : > { %v3698_v27 = vadd.f32 %v14166_v57, %v3697_v58 }
 0x529   : > { %v4074_v63 = vpop.f32.mrf.mxu3  ;;  %v4743_v39 = vpop.f32.mrf.mxu0 }
 0x52a   : > { %v4224_v44 = vadd.f32 %v4074_v63, %v13706_v16  ;;  %v4744_v13 = vadd.f32 %v14166_v57, %v4743_v39  ;;  %v3820_v42 = vmax.f32 %v3698_v27, 0.0 }
 0x52c   : > { %v4865_v50 = vmax.f32 %v4744_v13, 0.0  ;;  %v14383_v1 = vadd.f32 %v5118_v4, %v4224_v44 }
 0x52d   : > { %v5123_v59 = vpop.f32.mrf.mxu1 }
 0x52e   : > { %v4917_v54 = vpack.c.bf16 %v4865_v50, %v4864_v29 }
 0x52f   : > { %v3699_v19 = vpop.f32.mrf.mxu2 }
 0x530   : > { %v3700_v53 = vadd.f32 %v14166_v57, %v3699_v19  ;;  %11208 = vmatmul.msk.bf16.gmra.mxu1 %vm1581_vm3, %v4917_v54 }
 0x531   : > { %v4076_v2 = vpop.f32.mrf.mxu3  ;;  %v4746_v6 = vpop.f32.mrf.mxu0 }
 0x532   : > { %v3821_v16 = vmax.f32 %v3700_v53, 0.0  ;;  %v4225_v34 = vadd.f32 %v4076_v2, %v13724_v62  ;;  %v4747_v58 = vadd.f32 %v14166_v57, %v4746_v6  ;;  %v12609_v2 = vld [vmem:[%s12861_s29 + $0x568] sm:$0xff] }
 0x534   : > { %v3873_v40 = vpack.c.bf16 %v3821_v16, %v3820_v42  ;;  %10869 = vmatmul.msk.bf16.gmra.mxu2 %vm489_vm2, %v12570_v48  ;;  %11169 = vmatmul.msk.bf16.gmra.mxu0 %vm489_vm2, %v12608_v17  ;;  %v14393_v4 = vadd.f32 %v5120_v38, %v4225_v34  ;;  %v4866_v44 = vmax.f32 %v4747_v58, 0.0  ;;  %v12571_v17 = vld [vmem:[%s12861_s29 + $0x448] sm:$0xff]  ;;  %v16066_v34 = vld [vmem:[#allocation13_spill] sm:$0xff] }
 0x535   : > { %v5125_v25 = vpop.f32.mrf.mxu1 }
 0x536   : > { %10908 = vmatmul.msk.bf16.gmra.mxu3 %vm1581_vm3, %v3873_v40 }
 0x537   : > { %v3702_v63 = vpop.f32.mrf.mxu2 }
 0x538   : > { %v3703_v54 = vadd.f32 %v14166_v57, %v3702_v63 }
 0x539   : > { %v4079_v39 = vpop.f32.mrf.mxu3  ;;  %v4748_v29 = vpop.f32.mrf.mxu0 }
 0x53a   : > { %v4226_v62 = vadd.f32 %v4079_v39, %v13730_v31  ;;  %v4749_v13 = vadd.f32 %v14166_v57, %v4748_v29  ;;  %v3822_v16 = vmax.f32 %v3703_v54, 0.0 }
 0x53c   : > { %v4867_v50 = vmax.f32 %v4749_v13, 0.0  ;;  %v14399_v27 = vadd.f32 %v5123_v59, %v4226_v62 }
 0x53d   : > { %v5128_v38 = vpop.f32.mrf.mxu1 }
 0x53e   : > { %v4918_v19 = vpack.c.bf16 %v4867_v50, %v4866_v44  ;;  %v16067_v50 = vld [vmem:[#allocation14_spill] sm:$0xff] }
 0x53f   : > { %v3704_v53 = vpop.f32.mrf.mxu2 }
 0x540   : > { %v3705_v48 = vadd.f32 %v14166_v57, %v3704_v53  ;;  %11209 = vmatmul.msk.bf16.gmra.mxu1 %vm1581_vm3, %v4918_v19 }
 0x541   : > { %v4081_v6 = vpop.f32.mrf.mxu3  ;;  %v4751_v42 = vpop.f32.mrf.mxu0 }
 0x542   : > { %v3823_v31 = vmax.f32 %v3705_v48, 0.0  ;;  %v4227_v40 = vadd.f32 %v4081_v6, %v16066_v34  ;;  %v4752_v39 = vadd.f32 %v14166_v57, %v4751_v42 }
 0x544   : > { %v3874_v58 = vpack.c.bf16 %v3823_v31, %v3822_v16  ;;  %10870 = vmatmul.msk.bf16.gmra.mxu2 %vm489_vm2, %v12571_v17  ;;  %11170 = vmatmul.msk.bf16.gmra.mxu0 %vm489_vm2, %v12609_v2  ;;  %v14409_v59 = vadd.f32 %v5125_v25, %v4227_v40  ;;  %v4868_v13 = vmax.f32 %v4752_v39, 0.0  ;;  %v12572_v16 = vld [vmem:[%s12861_s29 + $0x450] sm:$0xff] }
 0x545   : > { %v5130_v63 = vpop.f32.mrf.mxu1  ;;  %v12610_v31 = vld [vmem:[%s12861_s29 + $0x570] sm:$0xff] }
 0x546   : > { %10909 = vmatmul.msk.bf16.gmra.mxu3 %vm1581_vm3, %v3874_v58 }
 0x547   : > { %v3707_v29 = vpop.f32.mrf.mxu2 }
 0x548   : > { %v3708_v17 = vadd.f32 %v14166_v57, %v3707_v29 }
 0x549   : > { %v4084_v44 = vpop.f32.mrf.mxu3  ;;  %v4753_v62 = vpop.f32.mrf.mxu0 }
 0x54a   : > { %v4228_v54 = vadd.f32 %v4084_v44, %v16067_v50  ;;  %v4754_v19 = vadd.f32 %v14166_v57, %v4753_v62  ;;  %v3824_v58 = vmax.f32 %v3708_v17, 0.0  ;;  %v16068_v44 = vld [vmem:[#allocation15_spill] sm:$0xff] }
 0x54c   : > { %v4869_v53 = vmax.f32 %v4754_v19, 0.0  ;;  %v14415_v48 = vadd.f32 %v5128_v38, %v4228_v54 }
 0x54d   : > { %v5133_v25 = vpop.f32.mrf.mxu1 }
 0x54e   : > { %v4919_v2 = vpack.c.bf16 %v4869_v53, %v4868_v13 }
 0x54f   : > { %v3709_v6 = vpop.f32.mrf.mxu2 }
 0x550   : > { %v3710_v42 = vadd.f32 %v14166_v57, %v3709_v6  ;;  %11210 = vmatmul.msk.bf16.gmra.mxu1 %vm1581_vm3, %v4919_v2  ;;  %v16070_v2 = vld [vmem:[#allocation16_spill] sm:$0xff] }
 0x551   : > { %v4086_v34 = vpop.f32.mrf.mxu3  ;;  %v4756_v40 = vpop.f32.mrf.mxu0 }
 0x552   : > { %v3825_v39 = vmax.f32 %v3710_v42, 0.0  ;;  %v4229_v62 = vadd.f32 %v4086_v34, %v16068_v44  ;;  %v4757_v13 = vadd.f32 %v14166_v57, %v4756_v40  ;;  %v12573_v44 = vld [vmem:[%s12861_s29 + $0x458] sm:$0xff] }
 0x554   : > { %v3875_v50 = vpack.c.bf16 %v3825_v39, %v3824_v58  ;;  %10871 = vmatmul.msk.bf16.gmra.mxu2 %vm489_vm2, %v12572_v16  ;;  %11171 = vmatmul.msk.bf16.gmra.mxu0 %vm489_vm2, %v12610_v31  ;;  %v14425_v38 = vadd.f32 %v5130_v63, %v4229_v62  ;;  %v4870_v17 = vmax.f32 %v4757_v13, 0.0  ;;  %v12611_v62 = vld [vmem:[%s12861_s29 + $0x578] sm:$0xff] }
 0x555   : > { %v5135_v29 = vpop.f32.mrf.mxu1 }
 0x556   : > { %16069 = vst [vmem:[#allocation13_spill] sm:$0xff] %v14425_v38  ;;  %10910 = vmatmul.msk.bf16.gmra.mxu3 %vm1581_vm3, %v3875_v50 }
 0x557   : > { %v3712_v54 = vpop.f32.mrf.mxu2 }
 0x558   : > { %v3713_v31 = vadd.f32 %v14166_v57, %v3712_v54 }
 0x559   : > { %v4089_v19 = vpop.f32.mrf.mxu3  ;;  %v4758_v53 = vpop.f32.mrf.mxu0 }
 0x55a   : > { %v4230_v6 = vadd.f32 %v4089_v19, %v16070_v2  ;;  %v4759_v42 = vadd.f32 %v14166_v57, %v4758_v53  ;;  %v3826_v38 = vmax.f32 %v3713_v31, 0.0  ;;  %v16072_v2 = vld [vmem:[#allocation17_spill] sm:$0xff] }
 0x55c   : > { %v4871_v16 = vmax.f32 %v4759_v42, 0.0  ;;  %v14431_v34 = vadd.f32 %v5133_v25, %v4230_v6 }
 0x55d   : > { %v5138_v63 = vpop.f32.mrf.mxu1 }
 0x55e   : > { %16071 = vst [vmem:[#allocation14_spill] sm:$0xff] %v14431_v34  ;;  %v4920_v58 = vpack.c.bf16 %v4871_v16, %v4870_v17 }
 0x55f   : > { %v3714_v40 = vpop.f32.mrf.mxu2 }
 0x560   : > { %v3715_v39 = vadd.f32 %v14166_v57, %v3714_v40  ;;  %11211 = vmatmul.msk.bf16.gmra.mxu1 %vm1581_vm3, %v4920_v58  ;;  %v16074_v40 = vld [vmem:[#allocation18_spill] sm:$0xff] }
 0x561   : > { %v4091_v50 = vpop.f32.mrf.mxu3  ;;  %v4761_v13 = vpop.f32.mrf.mxu0 }
 0x562   : > { %v3827_v19 = vmax.f32 %v3715_v39, 0.0  ;;  %v4231_v53 = vadd.f32 %v4091_v50, %v16072_v2  ;;  %v4762_v17 = vadd.f32 %v14166_v57, %v4761_v13 }
 0x564   : > { %v3876_v42 = vpack.c.bf16 %v3827_v19, %v3826_v38  ;;  %10872 = vmatmul.msk.bf16.gmra.mxu2 %vm489_vm2, %v12573_v44  ;;  %11172 = vmatmul.msk.bf16.gmra.mxu0 %vm489_vm2, %v12611_v62  ;;  %v14441_v25 = vadd.f32 %v5135_v29, %v4231_v53  ;;  %v4872_v58 = vmax.f32 %v4762_v17, 0.0  ;;  %v12574_v53 = vld [vmem:[%s12861_s29 + $0x460] sm:$0xff] }
 0x565   : > { %v5140_v54 = vpop.f32.mrf.mxu1 }
 0x566   : > { %16073 = vst [vmem:[#allocation15_spill] sm:$0xff] %v14441_v25  ;;  %10911 = vmatmul.msk.bf16.gmra.mxu3 %vm1581_vm3, %v3876_v42  ;;  %v12612_v42 = vld [vmem:[%s12861_s29 + $0x580] sm:$0xff] }
 0x567   : > { %v3717_v6 = vpop.f32.mrf.mxu2 }
 0x568   : > { %v3718_v62 = vadd.f32 %v14166_v57, %v3717_v6 }
 0x569   : > { %v4094_v16 = vpop.f32.mrf.mxu3  ;;  %v4763_v31 = vpop.f32.mrf.mxu0 }
 0x56a   : > { %v4232_v39 = vadd.f32 %v4094_v16, %v16074_v40  ;;  %v4764_v38 = vadd.f32 %v14166_v57, %v4763_v31  ;;  %v3828_v34 = vmax.f32 %v3718_v62, 0.0  ;;  %v16076_v40 = vld [vmem:[#allocation4_spill] sm:$0xff] }
 0x56c   : > { %v4873_v44 = vmax.f32 %v4764_v38, 0.0  ;;  %v14447_v50 = vadd.f32 %v5138_v63, %v4232_v39 }
 0x56d   : > { %v5143_v29 = vpop.f32.mrf.mxu1 }
 0x56e   : > { %16075 = vst [vmem:[#allocation16_spill] sm:$0xff] %v14447_v50  ;;  %v4921_v19 = vpack.c.bf16 %v4873_v44, %v4872_v58 }
 0x56f   : > { %v3719_v13 = vpop.f32.mrf.mxu2 }
 0x570   : > { %v3720_v2 = vadd.f32 %v14166_v57, %v3719_v13  ;;  %11212 = vmatmul.msk.bf16.gmra.mxu1 %vm1581_vm3, %v4921_v19  ;;  %v16078_v13 = vld [vmem:[#allocation3_spill] sm:$0xff] }
 0x571   : > { %v4096_v25 = vpop.f32.mrf.mxu3  ;;  %v4766_v17 = vpop.f32.mrf.mxu0 }
 0x572   : > { %v3829_v16 = vmax.f32 %v3720_v2, 0.0  ;;  %v4233_v31 = vadd.f32 %v4096_v25, %v16076_v40  ;;  %v4767_v58 = vadd.f32 %v14166_v57, %v4766_v17  ;;  %v14469_v40 = vld [vmem:[%s16006_s2] ss:$0 sm:$0xff] }
 0x574   : > { %v3877_v38 = vpack.c.bf16 %v3829_v16, %v3828_v34  ;;  %10873 = vmatmul.msk.bf16.gmra.mxu2 %vm489_vm2, %v12574_v53  ;;  %11173 = vmatmul.msk.bf16.gmra.mxu0 %vm489_vm2, %v12612_v42  ;;  %v14457_v63 = vadd.f32 %v5140_v54, %v4233_v31  ;;  %v4874_v19 = vmax.f32 %v4767_v58, 0.0  ;;  %v12613_v58 = vld [vmem:[%s12861_s29 + $0x588] sm:$0xff] }
 0x575   : > { %v5145_v6 = vpop.f32.mrf.mxu1 }
 0x576   : > { %16077 = vst [vmem:[#allocation17_spill] sm:$0xff] %v14457_v63  ;;  %10912 = vmatmul.msk.bf16.gmra.mxu3 %vm1581_vm3, %v3877_v38  ;;  %v12575_v38 = vld [vmem:[%s12861_s29 + $0x468] sm:$0xff] }
 0x577   : > { %v3722_v39 = vpop.f32.mrf.mxu2 }
 0x578   : > { %v3723_v42 = vadd.f32 %v14166_v57, %v3722_v39 }
 0x579   : > { %v4099_v44 = vpop.f32.mrf.mxu3  ;;  %v4768_v62 = vpop.f32.mrf.mxu0 }
 0x57a   : > { %v4234_v25 = vadd.f32 %v4099_v44, %v16078_v13  ;;  %v4769_v34 = vadd.f32 %v14166_v57, %v4768_v62 }
 0x57c   : > { %v4875_v2 = vmax.f32 %v4769_v34, 0.0  ;;  %v14463_v53 = vadd.f32 %v5143_v29, %v4234_v25  ;;  %v3830_v29 = vmax.f32 %v3723_v42, 0.0  ;;  %v16080_v25 = vld [vmem:[#allocation6_spill] sm:$0xff] }
 0x57d   : > { %v5148_v54 = vpop.f32.mrf.mxu1 }
 0x57e   : > { %16079 = vst [vmem:[#allocation18_spill] sm:$0xff] %v14463_v53  ;;  %v4922_v16 = vpack.c.bf16 %v4875_v2, %v4874_v19  ;;  %v16082_v53 = vld [vmem:[#allocation5_spill] sm:$0xff] }
 0x57f   : > { %v3724_v17 = vpop.f32.mrf.mxu2 }
 0x580   : > { %v3725_v31 = vadd.f32 %v14469_v40, %v3724_v17  ;;  %11213 = vmatmul.msk.bf16.gmra.mxu1 %vm1581_vm3, %v4922_v16 }
 0x581   : > { %v4101_v44 = vpop.f32.mrf.mxu3  ;;  %v4771_v62 = vpop.f32.mrf.mxu0 }
 0x582   : > { %v3831_v13 = vmax.f32 %v3725_v31, 0.0  ;;  %v4235_v34 = vadd.f32 %v4101_v44, %v16080_v25  ;;  %v4772_v2 = vadd.f32 %v14469_v40, %v4771_v62 }
 0x584   : > { %v3878_v57 = vpack.c.bf16 %v3831_v13, %v3830_v29  ;;  %10874 = vmatmul.msk.bf16.gmra.mxu2 %vm489_vm2, %v12575_v38  ;;  %11174 = vmatmul.msk.bf16.gmra.mxu0 %vm489_vm2, %v12613_v58  ;;  %v14478_v39 = vadd.f32 %v5145_v6, %v4235_v34  ;;  %v4876_v31 = vmax.f32 %v4772_v2, 0.0 }
 0x585   : > { %v5150_v19 = vpop.f32.mrf.mxu1 }
 0x586   : > { %16081 = vst [vmem:[#allocation4_spill] sm:$0xff] %v14478_v39  ;;  %10913 = vmatmul.msk.bf16.gmra.mxu3 %vm1581_vm3, %v3878_v57  ;;  %v12576_v57 = vld [vmem:[%s12861_s29 + $0x470] sm:$0xff] }
 0x587   : > { %v3727_v16 = vpop.f32.mrf.mxu2  ;;  %v12614_v39 = vld [vmem:[%s12861_s29 + $0x590] sm:$0xff] }
 0x588   : > { %v3728_v58 = vadd.f32 %v14469_v40, %v3727_v16 }
 0x589   : > { %v4104_v17 = vpop.f32.mrf.mxu3  ;;  %v4773_v42 = vpop.f32.mrf.mxu0 }
 0x58a   : > { %v4236_v44 = vadd.f32 %v4104_v17, %v16082_v53  ;;  %v4774_v29 = vadd.f32 %v14469_v40, %v4773_v42  ;;  %v3832_v50 = vmax.f32 %v3728_v58, 0.0  ;;  %v16084_v17 = vld [vmem:[#allocation8_spill] sm:$0xff] }
 0x58c   : > { %v4877_v38 = vmax.f32 %v4774_v29, 0.0  ;;  %v14484_v13 = vadd.f32 %v5148_v54, %v4236_v44 }
 0x58d   : > { %v5153_v6 = vpop.f32.mrf.mxu1 }
 0x58e   : > { %16083 = vst [vmem:[#allocation3_spill] sm:$0xff] %v14484_v13  ;;  %v4923_v25 = vpack.c.bf16 %v4877_v38, %v4876_v31 }
 0x58f   : > { %v3729_v62 = vpop.f32.mrf.mxu2 }
 0x590   : > { %v3730_v34 = vadd.f32 %v14469_v40, %v3729_v62  ;;  %11214 = vmatmul.msk.bf16.gmra.mxu1 %vm1581_vm3, %v4923_v25  ;;  %v16086_v62 = vld [vmem:[#allocation7_spill] sm:$0xff] }
 0x591   : > { %v4106_v63 = vpop.f32.mrf.mxu3  ;;  %v4776_v2 = vpop.f32.mrf.mxu0 }
 0x592   : > { %v3833_v53 = vmax.f32 %v3730_v34, 0.0  ;;  %v4237_v42 = vadd.f32 %v4106_v63, %v16084_v17  ;;  %v4777_v31 = vadd.f32 %v14469_v40, %v4776_v2 }
 0x594   : > { %v3879_v29 = vpack.c.bf16 %v3833_v53, %v3832_v50  ;;  %10875 = vmatmul.msk.bf16.gmra.mxu2 %vm489_vm2, %v12576_v57  ;;  %11175 = vmatmul.msk.bf16.gmra.mxu0 %vm489_vm2, %v12614_v39  ;;  %v14494_v54 = vadd.f32 %v5150_v19, %v4237_v42  ;;  %v4878_v25 = vmax.f32 %v4777_v31, 0.0  ;;  %v12577_v42 = vld [vmem:[%s12861_s29 + $0x478] sm:$0xff] }
 0x595   : > { %v5155_v16 = vpop.f32.mrf.mxu1 }
 0x596   : > { %16085 = vst [vmem:[#allocation6_spill] sm:$0xff] %v14494_v54  ;;  %10914 = vmatmul.msk.bf16.gmra.mxu3 %vm1581_vm3, %v3879_v29  ;;  %v12615_v29 = vld [vmem:[%s12861_s29 + $0x598] sm:$0xff] }
 0x597   : > { %v3732_v44 = vpop.f32.mrf.mxu2 }
 0x598   : > { %v3733_v19 = vadd.f32 %v14469_v40, %v3732_v44 }
 0x599   : > { %v4109_v38 = vpop.f32.mrf.mxu3  ;;  %v4778_v58 = vpop.f32.mrf.mxu0 }
 0x59a   : > { %v4238_v63 = vadd.f32 %v4109_v38, %v16086_v62  ;;  %v4779_v50 = vadd.f32 %v14469_v40, %v4778_v58  ;;  %v3834_v13 = vmax.f32 %v3733_v19, 0.0  ;;  %v16088_v62 = vld [vmem:[#allocation10_spill] sm:$0xff] }
 0x59c   : > { %v4879_v34 = vmax.f32 %v4779_v50, 0.0  ;;  %v14500_v57 = vadd.f32 %v5153_v6, %v4238_v63 }
 0x59d   : > { %v5158_v39 = vpop.f32.mrf.mxu1 }
 0x59e   : > { %16087 = vst [vmem:[#allocation5_spill] sm:$0xff] %v14500_v57  ;;  %v4924_v53 = vpack.c.bf16 %v4879_v34, %v4878_v25 }
 0x59f   : > { %v3734_v2 = vpop.f32.mrf.mxu2 }
 0x5a0   : > { %v3735_v17 = vadd.f32 %v14469_v40, %v3734_v2  ;;  %11215 = vmatmul.msk.bf16.gmra.mxu1 %vm1581_vm3, %v4924_v53  ;;  %v16090_v2 = vld [vmem:[#allocation9_spill] sm:$0xff] }
 0x5a1   : > { %v4111_v54 = vpop.f32.mrf.mxu3  ;;  %v4781_v31 = vpop.f32.mrf.mxu0 }
 0x5a2   : > { %v3835_v38 = vmax.f32 %v3735_v17, 0.0  ;;  %v4239_v58 = vadd.f32 %v4111_v54, %v16088_v62  ;;  %v4782_v25 = vadd.f32 %v14469_v40, %v4781_v31 }
 0x5a4   : > { %v3880_v50 = vpack.c.bf16 %v3835_v38, %v3834_v13  ;;  %10876 = vmatmul.msk.bf16.gmra.mxu2 %vm489_vm2, %v12577_v42  ;;  %11176 = vmatmul.msk.bf16.gmra.mxu0 %vm489_vm2, %v12615_v29  ;;  %v14510_v6 = vadd.f32 %v5155_v16, %v4239_v58  ;;  %v4880_v53 = vmax.f32 %v4782_v25, 0.0  ;;  %v12618_v58 = vld [vmem:[%s12861_s29 + $0x5a0] sm:$0xff] }
 0x5a5   : > { %v5160_v44 = vpop.f32.mrf.mxu1 }
 0x5a6   : > { %16089 = vst [vmem:[#allocation8_spill] sm:$0xff] %v14510_v6  ;;  %10915 = vmatmul.msk.bf16.gmra.mxu3 %vm1581_vm3, %v3880_v50  ;;  %v12656_v50 = vld [vmem:[%s12861_s29 + $0x6c0] sm:$0xff] }
 0x5a7   : > { %v3737_v63 = vpop.f32.mrf.mxu2 }
 0x5a8   : > { %v3738_v29 = vadd.f32 %v14469_v40, %v3737_v63 }
 0x5a9   : > { %v4114_v34 = vpop.f32.mrf.mxu3  ;;  %v4783_v19 = vpop.f32.mrf.mxu0 }
 0x5aa   : > { %v4240_v54 = vadd.f32 %v4114_v34, %v16090_v2  ;;  %v4784_v13 = vadd.f32 %v14469_v40, %v4783_v19  ;;  %v3836_v57 = vmax.f32 %v3738_v29, 0.0  ;;  %v16092_v2 = vld [vmem:[#allocation12_spill] sm:$0xff] }
 0x5ac   : > { %v4881_v17 = vmax.f32 %v4784_v13, 0.0  ;;  %v14516_v42 = vadd.f32 %v5158_v39, %v4240_v54 }
 0x5ad   : > { %v5163_v16 = vpop.f32.mrf.mxu1 }
 0x5ae   : > { %16091 = vst [vmem:[#allocation7_spill] sm:$0xff] %v14516_v42  ;;  %v4925_v38 = vpack.c.bf16 %v4881_v17, %v4880_v53 }
 0x5af   : > { %v3739_v31 = vpop.f32.mrf.mxu2 }
 0x5b0   : > { %v3740_v62 = vadd.f32 %v14469_v40, %v3739_v31  ;;  %11216 = vmatmul.msk.bf16.gmra.mxu1 %vm1581_vm3, %v4925_v38  ;;  %v16094_v31 = vld [vmem:[#allocation11_spill] sm:$0xff] }
 0x5b1   : > { %v4116_v6 = vpop.f32.mrf.mxu3  ;;  %v4786_v25 = vpop.f32.mrf.mxu0 }
 0x5b2   : > { %v3837_v34 = vmax.f32 %v3740_v62, 0.0  ;;  %v4241_v19 = vadd.f32 %v4116_v6, %v16092_v2  ;;  %v4787_v53 = vadd.f32 %v14469_v40, %v4786_v25 }
 0x5b4   : > { %v3881_v13 = vpack.c.bf16 %v3837_v34, %v3836_v57  ;;  %11441 = vmatmul.msk.bf16.vlgmr.msrb.gmra.mxu2 %vm489_vm2, %v12618_v58  ;;  %11741 = vmatmul.msk.bf16.vlgmr.msrb.gmra.mxu0 %vm489_vm2, %v12656_v50  ;;  %v14526_v39 = vadd.f32 %v5160_v44, %v4241_v19  ;;  %v4882_v38 = vmax.f32 %v4787_v53, 0.0  ;;  %v12619_v19 = vld [vmem:[%s12861_s29 + $0x5a8] sm:$0xff] }
 0x5b5   : > { %v5165_v63 = vpop.f32.mrf.mxu1 }
 0x5b6   : > { %16093 = vst [vmem:[#allocation10_spill] sm:$0xff] %v14526_v39  ;;  %10916 = vmatmul.msk.bf16.gmra.mxu3 %vm1581_vm3, %v3881_v13  ;;  %v12657_v13 = vld [vmem:[%s12861_s29 + $0x6c8] sm:$0xff] }
 0x5b7   : > { %v3742_v54 = vpop.f32.mrf.mxu2 }
 0x5b8   : > { %v3743_v50 = vadd.f32 %v14469_v40, %v3742_v54 }
 0x5b9   : > { %v4119_v17 = vpop.f32.mrf.mxu3  ;;  %v4788_v29 = vpop.f32.mrf.mxu0 }
 0x5ba   : > { %v4242_v6 = vadd.f32 %v4119_v17, %v16094_v31  ;;  %v4789_v57 = vadd.f32 %v14469_v40, %v4788_v29  ;;  %v3838_v42 = vmax.f32 %v3743_v50, 0.0  ;;  %v16096_v31 = vld [vmem:[#allocation2_spill] sm:$0xff] }
 0x5bc   : > { %v4883_v62 = vmax.f32 %v4789_v57, 0.0  ;;  %v14532_v58 = vadd.f32 %v5163_v16, %v4242_v6 }
 0x5bd   : > { %v5168_v44 = vpop.f32.mrf.mxu1 }
 0x5be   : > { %16095 = vst [vmem:[#allocation9_spill] sm:$0xff] %v14532_v58  ;;  %v4926_v34 = vpack.c.bf16 %v4883_v62, %v4882_v38 }
 0x5bf   : > { %v3744_v25 = vpop.f32.mrf.mxu2 }
 0x5c0   : > { %v3745_v2 = vadd.f32 %v14469_v40, %v3744_v25  ;;  %11217 = vmatmul.msk.bf16.gmra.mxu1 %vm1581_vm3, %v4926_v34  ;;  %v16098_v25 = vld [vmem:[#allocation19_spill] sm:$0xff] }
 0x5c1   : > { %v4121_v39 = vpop.f32.mrf.mxu3  ;;  %v4791_v53 = vpop.f32.mrf.mxu0 }
 0x5c2   : > { %v3839_v17 = vmax.f32 %v3745_v2, 0.0  ;;  %v4243_v29 = vadd.f32 %v4121_v39, %v16096_v31  ;;  %v4792_v38 = vadd.f32 %v14469_v40, %v4791_v53 }
 0x5c4   : > { %v3882_v57 = vpack.c.bf16 %v3839_v17, %v3838_v42  ;;  %11442 = vmatmul.msk.bf16.gmra.mxu2 %vm489_vm2, %v12619_v19  ;;  %11742 = vmatmul.msk.bf16.gmra.mxu0 %vm489_vm2, %v12657_v13  ;;  %v14542_v16 = vadd.f32 %v5165_v63, %v4243_v29  ;;  %v4884_v34 = vmax.f32 %v4792_v38, 0.0  ;;  %v12620_v29 = vld [vmem:[%s12861_s29 + $0x5b0] sm:$0xff] }
 0x5c5   : > { %v5170_v54 = vpop.f32.mrf.mxu1 }
 0x5c6   : > { %16097 = vst [vmem:[#allocation12_spill] sm:$0xff] %v14542_v16  ;;  %10917 = vmatmul.msk.bf16.gmra.mxu3 %vm1581_vm3, %v3882_v57  ;;  %v12658_v57 = vld [vmem:[%s12861_s29 + $0x6d0] sm:$0xff] }
 0x5c7   : > { %v3747_v6 = vpop.f32.mrf.mxu2 }
 0x5c8   : > { %v3748_v13 = vadd.f32 %v14469_v40, %v3747_v6 }
 0x5c9   : > { %v4124_v62 = vpop.f32.mrf.mxu3  ;;  %v4793_v50 = vpop.f32.mrf.mxu0 }
 0x5ca   : > { %v4244_v39 = vadd.f32 %v4124_v62, %v16098_v25  ;;  %v4794_v42 = vadd.f32 %v14469_v40, %v4793_v50  ;;  %v3840_v58 = vmax.f32 %v3748_v13, 0.0  ;;  %v16100_v25 = vld [vmem:[#allocation20_spill] sm:$0xff] }
 0x5cc   : > { %v4885_v2 = vmax.f32 %v4794_v42, 0.0  ;;  %v14548_v19 = vadd.f32 %v5168_v44, %v4244_v39 }
 0x5cd   : > { %v5173_v63 = vpop.f32.mrf.mxu1 }
 0x5ce   : > { %16099 = vst [vmem:[#allocation11_spill] sm:$0xff] %v14548_v19  ;;  %v4927_v17 = vpack.c.bf16 %v4885_v2, %v4884_v34 }
 0x5cf   : > { %v3749_v53 = vpop.f32.mrf.mxu2 }
 0x5d0   : > { %v3750_v31 = vadd.f32 %v14469_v40, %v3749_v53  ;;  %11218 = vmatmul.msk.bf16.gmra.mxu1 %vm1581_vm3, %v4927_v17  ;;  %v16102_v53 = vld [vmem:[#allocation21_spill] sm:$0xff] }
 0x5d1   : > { %v4126_v16 = vpop.f32.mrf.mxu3  ;;  %v4796_v38 = vpop.f32.mrf.mxu0 }
 0x5d2   : > { %v3841_v62 = vmax.f32 %v3750_v31, 0.0  ;;  %v4245_v50 = vadd.f32 %v4126_v16, %v16100_v25  ;;  %v4797_v34 = vadd.f32 %v14469_v40, %v4796_v38 }
 0x5d4   : > { %v3883_v42 = vpack.c.bf16 %v3841_v62, %v3840_v58  ;;  %11443 = vmatmul.msk.bf16.gmra.mxu2 %vm489_vm2, %v12620_v29  ;;  %11743 = vmatmul.msk.bf16.gmra.mxu0 %vm489_vm2, %v12658_v57  ;;  %v14558_v44 = vadd.f32 %v5170_v54, %v4245_v50  ;;  %v4886_v17 = vmax.f32 %v4797_v34, 0.0  ;;  %v12621_v50 = vld [vmem:[%s12861_s29 + $0x5b8] sm:$0xff] }
 0x5d5   : > { %v5175_v6 = vpop.f32.mrf.mxu1 }
 0x5d6   : > { %16101 = vst [vmem:[#allocation2_spill] sm:$0xff] %v14558_v44  ;;  %10918 = vmatmul.msk.bf16.gmra.mxu3 %vm1581_vm3, %v3883_v42  ;;  %v12659_v42 = vld [vmem:[%s12861_s29 + $0x6d8] sm:$0xff] }
 0x5d7   : > { %v3752_v39 = vpop.f32.mrf.mxu2 }
 0x5d8   : > { %v3753_v57 = vadd.f32 %v14469_v40, %v3752_v39 }
 0x5d9   : > { %v4129_v2 = vpop.f32.mrf.mxu3  ;;  %v4798_v13 = vpop.f32.mrf.mxu0 }
 0x5da   : > { %v4246_v16 = vadd.f32 %v4129_v2, %v16102_v53  ;;  %v4799_v58 = vadd.f32 %v14469_v40, %v4798_v13  ;;  %v3842_v19 = vmax.f32 %v3753_v57, 0.0  ;;  %v16104_v53 = vld [vmem:[#allocation22_spill] sm:$0xff] }
 0x5dc   : > { %v4887_v31 = vmax.f32 %v4799_v58, 0.0  ;;  %v14564_v29 = vadd.f32 %v5173_v63, %v4246_v16 }
 0x5dd   : > { %v5178_v54 = vpop.f32.mrf.mxu1 }
 0x5de   : > { %16103 = vst [vmem:[#allocation19_spill] sm:$0xff] %v14564_v29  ;;  %v4928_v62 = vpack.c.bf16 %v4887_v31, %v4886_v17 }
 0x5df   : > { %v3754_v38 = vpop.f32.mrf.mxu2 }
 0x5e0   : > { %v3755_v25 = vadd.f32 %v14469_v40, %v3754_v38  ;;  %11219 = vmatmul.msk.bf16.gmra.mxu1 %vm1581_vm3, %v4928_v62  ;;  %v16106_v38 = vld [vmem:[#allocation23_spill] sm:$0xff] }
 0x5e1   : > { %v4131_v44 = vpop.f32.mrf.mxu3  ;;  %v4801_v34 = vpop.f32.mrf.mxu0 }
 0x5e2   : > { %v3843_v2 = vmax.f32 %v3755_v25, 0.0  ;;  %v4247_v13 = vadd.f32 %v4131_v44, %v16104_v53  ;;  %v4802_v17 = vadd.f32 %v14469_v40, %v4801_v34 }
 0x5e4   : > { %v3884_v58 = vpack.c.bf16 %v3843_v2, %v3842_v19  ;;  %11444 = vmatmul.msk.bf16.gmra.mxu2 %vm489_vm2, %v12621_v50  ;;  %11744 = vmatmul.msk.bf16.gmra.mxu0 %vm489_vm2, %v12659_v42  ;;  %v14574_v63 = vadd.f32 %v5175_v6, %v4247_v13  ;;  %v4888_v62 = vmax.f32 %v4802_v17, 0.0  ;;  %v12622_v13 = vld [vmem:[%s12861_s29 + $0x5c0] sm:$0xff] }
 0x5e5   : > { %v5180_v39 = vpop.f32.mrf.mxu1 }
 0x5e6   : > { %16105 = vst [vmem:[#allocation20_spill] sm:$0xff] %v14574_v63  ;;  %10919 = vmatmul.msk.bf16.gmra.mxu3 %vm1581_vm3, %v3884_v58  ;;  %v12660_v58 = vld [vmem:[%s12861_s29 + $0x6e0] sm:$0xff] }
 0x5e7   : > { %v3757_v16 = vpop.f32.mrf.mxu2 }
 0x5e8   : > { %v3758_v42 = vadd.f32 %v14469_v40, %v3757_v16 }
 0x5e9   : > { %v4134_v31 = vpop.f32.mrf.mxu3  ;;  %v4803_v57 = vpop.f32.mrf.mxu0 }
 0x5ea   : > { %v4248_v44 = vadd.f32 %v4134_v31, %v16106_v38  ;;  %v4804_v19 = vadd.f32 %v14469_v40, %v4803_v57  ;;  %v3844_v29 = vmax.f32 %v3758_v42, 0.0  ;;  %v16108_v38 = vld [vmem:[#allocation24_spill] sm:$0xff] }
 0x5ec   : > { %v4889_v25 = vmax.f32 %v4804_v19, 0.0  ;;  %v14580_v50 = vadd.f32 %v5178_v54, %v4248_v44 }
 0x5ed   : > { %v5183_v6 = vpop.f32.mrf.mxu1 }
 0x5ee   : > { %16107 = vst [vmem:[#allocation21_spill] sm:$0xff] %v14580_v50  ;;  %v4929_v2 = vpack.c.bf16 %v4889_v25, %v4888_v62 }
 0x5ef   : > { %v3759_v34 = vpop.f32.mrf.mxu2 }
 0x5f0   : > { %v3760_v53 = vadd.f32 %v14469_v40, %v3759_v34  ;;  %11220 = vmatmul.msk.bf16.gmra.mxu1 %vm1581_vm3, %v4929_v2  ;;  %v16110_v34 = vld [vmem:[#allocation25_spill] sm:$0xff] }
 0x5f1   : > { %v4136_v63 = vpop.f32.mrf.mxu3  ;;  %v4806_v17 = vpop.f32.mrf.mxu0 }
 0x5f2   : > { %v3845_v31 = vmax.f32 %v3760_v53, 0.0  ;;  %v4249_v57 = vadd.f32 %v4136_v63, %v16108_v38  ;;  %v4807_v62 = vadd.f32 %v14469_v40, %v4806_v17 }
 0x5f4   : > { %v3885_v19 = vpack.c.bf16 %v3845_v31, %v3844_v29  ;;  %11445 = vmatmul.msk.bf16.gmra.mxu2 %vm489_vm2, %v12622_v13  ;;  %11745 = vmatmul.msk.bf16.gmra.mxu0 %vm489_vm2, %v12660_v58  ;;  %v14590_v54 = vadd.f32 %v5180_v39, %v4249_v57  ;;  %v4890_v2 = vmax.f32 %v4807_v62, 0.0  ;;  %v12623_v57 = vld [vmem:[%s12861_s29 + $0x5c8] sm:$0xff] }
 0x5f5   : > { %v5185_v16 = vpop.f32.mrf.mxu1 }
 0x5f6   : > { %16109 = vst [vmem:[#allocation22_spill] sm:$0xff] %v14590_v54  ;;  %10920 = vmatmul.msk.bf16.gmra.mxu3 %vm1581_vm3, %v3885_v19  ;;  %v12661_v19 = vld [vmem:[%s12861_s29 + $0x6e8] sm:$0xff] }
 0x5f7   : > { %v3762_v44 = vpop.f32.mrf.mxu2 }
 0x5f8   : > { %v3763_v58 = vadd.f32 %v14469_v40, %v3762_v44 }
 0x5f9   : > { %v4139_v25 = vpop.f32.mrf.mxu3  ;;  %v4808_v42 = vpop.f32.mrf.mxu0 }
 0x5fa   : > { %v4250_v63 = vadd.f32 %v4139_v25, %v16110_v34  ;;  %v4809_v29 = vadd.f32 %v14469_v40, %v4808_v42  ;;  %v3846_v50 = vmax.f32 %v3763_v58, 0.0  ;;  %v16112_v34 = vld [vmem:[#allocation26_spill] sm:$0xff] }
 0x5fc   : > { %v4891_v53 = vmax.f32 %v4809_v29, 0.0  ;;  %v14596_v13 = vadd.f32 %v5183_v6, %v4250_v63 }
 0x5fd   : > { %v5188_v39 = vpop.f32.mrf.mxu1 }
 0x5fe   : > { %16111 = vst [vmem:[#allocation23_spill] sm:$0xff] %v14596_v13  ;;  %v4930_v31 = vpack.c.bf16 %v4891_v53, %v4890_v2 }
 0x5ff   : > { %v3764_v17 = vpop.f32.mrf.mxu2 }
 0x600   : > { %v3765_v38 = vadd.f32 %v14469_v40, %v3764_v17  ;;  %11221 = vmatmul.msk.bf16.gmra.mxu1 %vm1581_vm3, %v4930_v31  ;;  %v16114_v17 = vld [vmem:[#allocation27_spill] sm:$0xff] }
 0x601   : > { %v4141_v54 = vpop.f32.mrf.mxu3  ;;  %v4811_v62 = vpop.f32.mrf.mxu0 }
 0x602   : > { %v3847_v25 = vmax.f32 %v3765_v38, 0.0  ;;  %v4251_v42 = vadd.f32 %v4141_v54, %v16112_v34  ;;  %v4812_v2 = vadd.f32 %v14469_v40, %v4811_v62 }
 0x604   : > { %v3886_v29 = vpack.c.bf16 %v3847_v25, %v3846_v50  ;;  %11446 = vmatmul.msk.bf16.gmra.mxu2 %vm489_vm2, %v12623_v57  ;;  %11746 = vmatmul.msk.bf16.gmra.mxu0 %vm489_vm2, %v12661_v19  ;;  %v14606_v6 = vadd.f32 %v5185_v16, %v4251_v42  ;;  %v4892_v31 = vmax.f32 %v4812_v2, 0.0  ;;  %v12624_v42 = vld [vmem:[%s12861_s29 + $0x5d0] sm:$0xff] }
 0x605   : > { %v5190_v44 = vpop.f32.mrf.mxu1 }
 0x606   : > { %16113 = vst [vmem:[#allocation24_spill] sm:$0xff] %v14606_v6  ;;  %10921 = vmatmul.msk.bf16.gmra.mxu3 %vm1581_vm3, %v3886_v29  ;;  %v12662_v29 = vld [vmem:[%s12861_s29 + $0x6f0] sm:$0xff] }
 0x607   : > { %v3767_v63 = vpop.f32.mrf.mxu2 }
 0x608   : > { %v3768_v19 = vadd.f32 %v14469_v40, %v3767_v63 }
 0x609   : > { %v4144_v53 = vpop.f32.mrf.mxu3  ;;  %v4813_v58 = vpop.f32.mrf.mxu0 }
 0x60a   : > { %v4252_v54 = vadd.f32 %v4144_v53, %v16114_v17  ;;  %v4814_v50 = vadd.f32 %v14469_v40, %v4813_v58  ;;  %v3848_v13 = vmax.f32 %v3768_v19, 0.0  ;;  %v16116_v17 = vld [vmem:[#allocation28_spill] sm:$0xff] }
 0x60c   : > { %v4893_v38 = vmax.f32 %v4814_v50, 0.0  ;;  %v14612_v57 = vadd.f32 %v5188_v39, %v4252_v54 }
 0x60d   : > { %v5193_v16 = vpop.f32.mrf.mxu1 }
 0x60e   : > { %16115 = vst [vmem:[#allocation25_spill] sm:$0xff] %v14612_v57  ;;  %v4931_v25 = vpack.c.bf16 %v4893_v38, %v4892_v31 }
 0x60f   : > { %v3769_v62 = vpop.f32.mrf.mxu2 }
 0x610   : > { %v3770_v34 = vadd.f32 %v14469_v40, %v3769_v62  ;;  %11222 = vmatmul.msk.bf16.gmra.mxu1 %vm1581_vm3, %v4931_v25  ;;  %v16118_v62 = vld [vmem:[#allocation29_spill] sm:$0xff] }
 0x611   : > { %v4146_v6 = vpop.f32.mrf.mxu3  ;;  %v4816_v2 = vpop.f32.mrf.mxu0 }
 0x612   : > { %v3849_v53 = vmax.f32 %v3770_v34, 0.0  ;;  %v4253_v58 = vadd.f32 %v4146_v6, %v16116_v17  ;;  %v4817_v31 = vadd.f32 %v14469_v40, %v4816_v2 }
 0x614   : > { %v3887_v50 = vpack.c.bf16 %v3849_v53, %v3848_v13  ;;  %11447 = vmatmul.msk.bf16.gmra.mxu2 %vm489_vm2, %v12624_v42  ;;  %11747 = vmatmul.msk.bf16.gmra.mxu0 %vm489_vm2, %v12662_v29  ;;  %v14622_v39 = vadd.f32 %v5190_v44, %v4253_v58  ;;  %v4894_v25 = vmax.f32 %v4817_v31, 0.0  ;;  %v12625_v58 = vld [vmem:[%s12861_s29 + $0x5d8] sm:$0xff] }
 0x615   : > { %v5195_v63 = vpop.f32.mrf.mxu1 }
 0x616   : > { %16117 = vst [vmem:[#allocation26_spill] sm:$0xff] %v14622_v39  ;;  %10922 = vmatmul.msk.bf16.gmra.mxu3 %vm1581_vm3, %v3887_v50  ;;  %v12663_v50 = vld [vmem:[%s12861_s29 + $0x6f8] sm:$0xff] }
 0x617   : > { %v3772_v54 = vpop.f32.mrf.mxu2 }
 0x618   : > { %v3773_v29 = vadd.f32 %v14469_v40, %v3772_v54 }
 0x619   : > { %v4149_v38 = vpop.f32.mrf.mxu3  ;;  %v4818_v19 = vpop.f32.mrf.mxu0 }
 0x61a   : > { %v4254_v6 = vadd.f32 %v4149_v38, %v16118_v62  ;;  %v4819_v13 = vadd.f32 %v14469_v40, %v4818_v19  ;;  %v3850_v57 = vmax.f32 %v3773_v29, 0.0 }
 0x61c   : > { %v4895_v34 = vmax.f32 %v4819_v13, 0.0  ;;  %v14628_v42 = vadd.f32 %v5193_v16, %v4254_v6  ;;  %v12731_v6 = vld [vmem:[%s16007_s3 + $0x78] sm:$0xff] }
 0x61d   : > { %v5198_v44 = vpop.f32.mrf.mxu1  ;;  %8197 = vmatpush.bf16.msra.mxu3 %v12731_v6 }
 0x61e   : > { %v4932_v53 = vpack.c.bf16 %v4895_v34, %v4894_v25  ;;  %v16120_v34 = vld [vmem:[#allocation30_spill] sm:$0xff] }
 0x61f   : > { %v3774_v2 = vpop.f32.mrf.mxu2 }
 0x620   : > { %v3775_v17 = vadd.f32 %v14469_v40, %v3774_v2  ;;  %11223 = vmatmul.msk.bf16.gmra.mxu1 %vm1581_vm3, %v4932_v53 }
 0x621   : > { %v4151_v39 = vpop.f32.mrf.mxu3  ;;  %v4821_v31 = vpop.f32.mrf.mxu0 }
 0x622   : > { %v3851_v38 = vmax.f32 %v3775_v17, 0.0  ;;  %v4255_v19 = vadd.f32 %v4151_v39, %v14019_v61  ;;  %v4822_v25 = vadd.f32 %v14469_v40, %v4821_v31  ;;  %v12769_v31 = vld [vmem:[%s16007_s3 + $0x88] sm:$0xff] }
 0x623   : > { %9241 = vmatpush.bf16.msra.mxu1 %v12769_v31 }
 0x624   : > { %v3888_v62 = vpack.c.bf16 %v3851_v38, %v3850_v57  ;;  %11448 = vmatmul.msk.bf16.gmra.mxu2 %vm489_vm2, %v12625_v58  ;;  %11748 = vmatmul.msk.bf16.gmra.mxu0 %vm489_vm2, %v12663_v50  ;;  %v14638_v16 = vadd.f32 %v5195_v63, %v4255_v19  ;;  %v4896_v39 = vmax.f32 %v4822_v25, 0.0  ;;  %v12664_v25 = vld [vmem:[%s12861_s29 + $0x700] sm:$0xff] }
 0x625   : > { %v5200_v54 = vpop.f32.mrf.mxu1 }
 0x626   : > { %16119 = vst [vmem:[#allocation27_spill] sm:$0xff] %v14638_v16  ;;  %10923 = vmatmul.msk.bf16.gmra.mxu3 %vm1581_vm3, %v3888_v62  ;;  %v12626_v62 = vld [vmem:[%s12861_s29 + $0x5e0] sm:$0xff] }
 0x627   : > { %v3777_v13 = vpop.f32.mrf.mxu2 }
 0x628   : > { %v3778_v58 = vadd.f32 %v14469_v40, %v3777_v13 }
 0x629   : > { %v4154_v61 = vpop.f32.mrf.mxu3  ;;  %v4823_v57 = vpop.f32.mrf.mxu0 }
 0x62a   : > { %v4256_v29 = vadd.f32 %v4154_v61, %v16120_v34  ;;  %v4824_v63 = vadd.f32 %v14469_v40, %v4823_v57  ;;  %v16122_v34 = vld [vmem:[#allocation31_spill] sm:$0xff] }
 0x62c   : > { %v4897_v53 = vmax.f32 %v4824_v63, 0.0  ;;  %v14647_v2 = vadd.f32 %v5198_v44, %v4256_v29  ;;  %v3852_v44 = vmax.f32 %v3778_v58, 0.0 }
 0x62d   : > { %v5203_v17 = vpop.f32.mrf.mxu1 }
 0x62e   : > { %16121 = vst [vmem:[#allocation28_spill] sm:$0xff] %v14647_v2  ;;  %v4933_v50 = vpack.c.bf16 %v4897_v53, %v4896_v39 }
 0x62f   : > { %v3779_v38 = vpop.f32.mrf.mxu2 }
 0x630   : > { %v3780_v19 = vadd.f32 %v14469_v40, %v3779_v38  ;;  %11224 = vmatmul.msk.bf16.gmra.mxu1 %vm1581_vm3, %v4933_v50 }
 0x631   : > { %v4156_v6 = vpop.f32.mrf.mxu3  ;;  %v6734_v61 = vpop.f32.mrf.mxu0 }
 0x632   : > { %v3853_v57 = vmax.f32 %v3780_v19, 0.0  ;;  %v4257_v29 = vadd.f32 %v4156_v6, %v16122_v34  ;;  %v6735_v53 = vadd.f32 %v14469_v40, %v6734_v61  ;;  %v16124_v19 = vld [vmem:[#allocation32_spill] sm:$0xff] }
 0x634   : > { %v3889_v13 = vpack.c.bf16 %v3853_v57, %v3852_v44  ;;  %11449 = vmatmul.msk.bf16.gmra.mxu2 %vm489_vm2, %v12626_v62  ;;  %11749 = vmatmul.msk.bf16.gmra.mxu0 %vm489_vm2, %v12664_v25  ;;  %v14660_v39 = vadd.f32 %v5200_v54, %v4257_v29  ;;  %v6914_v38 = vmax.f32 %v6735_v53, 0.0 }
 0x635   : > { %v5205_v63 = vpop.f32.mrf.mxu1 }
 0x636   : > { %16123 = vst [vmem:[#allocation29_spill] sm:$0xff] %v14660_v39  ;;  %10924 = vmatmul.msk.bf16.gmra.mxu3 %vm1581_vm3, %v3889_v13  ;;  %v12627_v13 = vld [vmem:[%s12861_s29 + $0x5e8] sm:$0xff] }
 0x637   : > { %v5690_v50 = vpop.f32.mrf.mxu2  ;;  %v12665_v39 = vld [vmem:[%s12861_s29 + $0x708] sm:$0xff] }
 0x638   : > { %v5691_v25 = vadd.f32 %v14469_v40, %v5690_v50 }
 0x639   : > { %v4159_v31 = vpop.f32.mrf.mxu3  ;;  %v6736_v58 = vpop.f32.mrf.mxu0 }
 0x63a   : > { %v4258_v6 = vadd.f32 %v4159_v31, %v16124_v19  ;;  %v6737_v44 = vadd.f32 %v14469_v40, %v6736_v58  ;;  %v5870_v16 = vmax.f32 %v5691_v25, 0.0  ;;  %v16125_v19 = vld [vmem:[#allocation33_spill] sm:$0xff] }
 0x63c   : > { %v6915_v62 = vmax.f32 %v6737_v44, 0.0  ;;  %v14666_v57 = vadd.f32 %v5203_v17, %v4258_v6 }
 0x63d   : > { %v5208_v54 = vpop.f32.mrf.mxu1 }
 0x63e   : > { %v6986_v34 = vpack.c.bf16 %v6915_v62, %v6914_v38 }
 0x63f   : > { %v5692_v61 = vpop.f32.mrf.mxu2 }
 0x640   : > { %v5693_v29 = vadd.f32 %v14469_v40, %v5692_v61  ;;  %11789 = vmatmul.msk.bf16.vlgmr.msrb.gmra.mxu1 %vm1581_vm3, %v6986_v34 }
 0x641   : > { %v4161_v2 = vpop.f32.mrf.mxu3  ;;  %v6739_v53 = vpop.f32.mrf.mxu0 }
 0x642   : > { %v5871_v31 = vmax.f32 %v5693_v29, 0.0  ;;  %v4259_v58 = vadd.f32 %v4161_v2, %v16125_v19  ;;  %v6740_v38 = vadd.f32 %v14469_v40, %v6739_v53  ;;  %v12628_v19 = vld [vmem:[%s12861_s29 + $0x5f0] sm:$0xff] }
 0x644   : > { %v5942_v44 = vpack.c.bf16 %v5871_v31, %v5870_v16  ;;  %11450 = vmatmul.msk.bf16.gmra.mxu2 %vm489_vm2, %v12627_v13  ;;  %11750 = vmatmul.msk.bf16.gmra.mxu0 %vm489_vm2, %v12665_v39  ;;  %v14676_v17 = vadd.f32 %v5205_v63, %v4259_v58  ;;  %v6916_v34 = vmax.f32 %v6740_v38, 0.0  ;;  %v12666_v58 = vld [vmem:[%s12861_s29 + $0x710] sm:$0xff] }
 0x645   : > { %v5210_v50 = vpop.f32.mrf.mxu1 }
 0x646   : > { %16126 = vst [vmem:[#allocation30_spill] sm:$0xff] %v14676_v17  ;;  %11489 = vmatmul.msk.bf16.vlgmr.msrb.gmra.mxu3 %vm1581_vm3, %v5942_v44 }
 0x647   : > { %v5695_v6 = vpop.f32.mrf.mxu2 }
 0x648   : > { %v5696_v63 = vadd.f32 %v14469_v40, %v5695_v6 }
 0x649   : > { %v4164_v62 = vpop.f32.mrf.mxu3  ;;  %v6741_v25 = vpop.f32.mrf.mxu0 }
 0x64a   : > { %v4260_v2 = vadd.f32 %v4164_v62, %v14068_v21  ;;  %v6742_v16 = vadd.f32 %v14469_v40, %v6741_v25  ;;  %v5872_v17 = vmax.f32 %v5696_v63, 0.0 }
 0x64c   : > { %v6917_v61 = vmax.f32 %v6742_v16, 0.0  ;;  %v14682_v29 = vadd.f32 %v5208_v54, %v4260_v2 }
 0x64d   : > { %v5213_v39 = vpop.f32.mrf.mxu1 }
 0x64e   : > { %v6987_v13 = vpack.c.bf16 %v6917_v61, %v6916_v34 }
 0x64f   : > { %v5697_v53 = vpop.f32.mrf.mxu2 }
 0x650   : > { %v5698_v31 = vadd.f32 %v14469_v40, %v5697_v53  ;;  %11790 = vmatmul.msk.bf16.gmra.mxu1 %vm1581_vm3, %v6987_v13 }
 0x651   : > { %v4166_v44 = vpop.f32.mrf.mxu3  ;;  %v6744_v38 = vpop.f32.mrf.mxu0 }
 0x652   : > { %v5873_v21 = vmax.f32 %v5698_v31, 0.0  ;;  %v4261_v62 = vadd.f32 %v4166_v44, %v14079_v12  ;;  %v6745_v34 = vadd.f32 %v14469_v40, %v6744_v38  ;;  %v12629_v38 = vld [vmem:[%s12861_s29 + $0x5f8] sm:$0xff] }
 0x654   : > { %v5943_v25 = vpack.c.bf16 %v5873_v21, %v5872_v17  ;;  %11451 = vmatmul.msk.bf16.gmra.mxu2 %vm489_vm2, %v12628_v19  ;;  %11751 = vmatmul.msk.bf16.gmra.mxu0 %vm489_vm2, %v12666_v58  ;;  %v14692_v54 = vadd.f32 %v5210_v50, %v4261_v62  ;;  %v6918_v63 = vmax.f32 %v6745_v34, 0.0  ;;  %v12667_v21 = vld [vmem:[%s12861_s29 + $0x718] sm:$0xff] }
 0x655   : > { %v5215_v6 = vpop.f32.mrf.mxu1 }
 0x656   : > { %11490 = vmatmul.msk.bf16.gmra.mxu3 %vm1581_vm3, %v5943_v25 }
 0x657   : > { %v5700_v2 = vpop.f32.mrf.mxu2 }
 0x658   : > { %v5701_v31 = vadd.f32 %v14469_v40, %v5700_v2 }
 0x659   : > { %v4169_v16 = vpop.f32.mrf.mxu3  ;;  %v6746_v61 = vpop.f32.mrf.mxu0 }
 0x65a   : > { %v4262_v12 = vadd.f32 %v4169_v16, %v14085_v33  ;;  %v6747_v17 = vadd.f32 %v14469_v40, %v6746_v61  ;;  %v5874_v34 = vmax.f32 %v5701_v31, 0.0 }
 0x65c   : > { %v6919_v13 = vmax.f32 %v6747_v17, 0.0  ;;  %v14698_v53 = vadd.f32 %v5213_v39, %v4262_v12 }
 0x65d   : > { %v5218_v50 = vpop.f32.mrf.mxu1 }
 0x65e   : > { %v6988_v19 = vpack.c.bf16 %v6919_v13, %v6918_v63 }
 0x65f   : > { %v5702_v58 = vpop.f32.mrf.mxu2 }
 0x660   : > { %v5703_v44 = vadd.f32 %v14469_v40, %v5702_v58  ;;  %11791 = vmatmul.msk.bf16.gmra.mxu1 %vm1581_vm3, %v6988_v19 }
 0x661   : > { %v4171_v62 = vpop.f32.mrf.mxu3  ;;  %v6749_v25 = vpop.f32.mrf.mxu0 }
 0x662   : > { %v5875_v33 = vmax.f32 %v5703_v44, 0.0  ;;  %v4263_v16 = vadd.f32 %v4171_v62, %v14096_v23  ;;  %v6750_v63 = vadd.f32 %v14469_v40, %v6749_v25 }
 0x664   : > { %v5944_v61 = vpack.c.bf16 %v5875_v33, %v5874_v34  ;;  %11452 = vmatmul.msk.bf16.gmra.mxu2 %vm489_vm2, %v12629_v38  ;;  %11752 = vmatmul.msk.bf16.gmra.mxu0 %vm489_vm2, %v12667_v21  ;;  %v14708_v39 = vadd.f32 %v5215_v6, %v4263_v16  ;;  %v6920_v31 = vmax.f32 %v6750_v63, 0.0  ;;  %v12630_v34 = vld [vmem:[%s12861_s29 + $0x600] sm:$0xff] }
 0x665   : > { %v5220_v2 = vpop.f32.mrf.mxu1  ;;  %v12668_v33 = vld [vmem:[%s12861_s29 + $0x720] sm:$0xff] }
 0x666   : > { %11491 = vmatmul.msk.bf16.gmra.mxu3 %vm1581_vm3, %v5944_v61 }
 0x667   : > { %v5705_v12 = vpop.f32.mrf.mxu2 }
 0x668   : > { %v5706_v38 = vadd.f32 %v14469_v40, %v5705_v12 }
 0x669   : > { %v4174_v17 = vpop.f32.mrf.mxu3  ;;  %v6751_v13 = vpop.f32.mrf.mxu0 }
 0x66a   : > { %v4264_v23 = vadd.f32 %v4174_v17, %v14102_v0  ;;  %v6752_v19 = vadd.f32 %v14469_v40, %v6751_v13  ;;  %v5876_v63 = vmax.f32 %v5706_v38, 0.0 }
 0x66c   : > { %v6921_v58 = vmax.f32 %v6752_v19, 0.0  ;;  %v14714_v44 = vadd.f32 %v5218_v50, %v4264_v23 }
 0x66d   : > { %v5223_v6 = vpop.f32.mrf.mxu1 }
 0x66e   : > { %v6989_v21 = vpack.c.bf16 %v6921_v58, %v6920_v31 }
 0x66f   : > { %v5707_v62 = vpop.f32.mrf.mxu2 }
 0x670   : > { %v5708_v25 = vadd.f32 %v14469_v40, %v5707_v62  ;;  %11792 = vmatmul.msk.bf16.gmra.mxu1 %vm1581_vm3, %v6989_v21 }
 0x671   : > { %v4176_v16 = vpop.f32.mrf.mxu3  ;;  %v6754_v61 = vpop.f32.mrf.mxu0 }
 0x672   : > { %v5877_v0 = vmax.f32 %v5708_v25, 0.0  ;;  %v4265_v17 = vadd.f32 %v4176_v16, %v14113_v56  ;;  %v6755_v31 = vadd.f32 %v14469_v40, %v6754_v61 }
 0x674   : > { %v5945_v13 = vpack.c.bf16 %v5877_v0, %v5876_v63  ;;  %11453 = vmatmul.msk.bf16.gmra.mxu2 %vm489_vm2, %v12630_v34  ;;  %11753 = vmatmul.msk.bf16.gmra.mxu0 %vm489_vm2, %v12668_v33  ;;  %v14724_v50 = vadd.f32 %v5220_v2, %v4265_v17  ;;  %v6922_v38 = vmax.f32 %v6755_v31, 0.0  ;;  %v12631_v63 = vld [vmem:[%s12861_s29 + $0x608] sm:$0xff] }
 0x675   : > { %v5225_v12 = vpop.f32.mrf.mxu1  ;;  %v12669_v0 = vld [vmem:[%s12861_s29 + $0x728] sm:$0xff] }
 0x676   : > { %11492 = vmatmul.msk.bf16.gmra.mxu3 %vm1581_vm3, %v5945_v13 }
 0x677   : > { %v5710_v23 = vpop.f32.mrf.mxu2 }
 0x678   : > { %v5711_v34 = vadd.f32 %v14469_v40, %v5710_v23 }
 0x679   : > { %v4179_v19 = vpop.f32.mrf.mxu3  ;;  %v6756_v58 = vpop.f32.mrf.mxu0 }
 0x67a   : > { %v4266_v56 = vadd.f32 %v4179_v19, %v14119_v55  ;;  %v6757_v21 = vadd.f32 %v14469_v40, %v6756_v58  ;;  %v5878_v31 = vmax.f32 %v5711_v34, 0.0 }
 0x67c   : > { %v6923_v62 = vmax.f32 %v6757_v21, 0.0  ;;  %v14730_v25 = vadd.f32 %v5223_v6, %v4266_v56 }
 0x67d   : > { %v5228_v2 = vpop.f32.mrf.mxu1 }
 0x67e   : > { %v6990_v33 = vpack.c.bf16 %v6923_v62, %v6922_v38 }
 0x67f   : > { %v5712_v16 = vpop.f32.mrf.mxu2 }
 0x680   : > { %v5713_v61 = vadd.f32 %v14469_v40, %v5712_v16  ;;  %11793 = vmatmul.msk.bf16.gmra.mxu1 %vm1581_vm3, %v6990_v33 }
 0x681   : > { %v4181_v17 = vpop.f32.mrf.mxu3  ;;  %v6759_v13 = vpop.f32.mrf.mxu0 }
 0x682   : > { %v5879_v55 = vmax.f32 %v5713_v61, 0.0  ;;  %v4267_v19 = vadd.f32 %v4181_v17, %v14130_v7  ;;  %v6760_v38 = vadd.f32 %v14469_v40, %v6759_v13 }
 0x684   : > { %v5946_v58 = vpack.c.bf16 %v5879_v55, %v5878_v31  ;;  %11454 = vmatmul.msk.bf16.gmra.mxu2 %vm489_vm2, %v12631_v63  ;;  %11754 = vmatmul.msk.bf16.gmra.mxu0 %vm489_vm2, %v12669_v0  ;;  %v14740_v6 = vadd.f32 %v5225_v12, %v4267_v19  ;;  %v6924_v34 = vmax.f32 %v6760_v38, 0.0  ;;  %v12632_v31 = vld [vmem:[%s12861_s29 + $0x610] sm:$0xff] }
 0x685   : > { %v5230_v23 = vpop.f32.mrf.mxu1  ;;  %v12670_v55 = vld [vmem:[%s12861_s29 + $0x730] sm:$0xff] }
 0x686   : > { %11493 = vmatmul.msk.bf16.gmra.mxu3 %vm1581_vm3, %v5946_v58 }
 0x687   : > { %v5715_v56 = vpop.f32.mrf.mxu2 }
 0x688   : > { %v5716_v63 = vadd.f32 %v14469_v40, %v5715_v56 }
 0x689   : > { %v4184_v21 = vpop.f32.mrf.mxu3  ;;  %v6761_v62 = vpop.f32.mrf.mxu0 }
 0x68a   : > { %v4268_v7 = vadd.f32 %v4184_v21, %v14136_v5  ;;  %v6762_v33 = vadd.f32 %v14469_v40, %v6761_v62  ;;  %v5880_v38 = vmax.f32 %v5716_v63, 0.0 }
 0x68c   : > { %v6925_v16 = vmax.f32 %v6762_v33, 0.0  ;;  %v14746_v61 = vadd.f32 %v5228_v2, %v4268_v7 }
 0x68d   : > { %v5233_v12 = vpop.f32.mrf.mxu1 }
 0x68e   : > { %v6991_v0 = vpack.c.bf16 %v6925_v16, %v6924_v34 }
 0x68f   : > { %v5717_v17 = vpop.f32.mrf.mxu2 }
 0x690   : > { %v5718_v13 = vadd.f32 %v14469_v40, %v5717_v17  ;;  %11794 = vmatmul.msk.bf16.gmra.mxu1 %vm1581_vm3, %v6991_v0 }
 0x691   : > { %v4186_v19 = vpop.f32.mrf.mxu3  ;;  %v6764_v58 = vpop.f32.mrf.mxu0 }
 0x692   : > { %v5881_v5 = vmax.f32 %v5718_v13, 0.0  ;;  %v4269_v21 = vadd.f32 %v4186_v19, %v14147_v51  ;;  %v6765_v34 = vadd.f32 %v14469_v40, %v6764_v58 }
 0x694   : > { %v5947_v62 = vpack.c.bf16 %v5881_v5, %v5880_v38  ;;  %11455 = vmatmul.msk.bf16.gmra.mxu2 %vm489_vm2, %v12632_v31  ;;  %11755 = vmatmul.msk.bf16.gmra.mxu0 %vm489_vm2, %v12670_v55  ;;  %v14756_v2 = vadd.f32 %v5230_v23, %v4269_v21  ;;  %v6926_v63 = vmax.f32 %v6765_v34, 0.0  ;;  %v12633_v38 = vld [vmem:[%s12861_s29 + $0x618] sm:$0xff] }
 0x695   : > { %v5235_v56 = vpop.f32.mrf.mxu1  ;;  %v12671_v5 = vld [vmem:[%s12861_s29 + $0x738] sm:$0xff] }
 0x696   : > { %11494 = vmatmul.msk.bf16.gmra.mxu3 %vm1581_vm3, %v5947_v62 }
 0x697   : > { %v5720_v7 = vpop.f32.mrf.mxu2 }
 0x698   : > { %v5721_v31 = vadd.f32 %v14469_v40, %v5720_v7 }
 0x699   : > { %v4189_v33 = vpop.f32.mrf.mxu3  ;;  %v6766_v16 = vpop.f32.mrf.mxu0 }
 0x69a   : > { %v4270_v51 = vadd.f32 %v4189_v33, %v14153_v35  ;;  %v6767_v0 = vadd.f32 %v14469_v40, %v6766_v16  ;;  %v5882_v34 = vmax.f32 %v5721_v31, 0.0 }
 0x69c   : > { %v6927_v17 = vmax.f32 %v6767_v0, 0.0  ;;  %v14762_v13 = vadd.f32 %v5233_v12, %v4270_v51 }
 0x69d   : > { %v5238_v23 = vpop.f32.mrf.mxu1 }
 0x69e   : > { %v6992_v55 = vpack.c.bf16 %v6927_v17, %v6926_v63 }
 0x69f   : > { %v5722_v19 = vpop.f32.mrf.mxu2 }
 0x6a0   : > { %v5723_v58 = vadd.f32 %v14469_v40, %v5722_v19  ;;  %11795 = vmatmul.msk.bf16.gmra.mxu1 %vm1581_vm3, %v6992_v55  ;;  %v14777_v40 = vld [vmem:[%s16006_s2] ss:$0 sm:$0xff] }
 0x6a1   : > { %v4191_v21 = vpop.f32.mrf.mxu3  ;;  %v6769_v62 = vpop.f32.mrf.mxu0 }
 0x6a2   : > { %v5883_v35 = vmax.f32 %v5723_v58, 0.0  ;;  %v4271_v33 = vadd.f32 %v4191_v21, %v14169_v8  ;;  %v6770_v63 = vadd.f32 %v14777_v40, %v6769_v62 }
 0x6a4   : > { %v5948_v16 = vpack.c.bf16 %v5883_v35, %v5882_v34  ;;  %11456 = vmatmul.msk.bf16.gmra.mxu2 %vm489_vm2, %v12633_v38  ;;  %11756 = vmatmul.msk.bf16.gmra.mxu0 %vm489_vm2, %v12671_v5  ;;  %v14772_v12 = vadd.f32 %v5235_v56, %v4271_v33  ;;  %v6928_v17 = vmax.f32 %v6770_v63, 0.0  ;;  %v12634_v34 = vld [vmem:[%s12861_s29 + $0x620] sm:$0xff] }
 0x6a5   : > { %v5240_v7 = vpop.f32.mrf.mxu1  ;;  %v12672_v35 = vld [vmem:[%s12861_s29 + $0x740] sm:$0xff] }
 0x6a6   : > { %11495 = vmatmul.msk.bf16.gmra.mxu3 %vm1581_vm3, %v5948_v16 }
 0x6a7   : > { %v5725_v8 = vpop.f32.mrf.mxu2 }
 0x6a8   : > { %v5726_v38 = vadd.f32 %v14777_v40, %v5725_v8 }
 0x6a9   : > { %v4194_v51 = vpop.f32.mrf.mxu3  ;;  %v6771_v0 = vpop.f32.mrf.mxu0 }
 0x6aa   : > { %v4272_v31 = vadd.f32 %v4194_v51, %v14175_v28  ;;  %v6772_v56 = vadd.f32 %v14777_v40, %v6771_v0  ;;  %v5884_v63 = vmax.f32 %v5726_v38, 0.0 }
 0x6ac   : > { %v6929_v55 = vmax.f32 %v6772_v56, 0.0  ;;  %v14783_v19 = vadd.f32 %v5238_v23, %v4272_v31 }
 0x6ad   : > { %v5243_v58 = vpop.f32.mrf.mxu1 }
 0x6ae   : > { %v6993_v5 = vpack.c.bf16 %v6929_v55, %v6928_v17 }
 0x6af   : > { %v5727_v21 = vpop.f32.mrf.mxu2 }
 0x6b0   : > { %v5728_v62 = vadd.f32 %v14777_v40, %v5727_v21  ;;  %11796 = vmatmul.msk.bf16.gmra.mxu1 %vm1581_vm3, %v6993_v5 }
 0x6b1   : > { %v4196_v33 = vpop.f32.mrf.mxu3  ;;  %v6774_v16 = vpop.f32.mrf.mxu0 }
 0x6b2   : > { %v5885_v28 = vmax.f32 %v5728_v62, 0.0  ;;  %v4273_v51 = vadd.f32 %v4196_v33, %v14186_v24  ;;  %v6775_v17 = vadd.f32 %v14777_v40, %v6774_v16 }
 0x6b4   : > { %v5949_v0 = vpack.c.bf16 %v5885_v28, %v5884_v63  ;;  %11457 = vmatmul.msk.bf16.gmra.mxu2 %vm489_vm2, %v12634_v34  ;;  %11757 = vmatmul.msk.bf16.gmra.mxu0 %vm489_vm2, %v12672_v35  ;;  %v14793_v23 = vadd.f32 %v5240_v7, %v4273_v51  ;;  %v6930_v38 = vmax.f32 %v6775_v17, 0.0  ;;  %v12635_v63 = vld [vmem:[%s12861_s29 + $0x628] sm:$0xff] }
 0x6b5   : > { %v5245_v8 = vpop.f32.mrf.mxu1  ;;  %v12673_v28 = vld [vmem:[%s12861_s29 + $0x748] sm:$0xff] }
 0x6b6   : > { %11496 = vmatmul.msk.bf16.gmra.mxu3 %vm1581_vm3, %v5949_v0 }
 0x6b7   : > { %v5730_v31 = vpop.f32.mrf.mxu2 }
 0x6b8   : > { %v5731_v34 = vadd.f32 %v14777_v40, %v5730_v31 }
 0x6b9   : > { %v4199_v56 = vpop.f32.mrf.mxu3  ;;  %v6776_v55 = vpop.f32.mrf.mxu0 }
 0x6ba   : > { %v4274_v24 = vadd.f32 %v4199_v56, %v14192_v14  ;;  %v6777_v5 = vadd.f32 %v14777_v40, %v6776_v55  ;;  %v5886_v17 = vmax.f32 %v5731_v34, 0.0 }
 0x6bc   : > { %v6931_v21 = vmax.f32 %v6777_v5, 0.0  ;;  %v14799_v62 = vadd.f32 %v5243_v58, %v4274_v24 }
 0x6bd   : > { %v7156_v7 = vpop.f32.mrf.mxu1 }
 0x6be   : > { %v6994_v35 = vpack.c.bf16 %v6931_v21, %v6930_v38 }
 0x6bf   : > { %v5732_v33 = vpop.f32.mrf.mxu2 }
 0x6c0   : > { %v5733_v16 = vadd.f32 %v14777_v40, %v5732_v33  ;;  %11797 = vmatmul.msk.bf16.gmra.mxu1 %vm1581_vm3, %v6994_v35 }
 0x6c1   : > { %v4201_v51 = vpop.f32.mrf.mxu3  ;;  %v6779_v0 = vpop.f32.mrf.mxu0 }
 0x6c2   : > { %v5887_v14 = vmax.f32 %v5733_v16, 0.0  ;;  %v4275_v56 = vadd.f32 %v4201_v51, %v14202_v22  ;;  %v6780_v38 = vadd.f32 %v14777_v40, %v6779_v0 }
 0x6c4   : > { %v5950_v55 = vpack.c.bf16 %v5887_v14, %v5886_v17  ;;  %11458 = vmatmul.msk.bf16.gmra.mxu2 %vm489_vm2, %v12635_v63  ;;  %11758 = vmatmul.msk.bf16.gmra.mxu0 %vm489_vm2, %v12673_v28  ;;  %v14809_v58 = vadd.f32 %v5245_v8, %v4275_v56  ;;  %v6932_v34 = vmax.f32 %v6780_v38, 0.0  ;;  %v12636_v17 = vld [vmem:[%s12861_s29 + $0x630] sm:$0xff] }
 0x6c5   : > { %v7158_v31 = vpop.f32.mrf.mxu1  ;;  %v12674_v14 = vld [vmem:[%s12861_s29 + $0x750] sm:$0xff] }
 0x6c6   : > { %11497 = vmatmul.msk.bf16.gmra.mxu3 %vm1581_vm3, %v5950_v55 }
 0x6c7   : > { %v5735_v24 = vpop.f32.mrf.mxu2 }
 0x6c8   : > { %v5736_v63 = vadd.f32 %v14777_v40, %v5735_v24 }
 0x6c9   : > { %v6112_v5 = vpop.f32.mrf.mxu3  ;;  %v6781_v21 = vpop.f32.mrf.mxu0 }
 0x6ca   : > { %v6292_v22 = vadd.f32 %v6112_v5, %v14217_v47  ;;  %v6782_v35 = vadd.f32 %v14777_v40, %v6781_v21  ;;  %v5888_v38 = vmax.f32 %v5736_v63, 0.0 }
 0x6cc   : > { %v6933_v33 = vmax.f32 %v6782_v35, 0.0  ;;  %v14815_v16 = vadd.f32 %v7156_v7, %v6292_v22 }
 0x6cd   : > { %v7161_v8 = vpop.f32.mrf.mxu1 }
 0x6ce   : > { %v6995_v28 = vpack.c.bf16 %v6933_v33, %v6932_v34 }
 0x6cf   : > { %v5737_v51 = vpop.f32.mrf.mxu2 }
 0x6d0   : > { %v5738_v0 = vadd.f32 %v14777_v40, %v5737_v51  ;;  %11798 = vmatmul.msk.bf16.gmra.mxu1 %vm1581_vm3, %v6995_v28 }
 0x6d1   : > { %v6114_v56 = vpop.f32.mrf.mxu3  ;;  %v6784_v55 = vpop.f32.mrf.mxu0 }
 0x6d2   : > { %v5889_v47 = vmax.f32 %v5738_v0, 0.0  ;;  %v6293_v5 = vadd.f32 %v6114_v56, %v14227_v43  ;;  %v6785_v34 = vadd.f32 %v14777_v40, %v6784_v55 }
 0x6d4   : > { %v5951_v21 = vpack.c.bf16 %v5889_v47, %v5888_v38  ;;  %11459 = vmatmul.msk.bf16.gmra.mxu2 %vm489_vm2, %v12636_v17  ;;  %11759 = vmatmul.msk.bf16.gmra.mxu0 %vm489_vm2, %v12674_v14  ;;  %v14825_v7 = vadd.f32 %v7158_v31, %v6293_v5  ;;  %v6934_v63 = vmax.f32 %v6785_v34, 0.0  ;;  %v12637_v38 = vld [vmem:[%s12861_s29 + $0x638] sm:$0xff] }
 0x6d5   : > { %v7163_v24 = vpop.f32.mrf.mxu1  ;;  %v12675_v47 = vld [vmem:[%s12861_s29 + $0x758] sm:$0xff] }
 0x6d6   : > { %11498 = vmatmul.msk.bf16.gmra.mxu3 %vm1581_vm3, %v5951_v21 }
 0x6d7   : > { %v5740_v22 = vpop.f32.mrf.mxu2 }
 0x6d8   : > { %v5741_v17 = vadd.f32 %v14777_v40, %v5740_v22 }
 0x6d9   : > { %v6117_v35 = vpop.f32.mrf.mxu3  ;;  %v6786_v33 = vpop.f32.mrf.mxu0 }
 0x6da   : > { %v6294_v43 = vadd.f32 %v6117_v35, %v14233_v11  ;;  %v6787_v28 = vadd.f32 %v14777_v40, %v6786_v33  ;;  %v5890_v34 = vmax.f32 %v5741_v17, 0.0 }
 0x6dc   : > { %v6935_v51 = vmax.f32 %v6787_v28, 0.0  ;;  %v14831_v0 = vadd.f32 %v7161_v8, %v6294_v43 }
 0x6dd   : > { %v7166_v31 = vpop.f32.mrf.mxu1 }
 0x6de   : > { %v6996_v14 = vpack.c.bf16 %v6935_v51, %v6934_v63 }
 0x6df   : > { %v5742_v56 = vpop.f32.mrf.mxu2 }
 0x6e0   : > { %v5743_v55 = vadd.f32 %v14777_v40, %v5742_v56  ;;  %11799 = vmatmul.msk.bf16.gmra.mxu1 %vm1581_vm3, %v6996_v14 }
 0x6e1   : > { %v6119_v5 = vpop.f32.mrf.mxu3  ;;  %v6789_v21 = vpop.f32.mrf.mxu0 }
 0x6e2   : > { %v5891_v11 = vmax.f32 %v5743_v55, 0.0  ;;  %v6295_v35 = vadd.f32 %v6119_v5, %v14243_v45  ;;  %v6790_v63 = vadd.f32 %v14777_v40, %v6789_v21 }
 0x6e4   : > { %v5952_v33 = vpack.c.bf16 %v5891_v11, %v5890_v34  ;;  %11460 = vmatmul.msk.bf16.gmra.mxu2 %vm489_vm2, %v12637_v38  ;;  %11760 = vmatmul.msk.bf16.gmra.mxu0 %vm489_vm2, %v12675_v47  ;;  %v14841_v8 = vadd.f32 %v7163_v24, %v6295_v35  ;;  %v6936_v17 = vmax.f32 %v6790_v63, 0.0  ;;  %v12638_v34 = vld [vmem:[%s12861_s29 + $0x640] sm:$0xff] }
 0x6e5   : > { %v7168_v22 = vpop.f32.mrf.mxu1  ;;  %v12676_v11 = vld [vmem:[%s12861_s29 + $0x760] sm:$0xff] }
 0x6e6   : > { %11499 = vmatmul.msk.bf16.gmra.mxu3 %vm1581_vm3, %v5952_v33 }
 0x6e7   : > { %v5745_v43 = vpop.f32.mrf.mxu2 }
 0x6e8   : > { %v5746_v38 = vadd.f32 %v14777_v40, %v5745_v43 }
 0x6e9   : > { %v6122_v28 = vpop.f32.mrf.mxu3  ;;  %v6791_v51 = vpop.f32.mrf.mxu0 }
 0x6ea   : > { %v6296_v45 = vadd.f32 %v6122_v28, %v14249_v32  ;;  %v6792_v14 = vadd.f32 %v14777_v40, %v6791_v51  ;;  %v5892_v63 = vmax.f32 %v5746_v38, 0.0 }
 0x6ec   : > { %v6937_v56 = vmax.f32 %v6792_v14, 0.0  ;;  %v14847_v55 = vadd.f32 %v7166_v31, %v6296_v45 }
 0x6ed   : > { %v7171_v24 = vpop.f32.mrf.mxu1 }
 0x6ee   : > { %v6997_v47 = vpack.c.bf16 %v6937_v56, %v6936_v17 }
 0x6ef   : > { %v5747_v5 = vpop.f32.mrf.mxu2 }
 0x6f0   : > { %v5748_v21 = vadd.f32 %v14777_v40, %v5747_v5  ;;  %11800 = vmatmul.msk.bf16.gmra.mxu1 %vm1581_vm3, %v6997_v47 }
 0x6f1   : > { %v6124_v35 = vpop.f32.mrf.mxu3  ;;  %v6794_v33 = vpop.f32.mrf.mxu0 }
 0x6f2   : > { %v5893_v32 = vmax.f32 %v5748_v21, 0.0  ;;  %v6297_v28 = vadd.f32 %v6124_v35, %v14259_v3  ;;  %v6795_v17 = vadd.f32 %v14777_v40, %v6794_v33 }
 0x6f4   : > { %v5953_v51 = vpack.c.bf16 %v5893_v32, %v5892_v63  ;;  %11461 = vmatmul.msk.bf16.gmra.mxu2 %vm489_vm2, %v12638_v34  ;;  %11761 = vmatmul.msk.bf16.gmra.mxu0 %vm489_vm2, %v12676_v11  ;;  %v14857_v31 = vadd.f32 %v7168_v22, %v6297_v28  ;;  %v6938_v38 = vmax.f32 %v6795_v17, 0.0  ;;  %v12639_v63 = vld [vmem:[%s12861_s29 + $0x648] sm:$0xff] }
 0x6f5   : > { %v7173_v43 = vpop.f32.mrf.mxu1  ;;  %v12677_v32 = vld [vmem:[%s12861_s29 + $0x768] sm:$0xff] }
 0x6f6   : > { %11500 = vmatmul.msk.bf16.gmra.mxu3 %vm1581_vm3, %v5953_v51 }
 0x6f7   : > { %v5750_v45 = vpop.f32.mrf.mxu2 }
 0x6f8   : > { %v5751_v34 = vadd.f32 %v14777_v40, %v5750_v45 }
 0x6f9   : > { %v6127_v14 = vpop.f32.mrf.mxu3  ;;  %v6796_v56 = vpop.f32.mrf.mxu0 }
 0x6fa   : > { %v6298_v3 = vadd.f32 %v6127_v14, %v14265_v52  ;;  %v6797_v47 = vadd.f32 %v14777_v40, %v6796_v56  ;;  %v5894_v17 = vmax.f32 %v5751_v34, 0.0 }
 0x6fc   : > { %v6939_v5 = vmax.f32 %v6797_v47, 0.0  ;;  %v14863_v21 = vadd.f32 %v7171_v24, %v6298_v3 }
 0x6fd   : > { %v7176_v22 = vpop.f32.mrf.mxu1 }
 0x6fe   : > { %v6998_v11 = vpack.c.bf16 %v6939_v5, %v6938_v38 }
 0x6ff   : > { %v5752_v35 = vpop.f32.mrf.mxu2 }
 0x700   : > { %v5753_v33 = vadd.f32 %v14777_v40, %v5752_v35  ;;  %11801 = vmatmul.msk.bf16.gmra.mxu1 %vm1581_vm3, %v6998_v11 }
 0x701   : > { %v6129_v28 = vpop.f32.mrf.mxu3  ;;  %v6799_v51 = vpop.f32.mrf.mxu0 }
 0x702   : > { %v5895_v52 = vmax.f32 %v5753_v33, 0.0  ;;  %v6299_v14 = vadd.f32 %v6129_v28, %v14275_v37  ;;  %v6800_v38 = vadd.f32 %v14777_v40, %v6799_v51 }
 0x704   : > { %v5954_v56 = vpack.c.bf16 %v5895_v52, %v5894_v17  ;;  %11462 = vmatmul.msk.bf16.gmra.mxu2 %vm489_vm2, %v12639_v63  ;;  %11762 = vmatmul.msk.bf16.gmra.mxu0 %vm489_vm2, %v12677_v32  ;;  %v14873_v24 = vadd.f32 %v7173_v43, %v6299_v14  ;;  %v6940_v34 = vmax.f32 %v6800_v38, 0.0  ;;  %v12640_v17 = vld [vmem:[%s12861_s29 + $0x650] sm:$0xff] }
 0x705   : > { %v7178_v45 = vpop.f32.mrf.mxu1  ;;  %v12678_v52 = vld [vmem:[%s12861_s29 + $0x770] sm:$0xff] }
 0x706   : > { %11501 = vmatmul.msk.bf16.gmra.mxu3 %vm1581_vm3, %v5954_v56 }
 0x707   : > { %v5755_v3 = vpop.f32.mrf.mxu2 }
 0x708   : > { %v5756_v63 = vadd.f32 %v14777_v40, %v5755_v3 }
 0x709   : > { %v6132_v47 = vpop.f32.mrf.mxu3  ;;  %v6801_v5 = vpop.f32.mrf.mxu0 }
 0x70a   : > { %v6300_v37 = vadd.f32 %v6132_v47, %v14281_v41  ;;  %v6802_v11 = vadd.f32 %v14777_v40, %v6801_v5  ;;  %v5896_v38 = vmax.f32 %v5756_v63, 0.0 }
 0x70c   : > { %v6941_v35 = vmax.f32 %v6802_v11, 0.0  ;;  %v14879_v33 = vadd.f32 %v7176_v22, %v6300_v37 }
 0x70d   : > { %v7181_v43 = vpop.f32.mrf.mxu1 }
 0x70e   : > { %v6999_v32 = vpack.c.bf16 %v6941_v35, %v6940_v34 }
 0x70f   : > { %v5757_v28 = vpop.f32.mrf.mxu2 }
 0x710   : > { %v5758_v51 = vadd.f32 %v14777_v40, %v5757_v28  ;;  %11802 = vmatmul.msk.bf16.gmra.mxu1 %vm1581_vm3, %v6999_v32 }
 0x711   : > { %v6134_v14 = vpop.f32.mrf.mxu3  ;;  %v6804_v56 = vpop.f32.mrf.mxu0 }
 0x712   : > { %v5897_v41 = vmax.f32 %v5758_v51, 0.0  ;;  %v6301_v47 = vadd.f32 %v6134_v14, %v14291_v9  ;;  %v6805_v34 = vadd.f32 %v14777_v40, %v6804_v56 }
 0x714   : > { %v5955_v5 = vpack.c.bf16 %v5897_v41, %v5896_v38  ;;  %11463 = vmatmul.msk.bf16.gmra.mxu2 %vm489_vm2, %v12640_v17  ;;  %11763 = vmatmul.msk.bf16.gmra.mxu0 %vm489_vm2, %v12678_v52  ;;  %v14889_v22 = vadd.f32 %v7178_v45, %v6301_v47  ;;  %v6942_v63 = vmax.f32 %v6805_v34, 0.0  ;;  %v12641_v38 = vld [vmem:[%s12861_s29 + $0x658] sm:$0xff] }
 0x715   : > { %v7183_v3 = vpop.f32.mrf.mxu1  ;;  %v12679_v41 = vld [vmem:[%s12861_s29 + $0x778] sm:$0xff] }
 0x716   : > { %11502 = vmatmul.msk.bf16.gmra.mxu3 %vm1581_vm3, %v5955_v5 }
 0x717   : > { %v5760_v37 = vpop.f32.mrf.mxu2 }
 0x718   : > { %v5761_v17 = vadd.f32 %v14777_v40, %v5760_v37 }
 0x719   : > { %v6137_v11 = vpop.f32.mrf.mxu3  ;;  %v6806_v35 = vpop.f32.mrf.mxu0 }
 0x71a   : > { %v6302_v9 = vadd.f32 %v6137_v11, %v14297_v15  ;;  %v6807_v32 = vadd.f32 %v14777_v40, %v6806_v35  ;;  %v5898_v34 = vmax.f32 %v5761_v17, 0.0 }
 0x71c   : > { %v6943_v28 = vmax.f32 %v6807_v32, 0.0  ;;  %v14895_v51 = vadd.f32 %v7181_v43, %v6302_v9 }
 0x71d   : > { %v7186_v45 = vpop.f32.mrf.mxu1 }
 0x71e   : > { %v7000_v52 = vpack.c.bf16 %v6943_v28, %v6942_v63 }
 0x71f   : > { %v5762_v14 = vpop.f32.mrf.mxu2 }
 0x720   : > { %v5763_v56 = vadd.f32 %v14777_v40, %v5762_v14  ;;  %11803 = vmatmul.msk.bf16.gmra.mxu1 %vm1581_vm3, %v7000_v52 }
 0x721   : > { %v6139_v47 = vpop.f32.mrf.mxu3  ;;  %v6809_v5 = vpop.f32.mrf.mxu0 }
 0x722   : > { %v5899_v15 = vmax.f32 %v5763_v56, 0.0  ;;  %v6303_v11 = vadd.f32 %v6139_v47, %v14307_v46  ;;  %v6810_v63 = vadd.f32 %v14777_v40, %v6809_v5 }
 0x724   : > { %v5956_v35 = vpack.c.bf16 %v5899_v15, %v5898_v34  ;;  %11464 = vmatmul.msk.bf16.gmra.mxu2 %vm489_vm2, %v12641_v38  ;;  %11764 = vmatmul.msk.bf16.gmra.mxu0 %vm489_vm2, %v12679_v41  ;;  %v14905_v43 = vadd.f32 %v7183_v3, %v6303_v11  ;;  %v6944_v17 = vmax.f32 %v6810_v63, 0.0  ;;  %v12642_v34 = vld [vmem:[%s12861_s29 + $0x660] sm:$0xff] }
 0x725   : > { %v7188_v37 = vpop.f32.mrf.mxu1  ;;  %v12680_v15 = vld [vmem:[%s12861_s29 + $0x780] sm:$0xff] }
 0x726   : > { %11503 = vmatmul.msk.bf16.gmra.mxu3 %vm1581_vm3, %v5956_v35 }
 0x727   : > { %v5765_v9 = vpop.f32.mrf.mxu2 }
 0x728   : > { %v5766_v38 = vadd.f32 %v14777_v40, %v5765_v9 }
 0x729   : > { %v6142_v32 = vpop.f32.mrf.mxu3  ;;  %v6811_v28 = vpop.f32.mrf.mxu0 }
 0x72a   : > { %v6304_v46 = vadd.f32 %v6142_v32, %v14313_v30  ;;  %v6812_v52 = vadd.f32 %v14777_v40, %v6811_v28  ;;  %v5900_v63 = vmax.f32 %v5766_v38, 0.0 }
 0x72c   : > { %v6945_v14 = vmax.f32 %v6812_v52, 0.0  ;;  %v14911_v56 = vadd.f32 %v7186_v45, %v6304_v46 }
 0x72d   : > { %v7191_v3 = vpop.f32.mrf.mxu1 }
 0x72e   : > { %v7001_v41 = vpack.c.bf16 %v6945_v14, %v6944_v17 }
 0x72f   : > { %v5767_v47 = vpop.f32.mrf.mxu2 }
 0x730   : > { %v5768_v5 = vadd.f32 %v14777_v40, %v5767_v47  ;;  %11804 = vmatmul.msk.bf16.gmra.mxu1 %vm1581_vm3, %v7001_v41 }
 0x731   : > { %v6144_v11 = vpop.f32.mrf.mxu3  ;;  %v6814_v35 = vpop.f32.mrf.mxu0 }
 0x732   : > { %v5901_v30 = vmax.f32 %v5768_v5, 0.0  ;;  %v6305_v32 = vadd.f32 %v6144_v11, %v14323_v20  ;;  %v6815_v17 = vadd.f32 %v14777_v40, %v6814_v35 }
 0x734   : > { %v5957_v28 = vpack.c.bf16 %v5901_v30, %v5900_v63  ;;  %11465 = vmatmul.msk.bf16.gmra.mxu2 %vm489_vm2, %v12642_v34  ;;  %11765 = vmatmul.msk.bf16.gmra.mxu0 %vm489_vm2, %v12680_v15  ;;  %v14921_v45 = vadd.f32 %v7188_v37, %v6305_v32  ;;  %v6946_v38 = vmax.f32 %v6815_v17, 0.0  ;;  %v12643_v63 = vld [vmem:[%s12861_s29 + $0x668] sm:$0xff] }
 0x735   : > { %v7193_v9 = vpop.f32.mrf.mxu1  ;;  %v12681_v30 = vld [vmem:[%s12861_s29 + $0x788] sm:$0xff] }
 0x736   : > { %11504 = vmatmul.msk.bf16.gmra.mxu3 %vm1581_vm3, %v5957_v28 }
 0x737   : > { %v5770_v46 = vpop.f32.mrf.mxu2 }
 0x738   : > { %v5771_v34 = vadd.f32 %v14777_v40, %v5770_v46 }
 0x739   : > { %v6147_v52 = vpop.f32.mrf.mxu3  ;;  %v6816_v14 = vpop.f32.mrf.mxu0 }
 0x73a   : > { %v6306_v20 = vadd.f32 %v6147_v52, %v14329_v10  ;;  %v6817_v41 = vadd.f32 %v14777_v40, %v6816_v14  ;;  %v5902_v17 = vmax.f32 %v5771_v34, 0.0 }
 0x73c   : > { %v6947_v47 = vmax.f32 %v6817_v41, 0.0  ;;  %v14927_v5 = vadd.f32 %v7191_v3, %v6306_v20  ;;  %v12730_v20 = vld [vmem:[%s16007_s3 + $0x70] sm:$0xff] }
 0x73d   : > { %v7196_v37 = vpop.f32.mrf.mxu1  ;;  %8198 = vmatpush.bf16.msra.mxu3 %v12730_v20 }
 0x73e   : > { %v7002_v15 = vpack.c.bf16 %v6947_v47, %v6946_v38 }
 0x73f   : > { %v5772_v11 = vpop.f32.mrf.mxu2 }
 0x740   : > { %v5773_v35 = vadd.f32 %v14777_v40, %v5772_v11  ;;  %11805 = vmatmul.msk.bf16.gmra.mxu1 %vm1581_vm3, %v7002_v15 }
 0x741   : > { %v6149_v32 = vpop.f32.mrf.mxu3  ;;  %v6819_v28 = vpop.f32.mrf.mxu0 }
 0x742   : > { %v5903_v10 = vmax.f32 %v5773_v35, 0.0  ;;  %v6307_v52 = vadd.f32 %v6149_v32, %v14339_v36  ;;  %v6820_v38 = vadd.f32 %v14777_v40, %v6819_v28  ;;  %v12768_v28 = vld [vmem:[%s16007_s3 + $0x80] sm:$0xff] }
 0x743   : > { %9242 = vmatpush.bf16.msra.mxu1 %v12768_v28 }
 0x744   : > { %v5958_v14 = vpack.c.bf16 %v5903_v10, %v5902_v17  ;;  %11466 = vmatmul.msk.bf16.gmra.mxu2 %vm489_vm2, %v12643_v63  ;;  %11766 = vmatmul.msk.bf16.gmra.mxu0 %vm489_vm2, %v12681_v30  ;;  %v14937_v3 = vadd.f32 %v7193_v9, %v6307_v52  ;;  %v6948_v34 = vmax.f32 %v6820_v38, 0.0  ;;  %v12644_v52 = vld [vmem:[%s12861_s29 + $0x670] sm:$0xff] }
 0x745   : > { %v7198_v46 = vpop.f32.mrf.mxu1 }
 0x746   : > { %11505 = vmatmul.msk.bf16.gmra.mxu3 %vm1581_vm3, %v5958_v14 }
 0x747   : > { %v5775_v41 = vpop.f32.mrf.mxu2 }
 0x748   : > { %v5776_v30 = vadd.f32 %v14777_v40, %v5775_v41 }
 0x749   : > { %v6152_v36 = vpop.f32.mrf.mxu3  ;;  %v6821_v47 = vpop.f32.mrf.mxu0 }
 0x74a   : > { %v6308_v15 = vadd.f32 %v6152_v36, %v14348_v18  ;;  %v6822_v9 = vadd.f32 %v14777_v40, %v6821_v47  ;;  %v12682_v18 = vld [vmem:[%s12861_s29 + $0x790] sm:$0xff] }
 0x74c   : > { %v6949_v11 = vmax.f32 %v6822_v9, 0.0  ;;  %v14946_v35 = vadd.f32 %v7196_v37, %v6308_v15  ;;  %v5904_v37 = vmax.f32 %v5776_v30, 0.0 }
 0x74d   : > { %v7201_v63 = vpop.f32.mrf.mxu1 }
 0x74e   : > { %v7003_v32 = vpack.c.bf16 %v6949_v11, %v6948_v34 }
 0x74f   : > { %v5777_v17 = vpop.f32.mrf.mxu2 }
 0x750   : > { %v5778_v10 = vadd.f32 %v14777_v40, %v5777_v17  ;;  %11806 = vmatmul.msk.bf16.gmra.mxu1 %vm1581_vm3, %v7003_v32 }
 0x751   : > { %v6154_v14 = vpop.f32.mrf.mxu3  ;;  %v6824_v38 = vpop.f32.mrf.mxu0 }
 0x752   : > { %v5905_v20 = vmax.f32 %v5778_v10, 0.0  ;;  %v6309_v36 = vadd.f32 %v6154_v14, %v14361_v26  ;;  %v6825_v15 = vadd.f32 %v14777_v40, %v6824_v38 }
 0x754   : > { %v5959_v41 = vpack.c.bf16 %v5905_v20, %v5904_v37  ;;  %11467 = vmatmul.msk.bf16.gmra.mxu2 %vm489_vm2, %v12644_v52  ;;  %11767 = vmatmul.msk.bf16.gmra.mxu0 %vm489_vm2, %v12682_v18  ;;  %v14959_v47 = vadd.f32 %v7198_v46, %v6309_v36  ;;  %v6950_v32 = vmax.f32 %v6825_v15, 0.0  ;;  %v12645_v37 = vld [vmem:[%s12861_s29 + $0x678] sm:$0xff] }
 0x755   : > { %v7203_v34 = vpop.f32.mrf.mxu1  ;;  %v12683_v20 = vld [vmem:[%s12861_s29 + $0x798] sm:$0xff] }
 0x756   : > { %11506 = vmatmul.msk.bf16.gmra.mxu3 %vm1581_vm3, %v5959_v41 }
 0x757   : > { %v5780_v9 = vpop.f32.mrf.mxu2 }
 0x758   : > { %v5781_v52 = vadd.f32 %v14777_v40, %v5780_v9 }
 0x759   : > { %v6157_v11 = vpop.f32.mrf.mxu3  ;;  %v6826_v30 = vpop.f32.mrf.mxu0 }
 0x75a   : > { %v6310_v26 = vadd.f32 %v6157_v11, %v14367_v60  ;;  %v6827_v28 = vadd.f32 %v14777_v40, %v6826_v30  ;;  %v5906_v15 = vmax.f32 %v5781_v52, 0.0 }
 0x75c   : > { %v6951_v17 = vmax.f32 %v6827_v28, 0.0  ;;  %v14965_v10 = vadd.f32 %v7201_v63, %v6310_v26 }
 0x75d   : > { %v7206_v46 = vpop.f32.mrf.mxu1 }
 0x75e   : > { %v7004_v18 = vpack.c.bf16 %v6951_v17, %v6950_v32 }
 0x75f   : > { %v5782_v14 = vpop.f32.mrf.mxu2 }
 0x760   : > { %v5783_v38 = vadd.f32 %v14777_v40, %v5782_v14  ;;  %11807 = vmatmul.msk.bf16.gmra.mxu1 %vm1581_vm3, %v7004_v18 }
 0x761   : > { %v6159_v36 = vpop.f32.mrf.mxu3  ;;  %v6829_v41 = vpop.f32.mrf.mxu0 }
 0x762   : > { %v5907_v60 = vmax.f32 %v5783_v38, 0.0  ;;  %v6311_v11 = vadd.f32 %v6159_v36, %v14377_v49  ;;  %v6830_v32 = vadd.f32 %v14777_v40, %v6829_v41 }
 0x764   : > { %v5960_v30 = vpack.c.bf16 %v5907_v60, %v5906_v15  ;;  %11468 = vmatmul.msk.bf16.gmra.mxu2 %vm489_vm2, %v12645_v37  ;;  %11768 = vmatmul.msk.bf16.gmra.mxu0 %vm489_vm2, %v12683_v20  ;;  %v14975_v63 = vadd.f32 %v7203_v34, %v6311_v11  ;;  %v6952_v52 = vmax.f32 %v6830_v32, 0.0  ;;  %v12646_v15 = vld [vmem:[%s12861_s29 + $0x680] sm:$0xff] }
 0x765   : > { %v7208_v9 = vpop.f32.mrf.mxu1  ;;  %v12684_v60 = vld [vmem:[%s12861_s29 + $0x7a0] sm:$0xff] }
 0x766   : > { %11507 = vmatmul.msk.bf16.gmra.mxu3 %vm1581_vm3, %v5960_v30 }
 0x767   : > { %v5785_v26 = vpop.f32.mrf.mxu2 }
 0x768   : > { %v5786_v37 = vadd.f32 %v14777_v40, %v5785_v26 }
 0x769   : > { %v6162_v28 = vpop.f32.mrf.mxu3  ;;  %v6831_v17 = vpop.f32.mrf.mxu0 }
 0x76a   : > { %v6312_v49 = vadd.f32 %v6162_v28, %v14383_v1  ;;  %v6832_v18 = vadd.f32 %v14777_v40, %v6831_v17  ;;  %v5908_v32 = vmax.f32 %v5786_v37, 0.0 }
 0x76c   : > { %v6953_v14 = vmax.f32 %v6832_v18, 0.0  ;;  %v14981_v38 = vadd.f32 %v7206_v46, %v6312_v49 }
 0x76d   : > { %v7211_v34 = vpop.f32.mrf.mxu1 }
 0x76e   : > { %v7005_v20 = vpack.c.bf16 %v6953_v14, %v6952_v52 }
 0x76f   : > { %v5787_v36 = vpop.f32.mrf.mxu2 }
 0x770   : > { %v5788_v41 = vadd.f32 %v14777_v40, %v5787_v36  ;;  %11808 = vmatmul.msk.bf16.gmra.mxu1 %vm1581_vm3, %v7005_v20 }
 0x771   : > { %v6164_v11 = vpop.f32.mrf.mxu3  ;;  %v6834_v30 = vpop.f32.mrf.mxu0 }
 0x772   : > { %v5909_v1 = vmax.f32 %v5788_v41, 0.0  ;;  %v6313_v28 = vadd.f32 %v6164_v11, %v14393_v4  ;;  %v6835_v52 = vadd.f32 %v14777_v40, %v6834_v30 }
 0x774   : > { %v5961_v17 = vpack.c.bf16 %v5909_v1, %v5908_v32  ;;  %11469 = vmatmul.msk.bf16.gmra.mxu2 %vm489_vm2, %v12646_v15  ;;  %11769 = vmatmul.msk.bf16.gmra.mxu0 %vm489_vm2, %v12684_v60  ;;  %v14991_v46 = vadd.f32 %v7208_v9, %v6313_v28  ;;  %v6954_v37 = vmax.f32 %v6835_v52, 0.0  ;;  %v12647_v32 = vld [vmem:[%s12861_s29 + $0x688] sm:$0xff] }
 0x775   : > { %v7213_v26 = vpop.f32.mrf.mxu1  ;;  %v12685_v1 = vld [vmem:[%s12861_s29 + $0x7a8] sm:$0xff] }
 0x776   : > { %11508 = vmatmul.msk.bf16.gmra.mxu3 %vm1581_vm3, %v5961_v17 }
 0x777   : > { %v5790_v49 = vpop.f32.mrf.mxu2 }
 0x778   : > { %v5791_v15 = vadd.f32 %v14777_v40, %v5790_v49 }
 0x779   : > { %v6167_v18 = vpop.f32.mrf.mxu3  ;;  %v6836_v14 = vpop.f32.mrf.mxu0 }
 0x77a   : > { %v6314_v4 = vadd.f32 %v6167_v18, %v14399_v27  ;;  %v6837_v20 = vadd.f32 %v14777_v40, %v6836_v14  ;;  %v5910_v52 = vmax.f32 %v5791_v15, 0.0 }
 0x77c   : > { %v6955_v36 = vmax.f32 %v6837_v20, 0.0  ;;  %v14997_v41 = vadd.f32 %v7211_v34, %v6314_v4 }
 0x77d   : > { %v7216_v9 = vpop.f32.mrf.mxu1 }
 0x77e   : > { %v7006_v60 = vpack.c.bf16 %v6955_v36, %v6954_v37 }
 0x77f   : > { %v5792_v11 = vpop.f32.mrf.mxu2 }
 0x780   : > { %v5793_v30 = vadd.f32 %v14777_v40, %v5792_v11  ;;  %11809 = vmatmul.msk.bf16.gmra.mxu1 %vm1581_vm3, %v7006_v60 }
 0x781   : > { %v6169_v28 = vpop.f32.mrf.mxu3  ;;  %v6839_v17 = vpop.f32.mrf.mxu0 }
 0x782   : > { %v5911_v27 = vmax.f32 %v5793_v30, 0.0  ;;  %v6315_v18 = vadd.f32 %v6169_v28, %v14409_v59  ;;  %v6840_v37 = vadd.f32 %v14777_v40, %v6839_v17 }
 0x784   : > { %v5962_v14 = vpack.c.bf16 %v5911_v27, %v5910_v52  ;;  %11470 = vmatmul.msk.bf16.gmra.mxu2 %vm489_vm2, %v12647_v32  ;;  %11770 = vmatmul.msk.bf16.gmra.mxu0 %vm489_vm2, %v12685_v1  ;;  %v15007_v34 = vadd.f32 %v7213_v26, %v6315_v18  ;;  %v6956_v15 = vmax.f32 %v6840_v37, 0.0  ;;  %v12648_v52 = vld [vmem:[%s12861_s29 + $0x690] sm:$0xff] }
 0x785   : > { %v7218_v49 = vpop.f32.mrf.mxu1  ;;  %v12686_v27 = vld [vmem:[%s12861_s29 + $0x7b0] sm:$0xff] }
 0x786   : > { %11509 = vmatmul.msk.bf16.gmra.mxu3 %vm1581_vm3, %v5962_v14 }
 0x787   : > { %v5795_v4 = vpop.f32.mrf.mxu2 }
 0x788   : > { %v5796_v32 = vadd.f32 %v14777_v40, %v5795_v4 }
 0x789   : > { %v6172_v20 = vpop.f32.mrf.mxu3  ;;  %v6841_v36 = vpop.f32.mrf.mxu0 }
 0x78a   : > { %v6316_v59 = vadd.f32 %v6172_v20, %v14415_v48  ;;  %v6842_v60 = vadd.f32 %v14777_v40, %v6841_v36  ;;  %v5912_v37 = vmax.f32 %v5796_v32, 0.0  ;;  %v16128_v20 = vld [vmem:[#allocation13_spill] sm:$0xff] }
 0x78c   : > { %v6957_v11 = vmax.f32 %v6842_v60, 0.0  ;;  %v15013_v30 = vadd.f32 %v7216_v9, %v6316_v59 }
 0x78d   : > { %v7221_v26 = vpop.f32.mrf.mxu1 }
 0x78e   : > { %16127 = vst [vmem:[#allocation31_spill] sm:$0xff] %v15013_v30  ;;  %v7007_v1 = vpack.c.bf16 %v6957_v11, %v6956_v15 }
 0x78f   : > { %v5797_v28 = vpop.f32.mrf.mxu2 }
 0x790   : > { %v5798_v17 = vadd.f32 %v14777_v40, %v5797_v28  ;;  %11810 = vmatmul.msk.bf16.gmra.mxu1 %vm1581_vm3, %v7007_v1  ;;  %v16130_v28 = vld [vmem:[#allocation14_spill] sm:$0xff] }
 0x791   : > { %v6174_v18 = vpop.f32.mrf.mxu3  ;;  %v6844_v14 = vpop.f32.mrf.mxu0 }
 0x792   : > { %v5913_v48 = vmax.f32 %v5798_v17, 0.0  ;;  %v6317_v36 = vadd.f32 %v6174_v18, %v16128_v20  ;;  %v6845_v15 = vadd.f32 %v14777_v40, %v6844_v14 }
 0x794   : > { %v5963_v60 = vpack.c.bf16 %v5913_v48, %v5912_v37  ;;  %11471 = vmatmul.msk.bf16.gmra.mxu2 %vm489_vm2, %v12648_v52  ;;  %11771 = vmatmul.msk.bf16.gmra.mxu0 %vm489_vm2, %v12686_v27  ;;  %v15023_v9 = vadd.f32 %v7218_v49, %v6317_v36  ;;  %v6958_v1 = vmax.f32 %v6845_v15, 0.0  ;;  %v12649_v36 = vld [vmem:[%s12861_s29 + $0x698] sm:$0xff] }
 0x795   : > { %v7223_v4 = vpop.f32.mrf.mxu1 }
 0x796   : > { %16129 = vst [vmem:[#allocation32_spill] sm:$0xff] %v15023_v9  ;;  %11510 = vmatmul.msk.bf16.gmra.mxu3 %vm1581_vm3, %v5963_v60  ;;  %v12687_v60 = vld [vmem:[%s12861_s29 + $0x7b8] sm:$0xff] }
 0x797   : > { %v5800_v59 = vpop.f32.mrf.mxu2 }
 0x798   : > { %v5801_v27 = vadd.f32 %v14777_v40, %v5800_v59 }
 0x799   : > { %v6177_v11 = vpop.f32.mrf.mxu3  ;;  %v6846_v32 = vpop.f32.mrf.mxu0 }
 0x79a   : > { %v6318_v17 = vadd.f32 %v6177_v11, %v16130_v28  ;;  %v6847_v18 = vadd.f32 %v14777_v40, %v6846_v32  ;;  %v5914_v30 = vmax.f32 %v5801_v27, 0.0  ;;  %v16132_v28 = vld [vmem:[#allocation15_spill] sm:$0xff] }
 0x79c   : > { %v6959_v52 = vmax.f32 %v6847_v18, 0.0  ;;  %v15029_v37 = vadd.f32 %v7221_v26, %v6318_v17 }
 0x79d   : > { %v7226_v49 = vpop.f32.mrf.mxu1 }
 0x79e   : > { %16131 = vst [vmem:[#allocation33_spill] sm:$0xff] %v15029_v37  ;;  %v7008_v48 = vpack.c.bf16 %v6959_v52, %v6958_v1 }
 0x79f   : > { %v5802_v14 = vpop.f32.mrf.mxu2 }
 0x7a0   : > { %v5803_v20 = vadd.f32 %v14777_v40, %v5802_v14  ;;  %11811 = vmatmul.msk.bf16.gmra.mxu1 %vm1581_vm3, %v7008_v48  ;;  %v16134_v14 = vld [vmem:[#allocation16_spill] sm:$0xff] }
 0x7a1   : > { %v6179_v9 = vpop.f32.mrf.mxu3  ;;  %v6849_v15 = vpop.f32.mrf.mxu0 }
 0x7a2   : > { %v5915_v11 = vmax.f32 %v5803_v20, 0.0  ;;  %v6319_v32 = vadd.f32 %v6179_v9, %v16132_v28  ;;  %v6850_v1 = vadd.f32 %v14777_v40, %v6849_v15 }
 0x7a4   : > { %v5964_v18 = vpack.c.bf16 %v5915_v11, %v5914_v30  ;;  %11472 = vmatmul.msk.bf16.gmra.mxu2 %vm489_vm2, %v12649_v36  ;;  %11772 = vmatmul.msk.bf16.gmra.mxu0 %vm489_vm2, %v12687_v60  ;;  %v15039_v26 = vadd.f32 %v7223_v4, %v6319_v32  ;;  %v6960_v48 = vmax.f32 %v6850_v1, 0.0  ;;  %v12650_v32 = vld [vmem:[%s12861_s29 + $0x6a0] sm:$0xff] }
 0x7a5   : > { %v7228_v59 = vpop.f32.mrf.mxu1 }
 0x7a6   : > { %16133 = vst [vmem:[#allocation13_spill] sm:$0xff] %v15039_v26  ;;  %11511 = vmatmul.msk.bf16.gmra.mxu3 %vm1581_vm3, %v5964_v18  ;;  %v12688_v18 = vld [vmem:[%s12861_s29 + $0x7c0] sm:$0xff] }
 0x7a7   : > { %v5805_v17 = vpop.f32.mrf.mxu2 }
 0x7a8   : > { %v5806_v60 = vadd.f32 %v14777_v40, %v5805_v17 }
 0x7a9   : > { %v6182_v52 = vpop.f32.mrf.mxu3  ;;  %v6851_v27 = vpop.f32.mrf.mxu0 }
 0x7aa   : > { %v6320_v9 = vadd.f32 %v6182_v52, %v16134_v14  ;;  %v6852_v30 = vadd.f32 %v14777_v40, %v6851_v27  ;;  %v5916_v37 = vmax.f32 %v5806_v60, 0.0  ;;  %v16136_v14 = vld [vmem:[#allocation17_spill] sm:$0xff] }
 0x7ac   : > { %v6961_v20 = vmax.f32 %v6852_v30, 0.0  ;;  %v15045_v36 = vadd.f32 %v7226_v49, %v6320_v9 }
 0x7ad   : > { %v7231_v4 = vpop.f32.mrf.mxu1 }
 0x7ae   : > { %16135 = vst [vmem:[#allocation14_spill] sm:$0xff] %v15045_v36  ;;  %v7009_v11 = vpack.c.bf16 %v6961_v20, %v6960_v48 }
 0x7af   : > { %v5807_v15 = vpop.f32.mrf.mxu2 }
 0x7b0   : > { %v5808_v28 = vadd.f32 %v14777_v40, %v5807_v15  ;;  %11812 = vmatmul.msk.bf16.gmra.mxu1 %vm1581_vm3, %v7009_v11  ;;  %v16138_v15 = vld [vmem:[#allocation18_spill] sm:$0xff] }
 0x7b1   : > { %v6184_v26 = vpop.f32.mrf.mxu3  ;;  %v6854_v1 = vpop.f32.mrf.mxu0 }
 0x7b2   : > { %v5917_v52 = vmax.f32 %v5808_v28, 0.0  ;;  %v6321_v27 = vadd.f32 %v6184_v26, %v16136_v14  ;;  %v6855_v48 = vadd.f32 %v14777_v40, %v6854_v1 }
 0x7b4   : > { %v5965_v30 = vpack.c.bf16 %v5917_v52, %v5916_v37  ;;  %11473 = vmatmul.msk.bf16.gmra.mxu2 %vm489_vm2, %v12650_v32  ;;  %11773 = vmatmul.msk.bf16.gmra.mxu0 %vm489_vm2, %v12688_v18  ;;  %v15055_v49 = vadd.f32 %v7228_v59, %v6321_v27  ;;  %v6962_v11 = vmax.f32 %v6855_v48, 0.0  ;;  %v12651_v27 = vld [vmem:[%s12861_s29 + $0x6a8] sm:$0xff] }
 0x7b5   : > { %v7233_v17 = vpop.f32.mrf.mxu1 }
 0x7b6   : > { %16137 = vst [vmem:[#allocation15_spill] sm:$0xff] %v15055_v49  ;;  %11512 = vmatmul.msk.bf16.gmra.mxu3 %vm1581_vm3, %v5965_v30  ;;  %v12689_v30 = vld [vmem:[%s12861_s29 + $0x7c8] sm:$0xff] }
 0x7b7   : > { %v5810_v9 = vpop.f32.mrf.mxu2 }
 0x7b8   : > { %v5811_v18 = vadd.f32 %v14777_v40, %v5810_v9 }
 0x7b9   : > { %v6187_v20 = vpop.f32.mrf.mxu3  ;;  %v6856_v60 = vpop.f32.mrf.mxu0 }
 0x7ba   : > { %v6322_v26 = vadd.f32 %v6187_v20, %v16138_v15  ;;  %v6857_v37 = vadd.f32 %v14777_v40, %v6856_v60  ;;  %v5918_v36 = vmax.f32 %v5811_v18, 0.0  ;;  %v16140_v15 = vld [vmem:[#allocation4_spill] sm:$0xff] }
 0x7bc   : > { %v6963_v28 = vmax.f32 %v6857_v37, 0.0  ;;  %v15061_v32 = vadd.f32 %v7231_v4, %v6322_v26 }
 0x7bd   : > { %v7236_v59 = vpop.f32.mrf.mxu1 }
 0x7be   : > { %16139 = vst [vmem:[#allocation16_spill] sm:$0xff] %v15061_v32  ;;  %v7010_v52 = vpack.c.bf16 %v6963_v28, %v6962_v11  ;;  %v16144_v32 = vld [vmem:[#allocation6_spill] sm:$0xff] }
 0x7bf   : > { %v5812_v1 = vpop.f32.mrf.mxu2 }
 0x7c0   : > { %v5813_v14 = vadd.f32 %v14777_v40, %v5812_v1  ;;  %11813 = vmatmul.msk.bf16.gmra.mxu1 %vm1581_vm3, %v7010_v52  ;;  %v16142_v1 = vld [vmem:[#allocation3_spill] sm:$0xff] }
 0x7c1   : > { %v6189_v49 = vpop.f32.mrf.mxu3  ;;  %v6859_v48 = vpop.f32.mrf.mxu0 }
 0x7c2   : > { %v5919_v20 = vmax.f32 %v5813_v14, 0.0  ;;  %v6323_v60 = vadd.f32 %v6189_v49, %v16140_v15  ;;  %v6860_v11 = vadd.f32 %v14777_v40, %v6859_v48 }
 0x7c4   : > { %v5966_v37 = vpack.c.bf16 %v5919_v20, %v5918_v36  ;;  %11474 = vmatmul.msk.bf16.gmra.mxu2 %vm489_vm2, %v12651_v27  ;;  %11774 = vmatmul.msk.bf16.gmra.mxu0 %vm489_vm2, %v12689_v30  ;;  %v15071_v4 = vadd.f32 %v7233_v17, %v6323_v60  ;;  %v6964_v52 = vmax.f32 %v6860_v11, 0.0  ;;  %v15079_v36 = vld [vmem:[%s16006_s2] ss:$0 sm:$0xff]  ;;  %v12652_v60 = vld [vmem:[%s12861_s29 + $0x6b0] sm:$0xff] }
 0x7c5   : > { %v7238_v9 = vpop.f32.mrf.mxu1 }
 0x7c6   : > { %16141 = vst [vmem:[#allocation17_spill] sm:$0xff] %v15071_v4  ;;  %11513 = vmatmul.msk.bf16.gmra.mxu3 %vm1581_vm3, %v5966_v37  ;;  %v12690_v37 = vld [vmem:[%s12861_s29 + $0x7d0] sm:$0xff] }
 0x7c7   : > { %v5815_v26 = vpop.f32.mrf.mxu2 }
 0x7c8   : > { %v5816_v30 = vadd.f32 %v15079_v36, %v5815_v26 }
 0x7c9   : > { %v6192_v28 = vpop.f32.mrf.mxu3  ;;  %v6861_v18 = vpop.f32.mrf.mxu0 }
 0x7ca   : > { %v6324_v49 = vadd.f32 %v6192_v28, %v16142_v1  ;;  %v6862_v17 = vadd.f32 %v15079_v36, %v6861_v18  ;;  %v5920_v1 = vmax.f32 %v5816_v30, 0.0 }
 0x7cc   : > { %v6965_v14 = vmax.f32 %v6862_v17, 0.0  ;;  %v15082_v27 = vadd.f32 %v7236_v59, %v6324_v49 }
 0x7cd   : > { %v7241_v40 = vpop.f32.mrf.mxu1 }
 0x7ce   : > { %16143 = vst [vmem:[#allocation18_spill] sm:$0xff] %v15082_v27  ;;  %v7011_v48 = vpack.c.bf16 %v6965_v14, %v6964_v52 }
 0x7cf   : > { %v5817_v20 = vpop.f32.mrf.mxu2 }
 0x7d0   : > { %v5818_v15 = vadd.f32 %v15079_v36, %v5817_v20  ;;  %11814 = vmatmul.msk.bf16.gmra.mxu1 %vm1581_vm3, %v7011_v48  ;;  %v16146_v20 = vld [vmem:[#allocation5_spill] sm:$0xff] }
 0x7d1   : > { %v6194_v11 = vpop.f32.mrf.mxu3  ;;  %v6864_v28 = vpop.f32.mrf.mxu0 }
 0x7d2   : > { %v5921_v4 = vmax.f32 %v5818_v15, 0.0  ;;  %v6325_v18 = vadd.f32 %v6194_v11, %v16144_v32  ;;  %v6865_v52 = vadd.f32 %v15079_v36, %v6864_v28 }
 0x7d4   : > { %v5967_v17 = vpack.c.bf16 %v5921_v4, %v5920_v1  ;;  %11475 = vmatmul.msk.bf16.gmra.mxu2 %vm489_vm2, %v12652_v60  ;;  %11775 = vmatmul.msk.bf16.gmra.mxu0 %vm489_vm2, %v12690_v37  ;;  %v15092_v59 = vadd.f32 %v7238_v9, %v6325_v18  ;;  %v6966_v48 = vmax.f32 %v6865_v52, 0.0  ;;  %v12653_v18 = vld [vmem:[%s12861_s29 + $0x6b8] sm:$0xff] }
 0x7d5   : > { %v7243_v26 = vpop.f32.mrf.mxu1 }
 0x7d6   : > { %16145 = vst [vmem:[#allocation4_spill] sm:$0xff] %v15092_v59  ;;  %11514 = vmatmul.msk.bf16.gmra.mxu3 %vm1581_vm3, %v5967_v17  ;;  %v12691_v17 = vld [vmem:[%s12861_s29 + $0x7d8] sm:$0xff] }
 0x7d7   : > { %v5820_v49 = vpop.f32.mrf.mxu2 }
 0x7d8   : > { %v5821_v37 = vadd.f32 %v15079_v36, %v5820_v49 }
 0x7d9   : > { %v6197_v14 = vpop.f32.mrf.mxu3  ;;  %v6866_v30 = vpop.f32.mrf.mxu0 }
 0x7da   : > { %v6326_v32 = vadd.f32 %v6197_v14, %v16146_v20  ;;  %v6867_v4 = vadd.f32 %v15079_v36, %v6866_v30  ;;  %v5922_v27 = vmax.f32 %v5821_v37, 0.0  ;;  %v16148_v20 = vld [vmem:[#allocation8_spill] sm:$0xff] }
 0x7dc   : > { %v6967_v15 = vmax.f32 %v6867_v4, 0.0  ;;  %v15098_v60 = vadd.f32 %v7241_v40, %v6326_v32 }
 0x7dd   : > { %v7246_v9 = vpop.f32.mrf.mxu1 }
 0x7de   : > { %16147 = vst [vmem:[#allocation3_spill] sm:$0xff] %v15098_v60  ;;  %v7012_v11 = vpack.c.bf16 %v6967_v15, %v6966_v48 }
 0x7df   : > { %v5822_v28 = vpop.f32.mrf.mxu2 }
 0x7e0   : > { %v5823_v1 = vadd.f32 %v15079_v36, %v5822_v28  ;;  %11815 = vmatmul.msk.bf16.gmra.mxu1 %vm1581_vm3, %v7012_v11  ;;  %v16150_v28 = vld [vmem:[#allocation7_spill] sm:$0xff] }
 0x7e1   : > { %v6199_v59 = vpop.f32.mrf.mxu3  ;;  %v6869_v52 = vpop.f32.mrf.mxu0 }
 0x7e2   : > { %v5923_v14 = vmax.f32 %v5823_v1, 0.0  ;;  %v6327_v30 = vadd.f32 %v6199_v59, %v16148_v20  ;;  %v6870_v48 = vadd.f32 %v15079_v36, %v6869_v52 }
 0x7e4   : > { %v5968_v4 = vpack.c.bf16 %v5923_v14, %v5922_v27  ;;  %11476 = vmatmul.msk.bf16.gmra.mxu2 %vm489_vm2, %v12653_v18  ;;  %11776 = vmatmul.msk.bf16.gmra.mxu0 %vm489_vm2, %v12691_v17  ;;  %v15108_v40 = vadd.f32 %v7243_v26, %v6327_v30  ;;  %v6968_v11 = vmax.f32 %v6870_v48, 0.0  ;;  %v12694_v30 = vld [vmem:[%s12861_s29 + $0x7e0] sm:$0xff] }
 0x7e5   : > { %v7248_v49 = vpop.f32.mrf.mxu1 }
 0x7e6   : > { %16149 = vst [vmem:[#allocation6_spill] sm:$0xff] %v15108_v40  ;;  %11515 = vmatmul.msk.bf16.gmra.mxu3 %vm1581_vm3, %v5968_v4  ;;  %v12732_v4 = vld [vmem:[%s12861_s29 + $0x900] sm:$0xff] }
 0x7e7   : > { %v5825_v32 = vpop.f32.mrf.mxu2 }
 0x7e8   : > { %v5826_v17 = vadd.f32 %v15079_v36, %v5825_v32 }
 0x7e9   : > { %v6202_v15 = vpop.f32.mrf.mxu3  ;;  %v6871_v37 = vpop.f32.mrf.mxu0 }
 0x7ea   : > { %v6328_v59 = vadd.f32 %v6202_v15, %v16150_v28  ;;  %v6872_v27 = vadd.f32 %v15079_v36, %v6871_v37  ;;  %v5924_v60 = vmax.f32 %v5826_v17, 0.0  ;;  %v16152_v28 = vld [vmem:[#allocation10_spill] sm:$0xff] }
 0x7ec   : > { %v6969_v1 = vmax.f32 %v6872_v27, 0.0  ;;  %v15114_v18 = vadd.f32 %v7246_v9, %v6328_v59 }
 0x7ed   : > { %v7251_v26 = vpop.f32.mrf.mxu1 }
 0x7ee   : > { %16151 = vst [vmem:[#allocation5_spill] sm:$0xff] %v15114_v18  ;;  %v7013_v14 = vpack.c.bf16 %v6969_v1, %v6968_v11 }
 0x7ef   : > { %v5827_v52 = vpop.f32.mrf.mxu2 }
 0x7f0   : > { %v5828_v20 = vadd.f32 %v15079_v36, %v5827_v52  ;;  %11816 = vmatmul.msk.bf16.gmra.mxu1 %vm1581_vm3, %v7013_v14  ;;  %v16154_v52 = vld [vmem:[#allocation9_spill] sm:$0xff] }
 0x7f1   : > { %v6204_v40 = vpop.f32.mrf.mxu3  ;;  %v6874_v48 = vpop.f32.mrf.mxu0 }
 0x7f2   : > { %v5925_v15 = vmax.f32 %v5828_v20, 0.0  ;;  %v6329_v37 = vadd.f32 %v6204_v40, %v16152_v28  ;;  %v6875_v11 = vadd.f32 %v15079_v36, %v6874_v48 }
 0x7f4   : > { %v5969_v27 = vpack.c.bf16 %v5925_v15, %v5924_v60  ;;  %12041 = vmatmul.msk.bf16.vlgmr.msra.gmra.mxu2 %vm489_vm2, %v12694_v30  ;;  %12341 = vmatmul.msk.bf16.vlgmr.msra.gmra.mxu0 %vm489_vm2, %v12732_v4  ;;  %v15124_v9 = vadd.f32 %v7248_v49, %v6329_v37  ;;  %v6970_v14 = vmax.f32 %v6875_v11, 0.0  ;;  %v12695_v37 = vld [vmem:[%s12861_s29 + $0x7e8] sm:$0xff] }
 0x7f5   : > { %v7253_v32 = vpop.f32.mrf.mxu1 }
 0x7f6   : > { %16153 = vst [vmem:[#allocation8_spill] sm:$0xff] %v15124_v9  ;;  %11516 = vmatmul.msk.bf16.gmra.mxu3 %vm1581_vm3, %v5969_v27  ;;  %v12733_v27 = vld [vmem:[%s12861_s29 + $0x908] sm:$0xff] }
 0x7f7   : > { %v5830_v59 = vpop.f32.mrf.mxu2 }
 0x7f8   : > { %v5831_v4 = vadd.f32 %v15079_v36, %v5830_v59 }
 0x7f9   : > { %v6207_v1 = vpop.f32.mrf.mxu3  ;;  %v6876_v17 = vpop.f32.mrf.mxu0 }
 0x7fa   : > { %v6330_v40 = vadd.f32 %v6207_v1, %v16154_v52  ;;  %v6877_v60 = vadd.f32 %v15079_v36, %v6876_v17  ;;  %v5926_v18 = vmax.f32 %v5831_v4, 0.0  ;;  %v16156_v52 = vld [vmem:[#allocation12_spill] sm:$0xff] }
 0x7fc   : > { %v6971_v20 = vmax.f32 %v6877_v60, 0.0  ;;  %v15130_v30 = vadd.f32 %v7251_v26, %v6330_v40 }
 0x7fd   : > { %v7256_v49 = vpop.f32.mrf.mxu1 }
 0x7fe   : > { %16155 = vst [vmem:[#allocation7_spill] sm:$0xff] %v15130_v30  ;;  %v7014_v15 = vpack.c.bf16 %v6971_v20, %v6970_v14 }
 0x7ff   : > { %v5832_v48 = vpop.f32.mrf.mxu2 }
 0x800   : > { %v5833_v28 = vadd.f32 %v15079_v36, %v5832_v48  ;;  %11817 = vmatmul.msk.bf16.gmra.mxu1 %vm1581_vm3, %v7014_v15  ;;  %v16158_v48 = vld [vmem:[#allocation11_spill] sm:$0xff] }
 0x801   : > { %v6209_v9 = vpop.f32.mrf.mxu3  ;;  %v6879_v11 = vpop.f32.mrf.mxu0 }
 0x802   : > { %v5927_v1 = vmax.f32 %v5833_v28, 0.0  ;;  %v6331_v17 = vadd.f32 %v6209_v9, %v16156_v52  ;;  %v6880_v14 = vadd.f32 %v15079_v36, %v6879_v11 }
 0x804   : > { %v5970_v60 = vpack.c.bf16 %v5927_v1, %v5926_v18  ;;  %12042 = vmatmul.msk.bf16.gmra.mxu2 %vm489_vm2, %v12695_v37  ;;  %12342 = vmatmul.msk.bf16.gmra.mxu0 %vm489_vm2, %v12733_v27  ;;  %v15140_v26 = vadd.f32 %v7253_v32, %v6331_v17  ;;  %v6972_v15 = vmax.f32 %v6880_v14, 0.0  ;;  %v12696_v17 = vld [vmem:[%s12861_s29 + $0x7f0] sm:$0xff] }
 0x805   : > { %v7258_v59 = vpop.f32.mrf.mxu1 }
 0x806   : > { %16157 = vst [vmem:[#allocation10_spill] sm:$0xff] %v15140_v26  ;;  %11517 = vmatmul.msk.bf16.gmra.mxu3 %vm1581_vm3, %v5970_v60  ;;  %v12734_v60 = vld [vmem:[%s12861_s29 + $0x910] sm:$0xff] }
 0x807   : > { %v5835_v40 = vpop.f32.mrf.mxu2 }
 0x808   : > { %v5836_v27 = vadd.f32 %v15079_v36, %v5835_v40 }
 0x809   : > { %v6212_v20 = vpop.f32.mrf.mxu3  ;;  %v6881_v4 = vpop.f32.mrf.mxu0 }
 0x80a   : > { %v6332_v9 = vadd.f32 %v6212_v20, %v16158_v48  ;;  %v6882_v18 = vadd.f32 %v15079_v36, %v6881_v4  ;;  %v5928_v30 = vmax.f32 %v5836_v27, 0.0  ;;  %v16160_v48 = vld [vmem:[#allocation2_spill] sm:$0xff] }
 0x80c   : > { %v6973_v28 = vmax.f32 %v6882_v18, 0.0  ;;  %v15146_v37 = vadd.f32 %v7256_v49, %v6332_v9 }
 0x80d   : > { %v7261_v32 = vpop.f32.mrf.mxu1 }
 0x80e   : > { %16159 = vst [vmem:[#allocation9_spill] sm:$0xff] %v15146_v37  ;;  %v7015_v1 = vpack.c.bf16 %v6973_v28, %v6972_v15 }
 0x80f   : > { %v5837_v11 = vpop.f32.mrf.mxu2 }
 0x810   : > { %v5838_v52 = vadd.f32 %v15079_v36, %v5837_v11  ;;  %11818 = vmatmul.msk.bf16.gmra.mxu1 %vm1581_vm3, %v7015_v1  ;;  %v16162_v11 = vld [vmem:[#allocation19_spill] sm:$0xff] }
 0x811   : > { %v6214_v26 = vpop.f32.mrf.mxu3  ;;  %v6884_v14 = vpop.f32.mrf.mxu0 }
 0x812   : > { %v5929_v20 = vmax.f32 %v5838_v52, 0.0  ;;  %v6333_v4 = vadd.f32 %v6214_v26, %v16160_v48  ;;  %v6885_v15 = vadd.f32 %v15079_v36, %v6884_v14 }
 0x814   : > { %v5971_v18 = vpack.c.bf16 %v5929_v20, %v5928_v30  ;;  %12043 = vmatmul.msk.bf16.gmra.mxu2 %vm489_vm2, %v12696_v17  ;;  %12343 = vmatmul.msk.bf16.gmra.mxu0 %vm489_vm2, %v12734_v60  ;;  %v15156_v49 = vadd.f32 %v7258_v59, %v6333_v4  ;;  %v6974_v1 = vmax.f32 %v6885_v15, 0.0  ;;  %v12697_v4 = vld [vmem:[%s12861_s29 + $0x7f8] sm:$0xff] }
 0x815   : > { %v7263_v40 = vpop.f32.mrf.mxu1 }
 0x816   : > { %16161 = vst [vmem:[#allocation12_spill] sm:$0xff] %v15156_v49  ;;  %11518 = vmatmul.msk.bf16.gmra.mxu3 %vm1581_vm3, %v5971_v18  ;;  %v12735_v18 = vld [vmem:[%s12861_s29 + $0x918] sm:$0xff] }
 0x817   : > { %v5840_v9 = vpop.f32.mrf.mxu2 }
 0x818   : > { %v5841_v60 = vadd.f32 %v15079_v36, %v5840_v9 }
 0x819   : > { %v6217_v28 = vpop.f32.mrf.mxu3  ;;  %v6886_v27 = vpop.f32.mrf.mxu0 }
 0x81a   : > { %v6334_v26 = vadd.f32 %v6217_v28, %v16162_v11  ;;  %v6887_v30 = vadd.f32 %v15079_v36, %v6886_v27  ;;  %v5930_v37 = vmax.f32 %v5841_v60, 0.0  ;;  %v16164_v11 = vld [vmem:[#allocation20_spill] sm:$0xff] }
 0x81c   : > { %v6975_v52 = vmax.f32 %v6887_v30, 0.0  ;;  %v15162_v17 = vadd.f32 %v7261_v32, %v6334_v26 }
 0x81d   : > { %v7266_v59 = vpop.f32.mrf.mxu1 }
 0x81e   : > { %16163 = vst [vmem:[#allocation11_spill] sm:$0xff] %v15162_v17  ;;  %v7016_v20 = vpack.c.bf16 %v6975_v52, %v6974_v1 }
 0x81f   : > { %v5842_v14 = vpop.f32.mrf.mxu2 }
 0x820   : > { %v5843_v48 = vadd.f32 %v15079_v36, %v5842_v14  ;;  %11819 = vmatmul.msk.bf16.gmra.mxu1 %vm1581_vm3, %v7016_v20  ;;  %v16166_v14 = vld [vmem:[#allocation21_spill] sm:$0xff] }
 0x821   : > { %v6219_v49 = vpop.f32.mrf.mxu3  ;;  %v6889_v15 = vpop.f32.mrf.mxu0 }
 0x822   : > { %v5931_v28 = vmax.f32 %v5843_v48, 0.0  ;;  %v6335_v27 = vadd.f32 %v6219_v49, %v16164_v11  ;;  %v6890_v1 = vadd.f32 %v15079_v36, %v6889_v15 }
 0x824   : > { %v5972_v30 = vpack.c.bf16 %v5931_v28, %v5930_v37  ;;  %12044 = vmatmul.msk.bf16.gmra.mxu2 %vm489_vm2, %v12697_v4  ;;  %12344 = vmatmul.msk.bf16.gmra.mxu0 %vm489_vm2, %v12735_v18  ;;  %v15172_v32 = vadd.f32 %v7263_v40, %v6335_v27  ;;  %v6976_v20 = vmax.f32 %v6890_v1, 0.0  ;;  %v12698_v27 = vld [vmem:[%s12861_s29 + $0x800] sm:$0xff] }
 0x825   : > { %v7268_v9 = vpop.f32.mrf.mxu1 }
 0x826   : > { %16165 = vst [vmem:[#allocation2_spill] sm:$0xff] %v15172_v32  ;;  %11519 = vmatmul.msk.bf16.gmra.mxu3 %vm1581_vm3, %v5972_v30  ;;  %v12736_v30 = vld [vmem:[%s12861_s29 + $0x920] sm:$0xff] }
 0x827   : > { %v5845_v26 = vpop.f32.mrf.mxu2 }
 0x828   : > { %v5846_v18 = vadd.f32 %v15079_v36, %v5845_v26 }
 0x829   : > { %v6222_v52 = vpop.f32.mrf.mxu3  ;;  %v6891_v60 = vpop.f32.mrf.mxu0 }
 0x82a   : > { %v6336_v49 = vadd.f32 %v6222_v52, %v16166_v14  ;;  %v6892_v37 = vadd.f32 %v15079_v36, %v6891_v60  ;;  %v5932_v17 = vmax.f32 %v5846_v18, 0.0  ;;  %v16168_v14 = vld [vmem:[#allocation22_spill] sm:$0xff] }
 0x82c   : > { %v6977_v48 = vmax.f32 %v6892_v37, 0.0  ;;  %v15178_v4 = vadd.f32 %v7266_v59, %v6336_v49 }
 0x82d   : > { %v7271_v40 = vpop.f32.mrf.mxu1 }
 0x82e   : > { %16167 = vst [vmem:[#allocation19_spill] sm:$0xff] %v15178_v4  ;;  %v7017_v28 = vpack.c.bf16 %v6977_v48, %v6976_v20 }
 0x82f   : > { %v5847_v15 = vpop.f32.mrf.mxu2 }
 0x830   : > { %v5848_v11 = vadd.f32 %v15079_v36, %v5847_v15  ;;  %11820 = vmatmul.msk.bf16.gmra.mxu1 %vm1581_vm3, %v7017_v28  ;;  %v16170_v15 = vld [vmem:[#allocation23_spill] sm:$0xff] }
 0x831   : > { %v6224_v32 = vpop.f32.mrf.mxu3  ;;  %v6894_v1 = vpop.f32.mrf.mxu0 }
 0x832   : > { %v5933_v52 = vmax.f32 %v5848_v11, 0.0  ;;  %v6337_v60 = vadd.f32 %v6224_v32, %v16168_v14  ;;  %v6895_v20 = vadd.f32 %v15079_v36, %v6894_v1 }
 0x834   : > { %v5973_v37 = vpack.c.bf16 %v5933_v52, %v5932_v17  ;;  %12045 = vmatmul.msk.bf16.gmra.mxu2 %vm489_vm2, %v12698_v27  ;;  %12345 = vmatmul.msk.bf16.gmra.mxu0 %vm489_vm2, %v12736_v30  ;;  %v15188_v59 = vadd.f32 %v7268_v9, %v6337_v60  ;;  %v6978_v28 = vmax.f32 %v6895_v20, 0.0  ;;  %v12699_v60 = vld [vmem:[%s12861_s29 + $0x808] sm:$0xff] }
 0x835   : > { %v7273_v26 = vpop.f32.mrf.mxu1 }
 0x836   : > { %16169 = vst [vmem:[#allocation20_spill] sm:$0xff] %v15188_v59  ;;  %11520 = vmatmul.msk.bf16.gmra.mxu3 %vm1581_vm3, %v5973_v37  ;;  %v12737_v37 = vld [vmem:[%s12861_s29 + $0x928] sm:$0xff] }
 0x837   : > { %v5850_v49 = vpop.f32.mrf.mxu2 }
 0x838   : > { %v5851_v30 = vadd.f32 %v15079_v36, %v5850_v49 }
 0x839   : > { %v6227_v48 = vpop.f32.mrf.mxu3  ;;  %v6896_v18 = vpop.f32.mrf.mxu0 }
 0x83a   : > { %v6338_v32 = vadd.f32 %v6227_v48, %v16170_v15  ;;  %v6897_v17 = vadd.f32 %v15079_v36, %v6896_v18  ;;  %v5934_v4 = vmax.f32 %v5851_v30, 0.0  ;;  %v16172_v15 = vld [vmem:[#allocation24_spill] sm:$0xff] }
 0x83c   : > { %v6979_v11 = vmax.f32 %v6897_v17, 0.0  ;;  %v15194_v27 = vadd.f32 %v7271_v40, %v6338_v32 }
 0x83d   : > { %v7276_v9 = vpop.f32.mrf.mxu1 }
 0x83e   : > { %16171 = vst [vmem:[#allocation21_spill] sm:$0xff] %v15194_v27  ;;  %v7018_v52 = vpack.c.bf16 %v6979_v11, %v6978_v28 }
 0x83f   : > { %v5852_v1 = vpop.f32.mrf.mxu2 }
 0x840   : > { %v5853_v14 = vadd.f32 %v15079_v36, %v5852_v1  ;;  %11821 = vmatmul.msk.bf16.gmra.mxu1 %vm1581_vm3, %v7018_v52  ;;  %v16174_v1 = vld [vmem:[#allocation25_spill] sm:$0xff] }
 0x841   : > { %v6229_v59 = vpop.f32.mrf.mxu3  ;;  %v6899_v20 = vpop.f32.mrf.mxu0 }
 0x842   : > { %v5935_v48 = vmax.f32 %v5853_v14, 0.0  ;;  %v6339_v18 = vadd.f32 %v6229_v59, %v16172_v15  ;;  %v6900_v28 = vadd.f32 %v15079_v36, %v6899_v20 }
 0x844   : > { %v5974_v17 = vpack.c.bf16 %v5935_v48, %v5934_v4  ;;  %12046 = vmatmul.msk.bf16.gmra.mxu2 %vm489_vm2, %v12699_v60  ;;  %12346 = vmatmul.msk.bf16.gmra.mxu0 %vm489_vm2, %v12737_v37  ;;  %v15204_v40 = vadd.f32 %v7273_v26, %v6339_v18  ;;  %v6980_v52 = vmax.f32 %v6900_v28, 0.0  ;;  %v12700_v18 = vld [vmem:[%s12861_s29 + $0x810] sm:$0xff] }
 0x845   : > { %v7278_v49 = vpop.f32.mrf.mxu1 }
 0x846   : > { %16173 = vst [vmem:[#allocation22_spill] sm:$0xff] %v15204_v40  ;;  %11521 = vmatmul.msk.bf16.gmra.mxu3 %vm1581_vm3, %v5974_v17  ;;  %v12738_v17 = vld [vmem:[%s12861_s29 + $0x930] sm:$0xff] }
 0x847   : > { %v5855_v32 = vpop.f32.mrf.mxu2 }
 0x848   : > { %v5856_v37 = vadd.f32 %v15079_v36, %v5855_v32 }
 0x849   : > { %v6232_v11 = vpop.f32.mrf.mxu3  ;;  %v6901_v30 = vpop.f32.mrf.mxu0 }
 0x84a   : > { %v6340_v59 = vadd.f32 %v6232_v11, %v16174_v1  ;;  %v6902_v4 = vadd.f32 %v15079_v36, %v6901_v30  ;;  %v5936_v27 = vmax.f32 %v5856_v37, 0.0  ;;  %v16175_v1 = vld [vmem:[#allocation26_spill] sm:$0xff] }
 0x84c   : > { %v6981_v14 = vmax.f32 %v6902_v4, 0.0  ;;  %v15210_v60 = vadd.f32 %v7276_v9, %v6340_v59 }
 0x84d   : > { %v7281_v26 = vpop.f32.mrf.mxu1 }
 0x84e   : > { %v7019_v48 = vpack.c.bf16 %v6981_v14, %v6980_v52 }
 0x84f   : > { %v5857_v20 = vpop.f32.mrf.mxu2 }
 0x850   : > { %v5858_v15 = vadd.f32 %v15079_v36, %v5857_v20  ;;  %11822 = vmatmul.msk.bf16.gmra.mxu1 %vm1581_vm3, %v7019_v48 }
 0x851   : > { %v6234_v40 = vpop.f32.mrf.mxu3  ;;  %v6904_v28 = vpop.f32.mrf.mxu0 }
 0x852   : > { %v5937_v11 = vmax.f32 %v5858_v15, 0.0  ;;  %v6341_v30 = vadd.f32 %v6234_v40, %v16175_v1  ;;  %v6905_v52 = vadd.f32 %v15079_v36, %v6904_v28  ;;  %v12701_v1 = vld [vmem:[%s12861_s29 + $0x818] sm:$0xff] }
 0x854   : > { %v5975_v4 = vpack.c.bf16 %v5937_v11, %v5936_v27  ;;  %12047 = vmatmul.msk.bf16.gmra.mxu2 %vm489_vm2, %v12700_v18  ;;  %12347 = vmatmul.msk.bf16.gmra.mxu0 %vm489_vm2, %v12738_v17  ;;  %v15220_v9 = vadd.f32 %v7278_v49, %v6341_v30  ;;  %v6982_v48 = vmax.f32 %v6905_v52, 0.0  ;;  %v12739_v30 = vld [vmem:[%s12861_s29 + $0x938] sm:$0xff] }
 0x855   : > { %v7283_v32 = vpop.f32.mrf.mxu1 }
 0x856   : > { %16176 = vst [vmem:[#allocation23_spill] sm:$0xff] %v15220_v9  ;;  %11522 = vmatmul.msk.bf16.gmra.mxu3 %vm1581_vm3, %v5975_v4 }
 0x857   : > { %v5860_v59 = vpop.f32.mrf.mxu2 }
 0x858   : > { %v5861_v18 = vadd.f32 %v15079_v36, %v5860_v59 }
 0x859   : > { %v6237_v14 = vpop.f32.mrf.mxu3  ;;  %v6906_v37 = vpop.f32.mrf.mxu0 }
 0x85a   : > { %v6342_v40 = vadd.f32 %v6237_v14, %v14628_v42  ;;  %v6907_v27 = vadd.f32 %v15079_v36, %v6906_v37  ;;  %v5938_v9 = vmax.f32 %v5861_v18, 0.0  ;;  %v16178_v14 = vld [vmem:[#allocation27_spill] sm:$0xff] }
 0x85c   : > { %v6983_v20 = vmax.f32 %v6907_v27, 0.0  ;;  %v15226_v15 = vadd.f32 %v7281_v26, %v6342_v40 }
 0x85d   : > { %v7286_v49 = vpop.f32.mrf.mxu1 }
 0x85e   : > { %16177 = vst [vmem:[#allocation24_spill] sm:$0xff] %v15226_v15  ;;  %v7020_v17 = vpack.c.bf16 %v6983_v20, %v6982_v48 }
 0x85f   : > { %v5862_v28 = vpop.f32.mrf.mxu2 }
 0x860   : > { %v5863_v11 = vadd.f32 %v15079_v36, %v5862_v28  ;;  %11823 = vmatmul.msk.bf16.gmra.mxu1 %vm1581_vm3, %v7020_v17  ;;  %v16180_v28 = vld [vmem:[#allocation28_spill] sm:$0xff] }
 0x861   : > { %v6239_v4 = vpop.f32.mrf.mxu3  ;;  %v6909_v52 = vpop.f32.mrf.mxu0 }
 0x862   : > { %v5939_v42 = vmax.f32 %v5863_v11, 0.0  ;;  %v6343_v37 = vadd.f32 %v6239_v4, %v16178_v14  ;;  %v6910_v48 = vadd.f32 %v15079_v36, %v6909_v52 }
 0x864   : > { %v5976_v27 = vpack.c.bf16 %v5939_v42, %v5938_v9  ;;  %12048 = vmatmul.msk.bf16.gmra.mxu2 %vm489_vm2, %v12701_v1  ;;  %12348 = vmatmul.msk.bf16.gmra.mxu0 %vm489_vm2, %v12739_v30  ;;  %v15236_v26 = vadd.f32 %v7283_v32, %v6343_v37  ;;  %v6984_v17 = vmax.f32 %v6910_v48, 0.0  ;;  %v12702_v37 = vld [vmem:[%s12861_s29 + $0x820] sm:$0xff] }
 0x865   : > { %v7288_v59 = vpop.f32.mrf.mxu1 }
 0x866   : > { %16179 = vst [vmem:[#allocation25_spill] sm:$0xff] %v15236_v26  ;;  %11523 = vmatmul.msk.bf16.gmra.mxu3 %vm1581_vm3, %v5976_v27  ;;  %v12740_v27 = vld [vmem:[%s12861_s29 + $0x940] sm:$0xff] }
 0x867   : > { %v5865_v40 = vpop.f32.mrf.mxu2 }
 0x868   : > { %v5866_v30 = vadd.f32 %v15079_v36, %v5865_v40 }
 0x869   : > { %v6242_v20 = vpop.f32.mrf.mxu3  ;;  %v6911_v18 = vpop.f32.mrf.mxu0 }
 0x86a   : > { %v6344_v11 = vadd.f32 %v6242_v20, %v16180_v28  ;;  %v6912_v9 = vadd.f32 %v15079_v36, %v6911_v18  ;;  %v5940_v15 = vmax.f32 %v5866_v30, 0.0  ;;  %v16181_v28 = vld [vmem:[#allocation29_spill] sm:$0xff] }
 0x86c   : > { %v6985_v1 = vmax.f32 %v6912_v9, 0.0  ;;  %v15242_v4 = vadd.f32 %v7286_v49, %v6344_v11 }
 0x86d   : > { %v7291_v32 = vpop.f32.mrf.mxu1 }
 0x86e   : > { %v7021_v42 = vpack.c.bf16 %v6985_v1, %v6984_v17 }
 0x86f   : > { %v5867_v52 = vpop.f32.mrf.mxu2 }
 0x870   : > { %v5868_v14 = vadd.f32 %v15079_v36, %v5867_v52  ;;  %11824 = vmatmul.msk.bf16.gmra.mxu1 %vm1581_vm3, %v7021_v42 }
 0x871   : > { %v6244_v26 = vpop.f32.mrf.mxu3  ;;  %v8822_v48 = vpop.f32.mrf.mxu0 }
 0x872   : > { %v5941_v20 = vmax.f32 %v5868_v14, 0.0  ;;  %v6345_v18 = vadd.f32 %v6244_v26, %v16181_v28  ;;  %v8823_v17 = vadd.f32 %v15079_v36, %v8822_v48  ;;  %v12703_v28 = vld [vmem:[%s12861_s29 + $0x828] sm:$0xff] }
 0x874   : > { %v5977_v9 = vpack.c.bf16 %v5941_v20, %v5940_v15  ;;  %12049 = vmatmul.msk.bf16.gmra.mxu2 %vm489_vm2, %v12702_v37  ;;  %12349 = vmatmul.msk.bf16.gmra.mxu0 %vm489_vm2, %v12740_v27  ;;  %v15252_v49 = vadd.f32 %v7288_v59, %v6345_v18  ;;  %v9002_v42 = vmax.f32 %v8823_v17, 0.0  ;;  %v12741_v18 = vld [vmem:[%s12861_s29 + $0x948] sm:$0xff] }
 0x875   : > { %v7293_v40 = vpop.f32.mrf.mxu1 }
 0x876   : > { %16182 = vst [vmem:[#allocation26_spill] sm:$0xff] %v15252_v49  ;;  %11524 = vmatmul.msk.bf16.gmra.mxu3 %vm1581_vm3, %v5977_v9 }
 0x877   : > { %v7778_v11 = vpop.f32.mrf.mxu2 }
 0x878   : > { %v7779_v37 = vadd.f32 %v15079_v36, %v7778_v11 }
 0x879   : > { %v6247_v1 = vpop.f32.mrf.mxu3  ;;  %v8824_v30 = vpop.f32.mrf.mxu0 }
 0x87a   : > { %v6346_v26 = vadd.f32 %v6247_v1, %v14666_v57  ;;  %v8825_v15 = vadd.f32 %v15079_v36, %v8824_v30  ;;  %v7958_v49 = vmax.f32 %v7779_v37, 0.0  ;;  %v16183_v1 = vld [vmem:[#allocation30_spill] sm:$0xff] }
 0x87c   : > { %v9003_v52 = vmax.f32 %v8825_v15, 0.0  ;;  %v15258_v14 = vadd.f32 %v7291_v32, %v6346_v26 }
 0x87d   : > { %v7296_v59 = vpop.f32.mrf.mxu1 }
 0x87e   : > { %v9074_v27 = vpack.c.bf16 %v9003_v52, %v9002_v42 }
 0x87f   : > { %v7780_v48 = vpop.f32.mrf.mxu2 }
 0x880   : > { %v7781_v20 = vadd.f32 %v15079_v36, %v7780_v48  ;;  %12389 = vmatmul.msk.bf16.vlgmr.msra.gmra.mxu1 %vm1581_vm3, %v9074_v27 }
 0x881   : > { %v6249_v9 = vpop.f32.mrf.mxu3  ;;  %v8827_v17 = vpop.f32.mrf.mxu0 }
 0x882   : > { %v7959_v57 = vmax.f32 %v7781_v20, 0.0  ;;  %v6347_v30 = vadd.f32 %v6249_v9, %v16183_v1  ;;  %v8828_v42 = vadd.f32 %v15079_v36, %v8827_v17  ;;  %v12704_v1 = vld [vmem:[%s12861_s29 + $0x830] sm:$0xff] }
 0x884   : > { %v8030_v15 = vpack.c.bf16 %v7959_v57, %v7958_v49  ;;  %12050 = vmatmul.msk.bf16.gmra.mxu2 %vm489_vm2, %v12703_v28  ;;  %12350 = vmatmul.msk.bf16.gmra.mxu0 %vm489_vm2, %v12741_v18  ;;  %v15268_v32 = vadd.f32 %v7293_v40, %v6347_v30  ;;  %v9004_v27 = vmax.f32 %v8828_v42, 0.0  ;;  %v12742_v30 = vld [vmem:[%s12861_s29 + $0x950] sm:$0xff] }
 0x885   : > { %v7298_v11 = vpop.f32.mrf.mxu1 }
 0x886   : > { %16184 = vst [vmem:[#allocation27_spill] sm:$0xff] %v15268_v32  ;;  %12089 = vmatmul.msk.bf16.vlgmr.msra.gmra.mxu3 %vm1581_vm3, %v8030_v15 }
 0x887   : > { %v7783_v26 = vpop.f32.mrf.mxu2 }
 0x888   : > { %v7784_v18 = vadd.f32 %v15079_v36, %v7783_v26 }
 0x889   : > { %v6252_v52 = vpop.f32.mrf.mxu3  ;;  %v8829_v37 = vpop.f32.mrf.mxu0 }
 0x88a   : > { %v6348_v48 = vadd.f32 %v6252_v52, %v14682_v29  ;;  %v8830_v49 = vadd.f32 %v15079_v36, %v8829_v37  ;;  %v7960_v32 = vmax.f32 %v7784_v18, 0.0 }
 0x88c   : > { %v9005_v20 = vmax.f32 %v8830_v49, 0.0  ;;  %v15274_v28 = vadd.f32 %v7296_v59, %v6348_v48 }
 0x88d   : > { %v7301_v40 = vpop.f32.mrf.mxu1 }
 0x88e   : > { %v9075_v9 = vpack.c.bf16 %v9005_v20, %v9004_v27 }
 0x88f   : > { %v7785_v17 = vpop.f32.mrf.mxu2 }
 0x890   : > { %v7786_v57 = vadd.f32 %v15079_v36, %v7785_v17  ;;  %12390 = vmatmul.msk.bf16.gmra.mxu1 %vm1581_vm3, %v9075_v9 }
 0x891   : > { %v6254_v15 = vpop.f32.mrf.mxu3  ;;  %v8832_v42 = vpop.f32.mrf.mxu0 }
 0x892   : > { %v7961_v29 = vmax.f32 %v7786_v57, 0.0  ;;  %v6349_v52 = vadd.f32 %v6254_v15, %v14692_v54  ;;  %v8833_v27 = vadd.f32 %v15079_v36, %v8832_v42  ;;  %v12705_v42 = vld [vmem:[%s12861_s29 + $0x838] sm:$0xff] }
 0x894   : > { %v8031_v37 = vpack.c.bf16 %v7961_v29, %v7960_v32  ;;  %12051 = vmatmul.msk.bf16.gmra.mxu2 %vm489_vm2, %v12704_v1  ;;  %12351 = vmatmul.msk.bf16.gmra.mxu0 %vm489_vm2, %v12742_v30  ;;  %v15284_v59 = vadd.f32 %v7298_v11, %v6349_v52  ;;  %v9006_v18 = vmax.f32 %v8833_v27, 0.0  ;;  %v12743_v29 = vld [vmem:[%s12861_s29 + $0x958] sm:$0xff] }
 0x895   : > { %v7303_v26 = vpop.f32.mrf.mxu1 }
 0x896   : > { %12090 = vmatmul.msk.bf16.gmra.mxu3 %vm1581_vm3, %v8031_v37 }
 0x897   : > { %v7788_v48 = vpop.f32.mrf.mxu2 }
 0x898   : > { %v7789_v57 = vadd.f32 %v15079_v36, %v7788_v48 }
 0x899   : > { %v6257_v49 = vpop.f32.mrf.mxu3  ;;  %v8834_v20 = vpop.f32.mrf.mxu0 }
 0x89a   : > { %v6350_v54 = vadd.f32 %v6257_v49, %v14698_v53  ;;  %v8835_v32 = vadd.f32 %v15079_v36, %v8834_v20  ;;  %v7962_v27 = vmax.f32 %v7789_v57, 0.0 }
 0x89c   : > { %v9007_v9 = vmax.f32 %v8835_v32, 0.0  ;;  %v15290_v17 = vadd.f32 %v7301_v40, %v6350_v54 }
 0x89d   : > { %v7306_v11 = vpop.f32.mrf.mxu1 }
 0x89e   : > { %v9076_v1 = vpack.c.bf16 %v9007_v9, %v9006_v18 }
 0x89f   : > { %v7790_v30 = vpop.f32.mrf.mxu2 }
 0x8a0   : > { %v7791_v15 = vadd.f32 %v15079_v36, %v7790_v30  ;;  %12391 = vmatmul.msk.bf16.gmra.mxu1 %vm1581_vm3, %v9076_v1 }
 0x8a1   : > { %v6259_v52 = vpop.f32.mrf.mxu3  ;;  %v8837_v37 = vpop.f32.mrf.mxu0 }
 0x8a2   : > { %v7963_v53 = vmax.f32 %v7791_v15, 0.0  ;;  %v6351_v49 = vadd.f32 %v6259_v52, %v14708_v39  ;;  %v8838_v18 = vadd.f32 %v15079_v36, %v8837_v37 }
 0x8a4   : > { %v8032_v20 = vpack.c.bf16 %v7963_v53, %v7962_v27  ;;  %12052 = vmatmul.msk.bf16.gmra.mxu2 %vm489_vm2, %v12705_v42  ;;  %12352 = vmatmul.msk.bf16.gmra.mxu0 %vm489_vm2, %v12743_v29  ;;  %v15300_v40 = vadd.f32 %v7303_v26, %v6351_v49  ;;  %v9008_v57 = vmax.f32 %v8838_v18, 0.0  ;;  %v12706_v27 = vld [vmem:[%s12861_s29 + $0x840] sm:$0xff] }
 0x8a5   : > { %v7308_v48 = vpop.f32.mrf.mxu1  ;;  %v12744_v53 = vld [vmem:[%s12861_s29 + $0x960] sm:$0xff] }
 0x8a6   : > { %12091 = vmatmul.msk.bf16.gmra.mxu3 %vm1581_vm3, %v8032_v20 }
 0x8a7   : > { %v7793_v54 = vpop.f32.mrf.mxu2 }
 0x8a8   : > { %v7794_v42 = vadd.f32 %v15079_v36, %v7793_v54 }
 0x8a9   : > { %v6262_v32 = vpop.f32.mrf.mxu3  ;;  %v8839_v9 = vpop.f32.mrf.mxu0 }
 0x8aa   : > { %v6352_v39 = vadd.f32 %v6262_v32, %v14714_v44  ;;  %v8840_v1 = vadd.f32 %v15079_v36, %v8839_v9  ;;  %v7964_v18 = vmax.f32 %v7794_v42, 0.0 }
 0x8ac   : > { %v9009_v30 = vmax.f32 %v8840_v1, 0.0  ;;  %v15306_v15 = vadd.f32 %v7306_v11, %v6352_v39 }
 0x8ad   : > { %v7311_v26 = vpop.f32.mrf.mxu1 }
 0x8ae   : > { %v9077_v29 = vpack.c.bf16 %v9009_v30, %v9008_v57 }
 0x8af   : > { %v7795_v52 = vpop.f32.mrf.mxu2 }
 0x8b0   : > { %v7796_v37 = vadd.f32 %v15079_v36, %v7795_v52  ;;  %12392 = vmatmul.msk.bf16.gmra.mxu1 %vm1581_vm3, %v9077_v29 }
 0x8b1   : > { %v6264_v49 = vpop.f32.mrf.mxu3  ;;  %v8842_v20 = vpop.f32.mrf.mxu0 }
 0x8b2   : > { %v7965_v44 = vmax.f32 %v7796_v37, 0.0  ;;  %v6353_v32 = vadd.f32 %v6264_v49, %v14724_v50  ;;  %v8843_v57 = vadd.f32 %v15079_v36, %v8842_v20 }
 0x8b4   : > { %v8033_v9 = vpack.c.bf16 %v7965_v44, %v7964_v18  ;;  %12053 = vmatmul.msk.bf16.gmra.mxu2 %vm489_vm2, %v12706_v27  ;;  %12353 = vmatmul.msk.bf16.gmra.mxu0 %vm489_vm2, %v12744_v53  ;;  %v15316_v11 = vadd.f32 %v7308_v48, %v6353_v32  ;;  %v9010_v42 = vmax.f32 %v8843_v57, 0.0  ;;  %v12707_v18 = vld [vmem:[%s12861_s29 + $0x848] sm:$0xff] }
 0x8b5   : > { %v7313_v54 = vpop.f32.mrf.mxu1  ;;  %v12745_v44 = vld [vmem:[%s12861_s29 + $0x968] sm:$0xff] }
 0x8b6   : > { %12092 = vmatmul.msk.bf16.gmra.mxu3 %vm1581_vm3, %v8033_v9 }
 0x8b7   : > { %v7798_v39 = vpop.f32.mrf.mxu2 }
 0x8b8   : > { %v7799_v27 = vadd.f32 %v15079_v36, %v7798_v39 }
 0x8b9   : > { %v6267_v1 = vpop.f32.mrf.mxu3  ;;  %v8844_v30 = vpop.f32.mrf.mxu0 }
 0x8ba   : > { %v6354_v50 = vadd.f32 %v6267_v1, %v14730_v25  ;;  %v8845_v29 = vadd.f32 %v15079_v36, %v8844_v30  ;;  %v7966_v57 = vmax.f32 %v7799_v27, 0.0 }
 0x8bc   : > { %v9011_v52 = vmax.f32 %v8845_v29, 0.0  ;;  %v15322_v37 = vadd.f32 %v7311_v26, %v6354_v50 }
 0x8bd   : > { %v7316_v48 = vpop.f32.mrf.mxu1 }
 0x8be   : > { %v9078_v53 = vpack.c.bf16 %v9011_v52, %v9010_v42 }
 0x8bf   : > { %v7800_v49 = vpop.f32.mrf.mxu2 }
 0x8c0   : > { %v7801_v20 = vadd.f32 %v15079_v36, %v7800_v49  ;;  %12393 = vmatmul.msk.bf16.gmra.mxu1 %vm1581_vm3, %v9078_v53 }
 0x8c1   : > { %v6269_v32 = vpop.f32.mrf.mxu3  ;;  %v8847_v9 = vpop.f32.mrf.mxu0 }
 0x8c2   : > { %v7967_v25 = vmax.f32 %v7801_v20, 0.0  ;;  %v6355_v1 = vadd.f32 %v6269_v32, %v14740_v6  ;;  %v8848_v42 = vadd.f32 %v15079_v36, %v8847_v9 }
 0x8c4   : > { %v8034_v30 = vpack.c.bf16 %v7967_v25, %v7966_v57  ;;  %12054 = vmatmul.msk.bf16.gmra.mxu2 %vm489_vm2, %v12707_v18  ;;  %12354 = vmatmul.msk.bf16.gmra.mxu0 %vm489_vm2, %v12745_v44  ;;  %v15332_v26 = vadd.f32 %v7313_v54, %v6355_v1  ;;  %v9012_v27 = vmax.f32 %v8848_v42, 0.0  ;;  %v12708_v57 = vld [vmem:[%s12861_s29 + $0x850] sm:$0xff] }
 0x8c5   : > { %v7318_v39 = vpop.f32.mrf.mxu1  ;;  %v12746_v25 = vld [vmem:[%s12861_s29 + $0x970] sm:$0xff] }
 0x8c6   : > { %12093 = vmatmul.msk.bf16.gmra.mxu3 %vm1581_vm3, %v8034_v30 }
 0x8c7   : > { %v7803_v50 = vpop.f32.mrf.mxu2 }
 0x8c8   : > { %v7804_v18 = vadd.f32 %v15079_v36, %v7803_v50 }
 0x8c9   : > { %v6272_v29 = vpop.f32.mrf.mxu3  ;;  %v8849_v52 = vpop.f32.mrf.mxu0 }
 0x8ca   : > { %v6356_v6 = vadd.f32 %v6272_v29, %v14746_v61  ;;  %v8850_v53 = vadd.f32 %v15079_v36, %v8849_v52  ;;  %v7968_v42 = vmax.f32 %v7804_v18, 0.0 }
 0x8cc   : > { %v9013_v49 = vmax.f32 %v8850_v53, 0.0  ;;  %v15338_v20 = vadd.f32 %v7316_v48, %v6356_v6 }
 0x8cd   : > { %v7321_v54 = vpop.f32.mrf.mxu1 }
 0x8ce   : > { %v9079_v44 = vpack.c.bf16 %v9013_v49, %v9012_v27 }
 0x8cf   : > { %v7805_v32 = vpop.f32.mrf.mxu2 }
 0x8d0   : > { %v7806_v9 = vadd.f32 %v15079_v36, %v7805_v32  ;;  %12394 = vmatmul.msk.bf16.gmra.mxu1 %vm1581_vm3, %v9079_v44 }
 0x8d1   : > { %v6274_v1 = vpop.f32.mrf.mxu3  ;;  %v8852_v30 = vpop.f32.mrf.mxu0 }
 0x8d2   : > { %v7969_v61 = vmax.f32 %v7806_v9, 0.0  ;;  %v6357_v29 = vadd.f32 %v6274_v1, %v14756_v2  ;;  %v8853_v27 = vadd.f32 %v15079_v36, %v8852_v30 }
 0x8d4   : > { %v8035_v52 = vpack.c.bf16 %v7969_v61, %v7968_v42  ;;  %12055 = vmatmul.msk.bf16.gmra.mxu2 %vm489_vm2, %v12708_v57  ;;  %12355 = vmatmul.msk.bf16.gmra.mxu0 %vm489_vm2, %v12746_v25  ;;  %v15348_v48 = vadd.f32 %v7318_v39, %v6357_v29  ;;  %v9014_v18 = vmax.f32 %v8853_v27, 0.0  ;;  %v12709_v42 = vld [vmem:[%s12861_s29 + $0x858] sm:$0xff] }
 0x8d5   : > { %v7323_v50 = vpop.f32.mrf.mxu1  ;;  %v12747_v61 = vld [vmem:[%s12861_s29 + $0x978] sm:$0xff] }
 0x8d6   : > { %12094 = vmatmul.msk.bf16.gmra.mxu3 %vm1581_vm3, %v8035_v52 }
 0x8d7   : > { %v7808_v6 = vpop.f32.mrf.mxu2 }
 0x8d8   : > { %v7809_v57 = vadd.f32 %v15079_v36, %v7808_v6 }
 0x8d9   : > { %v6277_v53 = vpop.f32.mrf.mxu3  ;;  %v8854_v49 = vpop.f32.mrf.mxu0 }
 0x8da   : > { %v6358_v2 = vadd.f32 %v6277_v53, %v14762_v13  ;;  %v8855_v44 = vadd.f32 %v15079_v36, %v8854_v49  ;;  %v7970_v27 = vmax.f32 %v7809_v57, 0.0 }
 0x8dc   : > { %v9015_v32 = vmax.f32 %v8855_v44, 0.0  ;;  %v15354_v9 = vadd.f32 %v7321_v54, %v6358_v2 }
 0x8dd   : > { %v7326_v39 = vpop.f32.mrf.mxu1 }
 0x8de   : > { %v9080_v25 = vpack.c.bf16 %v9015_v32, %v9014_v18 }
 0x8df   : > { %v7810_v1 = vpop.f32.mrf.mxu2 }
 0x8e0   : > { %v7811_v30 = vadd.f32 %v15079_v36, %v7810_v1  ;;  %12395 = vmatmul.msk.bf16.gmra.mxu1 %vm1581_vm3, %v9080_v25 }
 0x8e1   : > { %v6279_v29 = vpop.f32.mrf.mxu3  ;;  %v8857_v52 = vpop.f32.mrf.mxu0 }
 0x8e2   : > { %v7971_v13 = vmax.f32 %v7811_v30, 0.0  ;;  %v6359_v53 = vadd.f32 %v6279_v29, %v14772_v12  ;;  %v8858_v18 = vadd.f32 %v15079_v36, %v8857_v52 }
 0x8e4   : > { %v8036_v49 = vpack.c.bf16 %v7971_v13, %v7970_v27  ;;  %12056 = vmatmul.msk.bf16.gmra.mxu2 %vm489_vm2, %v12709_v42  ;;  %12356 = vmatmul.msk.bf16.gmra.mxu0 %vm489_vm2, %v12747_v61  ;;  %v15364_v54 = vadd.f32 %v7323_v50, %v6359_v53  ;;  %v9016_v57 = vmax.f32 %v8858_v18, 0.0  ;;  %v12710_v27 = vld [vmem:[%s12861_s29 + $0x860] sm:$0xff] }
 0x8e5   : > { %v7328_v6 = vpop.f32.mrf.mxu1  ;;  %v12748_v13 = vld [vmem:[%s12861_s29 + $0x980] sm:$0xff] }
 0x8e6   : > { %12095 = vmatmul.msk.bf16.gmra.mxu3 %vm1581_vm3, %v8036_v49 }
 0x8e7   : > { %v7813_v2 = vpop.f32.mrf.mxu2 }
 0x8e8   : > { %v7814_v42 = vadd.f32 %v15079_v36, %v7813_v2 }
 0x8e9   : > { %v6282_v44 = vpop.f32.mrf.mxu3  ;;  %v8859_v32 = vpop.f32.mrf.mxu0 }
 0x8ea   : > { %v6360_v12 = vadd.f32 %v6282_v44, %v14783_v19  ;;  %v8860_v25 = vadd.f32 %v15079_v36, %v8859_v32  ;;  %v7972_v18 = vmax.f32 %v7814_v42, 0.0 }
 0x8ec   : > { %v9017_v1 = vmax.f32 %v8860_v25, 0.0  ;;  %v15370_v30 = vadd.f32 %v7326_v39, %v6360_v12 }
 0x8ed   : > { %v7331_v50 = vpop.f32.mrf.mxu1 }
 0x8ee   : > { %v9081_v61 = vpack.c.bf16 %v9017_v1, %v9016_v57 }
 0x8ef   : > { %v7815_v29 = vpop.f32.mrf.mxu2 }
 0x8f0   : > { %v7816_v52 = vadd.f32 %v15079_v36, %v7815_v29  ;;  %12396 = vmatmul.msk.bf16.gmra.mxu1 %vm1581_vm3, %v9081_v61  ;;  %v15385_v36 = vld [vmem:[%s16006_s2] ss:$0 sm:$0xff] }
 0x8f1   : > { %v6284_v53 = vpop.f32.mrf.mxu3  ;;  %v8862_v49 = vpop.f32.mrf.mxu0 }
 0x8f2   : > { %v7973_v19 = vmax.f32 %v7816_v52, 0.0  ;;  %v6361_v44 = vadd.f32 %v6284_v53, %v14793_v23  ;;  %v8863_v57 = vadd.f32 %v15385_v36, %v8862_v49 }
 0x8f4   : > { %v8037_v32 = vpack.c.bf16 %v7973_v19, %v7972_v18  ;;  %12057 = vmatmul.msk.bf16.gmra.mxu2 %vm489_vm2, %v12710_v27  ;;  %12357 = vmatmul.msk.bf16.gmra.mxu0 %vm489_vm2, %v12748_v13  ;;  %v15380_v39 = vadd.f32 %v7328_v6, %v6361_v44  ;;  %v9018_v1 = vmax.f32 %v8863_v57, 0.0  ;;  %v12711_v18 = vld [vmem:[%s12861_s29 + $0x868] sm:$0xff] }
 0x8f5   : > { %v7333_v2 = vpop.f32.mrf.mxu1  ;;  %v12749_v19 = vld [vmem:[%s12861_s29 + $0x988] sm:$0xff] }
 0x8f6   : > { %16185 = vst [vmem:[#allocation28_spill] sm:$0xff] %v15380_v39  ;;  %12096 = vmatmul.msk.bf16.gmra.mxu3 %vm1581_vm3, %v8037_v32 }
 0x8f7   : > { %v7818_v23 = vpop.f32.mrf.mxu2 }
 0x8f8   : > { %v7819_v27 = vadd.f32 %v15385_v36, %v7818_v23 }
 0x8f9   : > { %v6287_v12 = vpop.f32.mrf.mxu3  ;;  %v8864_v25 = vpop.f32.mrf.mxu0 }
 0x8fa   : > { %v6362_v42 = vadd.f32 %v6287_v12, %v14799_v62  ;;  %v8865_v6 = vadd.f32 %v15385_v36, %v8864_v25  ;;  %v7974_v57 = vmax.f32 %v7819_v27, 0.0 }
 0x8fc   : > { %v9019_v61 = vmax.f32 %v8865_v6, 0.0  ;;  %v15391_v29 = vadd.f32 %v7331_v50, %v6362_v42 }
 0x8fd   : > { %v9244_v52 = vpop.f32.mrf.mxu1 }
 0x8fe   : > { %16186 = vst [vmem:[#allocation29_spill] sm:$0xff] %v15391_v29  ;;  %v9082_v13 = vpack.c.bf16 %v9019_v61, %v9018_v1  ;;  %v16216_v29 = vld [vmem:[#allocation22_spill] sm:$0xff] }
 0x8ff   : > { %v7820_v53 = vpop.f32.mrf.mxu2 }
 0x900   : > { %v7821_v49 = vadd.f32 %v15385_v36, %v7820_v53  ;;  %12397 = vmatmul.msk.bf16.gmra.mxu1 %vm1581_vm3, %v9082_v13 }
 0x901   : > { %v6289_v44 = vpop.f32.mrf.mxu3  ;;  %v8867_v32 = vpop.f32.mrf.mxu0 }
 0x902   : > { %v7975_v62 = vmax.f32 %v7821_v49, 0.0  ;;  %v6363_v12 = vadd.f32 %v6289_v44, %v14809_v58  ;;  %v8868_v1 = vadd.f32 %v15385_v36, %v8867_v32 }
 0x904   : > { %v8038_v25 = vpack.c.bf16 %v7975_v62, %v7974_v57  ;;  %12058 = vmatmul.msk.bf16.gmra.mxu2 %vm489_vm2, %v12711_v18  ;;  %12358 = vmatmul.msk.bf16.gmra.mxu0 %vm489_vm2, %v12749_v19  ;;  %v15401_v50 = vadd.f32 %v7333_v2, %v6363_v12  ;;  %v9020_v27 = vmax.f32 %v8868_v1, 0.0  ;;  %v12712_v57 = vld [vmem:[%s12861_s29 + $0x870] sm:$0xff] }
 0x905   : > { %v9246_v23 = vpop.f32.mrf.mxu1  ;;  %v12750_v62 = vld [vmem:[%s12861_s29 + $0x990] sm:$0xff] }
 0x906   : > { %16187 = vst [vmem:[#allocation30_spill] sm:$0xff] %v15401_v50  ;;  %12097 = vmatmul.msk.bf16.gmra.mxu3 %vm1581_vm3, %v8038_v25 }
 0x907   : > { %v7823_v42 = vpop.f32.mrf.mxu2 }
 0x908   : > { %v7824_v18 = vadd.f32 %v15385_v36, %v7823_v42 }
 0x909   : > { %v8200_v6 = vpop.f32.mrf.mxu3  ;;  %v8869_v61 = vpop.f32.mrf.mxu0 }
 0x90a   : > { %v8380_v58 = vadd.f32 %v8200_v6, %v14815_v16  ;;  %v8870_v13 = vadd.f32 %v15385_v36, %v8869_v61  ;;  %v7976_v1 = vmax.f32 %v7824_v18, 0.0 }
 0x90c   : > { %v15407_v53 = vadd.f32 %v9244_v52, %v8380_v58  ;;  %v9021_v49 = vmax.f32 %v8870_v13, 0.0 }
 0x90d   : > { %v9249_v2 = vpop.f32.mrf.mxu1 }
 0x90e   : > { %v9083_v19 = vpack.c.bf16 %v9021_v49, %v9020_v27 }
 0x90f   : > { %v7825_v44 = vpop.f32.mrf.mxu2 }
 0x910   : > { %v7826_v32 = vadd.f32 %v15385_v36, %v7825_v44  ;;  %12398 = vmatmul.msk.bf16.gmra.mxu1 %vm1581_vm3, %v9083_v19 }
 0x911   : > { %v8202_v12 = vpop.f32.mrf.mxu3  ;;  %v8872_v25 = vpop.f32.mrf.mxu0 }
 0x912   : > { %v7977_v16 = vmax.f32 %v7826_v32, 0.0  ;;  %v8381_v6 = vadd.f32 %v8202_v12, %v14825_v7  ;;  %v8873_v27 = vadd.f32 %v15385_v36, %v8872_v25 }
 0x914   : > { %v8039_v52 = vpack.c.bf16 %v7977_v16, %v7976_v1  ;;  %v15415_v61 = vadd.f32 %v9246_v23, %v8381_v6  ;;  %12059 = vmatmul.msk.bf16.gmra.mxu2 %vm489_vm2, %v12712_v57  ;;  %12359 = vmatmul.msk.bf16.gmra.mxu0 %vm489_vm2, %v12750_v62  ;;  %v9022_v18 = vmax.f32 %v8873_v27, 0.0  ;;  %v12713_v1 = vld [vmem:[%s12861_s29 + $0x878] sm:$0xff] }
 0x915   : > { %v9251_v42 = vpop.f32.mrf.mxu1  ;;  %v12751_v16 = vld [vmem:[%s12861_s29 + $0x998] sm:$0xff] }
 0x916   : > { %12098 = vmatmul.msk.bf16.gmra.mxu3 %vm1581_vm3, %v8039_v52 }
 0x917   : > { %v7828_v58 = vpop.f32.mrf.mxu2 }
 0x918   : > { %v7829_v57 = vadd.f32 %v15385_v36, %v7828_v58 }
 0x919   : > { %v8205_v13 = vpop.f32.mrf.mxu3  ;;  %v8874_v49 = vpop.f32.mrf.mxu0 }
 0x91a   : > { %v8382_v7 = vadd.f32 %v8205_v13, %v14831_v0  ;;  %v8875_v23 = vadd.f32 %v15385_v36, %v8874_v49  ;;  %v7978_v27 = vmax.f32 %v7829_v57, 0.0 }
 0x91c   : > { %v15423_v19 = vadd.f32 %v9249_v2, %v8382_v7  ;;  %v9023_v44 = vmax.f32 %v8875_v23, 0.0 }
 0x91d   : > { %v9254_v32 = vpop.f32.mrf.mxu1 }
 0x91e   : > { %v9084_v62 = vpack.c.bf16 %v9023_v44, %v9022_v18 }
 0x91f   : > { %v7830_v12 = vpop.f32.mrf.mxu2 }
 0x920   : > { %v7831_v25 = vadd.f32 %v15385_v36, %v7830_v12  ;;  %12399 = vmatmul.msk.bf16.gmra.mxu1 %vm1581_vm3, %v9084_v62 }
 0x921   : > { %v8207_v6 = vpop.f32.mrf.mxu3  ;;  %v8877_v52 = vpop.f32.mrf.mxu0 }
 0x922   : > { %v7979_v0 = vmax.f32 %v7831_v25, 0.0  ;;  %v8383_v13 = vadd.f32 %v8207_v6, %v14841_v8  ;;  %v8878_v18 = vadd.f32 %v15385_v36, %v8877_v52 }
 0x924   : > { %v8040_v2 = vpack.c.bf16 %v7979_v0, %v7978_v27  ;;  %v15431_v49 = vadd.f32 %v9251_v42, %v8383_v13  ;;  %12060 = vmatmul.msk.bf16.gmra.mxu2 %vm489_vm2, %v12713_v1  ;;  %12360 = vmatmul.msk.bf16.gmra.mxu0 %vm489_vm2, %v12751_v16  ;;  %v9024_v57 = vmax.f32 %v8878_v18, 0.0  ;;  %v12714_v27 = vld [vmem:[%s12861_s29 + $0x880] sm:$0xff] }
 0x925   : > { %v9256_v58 = vpop.f32.mrf.mxu1  ;;  %v12752_v0 = vld [vmem:[%s12861_s29 + $0x9a0] sm:$0xff] }
 0x926   : > { %12099 = vmatmul.msk.bf16.gmra.mxu3 %vm1581_vm3, %v8040_v2 }
 0x927   : > { %v7833_v7 = vpop.f32.mrf.mxu2 }
 0x928   : > { %v7834_v1 = vadd.f32 %v15385_v36, %v7833_v7 }
 0x929   : > { %v8210_v23 = vpop.f32.mrf.mxu3  ;;  %v8879_v44 = vpop.f32.mrf.mxu0 }
 0x92a   : > { %v8384_v8 = vadd.f32 %v8210_v23, %v14847_v55  ;;  %v8880_v42 = vadd.f32 %v15385_v36, %v8879_v44  ;;  %v7980_v18 = vmax.f32 %v7834_v1, 0.0 }
 0x92c   : > { %v15439_v62 = vadd.f32 %v9254_v32, %v8384_v8  ;;  %v9025_v12 = vmax.f32 %v8880_v42, 0.0 }
 0x92d   : > { %v9259_v25 = vpop.f32.mrf.mxu1 }
 0x92e   : > { %v9085_v16 = vpack.c.bf16 %v9025_v12, %v9024_v57 }
 0x92f   : > { %v7835_v6 = vpop.f32.mrf.mxu2 }
 0x930   : > { %v7836_v52 = vadd.f32 %v15385_v36, %v7835_v6  ;;  %12400 = vmatmul.msk.bf16.gmra.mxu1 %vm1581_vm3, %v9085_v16 }
 0x931   : > { %v8212_v13 = vpop.f32.mrf.mxu3  ;;  %v8882_v2 = vpop.f32.mrf.mxu0 }
 0x932   : > { %v7981_v55 = vmax.f32 %v7836_v52, 0.0  ;;  %v8385_v23 = vadd.f32 %v8212_v13, %v14857_v31  ;;  %v8883_v57 = vadd.f32 %v15385_v36, %v8882_v2 }
 0x934   : > { %v8041_v32 = vpack.c.bf16 %v7981_v55, %v7980_v18  ;;  %v15447_v44 = vadd.f32 %v9256_v58, %v8385_v23  ;;  %12061 = vmatmul.msk.bf16.gmra.mxu2 %vm489_vm2, %v12714_v27  ;;  %12361 = vmatmul.msk.bf16.gmra.mxu0 %vm489_vm2, %v12752_v0  ;;  %v9026_v1 = vmax.f32 %v8883_v57, 0.0  ;;  %v12715_v18 = vld [vmem:[%s12861_s29 + $0x888] sm:$0xff] }
 0x935   : > { %v9261_v7 = vpop.f32.mrf.mxu1  ;;  %v12753_v55 = vld [vmem:[%s12861_s29 + $0x9a8] sm:$0xff] }
 0x936   : > { %12100 = vmatmul.msk.bf16.gmra.mxu3 %vm1581_vm3, %v8041_v32 }
 0x937   : > { %v7838_v8 = vpop.f32.mrf.mxu2 }
 0x938   : > { %v7839_v27 = vadd.f32 %v15385_v36, %v7838_v8 }
 0x939   : > { %v8215_v42 = vpop.f32.mrf.mxu3  ;;  %v8884_v12 = vpop.f32.mrf.mxu0 }
 0x93a   : > { %v8386_v31 = vadd.f32 %v8215_v42, %v14863_v21  ;;  %v8885_v58 = vadd.f32 %v15385_v36, %v8884_v12  ;;  %v7982_v57 = vmax.f32 %v7839_v27, 0.0 }
 0x93c   : > { %v15455_v16 = vadd.f32 %v9259_v25, %v8386_v31  ;;  %v9027_v6 = vmax.f32 %v8885_v58, 0.0 }
 0x93d   : > { %v9264_v52 = vpop.f32.mrf.mxu1 }
 0x93e   : > { %v9086_v0 = vpack.c.bf16 %v9027_v6, %v9026_v1 }
 0x93f   : > { %v7840_v13 = vpop.f32.mrf.mxu2 }
 0x940   : > { %v7841_v2 = vadd.f32 %v15385_v36, %v7840_v13  ;;  %12401 = vmatmul.msk.bf16.gmra.mxu1 %vm1581_vm3, %v9086_v0 }
 0x941   : > { %v8217_v23 = vpop.f32.mrf.mxu3  ;;  %v8887_v32 = vpop.f32.mrf.mxu0 }
 0x942   : > { %v7983_v21 = vmax.f32 %v7841_v2, 0.0  ;;  %v8387_v42 = vadd.f32 %v8217_v23, %v14873_v24  ;;  %v8888_v1 = vadd.f32 %v15385_v36, %v8887_v32 }
 0x944   : > { %v8042_v25 = vpack.c.bf16 %v7983_v21, %v7982_v57  ;;  %v15463_v12 = vadd.f32 %v9261_v7, %v8387_v42  ;;  %12062 = vmatmul.msk.bf16.gmra.mxu2 %vm489_vm2, %v12715_v18  ;;  %12362 = vmatmul.msk.bf16.gmra.mxu0 %vm489_vm2, %v12753_v55  ;;  %v9028_v27 = vmax.f32 %v8888_v1, 0.0  ;;  %v12716_v57 = vld [vmem:[%s12861_s29 + $0x890] sm:$0xff] }
 0x945   : > { %v9266_v8 = vpop.f32.mrf.mxu1  ;;  %v12754_v21 = vld [vmem:[%s12861_s29 + $0x9b0] sm:$0xff] }
 0x946   : > { %12101 = vmatmul.msk.bf16.gmra.mxu3 %vm1581_vm3, %v8042_v25 }
 0x947   : > { %v7843_v31 = vpop.f32.mrf.mxu2 }
 0x948   : > { %v7844_v18 = vadd.f32 %v15385_v36, %v7843_v31 }
 0x949   : > { %v8220_v58 = vpop.f32.mrf.mxu3  ;;  %v8889_v6 = vpop.f32.mrf.mxu0 }
 0x94a   : > { %v8388_v24 = vadd.f32 %v8220_v58, %v14879_v33  ;;  %v8890_v7 = vadd.f32 %v15385_v36, %v8889_v6  ;;  %v7984_v1 = vmax.f32 %v7844_v18, 0.0 }
 0x94c   : > { %v15471_v0 = vadd.f32 %v9264_v52, %v8388_v24  ;;  %v9029_v13 = vmax.f32 %v8890_v7, 0.0 }
 0x94d   : > { %v9269_v2 = vpop.f32.mrf.mxu1 }
 0x94e   : > { %v9087_v55 = vpack.c.bf16 %v9029_v13, %v9028_v27 }
 0x94f   : > { %v7845_v23 = vpop.f32.mrf.mxu2 }
 0x950   : > { %v7846_v32 = vadd.f32 %v15385_v36, %v7845_v23  ;;  %12402 = vmatmul.msk.bf16.gmra.mxu1 %vm1581_vm3, %v9087_v55 }
 0x951   : > { %v8222_v42 = vpop.f32.mrf.mxu3  ;;  %v8892_v25 = vpop.f32.mrf.mxu0 }
 0x952   : > { %v7985_v33 = vmax.f32 %v7846_v32, 0.0  ;;  %v8389_v58 = vadd.f32 %v8222_v42, %v14889_v22  ;;  %v8893_v27 = vadd.f32 %v15385_v36, %v8892_v25 }
 0x954   : > { %v8043_v52 = vpack.c.bf16 %v7985_v33, %v7984_v1  ;;  %v15479_v6 = vadd.f32 %v9266_v8, %v8389_v58  ;;  %12063 = vmatmul.msk.bf16.gmra.mxu2 %vm489_vm2, %v12716_v57  ;;  %12363 = vmatmul.msk.bf16.gmra.mxu0 %vm489_vm2, %v12754_v21  ;;  %v9030_v18 = vmax.f32 %v8893_v27, 0.0  ;;  %v12717_v1 = vld [vmem:[%s12861_s29 + $0x898] sm:$0xff] }
 0x955   : > { %v9271_v31 = vpop.f32.mrf.mxu1  ;;  %v12755_v33 = vld [vmem:[%s12861_s29 + $0x9b8] sm:$0xff] }
 0x956   : > { %12102 = vmatmul.msk.bf16.gmra.mxu3 %vm1581_vm3, %v8043_v52 }
 0x957   : > { %v7848_v24 = vpop.f32.mrf.mxu2 }
 0x958   : > { %v7849_v57 = vadd.f32 %v15385_v36, %v7848_v24 }
 0x959   : > { %v8225_v7 = vpop.f32.mrf.mxu3  ;;  %v8894_v13 = vpop.f32.mrf.mxu0 }
 0x95a   : > { %v8390_v22 = vadd.f32 %v8225_v7, %v14895_v51  ;;  %v8895_v8 = vadd.f32 %v15385_v36, %v8894_v13  ;;  %v7986_v27 = vmax.f32 %v7849_v57, 0.0 }
 0x95c   : > { %v15487_v55 = vadd.f32 %v9269_v2, %v8390_v22  ;;  %v9031_v23 = vmax.f32 %v8895_v8, 0.0 }
 0x95d   : > { %v9274_v32 = vpop.f32.mrf.mxu1 }
 0x95e   : > { %v9088_v21 = vpack.c.bf16 %v9031_v23, %v9030_v18 }
 0x95f   : > { %v7850_v42 = vpop.f32.mrf.mxu2 }
 0x960   : > { %v7851_v25 = vadd.f32 %v15385_v36, %v7850_v42  ;;  %12403 = vmatmul.msk.bf16.gmra.mxu1 %vm1581_vm3, %v9088_v21 }
 0x961   : > { %v8227_v58 = vpop.f32.mrf.mxu3  ;;  %v8897_v52 = vpop.f32.mrf.mxu0 }
 0x962   : > { %v7987_v51 = vmax.f32 %v7851_v25, 0.0  ;;  %v8391_v7 = vadd.f32 %v8227_v58, %v14905_v43  ;;  %v8898_v18 = vadd.f32 %v15385_v36, %v8897_v52 }
 0x964   : > { %v8044_v2 = vpack.c.bf16 %v7987_v51, %v7986_v27  ;;  %v15495_v13 = vadd.f32 %v9271_v31, %v8391_v7  ;;  %12064 = vmatmul.msk.bf16.gmra.mxu2 %vm489_vm2, %v12717_v1  ;;  %12364 = vmatmul.msk.bf16.gmra.mxu0 %vm489_vm2, %v12755_v33  ;;  %v9032_v57 = vmax.f32 %v8898_v18, 0.0  ;;  %v12718_v27 = vld [vmem:[%s12861_s29 + $0x8a0] sm:$0xff] }
 0x965   : > { %v9276_v24 = vpop.f32.mrf.mxu1  ;;  %v12756_v51 = vld [vmem:[%s12861_s29 + $0x9c0] sm:$0xff] }
 0x966   : > { %12103 = vmatmul.msk.bf16.gmra.mxu3 %vm1581_vm3, %v8044_v2 }
 0x967   : > { %v7853_v22 = vpop.f32.mrf.mxu2 }
 0x968   : > { %v7854_v1 = vadd.f32 %v15385_v36, %v7853_v22 }
 0x969   : > { %v8230_v8 = vpop.f32.mrf.mxu3  ;;  %v8899_v23 = vpop.f32.mrf.mxu0 }
 0x96a   : > { %v8392_v43 = vadd.f32 %v8230_v8, %v14911_v56  ;;  %v8900_v31 = vadd.f32 %v15385_v36, %v8899_v23  ;;  %v7988_v18 = vmax.f32 %v7854_v1, 0.0 }
 0x96c   : > { %v15503_v21 = vadd.f32 %v9274_v32, %v8392_v43  ;;  %v9033_v42 = vmax.f32 %v8900_v31, 0.0 }
 0x96d   : > { %v9279_v25 = vpop.f32.mrf.mxu1 }
 0x96e   : > { %v9089_v33 = vpack.c.bf16 %v9033_v42, %v9032_v57 }
 0x96f   : > { %v7855_v58 = vpop.f32.mrf.mxu2 }
 0x970   : > { %v7856_v52 = vadd.f32 %v15385_v36, %v7855_v58  ;;  %12404 = vmatmul.msk.bf16.gmra.mxu1 %vm1581_vm3, %v9089_v33 }
 0x971   : > { %v8232_v7 = vpop.f32.mrf.mxu3  ;;  %v8902_v2 = vpop.f32.mrf.mxu0 }
 0x972   : > { %v7989_v56 = vmax.f32 %v7856_v52, 0.0  ;;  %v8393_v8 = vadd.f32 %v8232_v7, %v14921_v45  ;;  %v8903_v57 = vadd.f32 %v15385_v36, %v8902_v2 }
 0x974   : > { %v8045_v32 = vpack.c.bf16 %v7989_v56, %v7988_v18  ;;  %v15511_v23 = vadd.f32 %v9276_v24, %v8393_v8  ;;  %12065 = vmatmul.msk.bf16.gmra.mxu2 %vm489_vm2, %v12718_v27  ;;  %12365 = vmatmul.msk.bf16.gmra.mxu0 %vm489_vm2, %v12756_v51  ;;  %v9034_v1 = vmax.f32 %v8903_v57, 0.0  ;;  %v12719_v18 = vld [vmem:[%s12861_s29 + $0x8a8] sm:$0xff] }
 0x975   : > { %v9281_v22 = vpop.f32.mrf.mxu1  ;;  %v12757_v56 = vld [vmem:[%s12861_s29 + $0x9c8] sm:$0xff] }
 0x976   : > { %12104 = vmatmul.msk.bf16.gmra.mxu3 %vm1581_vm3, %v8045_v32 }
 0x977   : > { %v7858_v43 = vpop.f32.mrf.mxu2 }
 0x978   : > { %v7859_v27 = vadd.f32 %v15385_v36, %v7858_v43 }
 0x979   : > { %v8235_v31 = vpop.f32.mrf.mxu3  ;;  %v8904_v42 = vpop.f32.mrf.mxu0 }
 0x97a   : > { %v8394_v45 = vadd.f32 %v8235_v31, %v14927_v5  ;;  %v8905_v24 = vadd.f32 %v15385_v36, %v8904_v42  ;;  %v7990_v57 = vmax.f32 %v7859_v27, 0.0 }
 0x97c   : > { %v15519_v33 = vadd.f32 %v9279_v25, %v8394_v45  ;;  %v9035_v58 = vmax.f32 %v8905_v24, 0.0 }
 0x97d   : > { %v9284_v52 = vpop.f32.mrf.mxu1 }
 0x97e   : > { %v9090_v51 = vpack.c.bf16 %v9035_v58, %v9034_v1 }
 0x97f   : > { %v7860_v7 = vpop.f32.mrf.mxu2 }
 0x980   : > { %v7861_v2 = vadd.f32 %v15385_v36, %v7860_v7  ;;  %12405 = vmatmul.msk.bf16.gmra.mxu1 %vm1581_vm3, %v9090_v51 }
 0x981   : > { %v8237_v8 = vpop.f32.mrf.mxu3  ;;  %v8907_v32 = vpop.f32.mrf.mxu0 }
 0x982   : > { %v7991_v5 = vmax.f32 %v7861_v2, 0.0  ;;  %v8395_v31 = vadd.f32 %v8237_v8, %v14937_v3  ;;  %v8908_v1 = vadd.f32 %v15385_v36, %v8907_v32 }
 0x984   : > { %v8046_v25 = vpack.c.bf16 %v7991_v5, %v7990_v57  ;;  %v15527_v42 = vadd.f32 %v9281_v22, %v8395_v31  ;;  %12066 = vmatmul.msk.bf16.gmra.mxu2 %vm489_vm2, %v12719_v18  ;;  %12366 = vmatmul.msk.bf16.gmra.mxu0 %vm489_vm2, %v12757_v56  ;;  %v9036_v27 = vmax.f32 %v8908_v1, 0.0  ;;  %v12720_v57 = vld [vmem:[%s12861_s29 + $0x8b0] sm:$0xff] }
 0x985   : > { %v9286_v43 = vpop.f32.mrf.mxu1  ;;  %v12758_v5 = vld [vmem:[%s12861_s29 + $0x9d0] sm:$0xff] }
 0x986   : > { %12105 = vmatmul.msk.bf16.gmra.mxu3 %vm1581_vm3, %v8046_v25 }
 0x987   : > { %v7863_v45 = vpop.f32.mrf.mxu2 }
 0x988   : > { %v7864_v18 = vadd.f32 %v15385_v36, %v7863_v45 }
 0x989   : > { %v8240_v24 = vpop.f32.mrf.mxu3  ;;  %v8909_v58 = vpop.f32.mrf.mxu0 }
 0x98a   : > { %v8396_v3 = vadd.f32 %v8240_v24, %v14946_v35  ;;  %v8910_v22 = vadd.f32 %v15385_v36, %v8909_v58  ;;  %v7992_v1 = vmax.f32 %v7864_v18, 0.0 }
 0x98c   : > { %v15535_v51 = vadd.f32 %v9284_v52, %v8396_v3  ;;  %v9037_v7 = vmax.f32 %v8910_v22, 0.0  ;;  %v15552_v22 = vld [vmem:[%s16008_s4] ss:$0 sm:$0xff] }
 0x98d   : > { %v9289_v2 = vpop.f32.mrf.mxu1 }
 0x98e   : > { %v9091_v56 = vpack.c.bf16 %v9037_v7, %v9036_v27 }
 0x98f   : > { %v7865_v8 = vpop.f32.mrf.mxu2 }
 0x990   : > { %v7866_v32 = vadd.f32 %v15385_v36, %v7865_v8  ;;  %12406 = vmatmul.msk.bf16.gmra.mxu1 %vm1581_vm3, %v9091_v56  ;;  %v9500_v8 = vadd.f32 %v15552_v22, %v15407_v53 }
 0x991   : > { %v8242_v31 = vpop.f32.mrf.mxu3  ;;  %v8912_v25 = vpop.f32.mrf.mxu0 }
 0x992   : > { %v7993_v35 = vmax.f32 %v7866_v32, 0.0  ;;  %v8397_v24 = vadd.f32 %v8242_v31, %v14959_v47  ;;  %v8913_v27 = vadd.f32 %v15385_v36, %v8912_v25 }
 0x994   : > { %v8047_v52 = vpack.c.bf16 %v7993_v35, %v7992_v1  ;;  %v15543_v58 = vadd.f32 %v9286_v43, %v8397_v24  ;;  %12067 = vmatmul.msk.bf16.gmra.mxu2 %vm489_vm2, %v12720_v57  ;;  %12367 = vmatmul.msk.bf16.gmra.mxu0 %vm489_vm2, %v12758_v5  ;;  %v9038_v43 = vmax.f32 %v8913_v27, 0.0  ;;  %v9572_v24 = vmax.f32 %v9500_v8, 0.0 }
 0x995   : > { %v9291_v45 = vpop.f32.mrf.mxu1 }
 0x996   : > { %12106 = vmatmul.msk.bf16.gmra.mxu3 %vm1581_vm3, %v8047_v52 }
 0x997   : > { %v7868_v3 = vpop.f32.mrf.mxu2 }
 0x998   : > { %v7869_v31 = vadd.f32 %v15385_v36, %v7868_v3 }
 0x999   : > { %v8245_v7 = vpop.f32.mrf.mxu3  ;;  %v8914_v47 = vpop.f32.mrf.mxu0 }
 0x99a   : > { %v8398_v18 = vadd.f32 %v8245_v7, %v14965_v10  ;;  %v8915_v56 = vadd.f32 %v15385_v36, %v8914_v47  ;;  %v12721_v10 = vld [vmem:[%s12861_s29 + $0x8b8] sm:$0xff]  ;;  %v7994_v53 = vmax.f32 %v7869_v31, 0.0 }
 0x99b   : > { %v12759_v7 = vld [vmem:[%s12861_s29 + $0x9d8] sm:$0xff] }
 0x99c   : > { %v9442_v32 = vadd.f32 %v9289_v2, %v8398_v18  ;;  %v9039_v57 = vmax.f32 %v8915_v56, 0.0 }
 0x99d   : > { %v9294_v5 = vpop.f32.mrf.mxu1 }
 0x99e   : > { %v9518_v25 = vadd.f32 %v15552_v22, %v9442_v32  ;;  %v9092_v1 = vpack.c.bf16 %v9039_v57, %v9038_v43  ;;  %v9501_v43 = vadd.f32 %v15552_v22, %v15415_v61 }
 0x99f   : > { %v7870_v35 = vpop.f32.mrf.mxu2 }
 0x9a0   : > { %v9590_v52 = vmax.f32 %v9518_v25, 0.0  ;;  %v7871_v27 = vadd.f32 %v15385_v36, %v7870_v35  ;;  %12407 = vmatmul.msk.bf16.gmra.mxu1 %vm1581_vm3, %v9092_v1  ;;  %v9573_v1 = vmax.f32 %v9501_v43, 0.0 }
 0x9a1   : > { %v8247_v47 = vpop.f32.mrf.mxu3  ;;  %v8917_v50 = vpop.f32.mrf.mxu0 }
 0x9a2   : > { %v15564_v2 = vmax.f32 %v9572_v24, %v9590_v52  ;;  %v7995_v18 = vmax.f32 %v7871_v27, 0.0  ;;  %v8399_v3 = vadd.f32 %v8247_v47, %v14975_v63  ;;  %v8918_v25 = vadd.f32 %v15385_v36, %v8917_v50 }
 0x9a4   : > { %v8048_v56 = vpack.c.bf16 %v7995_v18, %v7994_v53  ;;  %v9443_v8 = vadd.f32 %v9291_v45, %v8399_v3  ;;  %12068 = vmatmul.msk.bf16.gmra.mxu2 %vm489_vm2, %v12721_v10  ;;  %12368 = vmatmul.msk.bf16.gmra.mxu0 %vm489_vm2, %v12759_v7  ;;  %v9040_v61 = vmax.f32 %v8918_v25, 0.0  ;;  %v9502_v10 = vadd.f32 %v15552_v22, %v15423_v19  ;;  %v12760_v25 = vld [vmem:[%s12861_s29 + $0x9e0] sm:$0xff] }
 0x9a5   : > { %v9296_v32 = vpop.f32.mrf.mxu1 }
 0x9a6   : > { %v9519_v57 = vadd.f32 %v15552_v22, %v9443_v8  ;;  %12107 = vmatmul.msk.bf16.gmra.mxu3 %vm1581_vm3, %v8048_v56  ;;  %v9574_v56 = vmax.f32 %v9502_v10, 0.0 }
 0x9a7   : > { %v7873_v31 = vpop.f32.mrf.mxu2 }
 0x9a8   : > { %v9591_v35 = vmax.f32 %v9519_v57, 0.0  ;;  %v7874_v53 = vadd.f32 %v15385_v36, %v7873_v31 }
 0x9a9   : > { %v8250_v63 = vpop.f32.mrf.mxu3  ;;  %v8919_v24 = vpop.f32.mrf.mxu0 }
 0x9aa   : > { %v15574_v52 = vmax.f32 %v9573_v1, %v9591_v35  ;;  %v8400_v45 = vadd.f32 %v8250_v63, %v14981_v38  ;;  %v8920_v27 = vadd.f32 %v15385_v36, %v8919_v24  ;;  %v12722_v38 = vld [vmem:[%s12861_s29 + $0x8c0] sm:$0xff]  ;;  %v7996_v19 = vmax.f32 %v7874_v53, 0.0 }
 0x9ab   : > { %v9503_v24 = vadd.f32 %v15552_v22, %v15431_v49 }
 0x9ac   : > { %v9444_v50 = vadd.f32 %v9294_v5, %v8400_v45  ;;  %v9041_v7 = vmax.f32 %v8920_v27, 0.0 }
 0x9ad   : > { %v9299_v47 = vpop.f32.mrf.mxu1  ;;  %v9575_v53 = vmax.f32 %v9503_v24, 0.0 }
 0x9ae   : > { %v9520_v18 = vadd.f32 %v15552_v22, %v9444_v50  ;;  %v9093_v3 = vpack.c.bf16 %v9041_v7, %v9040_v61 }
 0x9af   : > { %v7875_v43 = vpop.f32.mrf.mxu2 }
 0x9b0   : > { %v9592_v8 = vmax.f32 %v9520_v18, 0.0  ;;  %v7876_v57 = vadd.f32 %v15385_v36, %v7875_v43  ;;  %12408 = vmatmul.msk.bf16.gmra.mxu1 %vm1581_vm3, %v9093_v3 }
 0x9b1   : > { %v8252_v1 = vpop.f32.mrf.mxu3  ;;  %v8922_v35 = vpop.f32.mrf.mxu0 }
 0x9b2   : > { %v15586_v5 = vmax.f32 %v9574_v56, %v9592_v8  ;;  %v7997_v63 = vmax.f32 %v7876_v57, 0.0  ;;  %v8401_v31 = vadd.f32 %v8252_v1, %v14991_v46  ;;  %v8923_v50 = vadd.f32 %v15385_v36, %v8922_v35 }
 0x9b3   : > { %v9504_v8 = vadd.f32 %v15552_v22, %v15439_v62 }
 0x9b4   : > { %v8049_v61 = vpack.c.bf16 %v7997_v63, %v7996_v19  ;;  %v9445_v45 = vadd.f32 %v9296_v32, %v8401_v31  ;;  %12069 = vmatmul.msk.bf16.gmra.mxu2 %vm489_vm2, %v12722_v38  ;;  %12369 = vmatmul.msk.bf16.gmra.mxu0 %vm489_vm2, %v12760_v25  ;;  %v9042_v49 = vmax.f32 %v8923_v50, 0.0 }
 0x9b5   : > { %v9301_v27 = vpop.f32.mrf.mxu1  ;;  %v9576_v31 = vmax.f32 %v9504_v8, 0.0 }
 0x9b6   : > { %v9521_v10 = vadd.f32 %v15552_v22, %v9445_v45  ;;  %12108 = vmatmul.msk.bf16.gmra.mxu3 %vm1581_vm3, %v8049_v61  ;;  %v12761_v45 = vld [vmem:[%s12861_s29 + $0x9e8] sm:$0xff] }
 0x9b7   : > { %v7878_v7 = vpop.f32.mrf.mxu2 }
 0x9b8   : > { %v9593_v18 = vmax.f32 %v9521_v10, 0.0  ;;  %v7879_v1 = vadd.f32 %v15385_v36, %v7878_v7 }
 0x9b9   : > { %v8255_v46 = vpop.f32.mrf.mxu3  ;;  %v8924_v3 = vpop.f32.mrf.mxu0 }
 0x9ba   : > { %v15596_v43 = vmax.f32 %v9575_v53, %v9593_v18  ;;  %v8402_v32 = vadd.f32 %v8255_v46, %v14997_v41  ;;  %v8925_v56 = vadd.f32 %v15385_v36, %v8924_v3  ;;  %v12723_v41 = vld [vmem:[%s12861_s29 + $0x8c8] sm:$0xff]  ;;  %v7998_v62 = vmax.f32 %v7879_v1, 0.0 }
 0x9bb   : > { %v9505_v18 = vadd.f32 %v15552_v22, %v15447_v44 }
 0x9bc   : > { %v9446_v57 = vadd.f32 %v9299_v47, %v8402_v32  ;;  %v9043_v38 = vmax.f32 %v8925_v56, 0.0 }
 0x9bd   : > { %v9304_v25 = vpop.f32.mrf.mxu1 }
 0x9be   : > { %v9522_v35 = vadd.f32 %v15552_v22, %v9446_v57  ;;  %v9094_v19 = vpack.c.bf16 %v9043_v38, %v9042_v49  ;;  %v9577_v57 = vmax.f32 %v9505_v18, 0.0 }
 0x9bf   : > { %v7880_v63 = vpop.f32.mrf.mxu2 }
 0x9c0   : > { %v9594_v24 = vmax.f32 %v9522_v35, 0.0  ;;  %v7881_v61 = vadd.f32 %v15385_v36, %v7880_v63  ;;  %12409 = vmatmul.msk.bf16.gmra.mxu1 %vm1581_vm3, %v9094_v19 }
 0x9c1   : > { %v8257_v10 = vpop.f32.mrf.mxu3  ;;  %v8927_v50 = vpop.f32.mrf.mxu0 }
 0x9c2   : > { %v15608_v47 = vmax.f32 %v9576_v31, %v9594_v24  ;;  %v7999_v53 = vmax.f32 %v7881_v61, 0.0  ;;  %v8403_v7 = vadd.f32 %v8257_v10, %v15007_v34  ;;  %v8928_v56 = vadd.f32 %v15385_v36, %v8927_v50 }
 0x9c3   : > { %v9506_v31 = vadd.f32 %v15552_v22, %v15455_v16 }
 0x9c4   : > { %v8050_v46 = vpack.c.bf16 %v7999_v53, %v7998_v62  ;;  %v9447_v3 = vadd.f32 %v9301_v27, %v8403_v7  ;;  %12070 = vmatmul.msk.bf16.gmra.mxu2 %vm489_vm2, %v12723_v41  ;;  %12370 = vmatmul.msk.bf16.gmra.mxu0 %vm489_vm2, %v12761_v45  ;;  %v9044_v44 = vmax.f32 %v8928_v56, 0.0  ;;  %v16188_v27 = vld [vmem:[#allocation31_spill] sm:$0xff] }
 0x9c5   : > { %v9306_v49 = vpop.f32.mrf.mxu1  ;;  %v9578_v53 = vmax.f32 %v9506_v31, 0.0 }
 0x9c6   : > { %v9523_v32 = vadd.f32 %v15552_v22, %v9447_v3  ;;  %12109 = vmatmul.msk.bf16.gmra.mxu3 %vm1581_vm3, %v8050_v46  ;;  %v12724_v46 = vld [vmem:[%s12861_s29 + $0x8d0] sm:$0xff] }
 0x9c7   : > { %v7883_v8 = vpop.f32.mrf.mxu2  ;;  %v12762_v3 = vld [vmem:[%s12861_s29 + $0x9f0] sm:$0xff] }
 0x9c8   : > { %v9595_v38 = vmax.f32 %v9523_v32, 0.0  ;;  %v7884_v45 = vadd.f32 %v15385_v36, %v7883_v8 }
 0x9c9   : > { %v8260_v34 = vpop.f32.mrf.mxu3  ;;  %v8929_v1 = vpop.f32.mrf.mxu0 }
 0x9ca   : > { %v15618_v35 = vmax.f32 %v9577_v57, %v9595_v38  ;;  %v8404_v19 = vadd.f32 %v8260_v34, %v16188_v27  ;;  %v8930_v63 = vadd.f32 %v15385_v36, %v8929_v1  ;;  %v8000_v16 = vmax.f32 %v7884_v45, 0.0  ;;  %v16189_v38 = vld [vmem:[#allocation32_spill] sm:$0xff] }
 0x9cb   : > { %v9507_v34 = vadd.f32 %v15552_v22, %v15463_v12 }
 0x9cc   : > { %v9448_v24 = vadd.f32 %v9304_v25, %v8404_v19  ;;  %v9045_v61 = vmax.f32 %v8930_v63, 0.0 }
 0x9cd   : > { %v9309_v41 = vpop.f32.mrf.mxu1 }
 0x9ce   : > { %v9524_v10 = vadd.f32 %v15552_v22, %v9448_v24  ;;  %v9095_v50 = vpack.c.bf16 %v9045_v61, %v9044_v44  ;;  %v9579_v24 = vmax.f32 %v9507_v34, 0.0 }
 0x9cf   : > { %v7885_v62 = vpop.f32.mrf.mxu2 }
 0x9d0   : > { %v9596_v7 = vmax.f32 %v9524_v10, 0.0  ;;  %v7886_v18 = vadd.f32 %v15385_v36, %v7885_v62  ;;  %12410 = vmatmul.msk.bf16.gmra.mxu1 %vm1581_vm3, %v9095_v50 }
 0x9d1   : > { %v8262_v32 = vpop.f32.mrf.mxu3  ;;  %v8932_v56 = vpop.f32.mrf.mxu0 }
 0x9d2   : > { %v15630_v25 = vmax.f32 %v9578_v53, %v9596_v7  ;;  %v8001_v57 = vmax.f32 %v7886_v18, 0.0  ;;  %v8405_v8 = vadd.f32 %v8262_v32, %v16189_v38  ;;  %v8933_v63 = vadd.f32 %v15385_v36, %v8932_v56 }
 0x9d3   : > { %v9508_v7 = vadd.f32 %v15552_v22, %v15471_v0 }
 0x9d4   : > { %v8051_v1 = vpack.c.bf16 %v8001_v57, %v8000_v16  ;;  %v9449_v44 = vadd.f32 %v9306_v49, %v8405_v8  ;;  %12071 = vmatmul.msk.bf16.gmra.mxu2 %vm489_vm2, %v12724_v46  ;;  %12371 = vmatmul.msk.bf16.gmra.mxu0 %vm489_vm2, %v12762_v3  ;;  %v9046_v12 = vmax.f32 %v8933_v63, 0.0  ;;  %v16190_v49 = vld [vmem:[#allocation33_spill] sm:$0xff] }
 0x9d5   : > { %v9311_v27 = vpop.f32.mrf.mxu1  ;;  %v9580_v38 = vmax.f32 %v9508_v7, 0.0 }
 0x9d6   : > { %v9525_v19 = vadd.f32 %v15552_v22, %v9449_v44  ;;  %12110 = vmatmul.msk.bf16.gmra.mxu3 %vm1581_vm3, %v8051_v1  ;;  %v12725_v1 = vld [vmem:[%s12861_s29 + $0x8d8] sm:$0xff] }
 0x9d7   : > { %v7888_v31 = vpop.f32.mrf.mxu2  ;;  %v12763_v44 = vld [vmem:[%s12861_s29 + $0x9f8] sm:$0xff] }
 0x9d8   : > { %v9597_v61 = vmax.f32 %v9525_v19, 0.0  ;;  %v7889_v32 = vadd.f32 %v15385_v36, %v7888_v31 }
 0x9d9   : > { %v8265_v45 = vpop.f32.mrf.mxu3  ;;  %v8934_v10 = vpop.f32.mrf.mxu0 }
 0x9da   : > { %v15640_v50 = vmax.f32 %v9579_v24, %v9597_v61  ;;  %v8406_v62 = vadd.f32 %v8265_v45, %v16190_v49  ;;  %v8935_v53 = vadd.f32 %v15385_v36, %v8934_v10  ;;  %v8002_v0 = vmax.f32 %v7889_v32, 0.0  ;;  %v16191_v61 = vld [vmem:[#allocation13_spill] sm:$0xff] }
 0x9db   : > { %v9509_v45 = vadd.f32 %v15552_v22, %v15479_v6 }
 0x9dc   : > { %v9450_v18 = vadd.f32 %v9309_v41, %v8406_v62  ;;  %v9047_v46 = vmax.f32 %v8935_v53, 0.0 }
 0x9dd   : > { %v9314_v3 = vpop.f32.mrf.mxu1 }
 0x9de   : > { %v9526_v56 = vadd.f32 %v15552_v22, %v9450_v18  ;;  %v9096_v16 = vpack.c.bf16 %v9047_v46, %v9046_v12  ;;  %v9581_v18 = vmax.f32 %v9509_v45, 0.0 }
 0x9df   : > { %v7890_v57 = vpop.f32.mrf.mxu2 }
 0x9e0   : > { %v9598_v8 = vmax.f32 %v9526_v56, 0.0  ;;  %v7891_v34 = vadd.f32 %v15385_v36, %v7890_v57  ;;  %12411 = vmatmul.msk.bf16.gmra.mxu1 %vm1581_vm3, %v9096_v16 }
 0x9e1   : > { %v8267_v19 = vpop.f32.mrf.mxu3  ;;  %v8937_v63 = vpop.f32.mrf.mxu0 }
 0x9e2   : > { %v15652_v41 = vmax.f32 %v9580_v38, %v9598_v8  ;;  %v8003_v24 = vmax.f32 %v7891_v34, 0.0  ;;  %v8407_v31 = vadd.f32 %v8267_v19, %v16191_v61  ;;  %v8938_v53 = vadd.f32 %v15385_v36, %v8937_v63 }
 0x9e3   : > { %v9510_v8 = vadd.f32 %v15552_v22, %v15487_v55 }
 0x9e4   : > { %v8052_v10 = vpack.c.bf16 %v8003_v24, %v8002_v0  ;;  %v9451_v12 = vadd.f32 %v9311_v27, %v8407_v31  ;;  %12072 = vmatmul.msk.bf16.gmra.mxu2 %vm489_vm2, %v12725_v1  ;;  %12372 = vmatmul.msk.bf16.gmra.mxu0 %vm489_vm2, %v12763_v44  ;;  %v9048_v6 = vmax.f32 %v8938_v53, 0.0  ;;  %v16192_v27 = vld [vmem:[#allocation14_spill] sm:$0xff] }
 0x9e5   : > { %v9316_v49 = vpop.f32.mrf.mxu1  ;;  %v9582_v61 = vmax.f32 %v9510_v8, 0.0 }
 0x9e6   : > { %v9527_v62 = vadd.f32 %v15552_v22, %v9451_v12  ;;  %12111 = vmatmul.msk.bf16.gmra.mxu3 %vm1581_vm3, %v8052_v10  ;;  %v12726_v10 = vld [vmem:[%s12861_s29 + $0x8e0] sm:$0xff] }
 0x9e7   : > { %v7893_v7 = vpop.f32.mrf.mxu2  ;;  %v12764_v12 = vld [vmem:[%s12861_s29 + $0xa00] sm:$0xff] }
 0x9e8   : > { %v9599_v46 = vmax.f32 %v9527_v62, 0.0  ;;  %v7894_v19 = vadd.f32 %v15385_v36, %v7893_v7 }
 0x9e9   : > { %v8270_v32 = vpop.f32.mrf.mxu3  ;;  %v8939_v56 = vpop.f32.mrf.mxu0 }
 0x9ea   : > { %v15662_v16 = vmax.f32 %v9581_v18, %v9599_v46  ;;  %v8408_v57 = vadd.f32 %v8270_v32, %v16192_v27  ;;  %v8940_v38 = vadd.f32 %v15385_v36, %v8939_v56  ;;  %v8004_v55 = vmax.f32 %v7894_v19, 0.0  ;;  %v16193_v46 = vld [vmem:[#allocation15_spill] sm:$0xff] }
 0x9eb   : > { %v9511_v32 = vadd.f32 %v15552_v22, %v15495_v13 }
 0x9ec   : > { %v9452_v34 = vadd.f32 %v9314_v3, %v8408_v57  ;;  %v9049_v1 = vmax.f32 %v8940_v38, 0.0 }
 0x9ed   : > { %v9319_v44 = vpop.f32.mrf.mxu1 }
 0x9ee   : > { %v9528_v63 = vadd.f32 %v15552_v22, %v9452_v34  ;;  %v9097_v0 = vpack.c.bf16 %v9049_v1, %v9048_v6  ;;  %v9583_v34 = vmax.f32 %v9511_v32, 0.0 }
 0x9ef   : > { %v7895_v24 = vpop.f32.mrf.mxu2 }
 0x9f0   : > { %v9600_v31 = vmax.f32 %v9528_v63, 0.0  ;;  %v7896_v45 = vadd.f32 %v15385_v36, %v7895_v24  ;;  %12412 = vmatmul.msk.bf16.gmra.mxu1 %vm1581_vm3, %v9097_v0 }
 0x9f1   : > { %v8272_v62 = vpop.f32.mrf.mxu3  ;;  %v8942_v53 = vpop.f32.mrf.mxu0 }
 0x9f2   : > { %v15674_v3 = vmax.f32 %v9582_v61, %v9600_v31  ;;  %v8005_v18 = vmax.f32 %v7896_v45, 0.0  ;;  %v8409_v7 = vadd.f32 %v8272_v62, %v16193_v46  ;;  %v8943_v38 = vadd.f32 %v15385_v36, %v8942_v53  ;;  %v15690_v61 = vld [vmem:[%s16006_s2] ss:$0 sm:$0xff] }
 0x9f3   : > { %v9512_v31 = vadd.f32 %v15552_v22, %v15503_v21 }
 0x9f4   : > { %v8053_v56 = vpack.c.bf16 %v8005_v18, %v8004_v55  ;;  %v9453_v6 = vadd.f32 %v9316_v49, %v8409_v7  ;;  %12073 = vmatmul.msk.bf16.gmra.mxu2 %vm489_vm2, %v12726_v10  ;;  %12373 = vmatmul.msk.bf16.gmra.mxu0 %vm489_vm2, %v12764_v12  ;;  %v9050_v13 = vmax.f32 %v8943_v38, 0.0  ;;  %v16194_v49 = vld [vmem:[#allocation16_spill] sm:$0xff] }
 0x9f5   : > { %v9321_v27 = vpop.f32.mrf.mxu1  ;;  %v9584_v46 = vmax.f32 %v9512_v31, 0.0 }
 0x9f6   : > { %v9529_v57 = vadd.f32 %v15552_v22, %v9453_v6  ;;  %12112 = vmatmul.msk.bf16.gmra.mxu3 %vm1581_vm3, %v8053_v56  ;;  %v12727_v56 = vld [vmem:[%s12861_s29 + $0x8e8] sm:$0xff] }
 0x9f7   : > { %v7898_v8 = vpop.f32.mrf.mxu2  ;;  %v12765_v6 = vld [vmem:[%s12861_s29 + $0xa08] sm:$0xff] }
 0x9f8   : > { %v9601_v1 = vmax.f32 %v9529_v57, 0.0  ;;  %v7899_v62 = vadd.f32 %v15690_v61, %v7898_v8 }
 0x9f9   : > { %v8275_v19 = vpop.f32.mrf.mxu3  ;;  %v8944_v63 = vpop.f32.mrf.mxu0 }
 0x9fa   : > { %v15684_v0 = vmax.f32 %v9583_v34, %v9601_v1  ;;  %v8410_v24 = vadd.f32 %v8275_v19, %v16194_v49  ;;  %v8945_v36 = vadd.f32 %v15690_v61, %v8944_v63  ;;  %v8006_v21 = vmax.f32 %v7899_v62, 0.0  ;;  %v16195_v1 = vld [vmem:[#allocation17_spill] sm:$0xff] }
 0x9fb   : > { %v9513_v19 = vadd.f32 %v15552_v22, %v15511_v23 }
 0x9fc   : > { %v9454_v45 = vadd.f32 %v9319_v44, %v8410_v24  ;;  %v9051_v10 = vmax.f32 %v8945_v36, 0.0 }
 0x9fd   : > { %v9324_v12 = vpop.f32.mrf.mxu1 }
 0x9fe   : > { %v9530_v53 = vadd.f32 %v15552_v22, %v9454_v45  ;;  %v9098_v55 = vpack.c.bf16 %v9051_v10, %v9050_v13  ;;  %v9585_v45 = vmax.f32 %v9513_v19, 0.0 }
 0x9ff   : > { %v7900_v18 = vpop.f32.mrf.mxu2 }
 0xa00   : > { %v9602_v7 = vmax.f32 %v9530_v53, 0.0  ;;  %v7901_v32 = vadd.f32 %v15690_v61, %v7900_v18  ;;  %12413 = vmatmul.msk.bf16.gmra.mxu1 %vm1581_vm3, %v9098_v55 }
 0xa01   : > { %v8277_v57 = vpop.f32.mrf.mxu3  ;;  %v8947_v38 = vpop.f32.mrf.mxu0 }
 0xa02   : > { %v15701_v44 = vmax.f32 %v9584_v46, %v9602_v7  ;;  %v8007_v34 = vmax.f32 %v7901_v32, 0.0  ;;  %v8411_v8 = vadd.f32 %v8277_v57, %v16195_v1  ;;  %v8948_v36 = vadd.f32 %v15690_v61, %v8947_v38 }
 0xa03   : > { %v9514_v7 = vadd.f32 %v15552_v22, %v15519_v33 }
 0xa04   : > { %v8054_v63 = vpack.c.bf16 %v8007_v34, %v8006_v21  ;;  %v9455_v13 = vadd.f32 %v9321_v27, %v8411_v8  ;;  %12074 = vmatmul.msk.bf16.gmra.mxu2 %vm489_vm2, %v12727_v56  ;;  %12374 = vmatmul.msk.bf16.gmra.mxu0 %vm489_vm2, %v12765_v6  ;;  %v9052_v23 = vmax.f32 %v8948_v36, 0.0  ;;  %v16197_v27 = vld [vmem:[#allocation18_spill] sm:$0xff] }
 0xa05   : > { %v9326_v49 = vpop.f32.mrf.mxu1  ;;  %v9586_v1 = vmax.f32 %v9514_v7, 0.0 }
 0xa06   : > { %v9531_v24 = vadd.f32 %v15552_v22, %v9455_v13  ;;  %12113 = vmatmul.msk.bf16.gmra.mxu3 %vm1581_vm3, %v8054_v63  ;;  %v12728_v63 = vld [vmem:[%s12861_s29 + $0x8f0] sm:$0xff] }
 0xa07   : > { %v7903_v31 = vpop.f32.mrf.mxu2  ;;  %v12766_v13 = vld [vmem:[%s12861_s29 + $0xa10] sm:$0xff] }
 0xa08   : > { %v9603_v10 = vmax.f32 %v9531_v24, 0.0  ;;  %v7904_v57 = vadd.f32 %v15690_v61, %v7903_v31 }
 0xa09   : > { %v8280_v62 = vpop.f32.mrf.mxu3  ;;  %v8949_v53 = vpop.f32.mrf.mxu0 }
 0xa0a   : > { %v15711_v55 = vmax.f32 %v9585_v45, %v9603_v10  ;;  %v8412_v18 = vadd.f32 %v8280_v62, %v16197_v27  ;;  %v8950_v46 = vadd.f32 %v15690_v61, %v8949_v53  ;;  %v8008_v33 = vmax.f32 %v7904_v57, 0.0  ;;  %v16199_v10 = vld [vmem:[#allocation4_spill] sm:$0xff] }
 0xa0b   : > { %v9515_v62 = vadd.f32 %v15552_v22, %v15527_v42 }
 0xa0c   : > { %16196 = vst [vmem:[#allocation31_spill] sm:$0xff] %v15711_v55  ;;  %v9456_v32 = vadd.f32 %v9324_v12, %v8412_v18  ;;  %v9053_v56 = vmax.f32 %v8950_v46, 0.0  ;;  %v16219_v55 = vld [vmem:[#allocation25_spill] sm:$0xff] }
 0xa0d   : > { %v9329_v6 = vpop.f32.mrf.mxu1 }
 0xa0e   : > { %v9532_v38 = vadd.f32 %v15552_v22, %v9456_v32  ;;  %v9099_v21 = vpack.c.bf16 %v9053_v56, %v9052_v23  ;;  %v9587_v32 = vmax.f32 %v9515_v62, 0.0 }
 0xa0f   : > { %v7905_v34 = vpop.f32.mrf.mxu2 }
 0xa10   : > { %v9604_v8 = vmax.f32 %v9532_v38, 0.0  ;;  %v7906_v19 = vadd.f32 %v15690_v61, %v7905_v34  ;;  %12414 = vmatmul.msk.bf16.gmra.mxu1 %vm1581_vm3, %v9099_v21 }
 0xa11   : > { %v8282_v24 = vpop.f32.mrf.mxu3  ;;  %v8952_v36 = vpop.f32.mrf.mxu0 }
 0xa12   : > { %v15723_v12 = vmax.f32 %v9586_v1, %v9604_v8  ;;  %v8009_v45 = vmax.f32 %v7906_v19, 0.0  ;;  %v8413_v31 = vadd.f32 %v8282_v24, %v16199_v10  ;;  %v8953_v46 = vadd.f32 %v15690_v61, %v8952_v36 }
 0xa13   : > { %v9516_v8 = vadd.f32 %v15552_v22, %v15535_v51 }
 0xa14   : > { %16198 = vst [vmem:[#allocation32_spill] sm:$0xff] %v15723_v12  ;;  %v8055_v53 = vpack.c.bf16 %v8009_v45, %v8008_v33  ;;  %v9457_v23 = vadd.f32 %v9326_v49, %v8413_v31  ;;  %12075 = vmatmul.msk.bf16.gmra.mxu2 %vm489_vm2, %v12728_v63  ;;  %12375 = vmatmul.msk.bf16.gmra.mxu0 %vm489_vm2, %v12766_v13  ;;  %v9054_v42 = vmax.f32 %v8953_v46, 0.0  ;;  %v16201_v49 = vld [vmem:[#allocation3_spill] sm:$0xff] }
 0xa15   : > { %v9331_v27 = vpop.f32.mrf.mxu1  ;;  %v9588_v10 = vmax.f32 %v9516_v8, 0.0  ;;  %v16217_v12 = vld [vmem:[#allocation23_spill] sm:$0xff] }
 0xa16   : > { %v9533_v18 = vadd.f32 %v15552_v22, %v9457_v23  ;;  %12114 = vmatmul.msk.bf16.gmra.mxu3 %vm1581_vm3, %v8055_v53  ;;  %v12729_v53 = vld [vmem:[%s12861_s29 + $0x8f8] sm:$0xff] }
 0xa17   : > { %v7908_v7 = vpop.f32.mrf.mxu2  ;;  %v12767_v23 = vld [vmem:[%s12861_s29 + $0xa18] sm:$0xff] }
 0xa18   : > { %v9605_v56 = vmax.f32 %v9533_v18, 0.0  ;;  %v7909_v24 = vadd.f32 %v15690_v61, %v7908_v7 }
 0xa19   : > { %v8285_v57 = vpop.f32.mrf.mxu3  ;;  %v8954_v38 = vpop.f32.mrf.mxu0 }
 0xa1a   : > { %v15733_v21 = vmax.f32 %v9587_v32, %v9605_v56  ;;  %v8414_v34 = vadd.f32 %v8285_v57, %v16201_v49  ;;  %v8955_v1 = vadd.f32 %v15690_v61, %v8954_v38  ;;  %v8010_v51 = vmax.f32 %v7909_v24, 0.0  ;;  %v16203_v56 = vld [vmem:[#allocation6_spill] sm:$0xff] }
 0xa1b   : > { %v9517_v57 = vadd.f32 %v15552_v22, %v15543_v58 }
 0xa1c   : > { %16200 = vst [vmem:[#allocation33_spill] sm:$0xff] %v15733_v21  ;;  %v9458_v19 = vadd.f32 %v9329_v6, %v8414_v34  ;;  %v9055_v63 = vmax.f32 %v8955_v1, 0.0 }
 0xa1d   : > { %v9334_v13 = vpop.f32.mrf.mxu1 }
 0xa1e   : > { %v9534_v36 = vadd.f32 %v15552_v22, %v9458_v19  ;;  %v9100_v33 = vpack.c.bf16 %v9055_v63, %v9054_v42  ;;  %v9589_v19 = vmax.f32 %v9517_v57, 0.0  ;;  %v16206_v57 = vld [vmem:[#allocation8_spill] sm:$0xff] }
 0xa1f   : > { %v7910_v45 = vpop.f32.mrf.mxu2 }
 0xa20   : > { %v9606_v31 = vmax.f32 %v9534_v36, 0.0  ;;  %v7911_v62 = vadd.f32 %v15690_v61, %v7910_v45  ;;  %12415 = vmatmul.msk.bf16.gmra.mxu1 %vm1581_vm3, %v9100_v33 }
 0xa21   : > { %v8287_v18 = vpop.f32.mrf.mxu3  ;;  %v8957_v46 = vpop.f32.mrf.mxu0 }
 0xa22   : > { %v15745_v6 = vmax.f32 %v9588_v10, %v9606_v31  ;;  %v8011_v32 = vmax.f32 %v7911_v62, 0.0  ;;  %v8415_v7 = vadd.f32 %v8287_v18, %v16203_v56  ;;  %v8958_v1 = vadd.f32 %v15690_v61, %v8957_v46 }
 0xa24   : > { %16202 = vst [vmem:[#allocation13_spill] sm:$0xff] %v15745_v6  ;;  %v8056_v38 = vpack.c.bf16 %v8011_v32, %v8010_v51  ;;  %v9459_v42 = vadd.f32 %v9331_v27, %v8415_v7  ;;  %12076 = vmatmul.msk.bf16.gmra.mxu2 %vm489_vm2, %v12729_v53  ;;  %12376 = vmatmul.msk.bf16.gmra.mxu0 %vm489_vm2, %v12767_v23  ;;  %v9056_v58 = vmax.f32 %v8958_v1, 0.0  ;;  %v16205_v27 = vld [vmem:[#allocation5_spill] sm:$0xff]  ;;  %v16214_v6 = vld [vmem:[#allocation20_spill] sm:$0xff] }
 0xa25   : > { %v9336_v49 = vpop.f32.mrf.mxu1 }
 0xa26   : > { %v9535_v34 = vadd.f32 %v15552_v22, %v9459_v42  ;;  %12115 = vmatmul.msk.bf16.gmra.mxu3 %vm1581_vm3, %v8056_v38 }
 0xa27   : > { %v7913_v8 = vpop.f32.mrf.mxu2 }
 0xa28   : > { %v9607_v63 = vmax.f32 %v9535_v34, 0.0  ;;  %v7914_v53 = vadd.f32 %v15690_v61, %v7913_v8 }
 0xa29   : > { %v8290_v24 = vpop.f32.mrf.mxu3  ;;  %v8959_v36 = vpop.f32.mrf.mxu0 }
 0xa2a   : > { %v15755_v33 = vmax.f32 %v9589_v19, %v9607_v63  ;;  %v8416_v45 = vadd.f32 %v8290_v24, %v16205_v27  ;;  %v8960_v10 = vadd.f32 %v15690_v61, %v8959_v36  ;;  %v8012_v56 = vmax.f32 %v7914_v53, 0.0  ;;  %v16207_v36 = vld [vmem:[#allocation7_spill] sm:$0xff] }
 0xa2c   : > { %16204 = vst [vmem:[#allocation14_spill] sm:$0xff] %v15755_v33  ;;  %v15759_v31 = vadd.f32 %v9334_v13, %v8416_v45  ;;  %v9057_v62 = vmax.f32 %v8960_v10, 0.0 }
 0xa2d   : > { %v9339_v22 = vpop.f32.mrf.mxu1 }
 0xa2e   : > { %v9101_v23 = vpack.c.bf16 %v9057_v62, %v9056_v58 }
 0xa2f   : > { %v7915_v18 = vpop.f32.mrf.mxu2 }
 0xa30   : > { %v7916_v46 = vadd.f32 %v15690_v61, %v7915_v18  ;;  %12416 = vmatmul.msk.bf16.gmra.mxu1 %vm1581_vm3, %v9101_v23 }
 0xa31   : > { %v8292_v51 = vpop.f32.mrf.mxu3  ;;  %v8962_v32 = vpop.f32.mrf.mxu0 }
 0xa32   : > { %v8013_v7 = vmax.f32 %v7916_v46, 0.0  ;;  %v8417_v38 = vadd.f32 %v8292_v51, %v16206_v57  ;;  %v8963_v1 = vadd.f32 %v15690_v61, %v8962_v32 }
 0xa34   : > { %v8057_v42 = vpack.c.bf16 %v8013_v7, %v8012_v56  ;;  %v15765_v34 = vadd.f32 %v9336_v49, %v8417_v38  ;;  %v9058_v24 = vmax.f32 %v8963_v1, 0.0  ;;  %v16208_v7 = vld [vmem:[#allocation10_spill] sm:$0xff] }
 0xa35   : > { %v9341_v13 = vpop.f32.mrf.mxu1 }
 0xa36   : > { %12116 = vmatmul.msk.bf16.gmra.mxu3 %vm1581_vm3, %v8057_v42 }
 0xa37   : > { %v7918_v8 = vpop.f32.mrf.mxu2 }
 0xa38   : > { %v7919_v49 = vadd.f32 %v15690_v61, %v7918_v8 }
 0xa39   : > { %v8295_v19 = vpop.f32.mrf.mxu3  ;;  %v8964_v63 = vpop.f32.mrf.mxu0 }
 0xa3a   : > { %v8418_v58 = vadd.f32 %v8295_v19, %v16207_v36  ;;  %v8965_v27 = vadd.f32 %v15690_v61, %v8964_v63  ;;  %v8014_v32 = vmax.f32 %v7919_v49, 0.0  ;;  %v16209_v36 = vld [vmem:[#allocation9_spill] sm:$0xff] }
 0xa3c   : > { %v15771_v45 = vadd.f32 %v9339_v22, %v8418_v58  ;;  %v9059_v10 = vmax.f32 %v8965_v27, 0.0 }
 0xa3d   : > { %v9344_v62 = vpop.f32.mrf.mxu1 }
 0xa3e   : > { %v9102_v53 = vpack.c.bf16 %v9059_v10, %v9058_v24 }
 0xa3f   : > { %v7920_v23 = vpop.f32.mrf.mxu2 }
 0xa40   : > { %v7921_v18 = vadd.f32 %v15690_v61, %v7920_v23  ;;  %12417 = vmatmul.msk.bf16.gmra.mxu1 %vm1581_vm3, %v9102_v53 }
 0xa41   : > { %v8297_v46 = vpop.f32.mrf.mxu3  ;;  %v8967_v51 = vpop.f32.mrf.mxu0 }
 0xa42   : > { %v8015_v56 = vmax.f32 %v7921_v18, 0.0  ;;  %v8419_v57 = vadd.f32 %v8297_v46, %v16208_v7  ;;  %v8968_v1 = vadd.f32 %v15690_v61, %v8967_v51 }
 0xa44   : > { %v8058_v38 = vpack.c.bf16 %v8015_v56, %v8014_v32  ;;  %v15777_v42 = vadd.f32 %v9341_v13, %v8419_v57  ;;  %v9060_v24 = vmax.f32 %v8968_v1, 0.0  ;;  %v16210_v57 = vld [vmem:[#allocation12_spill] sm:$0xff] }
 0xa45   : > { %v9346_v22 = vpop.f32.mrf.mxu1 }
 0xa46   : > { %12117 = vmatmul.msk.bf16.gmra.mxu3 %vm1581_vm3, %v8058_v38 }
 0xa47   : > { %v7923_v8 = vpop.f32.mrf.mxu2 }
 0xa48   : > { %v7924_v13 = vadd.f32 %v15690_v61, %v7923_v8 }
 0xa49   : > { %v8300_v19 = vpop.f32.mrf.mxu3  ;;  %v8969_v63 = vpop.f32.mrf.mxu0 }
 0xa4a   : > { %v8420_v58 = vadd.f32 %v8300_v19, %v16209_v36  ;;  %v8970_v27 = vadd.f32 %v15690_v61, %v8969_v63  ;;  %v8016_v56 = vmax.f32 %v7924_v13, 0.0 }
 0xa4c   : > { %v15783_v10 = vadd.f32 %v9344_v62, %v8420_v58  ;;  %v9061_v49 = vmax.f32 %v8970_v27, 0.0  ;;  %v16211_v27 = vld [vmem:[#allocation11_spill] sm:$0xff] }
 0xa4d   : > { %v9349_v53 = vpop.f32.mrf.mxu1 }
 0xa4e   : > { %v9103_v23 = vpack.c.bf16 %v9061_v49, %v9060_v24 }
 0xa4f   : > { %v7925_v18 = vpop.f32.mrf.mxu2 }
 0xa50   : > { %v7926_v46 = vadd.f32 %v15690_v61, %v7925_v18  ;;  %12418 = vmatmul.msk.bf16.gmra.mxu1 %vm1581_vm3, %v9103_v23 }
 0xa51   : > { %v8302_v51 = vpop.f32.mrf.mxu3  ;;  %v8972_v32 = vpop.f32.mrf.mxu0 }
 0xa52   : > { %v8017_v7 = vmax.f32 %v7926_v46, 0.0  ;;  %v8421_v38 = vadd.f32 %v8302_v51, %v16210_v57  ;;  %v8973_v63 = vadd.f32 %v15690_v61, %v8972_v32 }
 0xa54   : > { %v8059_v1 = vpack.c.bf16 %v8017_v7, %v8016_v56  ;;  %v15789_v19 = vadd.f32 %v9346_v22, %v8421_v38  ;;  %v9062_v58 = vmax.f32 %v8973_v63, 0.0  ;;  %v16212_v63 = vld [vmem:[#allocation2_spill] sm:$0xff] }
 0xa55   : > { %v9351_v62 = vpop.f32.mrf.mxu1 }
 0xa56   : > { %12118 = vmatmul.msk.bf16.gmra.mxu3 %vm1581_vm3, %v8059_v1 }
 0xa57   : > { %v7928_v8 = vpop.f32.mrf.mxu2 }
 0xa58   : > { %v7929_v22 = vadd.f32 %v15690_v61, %v7928_v8 }
 0xa59   : > { %v8305_v24 = vpop.f32.mrf.mxu3  ;;  %v8974_v36 = vpop.f32.mrf.mxu0 }
 0xa5a   : > { %v8422_v49 = vadd.f32 %v8305_v24, %v16211_v27  ;;  %v8975_v23 = vadd.f32 %v15690_v61, %v8974_v36  ;;  %v8018_v38 = vmax.f32 %v7929_v22, 0.0 }
 0xa5c   : > { %v15795_v13 = vadd.f32 %v9349_v53, %v8422_v49  ;;  %v9063_v18 = vmax.f32 %v8975_v23, 0.0 }
 0xa5d   : > { %v9354_v46 = vpop.f32.mrf.mxu1 }
 0xa5e   : > { %v9104_v51 = vpack.c.bf16 %v9063_v18, %v9062_v58 }
 0xa5f   : > { %v7930_v56 = vpop.f32.mrf.mxu2 }
 0xa60   : > { %v7931_v32 = vadd.f32 %v15690_v61, %v7930_v56  ;;  %12419 = vmatmul.msk.bf16.gmra.mxu1 %vm1581_vm3, %v9104_v51  ;;  %v16213_v56 = vld [vmem:[#allocation19_spill] sm:$0xff] }
 0xa61   : > { %v8307_v7 = vpop.f32.mrf.mxu3  ;;  %v8977_v57 = vpop.f32.mrf.mxu0 }
 0xa62   : > { %v8019_v1 = vmax.f32 %v7931_v32, 0.0  ;;  %v8423_v24 = vadd.f32 %v8307_v7, %v16212_v63  ;;  %v8978_v49 = vadd.f32 %v15690_v61, %v8977_v57 }
 0xa64   : > { %v8060_v27 = vpack.c.bf16 %v8019_v1, %v8018_v38  ;;  %v15801_v36 = vadd.f32 %v9351_v62, %v8423_v24  ;;  %v9064_v18 = vmax.f32 %v8978_v49, 0.0 }
 0xa65   : > { %v9356_v53 = vpop.f32.mrf.mxu1 }
 0xa66   : > { %12119 = vmatmul.msk.bf16.gmra.mxu3 %vm1581_vm3, %v8060_v27 }
 0xa67   : > { %v7933_v8 = vpop.f32.mrf.mxu2 }
 0xa68   : > { %v7934_v62 = vadd.f32 %v15690_v61, %v7933_v8 }
 0xa69   : > { %v8310_v58 = vpop.f32.mrf.mxu3  ;;  %v8979_v23 = vpop.f32.mrf.mxu0 }
 0xa6a   : > { %v8424_v51 = vadd.f32 %v8310_v58, %v16213_v56  ;;  %v8980_v33 = vadd.f32 %v15690_v61, %v8979_v23  ;;  %v8020_v27 = vmax.f32 %v7934_v62, 0.0 }
 0xa6c   : > { %v15807_v22 = vadd.f32 %v9354_v46, %v8424_v51  ;;  %v9065_v32 = vmax.f32 %v8980_v33, 0.0 }
 0xa6d   : > { %v9359_v7 = vpop.f32.mrf.mxu1 }
 0xa6e   : > { %v9105_v38 = vpack.c.bf16 %v9065_v32, %v9064_v18 }
 0xa6f   : > { %v7935_v1 = vpop.f32.mrf.mxu2 }
 0xa70   : > { %v7936_v57 = vadd.f32 %v15690_v61, %v7935_v1  ;;  %12420 = vmatmul.msk.bf16.gmra.mxu1 %vm1581_vm3, %v9105_v38  ;;  %v16215_v1 = vld [vmem:[#allocation21_spill] sm:$0xff] }
 0xa71   : > { %v8312_v63 = vpop.f32.mrf.mxu3  ;;  %v8982_v24 = vpop.f32.mrf.mxu0 }
 0xa72   : > { %v8021_v49 = vmax.f32 %v7936_v57, 0.0  ;;  %v8425_v58 = vadd.f32 %v8312_v63, %v16214_v6  ;;  %v8983_v33 = vadd.f32 %v15690_v61, %v8982_v24 }
 0xa74   : > { %v8061_v56 = vpack.c.bf16 %v8021_v49, %v8020_v27  ;;  %v15813_v23 = vadd.f32 %v9356_v53, %v8425_v58  ;;  %v9066_v32 = vmax.f32 %v8983_v33, 0.0 }
 0xa75   : > { %v9361_v46 = vpop.f32.mrf.mxu1 }
 0xa76   : > { %12120 = vmatmul.msk.bf16.gmra.mxu3 %vm1581_vm3, %v8061_v56 }
 0xa77   : > { %v7938_v8 = vpop.f32.mrf.mxu2 }
 0xa78   : > { %v7939_v53 = vadd.f32 %v15690_v61, %v7938_v8 }
 0xa79   : > { %v8315_v18 = vpop.f32.mrf.mxu3  ;;  %v8984_v51 = vpop.f32.mrf.mxu0 }
 0xa7a   : > { %v8426_v38 = vadd.f32 %v8315_v18, %v16215_v1  ;;  %v8985_v21 = vadd.f32 %v15690_v61, %v8984_v51  ;;  %v8022_v56 = vmax.f32 %v7939_v53, 0.0 }
 0xa7c   : > { %v15819_v62 = vadd.f32 %v9359_v7, %v8426_v38  ;;  %v9067_v57 = vmax.f32 %v8985_v21, 0.0 }
 0xa7d   : > { %v9364_v6 = vpop.f32.mrf.mxu1 }
 0xa7e   : > { %v9106_v63 = vpack.c.bf16 %v9067_v57, %v9066_v32 }
 0xa7f   : > { %v7940_v27 = vpop.f32.mrf.mxu2 }
 0xa80   : > { %v7941_v24 = vadd.f32 %v15690_v61, %v7940_v27  ;;  %12421 = vmatmul.msk.bf16.gmra.mxu1 %vm1581_vm3, %v9106_v63 }
 0xa81   : > { %v8317_v49 = vpop.f32.mrf.mxu3  ;;  %v8987_v58 = vpop.f32.mrf.mxu0 }
 0xa82   : > { %v8023_v33 = vmax.f32 %v7941_v24, 0.0  ;;  %v8427_v18 = vadd.f32 %v8317_v49, %v16216_v29  ;;  %v8988_v21 = vadd.f32 %v15690_v61, %v8987_v58 }
 0xa84   : > { %v8062_v1 = vpack.c.bf16 %v8023_v33, %v8022_v56  ;;  %v15825_v51 = vadd.f32 %v9361_v46, %v8427_v18  ;;  %v9068_v57 = vmax.f32 %v8988_v21, 0.0 }
 0xa85   : > { %v9366_v7 = vpop.f32.mrf.mxu1 }
 0xa86   : > { %12121 = vmatmul.msk.bf16.gmra.mxu3 %vm1581_vm3, %v8062_v1 }
 0xa87   : > { %v7943_v8 = vpop.f32.mrf.mxu2 }
 0xa88   : > { %v7944_v46 = vadd.f32 %v15690_v61, %v7943_v8 }
 0xa89   : > { %v8320_v32 = vpop.f32.mrf.mxu3  ;;  %v8989_v38 = vpop.f32.mrf.mxu0 }
 0xa8a   : > { %v8428_v63 = vadd.f32 %v8320_v32, %v15210_v60  ;;  %v8990_v27 = vadd.f32 %v15690_v61, %v8989_v38  ;;  %v8024_v1 = vmax.f32 %v7944_v46, 0.0 }
 0xa8c   : > { %v15831_v53 = vadd.f32 %v9364_v6, %v8428_v63  ;;  %v9069_v24 = vmax.f32 %v8990_v27, 0.0 }
 0xa8d   : > { %v9369_v29 = vpop.f32.mrf.mxu1 }
 0xa8e   : > { %v9107_v49 = vpack.c.bf16 %v9069_v24, %v9068_v57 }
 0xa8f   : > { %v7945_v56 = vpop.f32.mrf.mxu2 }
 0xa90   : > { %v7946_v58 = vadd.f32 %v15690_v61, %v7945_v56  ;;  %12422 = vmatmul.msk.bf16.gmra.mxu1 %vm1581_vm3, %v9107_v49  ;;  %v16218_v56 = vld [vmem:[#allocation24_spill] sm:$0xff] }
 0xa91   : > { %v8322_v33 = vpop.f32.mrf.mxu3  ;;  %v8992_v18 = vpop.f32.mrf.mxu0 }
 0xa92   : > { %v8025_v21 = vmax.f32 %v7946_v58, 0.0  ;;  %v8429_v60 = vadd.f32 %v8322_v33, %v16217_v12  ;;  %v8993_v63 = vadd.f32 %v15690_v61, %v8992_v18 }
 0xa94   : > { %v8063_v32 = vpack.c.bf16 %v8025_v21, %v8024_v1  ;;  %v15837_v38 = vadd.f32 %v9366_v7, %v8429_v60  ;;  %v9070_v24 = vmax.f32 %v8993_v63, 0.0 }
 0xa95   : > { %v9371_v6 = vpop.f32.mrf.mxu1 }
 0xa96   : > { %12122 = vmatmul.msk.bf16.gmra.mxu3 %vm1581_vm3, %v8063_v32 }
 0xa97   : > { %v7948_v8 = vpop.f32.mrf.mxu2 }
 0xa98   : > { %v7949_v7 = vadd.f32 %v15690_v61, %v7948_v8 }
 0xa99   : > { %v8325_v57 = vpop.f32.mrf.mxu3  ;;  %v8994_v27 = vpop.f32.mrf.mxu0 }
 0xa9a   : > { %v8430_v49 = vadd.f32 %v8325_v57, %v16218_v56  ;;  %v8995_v39 = vadd.f32 %v15690_v61, %v8994_v27  ;;  %v8026_v32 = vmax.f32 %v7949_v7, 0.0 }
 0xa9c   : > { %v15843_v46 = vadd.f32 %v9369_v29, %v8430_v49  ;;  %v9071_v58 = vmax.f32 %v8995_v39, 0.0 }
 0xa9d   : > { %v9374_v12 = vpop.f32.mrf.mxu1 }
 0xa9e   : > { %v9108_v33 = vpack.c.bf16 %v9071_v58, %v9070_v24 }
 0xa9f   : > { %v7950_v1 = vpop.f32.mrf.mxu2 }
 0xaa0   : > { %v7951_v18 = vadd.f32 %v15690_v61, %v7950_v1  ;;  %12423 = vmatmul.msk.bf16.gmra.mxu1 %vm1581_vm3, %v9108_v33 }
 0xaa1   : > { %v8327_v21 = vpop.f32.mrf.mxu3  ;;  %v8997_v60 = vpop.f32.mrf.mxu0 }
 0xaa2   : > { %v8027_v63 = vmax.f32 %v7951_v18, 0.0  ;;  %v8431_v57 = vadd.f32 %v8327_v21, %v16219_v55  ;;  %v8998_v39 = vadd.f32 %v15690_v61, %v8997_v60 }
 0xaa4   : > { %v8064_v56 = vpack.c.bf16 %v8027_v63, %v8026_v32  ;;  %v15849_v27 = vadd.f32 %v9371_v6, %v8431_v57  ;;  %v9072_v58 = vmax.f32 %v8998_v39, 0.0  ;;  %v16220_v39 = vld [vmem:[#allocation26_spill] sm:$0xff] }
 0xaa5   : > { %v9376_v29 = vpop.f32.mrf.mxu1 }
 0xaa6   : > { %12123 = vmatmul.msk.bf16.gmra.mxu3 %vm1581_vm3, %v8064_v56 }
 0xaa7   : > { %v7953_v8 = vpop.f32.mrf.mxu2 }
 0xaa8   : > { %v7954_v6 = vadd.f32 %v15690_v61, %v7953_v8 }
 0xaa9   : > { %v8330_v24 = vpop.f32.mrf.mxu3  ;;  %v8999_v49 = vpop.f32.mrf.mxu0 }
 0xaaa   : > { %v8432_v33 = vadd.f32 %v8330_v24, %v15242_v4  ;;  %v9000_v1 = vadd.f32 %v15690_v61, %v8999_v49  ;;  %v8028_v57 = vmax.f32 %v7954_v6, 0.0 }
 0xaac   : > { %v15855_v7 = vadd.f32 %v9374_v12, %v8432_v33  ;;  %v9073_v18 = vmax.f32 %v9000_v1, 0.0 }
 0xaad   : > { %v9379_v55 = vpop.f32.mrf.mxu1 }
 0xaae   : > { %v9109_v21 = vpack.c.bf16 %v9073_v18, %v9072_v58 }
 0xaaf   : > { %v7955_v32 = vpop.f32.mrf.mxu2 }
 0xab0   : > { %v7956_v60 = vadd.f32 %v15690_v61, %v7955_v32  ;;  %12424 = vmatmul.msk.bf16.gmra.mxu1 %vm1581_vm3, %v9109_v21  ;;  %v15868_v61 = vld [vmem:[%s16008_s4] ss:$0 sm:$0xff] }
 0xab1   : > { %v8332_v63 = vpop.f32.mrf.mxu3  ;;  %v9536_v58 = vadd.f32 %v15868_v61, %v15759_v31 }
 0xab2   : > { %v8029_v56 = vmax.f32 %v7956_v60, 0.0  ;;  %v8433_v4 = vadd.f32 %v8332_v63, %v16220_v39  ;;  %v16221_v63 = vld [vmem:[#allocation27_spill] sm:$0xff] }
 0xab4   : > { %v8065_v24 = vpack.c.bf16 %v8029_v56, %v8028_v57  ;;  %v15861_v49 = vadd.f32 %v9376_v29, %v8433_v4  ;;  %v9608_v29 = vmax.f32 %v9536_v58, 0.0 }
 0xab5   : > { %v9381_v12 = vpop.f32.mrf.mxu1 }
 0xab6   : > { %12124 = vmatmul.msk.bf16.gmra.mxu3 %vm1581_vm3, %v8065_v24 }
 0xab9   : > { %v8335_v33 = vpop.f32.mrf.mxu3 }
 0xaba   : > { %v8434_v8 = vadd.f32 %v8335_v33, %v15258_v14  ;;  %v9537_v14 = vadd.f32 %v15868_v61, %v15765_v34 }
 0xabc   : > { %v9478_v1 = vadd.f32 %v9379_v55, %v8434_v8  ;;  %v9609_v24 = vmax.f32 %v9537_v14, 0.0 }
 0xabd   : > { %v9384_v18 = vpop.f32.mrf.mxu1 }
 0xabe   : > { %v9554_v6 = vadd.f32 %v15868_v61, %v9478_v1 }
 0xac0   : > { %v9626_v21 = vmax.f32 %v9554_v6, 0.0 }
 0xac1   : > { %v8337_v32 = vpop.f32.mrf.mxu3 }
 0xac2   : > { %v9662_v60 = vmax.f32 %v9608_v29, %v9626_v21  ;;  %v8435_v57 = vadd.f32 %v8337_v32, %v16221_v63 }
 0xac4   : > { %v9680_v56 = vmax.f32 %v15564_v2, %v9662_v60  ;;  %v9479_v39 = vadd.f32 %v9381_v12, %v8435_v57  ;;  %v9538_v12 = vadd.f32 %v15868_v61, %v15771_v45 }
 0xac5   : > { %v9386_v31 = vpop.f32.mrf.mxu1 }
 0xac6   : > { %v9698_v55 = vpack.c.bf16 %v9680_v56, %v9680_v56  ;;  %v9555_v4 = vadd.f32 %v15868_v61, %v9479_v39  ;;  %v9610_v32 = vmax.f32 %v9538_v12, 0.0 }
 0xac8   : > { %9717 = vst.msk [vmem:[%s15881_s21] sm:$0xf] %vm9716_vm4, %v9698_v55  ;;  %v9627_v33 = vmax.f32 %v9555_v4, 0.0 }
 0xac9   : > { %v8340_v34 = vpop.f32.mrf.mxu3 }
 0xaca   : > { %v9663_v8 = vmax.f32 %v9609_v24, %v9627_v33  ;;  %v8436_v2 = vadd.f32 %v8340_v34, %v15274_v28  ;;  %v9539_v28 = vadd.f32 %v15868_v61, %v15777_v42 }
 0xacc   : > { %v9681_v58 = vmax.f32 %v15574_v52, %v9663_v8  ;;  %v9480_v1 = vadd.f32 %v9384_v18, %v8436_v2  ;;  %v9611_v55 = vmax.f32 %v9539_v28, 0.0 }
 0xacd   : > { %v9389_v6 = vpop.f32.mrf.mxu1 }
 0xace   : > { %v9699_v29 = vpack.c.bf16 %v9681_v58, %v9681_v58  ;;  %v9556_v21 = vadd.f32 %v15868_v61, %v9480_v1 }
 0xad0   : > { %9718 = vst.msk [vmem:[%s15881_s21 + $0x4] sm:$0xf] %vm9716_vm4, %v9699_v29  ;;  %v9628_v60 = vmax.f32 %v9556_v21, 0.0 }
 0xad1   : > { %v8342_v63 = vpop.f32.mrf.mxu3 }
 0xad2   : > { %v9664_v57 = vmax.f32 %v9610_v32, %v9628_v60  ;;  %v8437_v14 = vadd.f32 %v8342_v63, %v15284_v59  ;;  %v9540_v59 = vadd.f32 %v15868_v61, %v15783_v10 }
 0xad4   : > { %v9682_v45 = vmax.f32 %v15586_v5, %v9664_v57  ;;  %v9481_v52 = vadd.f32 %v9386_v31, %v8437_v14  ;;  %v9612_v12 = vmax.f32 %v9540_v59, 0.0 }
 0xad5   : > { %v9391_v18 = vpop.f32.mrf.mxu1 }
 0xad6   : > { %v9700_v56 = vpack.c.bf16 %v9682_v45, %v9682_v45  ;;  %v9557_v39 = vadd.f32 %v15868_v61, %v9481_v52 }
 0xad8   : > { %9719 = vst.msk [vmem:[%s15881_s21 + $0x8] sm:$0xf] %vm9716_vm4, %v9700_v56  ;;  %v9629_v4 = vmax.f32 %v9557_v39, 0.0 }
 0xad9   : > { %v8345_v24 = vpop.f32.mrf.mxu3 }
 0xada   : > { %v9665_v33 = vmax.f32 %v9611_v55, %v9629_v4  ;;  %v8438_v34 = vadd.f32 %v8345_v24, %v15290_v17  ;;  %v9541_v17 = vadd.f32 %v15868_v61, %v15789_v19 }
 0xadc   : > { %v9683_v42 = vmax.f32 %v15596_v43, %v9665_v33  ;;  %v9482_v5 = vadd.f32 %v9389_v6, %v8438_v34  ;;  %v9613_v63 = vmax.f32 %v9541_v17, 0.0 }
 0xadd   : > { %v9394_v31 = vpop.f32.mrf.mxu1 }
 0xade   : > { %v9701_v8 = vpack.c.bf16 %v9683_v42, %v9683_v42  ;;  %v9558_v2 = vadd.f32 %v15868_v61, %v9482_v5 }
 0xae0   : > { %9720 = vst.msk [vmem:[%s15881_s21 + $0xc] sm:$0xf] %vm9716_vm4, %v9701_v8  ;;  %v9630_v58 = vmax.f32 %v9558_v2, 0.0 }
 0xae1   : > { %v8347_v1 = vpop.f32.mrf.mxu3 }
 0xae2   : > { %v9666_v29 = vmax.f32 %v9612_v12, %v9630_v58  ;;  %v8439_v21 = vadd.f32 %v8347_v1, %v15300_v40  ;;  %v9542_v40 = vadd.f32 %v15868_v61, %v15795_v13 }
 0xae4   : > { %v9684_v10 = vmax.f32 %v15608_v47, %v9666_v29  ;;  %v9483_v43 = vadd.f32 %v9391_v18, %v8439_v21  ;;  %v9614_v39 = vmax.f32 %v9542_v40, 0.0 }
 0xae5   : > { %v9396_v6 = vpop.f32.mrf.mxu1 }
 0xae6   : > { %v9702_v32 = vpack.c.bf16 %v9684_v10, %v9684_v10  ;;  %v9559_v60 = vadd.f32 %v15868_v61, %v9483_v43 }
 0xae8   : > { %9721 = vst.msk [vmem:[%s15881_s21 + $0x10] sm:$0xf] %vm9716_vm4, %v9702_v32  ;;  %v9631_v57 = vmax.f32 %v9559_v60, 0.0 }
 0xae9   : > { %v8350_v14 = vpop.f32.mrf.mxu3 }
 0xaea   : > { %v9667_v28 = vmax.f32 %v9613_v63, %v9631_v57  ;;  %v8440_v45 = vadd.f32 %v8350_v14, %v15306_v15  ;;  %v9543_v15 = vadd.f32 %v15868_v61, %v15801_v36 }
 0xaec   : > { %v9685_v19 = vmax.f32 %v15618_v35, %v9667_v28  ;;  %v9484_v47 = vadd.f32 %v9394_v31, %v8440_v45  ;;  %v9615_v5 = vmax.f32 %v9543_v15, 0.0 }
 0xaed   : > { %v9399_v52 = vpop.f32.mrf.mxu1 }
 0xaee   : > { %v9703_v18 = vpack.c.bf16 %v9685_v19, %v9685_v19  ;;  %v9560_v56 = vadd.f32 %v15868_v61, %v9484_v47 }
 0xaf0   : > { %9722 = vst.msk [vmem:[%s15881_s21 + $0x14] sm:$0xf] %vm9716_vm4, %v9703_v18  ;;  %v9632_v55 = vmax.f32 %v9560_v56, 0.0 }
 0xaf1   : > { %v8352_v4 = vpop.f32.mrf.mxu3 }
 0xaf2   : > { %v9668_v24 = vmax.f32 %v9614_v39, %v9632_v55  ;;  %v8441_v33 = vadd.f32 %v8352_v4, %v15316_v11  ;;  %v9544_v11 = vadd.f32 %v15868_v61, %v15807_v22 }
 0xaf4   : > { %v9686_v13 = vmax.f32 %v15630_v25, %v9668_v24  ;;  %v9485_v35 = vadd.f32 %v9396_v6, %v8441_v33  ;;  %v9616_v21 = vmax.f32 %v9544_v11, 0.0 }
 0xaf5   : > { %v9401_v34 = vpop.f32.mrf.mxu1 }
 0xaf6   : > { %v9704_v59 = vpack.c.bf16 %v9686_v13, %v9686_v13  ;;  %v9561_v42 = vadd.f32 %v15868_v61, %v9485_v35 }
 0xaf8   : > { %9723 = vst.msk [vmem:[%s15881_s21 + $0x18] sm:$0xf] %vm9716_vm4, %v9704_v59  ;;  %v9633_v31 = vmax.f32 %v9561_v42, 0.0 }
 0xaf9   : > { %v8355_v8 = vpop.f32.mrf.mxu3 }
 0xafa   : > { %v9669_v2 = vmax.f32 %v9615_v5, %v9633_v31  ;;  %v8442_v12 = vadd.f32 %v8355_v8, %v15322_v37  ;;  %v9545_v37 = vadd.f32 %v15868_v61, %v15813_v23 }
 0xafc   : > { %v9687_v36 = vmax.f32 %v15640_v50, %v9669_v2  ;;  %v9486_v25 = vadd.f32 %v9399_v52, %v8442_v12  ;;  %v9617_v57 = vmax.f32 %v9545_v37, 0.0 }
 0xafd   : > { %v9404_v58 = vpop.f32.mrf.mxu1 }
 0xafe   : > { %v9705_v1 = vpack.c.bf16 %v9687_v36, %v9687_v36  ;;  %v9562_v29 = vadd.f32 %v15868_v61, %v9486_v25 }
 0xb00   : > { %9724 = vst.msk [vmem:[%s15881_s21 + $0x1c] sm:$0xf] %vm9716_vm4, %v9705_v1  ;;  %v9634_v17 = vmax.f32 %v9562_v29, 0.0 }
 0xb01   : > { %v8357_v10 = vpop.f32.mrf.mxu3 }
 0xb02   : > { %v9670_v43 = vmax.f32 %v9616_v21, %v9634_v17  ;;  %v8443_v6 = vadd.f32 %v8357_v10, %v15332_v26  ;;  %v9546_v26 = vadd.f32 %v15868_v61, %v15819_v62 }
 0xb04   : > { %v9688_v22 = vmax.f32 %v15652_v41, %v9670_v43  ;;  %v9487_v50 = vadd.f32 %v9401_v34, %v8443_v6  ;;  %v9618_v52 = vmax.f32 %v9546_v26, 0.0 }
 0xb05   : > { %v9406_v63 = vpop.f32.mrf.mxu1 }
 0xb06   : > { %v9706_v32 = vpack.c.bf16 %v9688_v22, %v9688_v22  ;;  %v9563_v60 = vadd.f32 %v15868_v61, %v9487_v50 }
 0xb08   : > { %9725 = vst.msk [vmem:[%s15881_s21 + $0x20] sm:$0xf] %vm9716_vm4, %v9706_v32  ;;  %v9635_v14 = vmax.f32 %v9563_v60, 0.0 }
 0xb09   : > { %v8360_v28 = vpop.f32.mrf.mxu3 }
 0xb0a   : > { %v9671_v45 = vmax.f32 %v9617_v57, %v9635_v14  ;;  %v8444_v40 = vadd.f32 %v8360_v28, %v15338_v20  ;;  %v9547_v20 = vadd.f32 %v15868_v61, %v15825_v51  ;;  %v16223_v14 = vld [vmem:[#allocation28_spill] sm:$0xff] }
 0xb0c   : > { %v9689_v23 = vmax.f32 %v15662_v16, %v9671_v45  ;;  %v9488_v41 = vadd.f32 %v9404_v58, %v8444_v40  ;;  %v9619_v15 = vmax.f32 %v9547_v20, 0.0 }
 0xb0d   : > { %v9409_v56 = vpop.f32.mrf.mxu1 }
 0xb0e   : > { %v9707_v19 = vpack.c.bf16 %v9689_v23, %v9689_v23  ;;  %v9564_v47 = vadd.f32 %v15868_v61, %v9488_v41 }
 0xb10   : > { %9726 = vst.msk [vmem:[%s15881_s21 + $0x24] sm:$0xf] %vm9716_vm4, %v9707_v19  ;;  %v9636_v18 = vmax.f32 %v9564_v47, 0.0 }
 0xb11   : > { %v8362_v39 = vpop.f32.mrf.mxu3 }
 0xb12   : > { %v9672_v55 = vmax.f32 %v9618_v52, %v9636_v18  ;;  %v8445_v4 = vadd.f32 %v8362_v39, %v15348_v48  ;;  %v9548_v48 = vadd.f32 %v15868_v61, %v15831_v53 }
 0xb14   : > { %v9690_v62 = vmax.f32 %v15674_v3, %v9672_v55  ;;  %v9489_v16 = vadd.f32 %v9406_v63, %v8445_v4  ;;  %v9620_v8 = vmax.f32 %v9548_v48, 0.0  ;;  %v9552_v55 = vadd.f32 %v15868_v61, %v15855_v7 }
 0xb15   : > { %v9411_v42 = vpop.f32.mrf.mxu1  ;;  %v9553_v7 = vadd.f32 %v15868_v61, %v15861_v49 }
 0xb16   : > { %v9708_v24 = vpack.c.bf16 %v9690_v62, %v9690_v62  ;;  %v9565_v33 = vadd.f32 %v15868_v61, %v9489_v16 }
 0xb18   : > { %9727 = vst.msk [vmem:[%s15881_s21 + $0x28] sm:$0xf] %vm9716_vm4, %v9708_v24  ;;  %v9637_v13 = vmax.f32 %v9565_v33, 0.0  ;;  %v9624_v24 = vmax.f32 %v9552_v55, 0.0 }
 0xb19   : > { %v8365_v35 = vpop.f32.mrf.mxu3 }
 0xb1a   : > { %v9673_v34 = vmax.f32 %v9619_v15, %v9637_v13  ;;  %v8446_v59 = vadd.f32 %v8365_v35, %v15354_v9  ;;  %v9549_v9 = vadd.f32 %v15868_v61, %v15837_v38  ;;  %v16222_v38 = vld [vmem:[#allocation31_spill] sm:$0xff]  ;;  %v16227_v35 = vld [vmem:[#allocation30_spill] sm:$0xff] }
 0xb1c   : > { %v9691_v51 = vmax.f32 %v15684_v0, %v9673_v34  ;;  %v9490_v3 = vadd.f32 %v9409_v56, %v8446_v59  ;;  %v9621_v29 = vmax.f32 %v9549_v9, 0.0  ;;  %v16225_v56 = vld [vmem:[#allocation29_spill] sm:$0xff] }
 0xb1d   : > { %v9414_v0 = vpop.f32.mrf.mxu1 }
 0xb1e   : > { %v9709_v5 = vpack.c.bf16 %v9691_v51, %v9691_v51  ;;  %v9566_v31 = vadd.f32 %v15868_v61, %v9490_v3 }
 0xb20   : > { %9728 = vst.msk [vmem:[%s15881_s21 + $0x2c] sm:$0xf] %vm9716_vm4, %v9709_v5  ;;  %v9638_v2 = vmax.f32 %v9566_v31, 0.0  ;;  %v9625_v31 = vmax.f32 %v9553_v7, 0.0 }
 0xb21   : > { %v8367_v12 = vpop.f32.mrf.mxu3 }
 0xb22   : > { %v9674_v11 = vmax.f32 %v9620_v8, %v9638_v2  ;;  %v8447_v36 = vadd.f32 %v8367_v12, %v15364_v54  ;;  %v9550_v54 = vadd.f32 %v15868_v61, %v15843_v46  ;;  %v16224_v46 = vld [vmem:[#allocation32_spill] sm:$0xff]  ;;  %v16229_v12 = vld [vmem:[#allocation14_spill] sm:$0xff] }
 0xb24   : > { %v9692_v53 = vmax.f32 %v15701_v44, %v9674_v11  ;;  %v9491_v25 = vadd.f32 %v9411_v42, %v8447_v36  ;;  %v9622_v32 = vmax.f32 %v9550_v54, 0.0  ;;  %v16228_v42 = vld [vmem:[#allocation13_spill] sm:$0xff] }
 0xb25   : > { %v9416_v50 = vpop.f32.mrf.mxu1 }
 0xb26   : > { %v9710_v58 = vpack.c.bf16 %v9692_v53, %v9692_v53  ;;  %v9567_v1 = vadd.f32 %v15868_v61, %v9491_v25 }
 0xb28   : > { %9729 = vst.msk [vmem:[%s15881_s21 + $0x30] sm:$0xf] %vm9716_vm4, %v9710_v58  ;;  %v9639_v21 = vmax.f32 %v9567_v1, 0.0 }
 0xb29   : > { %v8370_v17 = vpop.f32.mrf.mxu3 }
 0xb2a   : > { %v9675_v10 = vmax.f32 %v9621_v29, %v9639_v21  ;;  %v8448_v43 = vadd.f32 %v8370_v17, %v15370_v30  ;;  %v9551_v30 = vadd.f32 %v15868_v61, %v15849_v27  ;;  %v16226_v27 = vld [vmem:[#allocation33_spill] sm:$0xff] }
 0xb2c   : > { %v9693_v6 = vmax.f32 %v16222_v38, %v9675_v10  ;;  %v9492_v44 = vadd.f32 %v9414_v0, %v8448_v43  ;;  %v9623_v41 = vmax.f32 %v9551_v30, 0.0 }
 0xb2d   : > { %v9419_v47 = vpop.f32.mrf.mxu1 }
 0xb2e   : > { %v9711_v37 = vpack.c.bf16 %v9693_v6, %v9693_v6  ;;  %v9568_v22 = vadd.f32 %v15868_v61, %v9492_v44 }
 0xb30   : > { %9730 = vst.msk [vmem:[%s15881_s21 + $0x34] sm:$0xf] %vm9716_vm4, %v9711_v37  ;;  %v9640_v60 = vmax.f32 %v9568_v22, 0.0 }
 0xb31   : > { %v8372_v63 = vpop.f32.mrf.mxu3 }
 0xb32   : > { %v9676_v57 = vmax.f32 %v9622_v32, %v9640_v60  ;;  %v8449_v28 = vadd.f32 %v8372_v63, %v16223_v14 }
 0xb34   : > { %v9694_v45 = vmax.f32 %v16224_v46, %v9676_v57  ;;  %v9493_v40 = vadd.f32 %v9416_v50, %v8449_v28 }
 0xb35   : > { %v9421_v59 = vpop.f32.mrf.mxu1 }
 0xb36   : > { %v9712_v26 = vpack.c.bf16 %v9694_v45, %v9694_v45  ;;  %v9569_v23 = vadd.f32 %v15868_v61, %v9493_v40 }
 0xb38   : > { %9731 = vst.msk [vmem:[%s15881_s21 + $0x38] sm:$0xf] %vm9716_vm4, %v9712_v26  ;;  %v9641_v19 = vmax.f32 %v9569_v23, 0.0 }
 0xb39   : > { %v8375_v52 = vpop.f32.mrf.mxu3 }
 0xb3a   : > { %v9677_v18 = vmax.f32 %v9623_v41, %v9641_v19  ;;  %v8450_v39 = vadd.f32 %v8375_v52, %v16225_v56 }
 0xb3c   : > { %v9695_v4 = vmax.f32 %v16226_v27, %v9677_v18  ;;  %v9494_v20 = vadd.f32 %v9419_v47, %v8450_v39 }
 0xb3e   : > { %v9713_v62 = vpack.c.bf16 %v9695_v4, %v9695_v4  ;;  %v9570_v16 = vadd.f32 %v15868_v61, %v9494_v20 }
 0xb40   : > { %9732 = vst.msk [vmem:[%s15881_s21 + $0x3c] sm:$0xf] %vm9716_vm4, %v9713_v62  ;;  %v9642_v33 = vmax.f32 %v9570_v16, 0.0 }
 0xb41   : > { %v8377_v15 = vpop.f32.mrf.mxu3 }
 0xb42   : > { %v9678_v13 = vmax.f32 %v9624_v24, %v9642_v33  ;;  %v8451_v34 = vadd.f32 %v8377_v15, %v16227_v35 }
 0xb44   : > { %v9696_v48 = vmax.f32 %v16228_v42, %v9678_v13  ;;  %v9495_v51 = vadd.f32 %v9421_v59, %v8451_v34 }
 0xb46   : > { %v9714_v3 = vpack.c.bf16 %v9696_v48, %v9696_v48  ;;  %v9571_v5 = vadd.f32 %v15868_v61, %v9495_v51 }
 0xb48   : > { %9733 = vst.msk [vmem:[%s15881_s21 + $0x40] sm:$0xf] %vm9716_vm4, %v9714_v3  ;;  %v9643_v8 = vmax.f32 %v9571_v5, 0.0 }
 0xb4a   : > { %v9679_v2 = vmax.f32 %v9625_v31, %v9643_v8 }
 0xb4c   : > { %v9697_v11 = vmax.f32 %v16229_v12, %v9679_v2 }
 0xb4e   : > { %v9715_v36 = vpack.c.bf16 %v9697_v11, %v9697_v11 }
 0xb50   : > { %9734 = vst.msk [vmem:[%s15881_s21 + $0x44] sm:$0xf] %vm9716_vm4, %v9715_v36 }
 0xb51 PF: > { %s15_s18 = sadd.s32 1, %s12800_s18  }
 0xb52   : > { %p12_p4 = scmp.ge.s32.totalorder %s15_s18, 4  }
 0xb54   :  { %14 = sbr.rel (!%p12_p4) target bundleno = 1 (0x1), region = 86 }

// kernel: net_forward.3
= control target key start
LH: loop header
LB: loop body
LE: loop exit
PB: predicated region body
PF: predicated region fallthrough
CT: control target
= control target key end

     0   :  { %vm6157_vm0 = vcmask 80896   ;;  %s11821_s1 = inlined_call_operand.vmem [shape: bf16[9216,128], index: 1, kind: input, shape index: {}]   ;;  %s11822_s0 = inlined_call_operand.vmem [shape: bf16[16,9216], index: 0, kind: input, shape index: {}]   ;;  %s11823_s2 = inlined_call_operand.vmem [shape: f32[1,128], index: 2, kind: input, shape index: {}]   ;;  %s11824_s4 = inlined_call_operand.vmem [shape: f32[1,10], index: 4, kind: input, shape index: {}]   ;;  %s11825_s3 = inlined_call_operand.vmem [shape: bf16[128,10], index: 3, kind: input, shape index: {}]   ;;  %s11826_s5 = inlined_call_operand.vmem [shape: f32[16,10], index: 5, kind: output, shape index: {}]  }
   0x1   :  { %v8893_v0 = vld [vmem:[%s11821_s1 + $0x38] sm:$0xff]  ;;  %v8892_v4 = vld [vmem:[%s11821_s1 + $0x30] sm:$0xff]  ;;  %v8891_v8 = vld [vmem:[%s11821_s1 + $0x28] sm:$0xff] }
   0x2   :  { %v8901_v1 = vld [vmem:[%s11821_s1 + $0x78] sm:$0xff]  ;;  %5064 = vmatpush.bf16.msra.mxu0 %v8893_v0  ;;  %v8900_v5 = vld [vmem:[%s11821_s1 + $0x70] sm:$0xff]  ;;  %v8899_v9 = vld [vmem:[%s11821_s1 + $0x68] sm:$0xff] }
   0x3   :  { %v8909_v2 = vld [vmem:[%s11821_s1 + $0xb8] sm:$0xff]  ;;  %5078 = vmatpush.bf16.msra.mxu1 %v8901_v1  ;;  %v8908_v6 = vld [vmem:[%s11821_s1 + $0xb0] sm:$0xff]  ;;  %v8907_v10 = vld [vmem:[%s11821_s1 + $0xa8] sm:$0xff] }
   0x4   :  { %v8917_v3 = vld [vmem:[%s11821_s1 + $0xf8] sm:$0xff]  ;;  %5092 = vmatpush.bf16.msra.mxu2 %v8909_v2  ;;  %v8916_v7 = vld [vmem:[%s11821_s1 + $0xf0] sm:$0xff]  ;;  %v8915_v11 = vld [vmem:[%s11821_s1 + $0xe8] sm:$0xff] }
   0x5   :  { %5106 = vmatpush.bf16.msra.mxu3 %v8917_v3  ;;  %v8890_v12 = vld [vmem:[%s11821_s1 + $0x20] sm:$0xff]  ;;  %v8889_v16 = vld [vmem:[%s11821_s1 + $0x18] sm:$0xff]  ;;  %v8888_v20 = vld [vmem:[%s11821_s1 + $0x10] sm:$0xff] }
   0x6   :  { %5065 = vmatpush.bf16.msra.mxu0 %v8892_v4  ;;  %v8898_v13 = vld [vmem:[%s11821_s1 + $0x60] sm:$0xff]  ;;  %v8897_v17 = vld [vmem:[%s11821_s1 + $0x58] sm:$0xff]  ;;  %v8896_v21 = vld [vmem:[%s11821_s1 + $0x50] sm:$0xff] }
   0x7   :  { %5079 = vmatpush.bf16.msra.mxu1 %v8900_v5  ;;  %v8906_v14 = vld [vmem:[%s11821_s1 + $0xa0] sm:$0xff]  ;;  %v8905_v18 = vld [vmem:[%s11821_s1 + $0x98] sm:$0xff]  ;;  %v8904_v22 = vld [vmem:[%s11821_s1 + $0x90] sm:$0xff] }
   0x8   :  { %5093 = vmatpush.bf16.msra.mxu2 %v8908_v6  ;;  %v8914_v15 = vld [vmem:[%s11821_s1 + $0xe0] sm:$0xff]  ;;  %v8913_v19 = vld [vmem:[%s11821_s1 + $0xd8] sm:$0xff]  ;;  %v8912_v23 = vld [vmem:[%s11821_s1 + $0xd0] sm:$0xff] }
   0x9   :  { %5107 = vmatpush.bf16.msra.mxu3 %v8916_v7  ;;  %v8887_v24 = vld [vmem:[%s11821_s1 + $0x8] sm:$0xff]  ;;  %v8886_v28 = vld [vmem:[%s11821_s1] sm:$0xff]  ;;  %v8925_v32 = vld [vmem:[%s11821_s1 + $0x138] sm:$0xff] }
   0xa   :  { %5066 = vmatpush.bf16.msra.mxu0 %v8891_v8  ;;  %v8895_v25 = vld [vmem:[%s11821_s1 + $0x48] sm:$0xff]  ;;  %v8894_v29 = vld [vmem:[%s11821_s1 + $0x40] sm:$0xff]  ;;  %v8933_v33 = vld [vmem:[%s11821_s1 + $0x178] sm:$0xff] }
   0xb   :  { %5080 = vmatpush.bf16.msra.mxu1 %v8899_v9  ;;  %v8903_v26 = vld [vmem:[%s11821_s1 + $0x88] sm:$0xff]  ;;  %v8902_v30 = vld [vmem:[%s11821_s1 + $0x80] sm:$0xff]  ;;  %v8941_v42 = vld [vmem:[%s11821_s1 + $0x1b8] sm:$0xff] }
   0xc   :  { %5094 = vmatpush.bf16.msra.mxu2 %v8907_v10  ;;  %v8911_v27 = vld [vmem:[%s11821_s1 + $0xc8] sm:$0xff]  ;;  %v8910_v31 = vld [vmem:[%s11821_s1 + $0xc0] sm:$0xff]  ;;  %v8949_v43 = vld [vmem:[%s11821_s1 + $0x1f8] sm:$0xff] }
   0xd   :  { %5108 = vmatpush.bf16.msra.mxu3 %v8915_v11  ;;  %v6192_v34 = vld [vmem:[%s11822_s0] sm:$0xf]  ;;  %v6200_v36 = vld [vmem:[%s11822_s0 + $0x8] sm:$0xf]  ;;  %v8814_v38 = vld [vmem:[%s11822_s0 + $0x4] sm:$0xf] }
   0xe   :  { %5067 = vmatpush.bf16.msra.mxu0 %v8890_v12  ;;  %v8850_v35 = vld [vmem:[%s11822_s0 + $0x11c] sm:$0xf0]  ;;  %v8851_v37 = vld [vmem:[%s11822_s0 + $0x124] sm:$0xf0]  ;;  %v6194_v39 = vld [vmem:[%s11822_s0 + $0x120] sm:$0xf0] }
   0xf   :  { %5081 = vmatpush.bf16.msra.mxu1 %v8898_v13  ;;  %v8815_v40 = vld [vmem:[%s11822_s0 + $0xc] sm:$0xf]  ;;  %v6193_v44 = vor.u32 %v8850_v35, %v6192_v34  ;;  %v6201_v45 = vor.u32 %v8851_v37, %v6200_v36  ;;  %v6197_v46 = vor.u32 %v8814_v38, %v6194_v39  ;;  %v8924_v48 = vld [vmem:[%s11821_s1 + $0x130] sm:$0xff]  ;;  %v8922_v56 = vld [vmem:[%s11821_s1 + $0x120] sm:$0xff] }
  0x10   :  { %5095 = vmatpush.bf16.msra.mxu2 %v8906_v14  ;;  %v6202_v41 = vld [vmem:[%s11822_s0 + $0x128] sm:$0xf0]  ;;  %v8932_v49 = vld [vmem:[%s11821_s1 + $0x170] sm:$0xff]  ;;  %v8930_v57 = vld [vmem:[%s11821_s1 + $0x160] sm:$0xff] }
  0x11   :  { %5109 = vmatpush.bf16.msra.mxu3 %v8914_v15  ;;  %v6205_v47 = vor.u32 %v8815_v40, %v6202_v41  ;;  %v8940_v50 = vld [vmem:[%s11821_s1 + $0x1b0] sm:$0xff]  ;;  %v8923_v52 = vld [vmem:[%s11821_s1 + $0x128] sm:$0xff]  ;;  %v8938_v58 = vld [vmem:[%s11821_s1 + $0x1a0] sm:$0xff] }
  0x12   :  { %5068 = vmatpush.bf16.msra.mxu0 %v8889_v16  ;;  %v8948_v51 = vld [vmem:[%s11821_s1 + $0x1f0] sm:$0xff]  ;;  %v8931_v53 = vld [vmem:[%s11821_s1 + $0x168] sm:$0xff]  ;;  %v8946_v59 = vld [vmem:[%s11821_s1 + $0x1e0] sm:$0xff] }
  0x13   :  { %5082 = vmatpush.bf16.msra.mxu1 %v8897_v17  ;;  %v8939_v54 = vld [vmem:[%s11821_s1 + $0x1a8] sm:$0xff]  ;;  %v8921_v60 = vld [vmem:[%s11821_s1 + $0x118] sm:$0xff]  ;;  %v8920_v0 = vld [vmem:[%s11821_s1 + $0x110] sm:$0xff] }
  0x14   :  { %5096 = vmatpush.bf16.msra.mxu2 %v8905_v18  ;;  %v8947_v55 = vld [vmem:[%s11821_s1 + $0x1e8] sm:$0xff]  ;;  %v8929_v61 = vld [vmem:[%s11821_s1 + $0x158] sm:$0xff]  ;;  %v8928_v1 = vld [vmem:[%s11821_s1 + $0x150] sm:$0xff] }
  0x15   :  { %5110 = vmatpush.bf16.msra.mxu3 %v8913_v19  ;;  %v8937_v62 = vld [vmem:[%s11821_s1 + $0x198] sm:$0xff]  ;;  %v8936_v2 = vld [vmem:[%s11821_s1 + $0x190] sm:$0xff]  ;;  %v8919_v4 = vld [vmem:[%s11821_s1 + $0x108] sm:$0xff] }
  0x16   :  { %5069 = vmatpush.bf16.msra.mxu0 %v8888_v20  ;;  %v8945_v63 = vld [vmem:[%s11821_s1 + $0x1d8] sm:$0xff]  ;;  %v8944_v3 = vld [vmem:[%s11821_s1 + $0x1d0] sm:$0xff]  ;;  %v8927_v5 = vld [vmem:[%s11821_s1 + $0x148] sm:$0xff] }
  0x17   :  { %5083 = vmatpush.bf16.msra.mxu1 %v8896_v21  ;;  %v8935_v6 = vld [vmem:[%s11821_s1 + $0x188] sm:$0xff]  ;;  %v8918_v8 = vld [vmem:[%s11821_s1 + $0x100] sm:$0xff]  ;;  %v8957_v12 = vld [vmem:[%s11821_s1 + $0x238] sm:$0xff] }
  0x18   :  { %5097 = vmatpush.bf16.msra.mxu2 %v8904_v22  ;;  %v8943_v7 = vld [vmem:[%s11821_s1 + $0x1c8] sm:$0xff]  ;;  %v8926_v9 = vld [vmem:[%s11821_s1 + $0x140] sm:$0xff]  ;;  %v8965_v13 = vld [vmem:[%s11821_s1 + $0x278] sm:$0xff] }
  0x19   :  { %5111 = vmatpush.bf16.msra.mxu3 %v8912_v23  ;;  %v8934_v10 = vld [vmem:[%s11821_s1 + $0x180] sm:$0xff]  ;;  %v6208_v14 = vld [vmem:[%s11822_s0 + $0x10] sm:$0xf]  ;;  %v6216_v16 = vld [vmem:[%s11822_s0 + $0x18] sm:$0xf] }
  0x1a   :  { %5070 = vmatpush.bf16.msra.mxu0 %v8887_v24  ;;  %v8942_v11 = vld [vmem:[%s11821_s1 + $0x1c0] sm:$0xff]  ;;  %v8852_v15 = vld [vmem:[%s11822_s0 + $0x12c] sm:$0xf0]  ;;  %v8853_v17 = vld [vmem:[%s11822_s0 + $0x134] sm:$0xf0] }
  0x1b   :  { %5084 = vmatpush.bf16.msra.mxu1 %v8895_v25  ;;  %v8816_v18 = vld [vmem:[%s11822_s0 + $0x14] sm:$0xf]  ;;  %v8817_v20 = vld [vmem:[%s11822_s0 + $0x1c] sm:$0xf]  ;;  %v6209_v24 = vor.u32 %v8852_v15, %v6208_v14  ;;  %v6217_v25 = vor.u32 %v8853_v17, %v6216_v16  ;;  %v8971_v34 = vld [vmem:[%s11821_s1 + $0x2a8] sm:$0xff] }
  0x1c   :  { %5098 = vmatpush.bf16.msra.mxu2 %v8903_v26  ;;  %v6210_v19 = vld [vmem:[%s11822_s0 + $0x130] sm:$0xf0]  ;;  %v6218_v21 = vld [vmem:[%s11822_s0 + $0x138] sm:$0xf0]  ;;  %v8979_v35 = vld [vmem:[%s11821_s1 + $0x2e8] sm:$0xff] }
  0x1d   :  { %5112 = vmatpush.bf16.msra.mxu3 %v8911_v27  ;;  %v8973_v22 = vld [vmem:[%s11821_s1 + $0x2b8] sm:$0xff]  ;;  %v6213_v26 = vor.u32 %v8816_v18, %v6210_v19  ;;  %v6221_v27 = vor.u32 %v8817_v20, %v6218_v21  ;;  %v8954_v36 = vld [vmem:[%s11821_s1 + $0x220] sm:$0xff]  ;;  %v9003_v14 = vld [vmem:[%s11821_s1 + $0x3a8] sm:$0xff] }
  0x1e   :  { %5071 = vmatpush.bf16.msra.mxu0 %v8886_v28  ;;  %v8981_v23 = vld [vmem:[%s11821_s1 + $0x2f8] sm:$0xff]  ;;  %v8956_v28 = vld [vmem:[%s11821_s1 + $0x230] sm:$0xff]  ;;  %v8962_v37 = vld [vmem:[%s11821_s1 + $0x260] sm:$0xff] }
  0x1f   :  { %5085 = vmatpush.bf16.msra.mxu1 %v8894_v29  ;;  %v8964_v29 = vld [vmem:[%s11821_s1 + $0x270] sm:$0xff]  ;;  %v8970_v38 = vld [vmem:[%s11821_s1 + $0x2a0] sm:$0xff]  ;;  %v8953_v40 = vld [vmem:[%s11821_s1 + $0x218] sm:$0xff] }
  0x20   :  { %5099 = vmatpush.bf16.msra.mxu2 %v8902_v30  ;;  %v8972_v30 = vld [vmem:[%s11821_s1 + $0x2b0] sm:$0xff]  ;;  %v8978_v39 = vld [vmem:[%s11821_s1 + $0x2e0] sm:$0xff]  ;;  %v8961_v41 = vld [vmem:[%s11821_s1 + $0x258] sm:$0xff] }
  0x21   :  { %5113 = vmatpush.bf16.msra.mxu3 %v8910_v31  ;;  %5072 = vmatmul.bf16.vlgmr.msra.gmra.mxu0 %v6193_v44  ;;  %v8980_v31 = vld [vmem:[%s11821_s1 + $0x2f0] sm:$0xff]  ;;  %v9011_v15 = vld [vmem:[%s11821_s1 + $0x3e8] sm:$0xff]  ;;  %v8986_v16 = vld [vmem:[%s11821_s1 + $0x320] sm:$0xff] }
  0x22   :  { %5120 = vmatpush.bf16.msrb.mxu0 %v8925_v32  ;;  %5086 = vmatmul.bf16.vlgmr.msra.gmra.mxu1 %v6197_v46  ;;  %v8955_v32 = vld [vmem:[%s11821_s1 + $0x228] sm:$0xff]  ;;  %v8952_v44 = vld [vmem:[%s11821_s1 + $0x210] sm:$0xff]  ;;  %v8994_v17 = vld [vmem:[%s11821_s1 + $0x360] sm:$0xff] }
  0x23   :  { %5134 = vmatpush.bf16.msrb.mxu1 %v8933_v33  ;;  %5100 = vmatmul.bf16.vlgmr.msra.gmra.mxu2 %v6201_v45  ;;  %v8963_v33 = vld [vmem:[%s11821_s1 + $0x268] sm:$0xff]  ;;  %v8960_v45 = vld [vmem:[%s11821_s1 + $0x250] sm:$0xff]  ;;  %v9002_v18 = vld [vmem:[%s11821_s1 + $0x3a0] sm:$0xff] }
  0x24   :  { %5148 = vmatpush.bf16.msrb.mxu2 %v8941_v42  ;;  %5114 = vmatmul.bf16.vlgmr.msra.gmra.mxu3 %v6205_v47  ;;  %v8969_v42 = vld [vmem:[%s11821_s1 + $0x298] sm:$0xff]  ;;  %v8968_v46 = vld [vmem:[%s11821_s1 + $0x290] sm:$0xff]  ;;  %v9010_v19 = vld [vmem:[%s11821_s1 + $0x3e0] sm:$0xff] }
  0x25   :  { %5162 = vmatpush.bf16.msrb.mxu3 %v8949_v43  ;;  %v8977_v43 = vld [vmem:[%s11821_s1 + $0x2d8] sm:$0xff]  ;;  %v8976_v47 = vld [vmem:[%s11821_s1 + $0x2d0] sm:$0xff] }
  0x26   :  { %5121 = vmatpush.bf16.msrb.mxu0 %v8924_v48  ;;  %v8951_v48 = vld [vmem:[%s11821_s1 + $0x208] sm:$0xff]  ;;  %v8985_v20 = vld [vmem:[%s11821_s1 + $0x318] sm:$0xff] }
  0x27   :  { %5135 = vmatpush.bf16.msrb.mxu1 %v8932_v49  ;;  %v8959_v49 = vld [vmem:[%s11821_s1 + $0x248] sm:$0xff]  ;;  %v8993_v21 = vld [vmem:[%s11821_s1 + $0x358] sm:$0xff] }
  0x28   :  { %5149 = vmatpush.bf16.msrb.mxu2 %v8940_v50  ;;  %v8967_v50 = vld [vmem:[%s11821_s1 + $0x288] sm:$0xff] }
  0x29   :  { %5163 = vmatpush.bf16.msrb.mxu3 %v8948_v51  ;;  %v8975_v51 = vld [vmem:[%s11821_s1 + $0x2c8] sm:$0xff] }
  0x2a   :  { %5122 = vmatpush.bf16.msrb.mxu0 %v8923_v52  ;;  %v8950_v52 = vld [vmem:[%s11821_s1 + $0x200] sm:$0xff] }
  0x2b   :  { %5136 = vmatpush.bf16.msrb.mxu1 %v8931_v53  ;;  %v8958_v53 = vld [vmem:[%s11821_s1 + $0x240] sm:$0xff] }
  0x2c   :  { %5150 = vmatpush.bf16.msrb.mxu2 %v8939_v54  ;;  %v8966_v54 = vld [vmem:[%s11821_s1 + $0x280] sm:$0xff] }
  0x2d   :  { %5164 = vmatpush.bf16.msrb.mxu3 %v8947_v55  ;;  %v8974_v55 = vld [vmem:[%s11821_s1 + $0x2c0] sm:$0xff] }
  0x2e   :  { %5123 = vmatpush.bf16.msrb.mxu0 %v8922_v56  ;;  %v8989_v56 = vld [vmem:[%s11821_s1 + $0x338] sm:$0xff] }
  0x2f   :  { %5137 = vmatpush.bf16.msrb.mxu1 %v8930_v57  ;;  %v8997_v57 = vld [vmem:[%s11821_s1 + $0x378] sm:$0xff] }
  0x30   :  { %5151 = vmatpush.bf16.msrb.mxu2 %v8938_v58  ;;  %v6224_v58 = vld [vmem:[%s11822_s0 + $0x20] sm:$0xf] }
  0x31   :  { %5165 = vmatpush.bf16.msrb.mxu3 %v8946_v59  ;;  %v8854_v59 = vld [vmem:[%s11822_s0 + $0x13c] sm:$0xf0] }
  0x32   :  { %5124 = vmatpush.bf16.msrb.mxu0 %v8921_v60  ;;  %v6232_v60 = vld [vmem:[%s11822_s0 + $0x28] sm:$0xf] }
  0x33   :  { %5138 = vmatpush.bf16.msrb.mxu1 %v8929_v61  ;;  %v8855_v61 = vld [vmem:[%s11822_s0 + $0x144] sm:$0xf0] }
  0x34   :  { %5152 = vmatpush.bf16.msrb.mxu2 %v8937_v62  ;;  %v8818_v62 = vld [vmem:[%s11822_s0 + $0x24] sm:$0xf] }
  0x35   :  { %5166 = vmatpush.bf16.msrb.mxu3 %v8945_v63  ;;  %v6226_v63 = vld [vmem:[%s11822_s0 + $0x140] sm:$0xf0] }
  0x36   :  { %5125 = vmatpush.bf16.msrb.mxu0 %v8920_v0  ;;  %v8819_v0 = vld [vmem:[%s11822_s0 + $0x2c] sm:$0xf] }
  0x37   :  { %5139 = vmatpush.bf16.msrb.mxu1 %v8928_v1  ;;  %v6234_v1 = vld [vmem:[%s11822_s0 + $0x148] sm:$0xf0] }
  0x38   :  { %5153 = vmatpush.bf16.msrb.mxu2 %v8936_v2  ;;  %v9005_v2 = vld [vmem:[%s11821_s1 + $0x3b8] sm:$0xff] }
  0x39   :  { %5167 = vmatpush.bf16.msrb.mxu3 %v8944_v3  ;;  %v9013_v3 = vld [vmem:[%s11821_s1 + $0x3f8] sm:$0xff] }
  0x3a   :  { %5126 = vmatpush.bf16.msrb.mxu0 %v8919_v4  ;;  %v6225_v4 = vor.u32 %v8854_v59, %v6224_v58  ;;  %v9035_v58 = vld [vmem:[%s11821_s1 + $0x4a8] sm:$0xff] }
  0x3b   :  { %5140 = vmatpush.bf16.msrb.mxu1 %v8927_v5  ;;  %v6233_v5 = vor.u32 %v8855_v61, %v6232_v60  ;;  %v9043_v59 = vld [vmem:[%s11821_s1 + $0x4e8] sm:$0xff]  ;;  %v9018_v60 = vld [vmem:[%s11821_s1 + $0x420] sm:$0xff] }
  0x3c   :  { %5154 = vmatpush.bf16.msrb.mxu2 %v8935_v6  ;;  %v6229_v6 = vor.u32 %v8818_v62, %v6226_v63  ;;  %v9026_v61 = vld [vmem:[%s11821_s1 + $0x460] sm:$0xff] }
  0x3d   :  { %5168 = vmatpush.bf16.msrb.mxu3 %v8943_v7  ;;  %v6237_v7 = vor.u32 %v8819_v0, %v6234_v1  ;;  %v9034_v62 = vld [vmem:[%s11821_s1 + $0x4a0] sm:$0xff]  ;;  %v9017_v0 = vld [vmem:[%s11821_s1 + $0x418] sm:$0xff] }
  0x3e   :  { %5127 = vmatpush.bf16.msrb.mxu0 %v8918_v8  ;;  %v8988_v8 = vld [vmem:[%s11821_s1 + $0x330] sm:$0xff]  ;;  %v9042_v63 = vld [vmem:[%s11821_s1 + $0x4e0] sm:$0xff]  ;;  %v9025_v1 = vld [vmem:[%s11821_s1 + $0x458] sm:$0xff] }
  0x3f   :  { %5141 = vmatpush.bf16.msrb.mxu1 %v8926_v9  ;;  %v8996_v9 = vld [vmem:[%s11821_s1 + $0x370] sm:$0xff] }
  0x40   :  { %5155 = vmatpush.bf16.msrb.mxu2 %v8934_v10  ;;  %v9004_v10 = vld [vmem:[%s11821_s1 + $0x3b0] sm:$0xff] }
  0x41   :  { %5169 = vmatpush.bf16.msrb.mxu3 %v8942_v11  ;;  %5128 = vmatmul.bf16.vlgmr.msrb.gmra.mxu0 %v6209_v24  ;;  %v9012_v11 = vld [vmem:[%s11821_s1 + $0x3f0] sm:$0xff] }
  0x42   :  { %5176 = vmatpush.bf16.msra.mxu0 %v8957_v12  ;;  %5142 = vmatmul.bf16.vlgmr.msrb.gmra.mxu1 %v6213_v26  ;;  %v8987_v12 = vld [vmem:[%s11821_s1 + $0x328] sm:$0xff]  ;;  %v8984_v24 = vld [vmem:[%s11821_s1 + $0x310] sm:$0xff] }
  0x43   :  { %5190 = vmatpush.bf16.msra.mxu1 %v8965_v13  ;;  %5156 = vmatmul.bf16.vlgmr.msrb.gmra.mxu2 %v6217_v25  ;;  %v8995_v13 = vld [vmem:[%s11821_s1 + $0x368] sm:$0xff]  ;;  %v8992_v25 = vld [vmem:[%s11821_s1 + $0x350] sm:$0xff] }
  0x44   :  { %5204 = vmatpush.bf16.msra.mxu2 %v8973_v22  ;;  %5170 = vmatmul.bf16.vlgmr.msrb.gmra.mxu3 %v6221_v27  ;;  %v9001_v22 = vld [vmem:[%s11821_s1 + $0x398] sm:$0xff]  ;;  %v9000_v26 = vld [vmem:[%s11821_s1 + $0x390] sm:$0xff] }
  0x45   :  { %5218 = vmatpush.bf16.msra.mxu3 %v8981_v23  ;;  %v9009_v23 = vld [vmem:[%s11821_s1 + $0x3d8] sm:$0xff]  ;;  %v9008_v27 = vld [vmem:[%s11821_s1 + $0x3d0] sm:$0xff] }
  0x46   :  { %5177 = vmatpush.bf16.msra.mxu0 %v8956_v28  ;;  %v8983_v28 = vld [vmem:[%s11821_s1 + $0x308] sm:$0xff] }
  0x47   :  { %5191 = vmatpush.bf16.msra.mxu1 %v8964_v29  ;;  %v8991_v29 = vld [vmem:[%s11821_s1 + $0x348] sm:$0xff] }
  0x48   :  { %5205 = vmatpush.bf16.msra.mxu2 %v8972_v30  ;;  %v8999_v30 = vld [vmem:[%s11821_s1 + $0x388] sm:$0xff] }
  0x49   :  { %5219 = vmatpush.bf16.msra.mxu3 %v8980_v31  ;;  %v9007_v31 = vld [vmem:[%s11821_s1 + $0x3c8] sm:$0xff] }
  0x4a   :  { %5178 = vmatpush.bf16.msra.mxu0 %v8955_v32  ;;  %v8982_v32 = vld [vmem:[%s11821_s1 + $0x300] sm:$0xff] }
  0x4b   :  { %5192 = vmatpush.bf16.msra.mxu1 %v8963_v33  ;;  %v8990_v33 = vld [vmem:[%s11821_s1 + $0x340] sm:$0xff] }
  0x4c   :  { %5206 = vmatpush.bf16.msra.mxu2 %v8971_v34  ;;  %v8998_v34 = vld [vmem:[%s11821_s1 + $0x380] sm:$0xff] }
  0x4d   :  { %5220 = vmatpush.bf16.msra.mxu3 %v8979_v35  ;;  %v9006_v35 = vld [vmem:[%s11821_s1 + $0x3c0] sm:$0xff] }
  0x4e   :  { %5179 = vmatpush.bf16.msra.mxu0 %v8954_v36  ;;  %v9021_v36 = vld [vmem:[%s11821_s1 + $0x438] sm:$0xff] }
  0x4f   :  { %5193 = vmatpush.bf16.msra.mxu1 %v8962_v37  ;;  %v9029_v37 = vld [vmem:[%s11821_s1 + $0x478] sm:$0xff] }
  0x50   :  { %5207 = vmatpush.bf16.msra.mxu2 %v8970_v38  ;;  %v6240_v38 = vld [vmem:[%s11822_s0 + $0x30] sm:$0xf] }
  0x51   :  { %5221 = vmatpush.bf16.msra.mxu3 %v8978_v39  ;;  %v8856_v39 = vld [vmem:[%s11822_s0 + $0x14c] sm:$0xf0] }
  0x52   :  { %5180 = vmatpush.bf16.msra.mxu0 %v8953_v40  ;;  %v6248_v40 = vld [vmem:[%s11822_s0 + $0x38] sm:$0xf] }
  0x53   :  { %5194 = vmatpush.bf16.msra.mxu1 %v8961_v41  ;;  %v8857_v41 = vld [vmem:[%s11822_s0 + $0x154] sm:$0xf0] }
  0x54   :  { %5208 = vmatpush.bf16.msra.mxu2 %v8969_v42  ;;  %v8820_v42 = vld [vmem:[%s11822_s0 + $0x34] sm:$0xf] }
  0x55   :  { %5222 = vmatpush.bf16.msra.mxu3 %v8977_v43  ;;  %v6242_v43 = vld [vmem:[%s11822_s0 + $0x150] sm:$0xf0] }
  0x56   :  { %5181 = vmatpush.bf16.msra.mxu0 %v8952_v44  ;;  %v8821_v44 = vld [vmem:[%s11822_s0 + $0x3c] sm:$0xf] }
  0x57   :  { %5195 = vmatpush.bf16.msra.mxu1 %v8960_v45  ;;  %v6250_v45 = vld [vmem:[%s11822_s0 + $0x158] sm:$0xf0] }
  0x58   :  { %5209 = vmatpush.bf16.msra.mxu2 %v8968_v46  ;;  %v9037_v46 = vld [vmem:[%s11821_s1 + $0x4b8] sm:$0xff] }
  0x59   :  { %5223 = vmatpush.bf16.msra.mxu3 %v8976_v47  ;;  %v9045_v47 = vld [vmem:[%s11821_s1 + $0x4f8] sm:$0xff] }
  0x5a   :  { %5182 = vmatpush.bf16.msra.mxu0 %v8951_v48  ;;  %v6241_v48 = vor.u32 %v8856_v39, %v6240_v38  ;;  %v10143_v38 = vld [vmem:[%s11823_s2] ss:$0 sm:$0xff]  ;;  %v9067_v39 = vld [vmem:[%s11821_s1 + $0x5a8] sm:$0xff] }
  0x5b   :  { %5196 = vmatpush.bf16.msra.mxu1 %v8959_v49  ;;  %v6249_v49 = vor.u32 %v8857_v41, %v6248_v40  ;;  %v9075_v40 = vld [vmem:[%s11821_s1 + $0x5e8] sm:$0xff] }
  0x5c   :  { %5210 = vmatpush.bf16.msra.mxu2 %v8967_v50  ;;  %v6245_v50 = vor.u32 %v8820_v42, %v6242_v43  ;;  %v9050_v42 = vld [vmem:[%s11821_s1 + $0x520] sm:$0xff] }
  0x5d   :  { %5224 = vmatpush.bf16.msra.mxu3 %v8975_v51  ;;  %v6253_v51 = vor.u32 %v8821_v44, %v6250_v45  ;;  %v9058_v43 = vld [vmem:[%s11821_s1 + $0x560] sm:$0xff] }
  0x5e   :  { %5183 = vmatpush.bf16.msra.mxu0 %v8950_v52  ;;  %v9020_v52 = vld [vmem:[%s11821_s1 + $0x430] sm:$0xff]  ;;  %v9066_v45 = vld [vmem:[%s11821_s1 + $0x5a0] sm:$0xff] }
  0x5f   :  { %5197 = vmatpush.bf16.msra.mxu1 %v8958_v53  ;;  %v9028_v53 = vld [vmem:[%s11821_s1 + $0x470] sm:$0xff] }
  0x60   :  { %5211 = vmatpush.bf16.msra.mxu2 %v8966_v54  ;;  %v9036_v54 = vld [vmem:[%s11821_s1 + $0x4b0] sm:$0xff] }
  0x61   :  { %5225 = vmatpush.bf16.msra.mxu3 %v8974_v55  ;;  %5184 = vmatmul.bf16.vlgmr.msra.gmra.mxu0 %v6225_v4  ;;  %v9044_v55 = vld [vmem:[%s11821_s1 + $0x4f0] sm:$0xff] }
  0x62   :  { %5232 = vmatpush.bf16.msrb.mxu0 %v8989_v56  ;;  %5198 = vmatmul.bf16.vlgmr.msra.gmra.mxu1 %v6229_v6  ;;  %v9019_v56 = vld [vmem:[%s11821_s1 + $0x428] sm:$0xff]  ;;  %v9016_v4 = vld [vmem:[%s11821_s1 + $0x410] sm:$0xff] }
  0x63   :  { %5246 = vmatpush.bf16.msrb.mxu1 %v8997_v57  ;;  %5212 = vmatmul.bf16.vlgmr.msra.gmra.mxu2 %v6233_v5  ;;  %v9027_v57 = vld [vmem:[%s11821_s1 + $0x468] sm:$0xff]  ;;  %v9024_v5 = vld [vmem:[%s11821_s1 + $0x450] sm:$0xff] }
  0x64   :  { %5260 = vmatpush.bf16.msrb.mxu2 %v9005_v2  ;;  %5226 = vmatmul.bf16.vlgmr.msra.gmra.mxu3 %v6237_v7  ;;  %v9033_v2 = vld [vmem:[%s11821_s1 + $0x498] sm:$0xff]  ;;  %v9032_v6 = vld [vmem:[%s11821_s1 + $0x490] sm:$0xff] }
  0x65   :  { %5274 = vmatpush.bf16.msrb.mxu3 %v9013_v3  ;;  %v9041_v3 = vld [vmem:[%s11821_s1 + $0x4d8] sm:$0xff]  ;;  %v9040_v7 = vld [vmem:[%s11821_s1 + $0x4d0] sm:$0xff] }
  0x66   :  { %5233 = vmatpush.bf16.msrb.mxu0 %v8988_v8  ;;  %v9015_v8 = vld [vmem:[%s11821_s1 + $0x408] sm:$0xff] }
  0x67   :  { %5247 = vmatpush.bf16.msrb.mxu1 %v8996_v9  ;;  %v9023_v9 = vld [vmem:[%s11821_s1 + $0x448] sm:$0xff] }
  0x68   :  { %5261 = vmatpush.bf16.msrb.mxu2 %v9004_v10  ;;  %v9031_v10 = vld [vmem:[%s11821_s1 + $0x488] sm:$0xff] }
  0x69   :  { %5275 = vmatpush.bf16.msrb.mxu3 %v9012_v11  ;;  %v9039_v11 = vld [vmem:[%s11821_s1 + $0x4c8] sm:$0xff] }
  0x6a   :  { %5234 = vmatpush.bf16.msrb.mxu0 %v8987_v12  ;;  %v9014_v12 = vld [vmem:[%s11821_s1 + $0x400] sm:$0xff] }
  0x6b   :  { %5248 = vmatpush.bf16.msrb.mxu1 %v8995_v13  ;;  %v9022_v13 = vld [vmem:[%s11821_s1 + $0x440] sm:$0xff] }
  0x6c   :  { %5262 = vmatpush.bf16.msrb.mxu2 %v9003_v14  ;;  %v9030_v14 = vld [vmem:[%s11821_s1 + $0x480] sm:$0xff] }
  0x6d   :  { %5276 = vmatpush.bf16.msrb.mxu3 %v9011_v15  ;;  %v9038_v15 = vld [vmem:[%s11821_s1 + $0x4c0] sm:$0xff] }
  0x6e   :  { %5235 = vmatpush.bf16.msrb.mxu0 %v8986_v16  ;;  %v9053_v16 = vld [vmem:[%s11821_s1 + $0x538] sm:$0xff] }
  0x6f   :  { %5249 = vmatpush.bf16.msrb.mxu1 %v8994_v17  ;;  %v9061_v17 = vld [vmem:[%s11821_s1 + $0x578] sm:$0xff] }
  0x70   :  { %5263 = vmatpush.bf16.msrb.mxu2 %v9002_v18  ;;  %v6256_v18 = vld [vmem:[%s11822_s0 + $0x40] sm:$0xf] }
  0x71   :  { %5277 = vmatpush.bf16.msrb.mxu3 %v9010_v19  ;;  %v8858_v19 = vld [vmem:[%s11822_s0 + $0x15c] sm:$0xf0] }
  0x72   :  { %5236 = vmatpush.bf16.msrb.mxu0 %v8985_v20  ;;  %v6264_v20 = vld [vmem:[%s11822_s0 + $0x48] sm:$0xf] }
  0x73   :  { %5250 = vmatpush.bf16.msrb.mxu1 %v8993_v21  ;;  %v8859_v21 = vld [vmem:[%s11822_s0 + $0x164] sm:$0xf0] }
  0x74   :  { %5264 = vmatpush.bf16.msrb.mxu2 %v9001_v22  ;;  %v8822_v22 = vld [vmem:[%s11822_s0 + $0x44] sm:$0xf] }
  0x75   :  { %5278 = vmatpush.bf16.msrb.mxu3 %v9009_v23  ;;  %v6258_v23 = vld [vmem:[%s11822_s0 + $0x160] sm:$0xf0] }
  0x76   :  { %5237 = vmatpush.bf16.msrb.mxu0 %v8984_v24  ;;  %v8823_v24 = vld [vmem:[%s11822_s0 + $0x4c] sm:$0xf] }
  0x77   :  { %5251 = vmatpush.bf16.msrb.mxu1 %v8992_v25  ;;  %v6266_v25 = vld [vmem:[%s11822_s0 + $0x168] sm:$0xf0] }
  0x78   :  { %5265 = vmatpush.bf16.msrb.mxu2 %v9000_v26  ;;  %v9069_v26 = vld [vmem:[%s11821_s1 + $0x5b8] sm:$0xff] }
  0x79   :  { %5279 = vmatpush.bf16.msrb.mxu3 %v9008_v27  ;;  %v9077_v27 = vld [vmem:[%s11821_s1 + $0x5f8] sm:$0xff] }
  0x7a   :  { %5238 = vmatpush.bf16.msrb.mxu0 %v8983_v28  ;;  %v6257_v28 = vor.u32 %v8858_v19, %v6256_v18 }
  0x7b   :  { %5252 = vmatpush.bf16.msrb.mxu1 %v8991_v29  ;;  %v6265_v29 = vor.u32 %v8859_v21, %v6264_v20 }
  0x7c   :  { %5266 = vmatpush.bf16.msrb.mxu2 %v8999_v30  ;;  %v6261_v30 = vor.u32 %v8822_v22, %v6258_v23  ;;  %v9084_v23 = vld [vmem:[%s11821_s1 + $0x630] sm:$0xff] }
  0x7d   :  { %5280 = vmatpush.bf16.msrb.mxu3 %v9007_v31  ;;  %v6269_v31 = vor.u32 %v8823_v24, %v6266_v25  ;;  %v9092_v24 = vld [vmem:[%s11821_s1 + $0x670] sm:$0xff] }
  0x7e   :  { %5239 = vmatpush.bf16.msrb.mxu0 %v8982_v32  ;;  %v9052_v32 = vld [vmem:[%s11821_s1 + $0x530] sm:$0xff] }
  0x7f   :  { %5253 = vmatpush.bf16.msrb.mxu1 %v8990_v33  ;;  %v9060_v33 = vld [vmem:[%s11821_s1 + $0x570] sm:$0xff] }
  0x80   :  { %5267 = vmatpush.bf16.msrb.mxu2 %v8998_v34  ;;  %v9068_v34 = vld [vmem:[%s11821_s1 + $0x5b0] sm:$0xff] }
  0x81   :  { %5281 = vmatpush.bf16.msrb.mxu3 %v9006_v35  ;;  %5240 = vmatmul.bf16.vlgmr.msrb.gmra.mxu0 %v6241_v48  ;;  %v9076_v35 = vld [vmem:[%s11821_s1 + $0x5f0] sm:$0xff] }
  0x82   :  { %5288 = vmatpush.bf16.msra.mxu0 %v9021_v36  ;;  %5254 = vmatmul.bf16.vlgmr.msrb.gmra.mxu1 %v6245_v50  ;;  %v9051_v36 = vld [vmem:[%s11821_s1 + $0x528] sm:$0xff]  ;;  %v9057_v50 = vld [vmem:[%s11821_s1 + $0x558] sm:$0xff]  ;;  %v9100_v25 = vld [vmem:[%s11821_s1 + $0x6b0] sm:$0xff] }
  0x83   :  { %5302 = vmatpush.bf16.msra.mxu1 %v9029_v37  ;;  %5268 = vmatmul.bf16.vlgmr.msrb.gmra.mxu2 %v6249_v49  ;;  %v9059_v37 = vld [vmem:[%s11821_s1 + $0x568] sm:$0xff]  ;;  %v9049_v49 = vld [vmem:[%s11821_s1 + $0x518] sm:$0xff] }
  0x84   :  { %5316 = vmatpush.bf16.msra.mxu2 %v9037_v46  ;;  %5282 = vmatmul.bf16.vlgmr.msrb.gmra.mxu3 %v6253_v51  ;;  %v9074_v46 = vld [vmem:[%s11821_s1 + $0x5e0] sm:$0xff]  ;;  %v9065_v51 = vld [vmem:[%s11821_s1 + $0x598] sm:$0xff] }
  0x85   :  { %5330 = vmatpush.bf16.msra.mxu3 %v9045_v47 }
  0x86   :  { %5289 = vmatpush.bf16.msra.mxu0 %v9020_v52  ;;  %v9073_v52 = vld [vmem:[%s11821_s1 + $0x5d8] sm:$0xff] }
  0x87   :  { %5303 = vmatpush.bf16.msra.mxu1 %v9028_v53 }
  0x88   :  { %5317 = vmatpush.bf16.msra.mxu2 %v9036_v54 }
  0x89   :  { %5331 = vmatpush.bf16.msra.mxu3 %v9044_v55 }
  0x8a   :  { %5290 = vmatpush.bf16.msra.mxu0 %v9019_v56  ;;  %v9048_v56 = vld [vmem:[%s11821_s1 + $0x510] sm:$0xff] }
  0x8b   :  { %5304 = vmatpush.bf16.msra.mxu1 %v9027_v57  ;;  %v9056_v57 = vld [vmem:[%s11821_s1 + $0x550] sm:$0xff] }
  0x8c   :  { %5318 = vmatpush.bf16.msra.mxu2 %v9035_v58 }
  0x8d   :  { %5332 = vmatpush.bf16.msra.mxu3 %v9043_v59  ;;  %v9064_v59 = vld [vmem:[%s11821_s1 + $0x590] sm:$0xff] }
  0x8e   :  { %5291 = vmatpush.bf16.msra.mxu0 %v9018_v60  ;;  %v9072_v60 = vld [vmem:[%s11821_s1 + $0x5d0] sm:$0xff] }
  0x8f   :  { %5305 = vmatpush.bf16.msra.mxu1 %v9026_v61  ;;  %v9047_v61 = vld [vmem:[%s11821_s1 + $0x508] sm:$0xff] }
  0x90   :  { %5319 = vmatpush.bf16.msra.mxu2 %v9034_v62  ;;  %v9055_v62 = vld [vmem:[%s11821_s1 + $0x548] sm:$0xff] }
  0x91   :  { %5333 = vmatpush.bf16.msra.mxu3 %v9042_v63  ;;  %v9063_v63 = vld [vmem:[%s11821_s1 + $0x588] sm:$0xff] }
  0x92   :  { %5292 = vmatpush.bf16.msra.mxu0 %v9017_v0  ;;  %v9071_v0 = vld [vmem:[%s11821_s1 + $0x5c8] sm:$0xff] }
  0x93   :  { %5306 = vmatpush.bf16.msra.mxu1 %v9025_v1  ;;  %v9046_v1 = vld [vmem:[%s11821_s1 + $0x500] sm:$0xff] }
  0x94   :  { %5320 = vmatpush.bf16.msra.mxu2 %v9033_v2  ;;  %v9054_v2 = vld [vmem:[%s11821_s1 + $0x540] sm:$0xff] }
  0x95   :  { %5334 = vmatpush.bf16.msra.mxu3 %v9041_v3  ;;  %v9062_v3 = vld [vmem:[%s11821_s1 + $0x580] sm:$0xff] }
  0x96   :  { %5293 = vmatpush.bf16.msra.mxu0 %v9016_v4  ;;  %v9070_v4 = vld [vmem:[%s11821_s1 + $0x5c0] sm:$0xff] }
  0x97   :  { %5307 = vmatpush.bf16.msra.mxu1 %v9024_v5  ;;  %v9085_v5 = vld [vmem:[%s11821_s1 + $0x638] sm:$0xff] }
  0x98   :  { %5321 = vmatpush.bf16.msra.mxu2 %v9032_v6  ;;  %v9093_v6 = vld [vmem:[%s11821_s1 + $0x678] sm:$0xff] }
  0x99   :  { %5335 = vmatpush.bf16.msra.mxu3 %v9040_v7  ;;  %v6272_v7 = vld [vmem:[%s11822_s0 + $0x50] sm:$0xf] }
  0x9a   :  { %5294 = vmatpush.bf16.msra.mxu0 %v9015_v8  ;;  %v8860_v8 = vld [vmem:[%s11822_s0 + $0x16c] sm:$0xf0] }
  0x9b   :  { %5308 = vmatpush.bf16.msra.mxu1 %v9023_v9  ;;  %v6280_v9 = vld [vmem:[%s11822_s0 + $0x58] sm:$0xf]  ;;  %v6273_v18 = vor.u32 %v8860_v8, %v6272_v7  ;;  %v6298_v7 = vld [vmem:[%s11822_s0 + $0x188] sm:$0xf0] }
  0x9c   :  { %5322 = vmatpush.bf16.msra.mxu2 %v9031_v10  ;;  %v8861_v10 = vld [vmem:[%s11822_s0 + $0x174] sm:$0xf0] }
  0x9d   :  { %5336 = vmatpush.bf16.msra.mxu3 %v9039_v11  ;;  %v8824_v11 = vld [vmem:[%s11822_s0 + $0x54] sm:$0xf]  ;;  %v6281_v19 = vor.u32 %v8861_v10, %v6280_v9  ;;  %v9133_v8 = vld [vmem:[%s11821_s1 + $0x7b8] sm:$0xff] }
  0x9e   :  { %5295 = vmatpush.bf16.msra.mxu0 %v9014_v12  ;;  %v5073_v41 = vpop.f32.mrf.mxu0  ;;  %v6274_v12 = vld [vmem:[%s11822_s0 + $0x170] sm:$0xf0]  ;;  %v9141_v9 = vld [vmem:[%s11821_s1 + $0x7f8] sm:$0xff] }
  0x9f   :  { %5309 = vmatpush.bf16.msra.mxu1 %v9022_v13  ;;  %v5074_v44 = vadd.f32 %v10143_v38, %v5073_v41  ;;  %v5087_v47 = vpop.f32.mrf.mxu1  ;;  %v8825_v13 = vld [vmem:[%s11822_s0 + $0x5c] sm:$0xf]  ;;  %v6277_v20 = vor.u32 %v8824_v11, %v6274_v12 }
  0xa0   :  { %5323 = vmatpush.bf16.msra.mxu2 %v9030_v14  ;;  %v6282_v14 = vld [vmem:[%s11822_s0 + $0x178] sm:$0xf0] }
  0xa1   :  { %5337 = vmatpush.bf16.msra.mxu3 %v9038_v15  ;;  %5296 = vmatmul.bf16.vlgmr.msra.gmra.mxu0 %v6257_v28  ;;  %v5088_v48 = vadd.f32 %v5087_v47, %v5074_v44  ;;  %v9101_v15 = vld [vmem:[%s11821_s1 + $0x6b8] sm:$0xff]  ;;  %v6285_v21 = vor.u32 %v8825_v13, %v6282_v14  ;;  %v9083_v28 = vld [vmem:[%s11821_s1 + $0x628] sm:$0xff] }
  0xa2   :  { %5344 = vmatpush.bf16.msrb.mxu0 %v9053_v16  ;;  %5310 = vmatmul.bf16.vlgmr.msra.gmra.mxu1 %v6261_v30  ;;  %v9109_v16 = vld [vmem:[%s11821_s1 + $0x6f8] sm:$0xff]  ;;  %v9099_v30 = vld [vmem:[%s11821_s1 + $0x6a8] sm:$0xff] }
  0xa3   :  { %5358 = vmatpush.bf16.msrb.mxu1 %v9061_v17  ;;  %5324 = vmatmul.bf16.vlgmr.msra.gmra.mxu2 %v6265_v29  ;;  %v9091_v29 = vld [vmem:[%s11821_s1 + $0x668] sm:$0xff]  ;;  %v9097_v44 = vld [vmem:[%s11821_s1 + $0x698] sm:$0xff] }
  0xa4   :  { %5372 = vmatpush.bf16.msrb.mxu2 %v9069_v26  ;;  %5338 = vmatmul.bf16.vlgmr.msra.gmra.mxu3 %v6269_v31  ;;  %v9108_v26 = vld [vmem:[%s11821_s1 + $0x6f0] sm:$0xff]  ;;  %v9107_v31 = vld [vmem:[%s11821_s1 + $0x6e8] sm:$0xff] }
  0xa5   :  { %5386 = vmatpush.bf16.msrb.mxu3 %v9077_v27 }
  0xa6   :  { %5345 = vmatpush.bf16.msrb.mxu0 %v9052_v32  ;;  %v5101_v53 = vpop.f32.mrf.mxu2  ;;  %v10250_v17 = vpop.f32.mrf.mxu0 }
  0xa7   :  { %5359 = vmatpush.bf16.msrb.mxu1 %v9060_v33  ;;  %v5102_v54 = vadd.f32 %v5101_v53, %v5088_v48  ;;  %v5115_v55 = vpop.f32.mrf.mxu3  ;;  %v10252_v22 = vpop.f32.mrf.mxu1  ;;  %v9104_v53 = vld [vmem:[%s11821_s1 + $0x6d0] sm:$0xff] }
  0xa8   :  { %5373 = vmatpush.bf16.msrb.mxu2 %v9068_v34 }
  0xa9   :  { %5387 = vmatpush.bf16.msrb.mxu3 %v9076_v35  ;;  %v10182_v58 = vadd.f32 %v5115_v55, %v5102_v54  ;;  %v9082_v35 = vld [vmem:[%s11821_s1 + $0x620] sm:$0xff]  ;;  %v9079_v54 = vld [vmem:[%s11821_s1 + $0x608] sm:$0xff] }
  0xaa   :  { %5346 = vmatpush.bf16.msrb.mxu0 %v9051_v36  ;;  %v9090_v36 = vld [vmem:[%s11821_s1 + $0x660] sm:$0xff]  ;;  %v9087_v55 = vld [vmem:[%s11821_s1 + $0x648] sm:$0xff] }
  0xab   :  { %5360 = vmatpush.bf16.msrb.mxu1 %v9059_v37  ;;  %v9098_v37 = vld [vmem:[%s11821_s1 + $0x6a0] sm:$0xff] }
  0xac   :  { %5374 = vmatpush.bf16.msrb.mxu2 %v9067_v39  ;;  %v9106_v39 = vld [vmem:[%s11821_s1 + $0x6e0] sm:$0xff] }
  0xad   :  { %5388 = vmatpush.bf16.msrb.mxu3 %v9075_v40 }
  0xae   :  { %5347 = vmatpush.bf16.msrb.mxu0 %v9050_v42  ;;  %v10266_v27 = vpop.f32.mrf.mxu2  ;;  %v9081_v42 = vld [vmem:[%s11821_s1 + $0x618] sm:$0xff] }
  0xaf   :  { %5361 = vmatpush.bf16.msrb.mxu1 %v9058_v43  ;;  %v10280_v32 = vpop.f32.mrf.mxu3  ;;  %v9089_v43 = vld [vmem:[%s11821_s1 + $0x658] sm:$0xff] }
  0xb0   :  { %5375 = vmatpush.bf16.msrb.mxu2 %v9066_v45  ;;  %v9105_v45 = vld [vmem:[%s11821_s1 + $0x6d8] sm:$0xff] }
  0xb1   :  { %5389 = vmatpush.bf16.msrb.mxu3 %v9074_v46 }
  0xb2   :  { %5348 = vmatpush.bf16.msrb.mxu0 %v9049_v49 }
  0xb3   :  { %5362 = vmatpush.bf16.msrb.mxu1 %v9057_v50  ;;  %v9080_v50 = vld [vmem:[%s11821_s1 + $0x610] sm:$0xff] }
  0xb4   :  { %5376 = vmatpush.bf16.msrb.mxu2 %v9065_v51  ;;  %v9088_v51 = vld [vmem:[%s11821_s1 + $0x650] sm:$0xff] }
  0xb5   :  { %5390 = vmatpush.bf16.msrb.mxu3 %v9073_v52  ;;  %v9096_v52 = vld [vmem:[%s11821_s1 + $0x690] sm:$0xff] }
  0xb6   :  { %5349 = vmatpush.bf16.msrb.mxu0 %v9048_v56  ;;  %v9095_v56 = vld [vmem:[%s11821_s1 + $0x688] sm:$0xff] }
  0xb7   :  { %5363 = vmatpush.bf16.msrb.mxu1 %v9056_v57  ;;  %v9103_v57 = vld [vmem:[%s11821_s1 + $0x6c8] sm:$0xff] }
  0xb8   :  { %5377 = vmatpush.bf16.msrb.mxu2 %v9064_v59  ;;  %v9086_v59 = vld [vmem:[%s11821_s1 + $0x640] sm:$0xff] }
  0xb9   :  { %5391 = vmatpush.bf16.msrb.mxu3 %v9072_v60  ;;  %v9094_v60 = vld [vmem:[%s11821_s1 + $0x680] sm:$0xff] }
  0xba   :  { %5350 = vmatpush.bf16.msrb.mxu0 %v9047_v61  ;;  %v9102_v61 = vld [vmem:[%s11821_s1 + $0x6c0] sm:$0xff] }
  0xbb   :  { %5364 = vmatpush.bf16.msrb.mxu1 %v9055_v62  ;;  %v9117_v62 = vld [vmem:[%s11821_s1 + $0x738] sm:$0xff] }
  0xbc   :  { %5378 = vmatpush.bf16.msrb.mxu2 %v9063_v63  ;;  %v9125_v63 = vld [vmem:[%s11821_s1 + $0x778] sm:$0xff] }
  0xbd   :  { %5392 = vmatpush.bf16.msrb.mxu3 %v9071_v0  ;;  %v6288_v0 = vld [vmem:[%s11822_s0 + $0x60] sm:$0xf] }
  0xbe   :  { %5351 = vmatpush.bf16.msrb.mxu0 %v9046_v1  ;;  %v5129_v33 = vpop.f32.mrf.mxu0  ;;  %v8862_v1 = vld [vmem:[%s11822_s0 + $0x17c] sm:$0xf0] }
  0xbf   :  { %5365 = vmatpush.bf16.msrb.mxu1 %v9054_v2  ;;  %v5130_v34 = vadd.f32 %v5129_v33, %v10182_v58  ;;  %v5143_v40 = vpop.f32.mrf.mxu1  ;;  %v9078_v58 = vld [vmem:[%s11821_s1 + $0x600] sm:$0xff]  ;;  %v6296_v2 = vld [vmem:[%s11822_s0 + $0x68] sm:$0xf]  ;;  %v6289_v10 = vor.u32 %v8862_v1, %v6288_v0  ;;  %v8865_v0 = vld [vmem:[%s11822_s0 + $0x194] sm:$0xf0] }
  0xc0   :  { %5379 = vmatpush.bf16.msrb.mxu2 %v9062_v3  ;;  %v8863_v3 = vld [vmem:[%s11822_s0 + $0x184] sm:$0xf0]  ;;  %v9122_v33 = vld [vmem:[%s11821_s1 + $0x760] sm:$0xff]  ;;  %v8828_v1 = vld [vmem:[%s11822_s0 + $0x74] sm:$0xf] }
  0xc1   :  { %5393 = vmatpush.bf16.msrb.mxu3 %v9070_v4  ;;  %5352 = vmatmul.bf16.vlgmr.msrb.gmra.mxu0 %v6273_v18  ;;  %v5144_v41 = vadd.f32 %v5143_v40, %v5130_v34  ;;  %v8826_v4 = vld [vmem:[%s11822_s0 + $0x64] sm:$0xf]  ;;  %v6297_v11 = vor.u32 %v8863_v3, %v6296_v2  ;;  %v9124_v18 = vld [vmem:[%s11821_s1 + $0x770] sm:$0xff]  ;;  %v9121_v40 = vld [vmem:[%s11821_s1 + $0x758] sm:$0xff] }
  0xc2   :  { %5400 = vmatpush.bf16.msra.mxu0 %v9085_v5  ;;  %5366 = vmatmul.bf16.vlgmr.msrb.gmra.mxu1 %v6277_v20  ;;  %v6290_v5 = vld [vmem:[%s11822_s0 + $0x180] sm:$0xf0]  ;;  %v9140_v20 = vld [vmem:[%s11821_s1 + $0x7f0] sm:$0xff]  ;;  %v8829_v3 = vld [vmem:[%s11822_s0 + $0x7c] sm:$0xf] }
  0xc3   :  { %5414 = vmatpush.bf16.msra.mxu1 %v9093_v6  ;;  %5380 = vmatmul.bf16.vlgmr.msrb.gmra.mxu2 %v6281_v19  ;;  %v8827_v6 = vld [vmem:[%s11822_s0 + $0x6c] sm:$0xf]  ;;  %v6293_v13 = vor.u32 %v8826_v4, %v6290_v5  ;;  %v9132_v19 = vld [vmem:[%s11821_s1 + $0x7b0] sm:$0xff]  ;;  %v6314_v4 = vld [vmem:[%s11822_s0 + $0x198] sm:$0xf0] }
  0xc4   :  { %5428 = vmatpush.bf16.msra.mxu2 %v9101_v15  ;;  %5394 = vmatmul.bf16.vlgmr.msrb.gmra.mxu3 %v6285_v21  ;;  %v6301_v14 = vor.u32 %v8827_v6, %v6298_v7  ;;  %v9115_v21 = vld [vmem:[%s11821_s1 + $0x728] sm:$0xff]  ;;  %v6306_v2 = vld [vmem:[%s11822_s0 + $0x190] sm:$0xf0]  ;;  %v9165_v5 = vld [vmem:[%s11821_s1 + $0x8b8] sm:$0xff] }
  0xc5   :  { %5442 = vmatpush.bf16.msra.mxu3 %v9109_v16  ;;  %v9116_v16 = vld [vmem:[%s11821_s1 + $0x730] sm:$0xff]  ;;  %v9173_v6 = vld [vmem:[%s11821_s1 + $0x8f8] sm:$0xff] }
  0xc6   :  { %5401 = vmatpush.bf16.msra.mxu0 %v9084_v23  ;;  %v5157_v46 = vpop.f32.mrf.mxu2  ;;  %v10381_v12 = vpop.f32.mrf.mxu0  ;;  %v9123_v23 = vld [vmem:[%s11821_s1 + $0x768] sm:$0xff] }
  0xc7   :  { %5415 = vmatpush.bf16.msra.mxu1 %v9092_v24  ;;  %v5158_v47 = vadd.f32 %v5157_v46, %v5144_v41  ;;  %v5171_v48 = vpop.f32.mrf.mxu3  ;;  %v10383_v15 = vpop.f32.mrf.mxu1  ;;  %v9129_v41 = vld [vmem:[%s11821_s1 + $0x798] sm:$0xff] }
  0xc8   :  { %5429 = vmatpush.bf16.msra.mxu2 %v9100_v25  ;;  %v9131_v25 = vld [vmem:[%s11821_s1 + $0x7a8] sm:$0xff] }
  0xc9   :  { %5443 = vmatpush.bf16.msra.mxu3 %v9108_v26  ;;  %v10307_v49 = vadd.f32 %v5171_v48, %v5158_v47  ;;  %v9139_v26 = vld [vmem:[%s11821_s1 + $0x7e8] sm:$0xff]  ;;  %v9112_v47 = vld [vmem:[%s11821_s1 + $0x710] sm:$0xff] }
  0xca   :  { %5402 = vmatpush.bf16.msra.mxu0 %v9083_v28  ;;  %v9120_v48 = vld [vmem:[%s11821_s1 + $0x750] sm:$0xff] }
  0xcb   :  { %5416 = vmatpush.bf16.msra.mxu1 %v9091_v29 }
  0xcc   :  { %5430 = vmatpush.bf16.msra.mxu2 %v9099_v30 }
  0xcd   :  { %5444 = vmatpush.bf16.msra.mxu3 %v9107_v31  ;;  %v9114_v31 = vld [vmem:[%s11821_s1 + $0x720] sm:$0xff] }
  0xce   :  { %5403 = vmatpush.bf16.msra.mxu0 %v9082_v35  ;;  %v10403_v24 = vpop.f32.mrf.mxu2  ;;  %v9130_v35 = vld [vmem:[%s11821_s1 + $0x7a0] sm:$0xff] }
  0xcf   :  { %5417 = vmatpush.bf16.msra.mxu1 %v9090_v36  ;;  %v10411_v28 = vpop.f32.mrf.mxu3  ;;  %v9138_v36 = vld [vmem:[%s11821_s1 + $0x7e0] sm:$0xff] }
  0xd0   :  { %5431 = vmatpush.bf16.msra.mxu2 %v9098_v37 }
  0xd1   :  { %5445 = vmatpush.bf16.msra.mxu3 %v9106_v39  ;;  %v9113_v39 = vld [vmem:[%s11821_s1 + $0x718] sm:$0xff] }
  0xd2   :  { %5404 = vmatpush.bf16.msra.mxu0 %v9081_v42  ;;  %v9137_v42 = vld [vmem:[%s11821_s1 + $0x7d8] sm:$0xff] }
  0xd3   :  { %5418 = vmatpush.bf16.msra.mxu1 %v9089_v43 }
  0xd4   :  { %5432 = vmatpush.bf16.msra.mxu2 %v9097_v44 }
  0xd5   :  { %5446 = vmatpush.bf16.msra.mxu3 %v9105_v45 }
  0xd6   :  { %5405 = vmatpush.bf16.msra.mxu0 %v9080_v50  ;;  %v9136_v50 = vld [vmem:[%s11821_s1 + $0x7d0] sm:$0xff] }
  0xd7   :  { %5419 = vmatpush.bf16.msra.mxu1 %v9088_v51  ;;  %v9111_v51 = vld [vmem:[%s11821_s1 + $0x708] sm:$0xff] }
  0xd8   :  { %5433 = vmatpush.bf16.msra.mxu2 %v9096_v52  ;;  %v9119_v52 = vld [vmem:[%s11821_s1 + $0x748] sm:$0xff] }
  0xd9   :  { %5447 = vmatpush.bf16.msra.mxu3 %v9104_v53  ;;  %v9127_v53 = vld [vmem:[%s11821_s1 + $0x788] sm:$0xff] }
  0xda   :  { %5406 = vmatpush.bf16.msra.mxu0 %v9079_v54  ;;  %v9135_v54 = vld [vmem:[%s11821_s1 + $0x7c8] sm:$0xff] }
  0xdb   :  { %5420 = vmatpush.bf16.msra.mxu1 %v9087_v55  ;;  %v9110_v55 = vld [vmem:[%s11821_s1 + $0x700] sm:$0xff] }
  0xdc   :  { %5434 = vmatpush.bf16.msra.mxu2 %v9095_v56  ;;  %v9118_v56 = vld [vmem:[%s11821_s1 + $0x740] sm:$0xff] }
  0xdd   :  { %5448 = vmatpush.bf16.msra.mxu3 %v9103_v57  ;;  %v9126_v57 = vld [vmem:[%s11821_s1 + $0x780] sm:$0xff] }
  0xde   :  { %5407 = vmatpush.bf16.msra.mxu0 %v9078_v58  ;;  %v5185_v29 = vpop.f32.mrf.mxu0  ;;  %v9134_v58 = vld [vmem:[%s11821_s1 + $0x7c0] sm:$0xff] }
  0xdf   :  { %5421 = vmatpush.bf16.msra.mxu1 %v9086_v59  ;;  %v5186_v30 = vadd.f32 %v5185_v29, %v10307_v49  ;;  %v5199_v34 = vpop.f32.mrf.mxu1  ;;  %v9128_v49 = vld [vmem:[%s11821_s1 + $0x790] sm:$0xff]  ;;  %v9149_v59 = vld [vmem:[%s11821_s1 + $0x838] sm:$0xff] }
  0xe0   :  { %5435 = vmatpush.bf16.msra.mxu2 %v9094_v60  ;;  %v9157_v60 = vld [vmem:[%s11821_s1 + $0x878] sm:$0xff] }
  0xe1   :  { %5449 = vmatpush.bf16.msra.mxu3 %v9102_v61  ;;  %5408 = vmatmul.bf16.vlgmr.msra.gmra.mxu0 %v6289_v10  ;;  %v5200_v37 = vadd.f32 %v5199_v34, %v5186_v30  ;;  %v6304_v61 = vld [vmem:[%s11822_s0 + $0x70] sm:$0xf]  ;;  %v6309_v10 = vor.u32 %v8828_v1, %v6306_v2  ;;  %v9154_v34 = vld [vmem:[%s11821_s1 + $0x860] sm:$0xff]  ;;  %v8867_v1 = vld [vmem:[%s11822_s0 + $0x1a4] sm:$0xf0] }
  0xe2   :  { %5456 = vmatpush.bf16.msrb.mxu0 %v9117_v62  ;;  %5422 = vmatmul.bf16.vlgmr.msra.gmra.mxu1 %v6293_v13  ;;  %v8864_v62 = vld [vmem:[%s11822_s0 + $0x18c] sm:$0xf0]  ;;  %v8830_v2 = vld [vmem:[%s11822_s0 + $0x84] sm:$0xf] }
  0xe3   :  { %5470 = vmatpush.bf16.msrb.mxu1 %v9125_v63  ;;  %5436 = vmatmul.bf16.vlgmr.msra.gmra.mxu2 %v6297_v11  ;;  %v6312_v63 = vld [vmem:[%s11822_s0 + $0x78] sm:$0xf]  ;;  %v6305_v7 = vor.u32 %v8864_v62, %v6304_v61  ;;  %v6317_v11 = vor.u32 %v8829_v3, %v6314_v4  ;;  %v6320_v62 = vld [vmem:[%s11822_s0 + $0x80] sm:$0xf]  ;;  %v6322_v3 = vld [vmem:[%s11822_s0 + $0x1a0] sm:$0xf0] }
  0xe4   :  { %5484 = vmatpush.bf16.msrb.mxu2 %v9133_v8  ;;  %5450 = vmatmul.bf16.vlgmr.msra.gmra.mxu3 %v6301_v14  ;;  %v6313_v8 = vor.u32 %v8865_v0, %v6312_v63  ;;  %v9148_v14 = vld [vmem:[%s11821_s1 + $0x830] sm:$0xff]  ;;  %v9189_v61 = vld [vmem:[%s11821_s1 + $0x978] sm:$0xff]  ;;  %v8866_v63 = vld [vmem:[%s11822_s0 + $0x19c] sm:$0xf0] }
  0xe5   :  { %5498 = vmatpush.bf16.msrb.mxu3 %v9141_v9  ;;  %v6328_v0 = vld [vmem:[%s11822_s0 + $0x88] sm:$0xf]  ;;  %v8831_v4 = vld [vmem:[%s11822_s0 + $0x8c] sm:$0xf] }
  0xe6   :  { %5457 = vmatpush.bf16.msrb.mxu0 %v9116_v16  ;;  %v5213_v43 = vpop.f32.mrf.mxu2  ;;  %v10512_v9 = vpop.f32.mrf.mxu0  ;;  %v9156_v16 = vld [vmem:[%s11821_s1 + $0x870] sm:$0xff] }
  0xe7   :  { %5471 = vmatpush.bf16.msrb.mxu1 %v9124_v18  ;;  %v5214_v44 = vadd.f32 %v5213_v43, %v5200_v37  ;;  %v5227_v45 = vpop.f32.mrf.mxu3  ;;  %v10514_v13 = vpop.f32.mrf.mxu1  ;;  %v9164_v18 = vld [vmem:[%s11821_s1 + $0x8b0] sm:$0xff]  ;;  %v9170_v37 = vld [vmem:[%s11821_s1 + $0x8e0] sm:$0xff]  ;;  %v9169_v43 = vld [vmem:[%s11821_s1 + $0x8d8] sm:$0xff] }
  0xe8   :  { %5485 = vmatpush.bf16.msrb.mxu2 %v9132_v19  ;;  %v9172_v19 = vld [vmem:[%s11821_s1 + $0x8f0] sm:$0xff] }
  0xe9   :  { %5499 = vmatpush.bf16.msrb.mxu3 %v9140_v20  ;;  %v10438_v46 = vadd.f32 %v5227_v45, %v5214_v44  ;;  %v9147_v20 = vld [vmem:[%s11821_s1 + $0x828] sm:$0xff] }
  0xea   :  { %5458 = vmatpush.bf16.msrb.mxu0 %v9115_v21  ;;  %v9155_v21 = vld [vmem:[%s11821_s1 + $0x868] sm:$0xff] }
  0xeb   :  { %5472 = vmatpush.bf16.msrb.mxu1 %v9123_v23 }
  0xec   :  { %5486 = vmatpush.bf16.msrb.mxu2 %v9131_v25  ;;  %v9163_v25 = vld [vmem:[%s11821_s1 + $0x8a8] sm:$0xff] }
  0xed   :  { %5500 = vmatpush.bf16.msrb.mxu3 %v9139_v26  ;;  %v9171_v26 = vld [vmem:[%s11821_s1 + $0x8e8] sm:$0xff] }
  0xee   :  { %5459 = vmatpush.bf16.msrb.mxu0 %v9114_v31  ;;  %v10534_v23 = vpop.f32.mrf.mxu2 }
  0xef   :  { %5473 = vmatpush.bf16.msrb.mxu1 %v9122_v33  ;;  %v10542_v29 = vpop.f32.mrf.mxu3  ;;  %v9146_v33 = vld [vmem:[%s11821_s1 + $0x820] sm:$0xff] }
  0xf0   :  { %5487 = vmatpush.bf16.msrb.mxu2 %v9130_v35 }
  0xf1   :  { %5501 = vmatpush.bf16.msrb.mxu3 %v9138_v36  ;;  %v9162_v36 = vld [vmem:[%s11821_s1 + $0x8a0] sm:$0xff] }
  0xf2   :  { %5460 = vmatpush.bf16.msrb.mxu0 %v9113_v39 }
  0xf3   :  { %5474 = vmatpush.bf16.msrb.mxu1 %v9121_v40  ;;  %v9145_v40 = vld [vmem:[%s11821_s1 + $0x818] sm:$0xff] }
  0xf4   :  { %5488 = vmatpush.bf16.msrb.mxu2 %v9129_v41  ;;  %v9153_v41 = vld [vmem:[%s11821_s1 + $0x858] sm:$0xff] }
  0xf5   :  { %5502 = vmatpush.bf16.msrb.mxu3 %v9137_v42  ;;  %v9161_v42 = vld [vmem:[%s11821_s1 + $0x898] sm:$0xff] }
  0xf6   :  { %5461 = vmatpush.bf16.msrb.mxu0 %v9112_v47 }
  0xf7   :  { %5475 = vmatpush.bf16.msrb.mxu1 %v9120_v48  ;;  %v9144_v48 = vld [vmem:[%s11821_s1 + $0x810] sm:$0xff] }
  0xf8   :  { %5489 = vmatpush.bf16.msrb.mxu2 %v9128_v49  ;;  %v9152_v49 = vld [vmem:[%s11821_s1 + $0x850] sm:$0xff] }
  0xf9   :  { %5503 = vmatpush.bf16.msrb.mxu3 %v9136_v50  ;;  %v9160_v50 = vld [vmem:[%s11821_s1 + $0x890] sm:$0xff] }
  0xfa   :  { %5462 = vmatpush.bf16.msrb.mxu0 %v9111_v51  ;;  %v9168_v51 = vld [vmem:[%s11821_s1 + $0x8d0] sm:$0xff] }
  0xfb   :  { %5476 = vmatpush.bf16.msrb.mxu1 %v9119_v52  ;;  %v9143_v52 = vld [vmem:[%s11821_s1 + $0x808] sm:$0xff] }
  0xfc   :  { %5490 = vmatpush.bf16.msrb.mxu2 %v9127_v53  ;;  %v9151_v53 = vld [vmem:[%s11821_s1 + $0x848] sm:$0xff] }
  0xfd   :  { %5504 = vmatpush.bf16.msrb.mxu3 %v9135_v54  ;;  %v9159_v54 = vld [vmem:[%s11821_s1 + $0x888] sm:$0xff] }
  0xfe   :  { %5463 = vmatpush.bf16.msrb.mxu0 %v9110_v55  ;;  %v5241_v30 = vpop.f32.mrf.mxu0  ;;  %v9167_v55 = vld [vmem:[%s11821_s1 + $0x8c8] sm:$0xff] }
  0xff   :  { %5477 = vmatpush.bf16.msrb.mxu1 %v9118_v56  ;;  %v5242_v31 = vadd.f32 %v5241_v30, %v10438_v46  ;;  %v5255_v35 = vpop.f32.mrf.mxu1  ;;  %v9142_v56 = vld [vmem:[%s11821_s1 + $0x800] sm:$0xff]  ;;  %v9187_v30 = vld [vmem:[%s11821_s1 + $0x968] sm:$0xff] }
 0x100   :  { %5491 = vmatpush.bf16.msrb.mxu2 %v9126_v57  ;;  %v9150_v57 = vld [vmem:[%s11821_s1 + $0x840] sm:$0xff] }
 0x101   :  { %5505 = vmatpush.bf16.msrb.mxu3 %v9134_v58  ;;  %5464 = vmatmul.bf16.vlgmr.msrb.gmra.mxu0 %v6305_v7  ;;  %v5256_v39 = vadd.f32 %v5255_v35, %v5242_v31  ;;  %v9158_v58 = vld [vmem:[%s11821_s1 + $0x880] sm:$0xff]  ;;  %v9205_v7 = vld [vmem:[%s11821_s1 + $0x9f8] sm:$0xff] }
 0x102   :  { %5512 = vmatpush.bf16.msra.mxu0 %v9149_v59  ;;  %5478 = vmatmul.bf16.vlgmr.msrb.gmra.mxu1 %v6309_v10  ;;  %v9166_v59 = vld [vmem:[%s11821_s1 + $0x8c0] sm:$0xff]  ;;  %v6329_v10 = vor.u32 %v8867_v1, %v6328_v0  ;;  %v9221_v1 = vld [vmem:[%s11821_s1 + $0xa78] sm:$0xff] }
 0x103   :  { %5526 = vmatpush.bf16.msra.mxu1 %v9157_v60  ;;  %5492 = vmatmul.bf16.vlgmr.msrb.gmra.mxu2 %v6313_v8  ;;  %v9181_v60 = vld [vmem:[%s11821_s1 + $0x938] sm:$0xff]  ;;  %v6321_v8 = vor.u32 %v8866_v63, %v6320_v62  ;;  %v9182_v62 = vld [vmem:[%s11821_s1 + $0x940] sm:$0xff] }
 0x104   :  { %5540 = vmatpush.bf16.msra.mxu2 %v9165_v5  ;;  %5506 = vmatmul.bf16.vlgmr.msrb.gmra.mxu3 %v6317_v11  ;;  %v6330_v5 = vld [vmem:[%s11822_s0 + $0x1a8] sm:$0xf0]  ;;  %v9190_v63 = vld [vmem:[%s11821_s1 + $0x980] sm:$0xff] }
 0x105   :  { %5554 = vmatpush.bf16.msra.mxu3 %v9173_v6  ;;  %v9197_v6 = vld [vmem:[%s11821_s1 + $0x9b8] sm:$0xff]  ;;  %v9198_v0 = vld [vmem:[%s11821_s1 + $0x9c0] sm:$0xff] }
 0x106   :  { %5513 = vmatpush.bf16.msra.mxu0 %v9148_v14  ;;  %v5269_v44 = vpop.f32.mrf.mxu2  ;;  %v10643_v11 = vpop.f32.mrf.mxu0  ;;  %v6325_v14 = vor.u32 %v8830_v2, %v6322_v3  ;;  %v6336_v2 = vld [vmem:[%s11822_s0 + $0x90] sm:$0xf] }
 0x107   :  { %5527 = vmatpush.bf16.msra.mxu1 %v9156_v16  ;;  %v5270_v45 = vadd.f32 %v5269_v44, %v5256_v39  ;;  %v5283_v46 = vpop.f32.mrf.mxu3  ;;  %v6333_v16 = vor.u32 %v8831_v4, %v6330_v5  ;;  %v9178_v39 = vld [vmem:[%s11821_s1 + $0x920] sm:$0xff]  ;;  %v8868_v3 = vld [vmem:[%s11822_s0 + $0x1ac] sm:$0xf0]  ;;  %v6344_v4 = vld [vmem:[%s11822_s0 + $0x98] sm:$0xf] }
 0x108   :  { %5541 = vmatpush.bf16.msra.mxu2 %v9164_v18  ;;  %v5076_v18 = vadd.f32 %v10143_v38, %v10250_v17  ;;  %v9204_v38 = vld [vmem:[%s11821_s1 + $0x9f0] sm:$0xff]  ;;  %v8869_v5 = vld [vmem:[%s11822_s0 + $0x1b4] sm:$0xf0] }
 0x109   :  { %5555 = vmatpush.bf16.msra.mxu3 %v9172_v19  ;;  %v10569_v47 = vadd.f32 %v5283_v46, %v5270_v45  ;;  %v10647_v19 = vpop.f32.mrf.mxu1  ;;  %v9177_v45 = vld [vmem:[%s11821_s1 + $0x918] sm:$0xff] }
 0x10a   :  { %5514 = vmatpush.bf16.msra.mxu0 %v9147_v20  ;;  %v9180_v20 = vld [vmem:[%s11821_s1 + $0x930] sm:$0xff]  ;;  %v5090_v17 = vadd.f32 %v10252_v22, %v5076_v18  ;;  %v9203_v22 = vld [vmem:[%s11821_s1 + $0x9e8] sm:$0xff]  ;;  %v9185_v46 = vld [vmem:[%s11821_s1 + $0x958] sm:$0xff] }
 0x10b   :  { %5528 = vmatpush.bf16.msra.mxu1 %v9155_v21  ;;  %v9188_v21 = vld [vmem:[%s11821_s1 + $0x970] sm:$0xff] }
 0x10c   :  { %5542 = vmatpush.bf16.msra.mxu2 %v9163_v25  ;;  %v9196_v25 = vld [vmem:[%s11821_s1 + $0x9b0] sm:$0xff] }
 0x10d   :  { %5556 = vmatpush.bf16.msra.mxu3 %v9171_v26  ;;  %v9179_v26 = vld [vmem:[%s11821_s1 + $0x928] sm:$0xff] }
 0x10e   :  { %5515 = vmatpush.bf16.msra.mxu0 %v9146_v33  ;;  %v10668_v31 = vpop.f32.mrf.mxu2  ;;  %v9195_v33 = vld [vmem:[%s11821_s1 + $0x9a8] sm:$0xff] }
 0x10f   :  { %5529 = vmatpush.bf16.msra.mxu1 %v9154_v34  ;;  %v10676_v34 = vpop.f32.mrf.mxu3 }
 0x110   :  { %5543 = vmatpush.bf16.msra.mxu2 %v9162_v36  ;;  %v5104_v36 = vadd.f32 %v10266_v27, %v5090_v17  ;;  %v9202_v27 = vld [vmem:[%s11821_s1 + $0x9e0] sm:$0xff] }
 0x111   :  { %5557 = vmatpush.bf16.msra.mxu3 %v9170_v37 }
 0x112   :  { %5516 = vmatpush.bf16.msra.mxu0 %v9145_v40  ;;  %v9186_v40 = vld [vmem:[%s11821_s1 + $0x960] sm:$0xff]  ;;  %v5118_v44 = vadd.f32 %v10280_v32, %v5104_v36  ;;  %v9201_v32 = vld [vmem:[%s11821_s1 + $0x9d8] sm:$0xff] }
 0x113   :  { %5530 = vmatpush.bf16.msra.mxu1 %v9153_v41 }
 0x114   :  { %5544 = vmatpush.bf16.msra.mxu2 %v9161_v42  ;;  %v9194_v42 = vld [vmem:[%s11821_s1 + $0x9a0] sm:$0xff] }
 0x115   :  { %5558 = vmatpush.bf16.msra.mxu3 %v9169_v43 }
 0x116   :  { %5517 = vmatpush.bf16.msra.mxu0 %v9144_v48 }
 0x117   :  { %5531 = vmatpush.bf16.msra.mxu1 %v9152_v49 }
 0x118   :  { %5545 = vmatpush.bf16.msra.mxu2 %v9160_v50 }
 0x119   :  { %5559 = vmatpush.bf16.msra.mxu3 %v9168_v51  ;;  %v5132_v51 = vadd.f32 %v10381_v12, %v5118_v44  ;;  %v9200_v12 = vld [vmem:[%s11821_s1 + $0x9d0] sm:$0xff]  ;;  %v9210_v44 = vld [vmem:[%s11821_s1 + $0xa20] sm:$0xff] }
 0x11a   :  { %5518 = vmatpush.bf16.msra.mxu0 %v9143_v52 }
 0x11b   :  { %5532 = vmatpush.bf16.msra.mxu1 %v9151_v53  ;;  %v9176_v53 = vld [vmem:[%s11821_s1 + $0x910] sm:$0xff] }
 0x11c   :  { %5546 = vmatpush.bf16.msra.mxu2 %v9159_v54  ;;  %v9184_v54 = vld [vmem:[%s11821_s1 + $0x950] sm:$0xff] }
 0x11d   :  { %5560 = vmatpush.bf16.msra.mxu3 %v9167_v55  ;;  %v9192_v55 = vld [vmem:[%s11821_s1 + $0x990] sm:$0xff] }
 0x11e   :  { %5519 = vmatpush.bf16.msra.mxu0 %v9142_v56  ;;  %v5297_v35 = vpop.f32.mrf.mxu0  ;;  %v5146_v56 = vadd.f32 %v10383_v15, %v5132_v51  ;;  %v9199_v15 = vld [vmem:[%s11821_s1 + $0x9c8] sm:$0xff]  ;;  %v9225_v51 = vld [vmem:[%s11821_s1 + $0xa98] sm:$0xff] }
 0x11f   :  { %5533 = vmatpush.bf16.msra.mxu1 %v9150_v57  ;;  %v5298_v37 = vadd.f32 %v5297_v35, %v10569_v47  ;;  %v5311_v41 = vpop.f32.mrf.mxu1  ;;  %v9193_v47 = vld [vmem:[%s11821_s1 + $0x998] sm:$0xff]  ;;  %v9175_v57 = vld [vmem:[%s11821_s1 + $0x908] sm:$0xff] }
 0x120   :  { %5547 = vmatpush.bf16.msra.mxu2 %v9158_v58  ;;  %v9183_v58 = vld [vmem:[%s11821_s1 + $0x948] sm:$0xff] }
 0x121   :  { %5561 = vmatpush.bf16.msra.mxu3 %v9166_v59  ;;  %5520 = vmatmul.bf16.vlgmr.msra.gmra.mxu0 %v6321_v8  ;;  %v5312_v43 = vadd.f32 %v5311_v41, %v5298_v37  ;;  %v9191_v59 = vld [vmem:[%s11821_s1 + $0x988] sm:$0xff]  ;;  %v6338_v8 = vld [vmem:[%s11822_s0 + $0x1b0] sm:$0xf0] }
 0x122   :  { %5568 = vmatpush.bf16.msrb.mxu0 %v9181_v60  ;;  %5534 = vmatmul.bf16.vlgmr.msra.gmra.mxu1 %v6325_v14  ;;  %v5160_v60 = vadd.f32 %v10403_v24, %v5146_v56  ;;  %v9213_v24 = vld [vmem:[%s11821_s1 + $0xa38] sm:$0xff]  ;;  %v9211_v37 = vld [vmem:[%s11821_s1 + $0xa28] sm:$0xff] }
 0x123   :  { %5582 = vmatpush.bf16.msrb.mxu1 %v9189_v61  ;;  %5548 = vmatmul.bf16.vlgmr.msra.gmra.mxu2 %v6329_v10  ;;  %v9174_v61 = vld [vmem:[%s11821_s1 + $0x900] sm:$0xff]  ;;  %v8833_v10 = vld [vmem:[%s11822_s0 + $0x9c] sm:$0xf] }
 0x124   :  { %5596 = vmatpush.bf16.msrb.mxu2 %v9197_v6  ;;  %5562 = vmatmul.bf16.vlgmr.msra.gmra.mxu3 %v6333_v16  ;;  %v8832_v6 = vld [vmem:[%s11822_s0 + $0x94] sm:$0xf]  ;;  %v6346_v14 = vld [vmem:[%s11822_s0 + $0x1b8] sm:$0xf0] }
 0x125   :  { %5610 = vmatpush.bf16.msrb.mxu3 %v9205_v7  ;;  %v5174_v7 = vadd.f32 %v10411_v28, %v5160_v60  ;;  %v9229_v16 = vld [vmem:[%s11821_s1 + $0xab8] sm:$0xff]  ;;  %v6349_v17 = vor.u32 %v8833_v10, %v6346_v14  ;;  %v9215_v60 = vld [vmem:[%s11821_s1 + $0xa48] sm:$0xff]  ;;  %v6354_v14 = vld [vmem:[%s11822_s0 + $0x1c0] sm:$0xf0] }
 0x126   :  { %5569 = vmatpush.bf16.msrb.mxu0 %v9180_v20  ;;  %v5325_v48 = vpop.f32.mrf.mxu2  ;;  %v9237_v28 = vld [vmem:[%s11821_s1 + $0xaf8] sm:$0xff]  ;;  %v6337_v20 = vor.u32 %v8868_v3, %v6336_v2 }
 0x127   :  { %5583 = vmatpush.bf16.msrb.mxu1 %v9188_v21  ;;  %v5326_v49 = vadd.f32 %v5325_v48, %v5312_v43  ;;  %v5339_v50 = vpop.f32.mrf.mxu3  ;;  %v5188_v18 = vadd.f32 %v10512_v9, %v5174_v7  ;;  %v6345_v21 = vor.u32 %v8869_v5, %v6344_v4  ;;  %v9220_v9 = vld [vmem:[%s11821_s1 + $0xa70] sm:$0xff]  ;;  %v9245_v2 = vld [vmem:[%s11821_s1 + $0xb38] sm:$0xff]  ;;  %v6352_v4 = vld [vmem:[%s11822_s0 + $0xa0] sm:$0xf] }
 0x128   :  { %5597 = vmatpush.bf16.msrb.mxu2 %v9196_v25  ;;  %v10784_v25 = vpop.f32.mrf.mxu0  ;;  %v9253_v3 = vld [vmem:[%s11821_s1 + $0xb78] sm:$0xff]  ;;  %v8870_v5 = vld [vmem:[%s11822_s0 + $0x1bc] sm:$0xf0]  ;;  %v8871_v7 = vld [vmem:[%s11822_s0 + $0x1c4] sm:$0xf0] }
 0x129   :  { %5611 = vmatpush.bf16.msrb.mxu3 %v9204_v38  ;;  %v10706_v52 = vadd.f32 %v5339_v50, %v5326_v49  ;;  %v6341_v38 = vor.u32 %v8832_v6, %v6338_v8  ;;  %v5202_v35 = vadd.f32 %v10514_v13, %v5188_v18  ;;  %v9227_v13 = vld [vmem:[%s11821_s1 + $0xaa8] sm:$0xff]  ;;  %v9209_v49 = vld [vmem:[%s11821_s1 + $0xa18] sm:$0xff]  ;;  %v8834_v8 = vld [vmem:[%s11822_s0 + $0xa4] sm:$0xf] }
 0x12a   :  { %5570 = vmatpush.bf16.msrb.mxu0 %v9179_v26  ;;  %v10786_v26 = vpop.f32.mrf.mxu1  ;;  %v9217_v50 = vld [vmem:[%s11821_s1 + $0xa58] sm:$0xff]  ;;  %v6360_v6 = vld [vmem:[%s11822_s0 + $0xa8] sm:$0xf] }
 0x12b   :  { %5584 = vmatpush.bf16.msrb.mxu1 %v9187_v30  ;;  %v9212_v30 = vld [vmem:[%s11821_s1 + $0xa30] sm:$0xff]  ;;  %v5216_v36 = vadd.f32 %v10534_v23, %v5202_v35  ;;  %v9235_v23 = vld [vmem:[%s11821_s1 + $0xae8] sm:$0xff]  ;;  %v9261_v18 = vld [vmem:[%s11821_s1 + $0xbb8] sm:$0xff] }
 0x12c   :  { %5598 = vmatpush.bf16.msrb.mxu2 %v9195_v33  ;;  %v9228_v33 = vld [vmem:[%s11821_s1 + $0xab0] sm:$0xff] }
 0x12d   :  { %5612 = vmatpush.bf16.msrb.mxu3 %v9203_v22  ;;  %v9236_v22 = vld [vmem:[%s11821_s1 + $0xaf0] sm:$0xff] }
 0x12e   :  { %5571 = vmatpush.bf16.msrb.mxu0 %v9178_v39  ;;  %v9219_v39 = vld [vmem:[%s11821_s1 + $0xa68] sm:$0xff]  ;;  %v9260_v35 = vld [vmem:[%s11821_s1 + $0xbb0] sm:$0xff] }
 0x12f   :  { %5585 = vmatpush.bf16.msrb.mxu1 %v9186_v40  ;;  %v10808_v40 = vpop.f32.mrf.mxu2  ;;  %v10816_v41 = vpop.f32.mrf.mxu3 }
 0x130   :  { %5599 = vmatpush.bf16.msrb.mxu2 %v9194_v42 }
 0x131   :  { %5613 = vmatpush.bf16.msrb.mxu3 %v9202_v27  ;;  %v5230_v27 = vadd.f32 %v10542_v29, %v5216_v36  ;;  %v9234_v29 = vld [vmem:[%s11821_s1 + $0xae0] sm:$0xff]  ;;  %v9268_v36 = vld [vmem:[%s11821_s1 + $0xbf0] sm:$0xff] }
 0x132   :  { %5572 = vmatpush.bf16.msrb.mxu0 %v9177_v45  ;;  %v9218_v45 = vld [vmem:[%s11821_s1 + $0xa60] sm:$0xff] }
 0x133   :  { %5586 = vmatpush.bf16.msrb.mxu1 %v9185_v46 }
 0x134   :  { %5600 = vmatpush.bf16.msrb.mxu2 %v9193_v47  ;;  %v9226_v47 = vld [vmem:[%s11821_s1 + $0xaa0] sm:$0xff] }
 0x135   :  { %5614 = vmatpush.bf16.msrb.mxu3 %v9201_v32  ;;  %v5244_v32 = vadd.f32 %v10643_v11, %v5230_v27  ;;  %v9233_v11 = vld [vmem:[%s11821_s1 + $0xad8] sm:$0xff] }
 0x136   :  { %5573 = vmatpush.bf16.msrb.mxu0 %v9176_v53 }
 0x137   :  { %5587 = vmatpush.bf16.msrb.mxu1 %v9184_v54  ;;  %v5258_v53 = vadd.f32 %v10647_v19, %v5244_v32  ;;  %v9224_v19 = vld [vmem:[%s11821_s1 + $0xa90] sm:$0xff]  ;;  %v9258_v32 = vld [vmem:[%s11821_s1 + $0xba0] sm:$0xff] }
 0x138   :  { %5601 = vmatpush.bf16.msrb.mxu2 %v9192_v55 }
 0x139   :  { %5615 = vmatpush.bf16.msrb.mxu3 %v9200_v12  ;;  %v5272_v12 = vadd.f32 %v10668_v31, %v5258_v53  ;;  %v9232_v31 = vld [vmem:[%s11821_s1 + $0xad0] sm:$0xff]  ;;  %v9265_v53 = vld [vmem:[%s11821_s1 + $0xbd8] sm:$0xff] }
 0x13a   :  { %5574 = vmatpush.bf16.msrb.mxu0 %v9175_v57  ;;  %v9208_v57 = vld [vmem:[%s11821_s1 + $0xa10] sm:$0xff] }
 0x13b   :  { %5588 = vmatpush.bf16.msrb.mxu1 %v9183_v58  ;;  %v9216_v58 = vld [vmem:[%s11821_s1 + $0xa50] sm:$0xff] }
 0x13c   :  { %5602 = vmatpush.bf16.msrb.mxu2 %v9191_v59  ;;  %v5286_v59 = vadd.f32 %v10676_v34, %v5272_v12  ;;  %v9231_v34 = vld [vmem:[%s11821_s1 + $0xac8] sm:$0xff] }
 0x13d   :  { %5616 = vmatpush.bf16.msrb.mxu3 %v9199_v15  ;;  %v9207_v15 = vld [vmem:[%s11821_s1 + $0xa08] sm:$0xff] }
 0x13e   :  { %5575 = vmatpush.bf16.msrb.mxu0 %v9174_v61  ;;  %v5353_v42 = vpop.f32.mrf.mxu0  ;;  %v9223_v61 = vld [vmem:[%s11821_s1 + $0xa88] sm:$0xff] }
 0x13f   :  { %5589 = vmatpush.bf16.msrb.mxu1 %v9182_v62  ;;  %v5354_v43 = vadd.f32 %v5353_v42, %v10706_v52  ;;  %v5367_v46 = vpop.f32.mrf.mxu1  ;;  %v5300_v62 = vadd.f32 %v10784_v25, %v5286_v59  ;;  %v6353_v25 = vor.u32 %v8870_v5, %v6352_v4  ;;  %v9267_v42 = vld [vmem:[%s11821_s1 + $0xbe8] sm:$0xff]  ;;  %v9248_v59 = vld [vmem:[%s11821_s1 + $0xb50] sm:$0xff]  ;;  %v9238_v4 = vld [vmem:[%s11821_s1 + $0xb00] sm:$0xff] }
 0x140   :  { %5603 = vmatpush.bf16.msrb.mxu2 %v9190_v63  ;;  %v9206_v63 = vld [vmem:[%s11821_s1 + $0xa00] sm:$0xff] }
 0x141   :  { %5617 = vmatpush.bf16.msrb.mxu3 %v9198_v0  ;;  %5576 = vmatmul.bf16.vlgmr.msrb.gmra.mxu0 %v6337_v20  ;;  %v5368_v48 = vadd.f32 %v5367_v46, %v5354_v43  ;;  %v9214_v0 = vld [vmem:[%s11821_s1 + $0xa40] sm:$0xff]  ;;  %v5314_v10 = vadd.f32 %v10786_v26, %v5300_v62  ;;  %v9269_v20 = vld [vmem:[%s11821_s1 + $0xbf8] sm:$0xff]  ;;  %v6357_v26 = vor.u32 %v8834_v8, %v6354_v14  ;;  %v9239_v62 = vld [vmem:[%s11821_s1 + $0xb08] sm:$0xff] }
 0x142   :  { %5624 = vmatpush.bf16.msra.mxu0 %v9213_v24  ;;  %5590 = vmatmul.bf16.vlgmr.msrb.gmra.mxu1 %v6341_v38  ;;  %v9222_v24 = vld [vmem:[%s11821_s1 + $0xa80] sm:$0xff]  ;;  %v6361_v38 = vor.u32 %v8871_v7, %v6360_v6  ;;  %v9285_v14 = vld [vmem:[%s11821_s1 + $0xc78] sm:$0xff] }
 0x143   :  { %5638 = vmatpush.bf16.msra.mxu1 %v9221_v1  ;;  %5604 = vmatmul.bf16.vlgmr.msrb.gmra.mxu2 %v6345_v21  ;;  %v9230_v1 = vld [vmem:[%s11821_s1 + $0xac0] sm:$0xff]  ;;  %v5328_v21 = vadd.f32 %v10808_v40, %v5314_v10  ;;  %v9243_v40 = vld [vmem:[%s11821_s1 + $0xb28] sm:$0xff]  ;;  %v9277_v10 = vld [vmem:[%s11821_s1 + $0xc38] sm:$0xff] }
 0x144   :  { %5652 = vmatpush.bf16.msra.mxu2 %v9229_v16  ;;  %5618 = vmatmul.bf16.vlgmr.msrb.gmra.mxu3 %v6349_v17  ;;  %v8835_v16 = vld [vmem:[%s11822_s0 + $0xac] sm:$0xf]  ;;  %v9242_v46 = vld [vmem:[%s11821_s1 + $0xb20] sm:$0xff] }
 0x145   :  { %5666 = vmatpush.bf16.msra.mxu3 %v9237_v28  ;;  %v6362_v28 = vld [vmem:[%s11822_s0 + $0x1c8] sm:$0xf0]  ;;  %v9246_v5 = vld [vmem:[%s11821_s1 + $0xb40] sm:$0xff] }
 0x146   :  { %5625 = vmatpush.bf16.msra.mxu0 %v9212_v30  ;;  %v5381_v52 = vpop.f32.mrf.mxu2  ;;  %v5355_v17 = vpop.f32.mrf.mxu0  ;;  %v6365_v30 = vor.u32 %v8835_v16, %v6362_v28  ;;  %v9254_v6 = vld [vmem:[%s11821_s1 + $0xb80] sm:$0xff]  ;;  %v6368_v16 = vld [vmem:[%s11822_s0 + $0xb0] sm:$0xf] }
 0x147   :  { %5639 = vmatpush.bf16.msra.mxu1 %v9220_v9  ;;  %v5382_v54 = vadd.f32 %v5381_v52, %v5368_v48  ;;  %v5395_v55 = vpop.f32.mrf.mxu3  ;;  %v5369_v9 = vpop.f32.mrf.mxu1  ;;  %v9266_v48 = vld [vmem:[%s11821_s1 + $0xbe0] sm:$0xff]  ;;  %v9257_v52 = vld [vmem:[%s11821_s1 + $0xb98] sm:$0xff]  ;;  %v8872_v28 = vld [vmem:[%s11822_s0 + $0x1cc] sm:$0xf0] }
 0x148   :  { %5653 = vmatpush.bf16.msra.mxu2 %v9228_v33  ;;  %v9244_v33 = vld [vmem:[%s11821_s1 + $0xb30] sm:$0xff]  ;;  %v9262_v7 = vld [vmem:[%s11821_s1 + $0xbc0] sm:$0xff] }
 0x149   :  { %5667 = vmatpush.bf16.msra.mxu3 %v9236_v22  ;;  %v10847_v56 = vadd.f32 %v5395_v55, %v5382_v54  ;;  %v9252_v22 = vld [vmem:[%s11821_s1 + $0xb70] sm:$0xff] }
 0x14a   :  { %5626 = vmatpush.bf16.msra.mxu0 %v9211_v37  ;;  %v5342_v37 = vadd.f32 %v10816_v41, %v5328_v21  ;;  %v9259_v41 = vld [vmem:[%s11821_s1 + $0xba8] sm:$0xff]  ;;  %v8836_v21 = vld [vmem:[%s11822_s0 + $0xb4] sm:$0xf] }
 0x14b   :  { %5640 = vmatpush.bf16.msra.mxu1 %v9219_v39 }
 0x14c   :  { %5654 = vmatpush.bf16.msra.mxu2 %v9227_v13  ;;  %v5356_v39 = vadd.f32 %v5355_v17, %v5342_v37  ;;  %v9251_v13 = vld [vmem:[%s11821_s1 + $0xb68] sm:$0xff]  ;;  %v6378_v17 = vld [vmem:[%s11822_s0 + $0x1d8] sm:$0xf0]  ;;  %v9284_v37 = vld [vmem:[%s11821_s1 + $0xc70] sm:$0xff] }
 0x14d   :  { %5668 = vmatpush.bf16.msra.mxu3 %v9235_v23 }
 0x14e   :  { %5627 = vmatpush.bf16.msra.mxu0 %v9210_v44  ;;  %v5383_v23 = vpop.f32.mrf.mxu2  ;;  %v5370_v44 = vadd.f32 %v5369_v9, %v5356_v39  ;;  %v6369_v9 = vor.u32 %v8872_v28, %v6368_v16  ;;  %v9292_v39 = vld [vmem:[%s11821_s1 + $0xcb0] sm:$0xff]  ;;  %v8838_v16 = vld [vmem:[%s11822_s0 + $0xc4] sm:$0xf] }
 0x14f   :  { %5641 = vmatpush.bf16.msra.mxu1 %v9218_v45  ;;  %v5397_v27 = vpop.f32.mrf.mxu3  ;;  %v6386_v28 = vld [vmem:[%s11822_s0 + $0x1e0] sm:$0xf0] }
 0x150   :  { %5655 = vmatpush.bf16.msra.mxu2 %v9226_v47  ;;  %v9250_v47 = vld [vmem:[%s11821_s1 + $0xb60] sm:$0xff] }
 0x151   :  { %5669 = vmatpush.bf16.msra.mxu3 %v9234_v29 }
 0x152   :  { %5628 = vmatpush.bf16.msra.mxu0 %v9209_v49  ;;  %v5384_v49 = vadd.f32 %v5383_v23, %v5370_v44  ;;  %v9283_v23 = vld [vmem:[%s11821_s1 + $0xc68] sm:$0xff]  ;;  %v9274_v44 = vld [vmem:[%s11821_s1 + $0xc20] sm:$0xff] }
 0x153   :  { %5642 = vmatpush.bf16.msra.mxu1 %v9217_v50 }
 0x154   :  { %5656 = vmatpush.bf16.msra.mxu2 %v9225_v51  ;;  %v9241_v51 = vld [vmem:[%s11821_s1 + $0xb18] sm:$0xff]  ;;  %v5398_v55 = vadd.f32 %v5397_v27, %v5384_v49 }
 0x155   :  { %5670 = vmatpush.bf16.msra.mxu3 %v9233_v11  ;;  %v9249_v11 = vld [vmem:[%s11821_s1 + $0xb58] sm:$0xff] }
 0x156   :  { %5629 = vmatpush.bf16.msra.mxu0 %v9208_v57  ;;  %v9281_v49 = vld [vmem:[%s11821_s1 + $0xc58] sm:$0xff] }
 0x157   :  { %5643 = vmatpush.bf16.msra.mxu1 %v9216_v58 }
 0x158   :  { %5657 = vmatpush.bf16.msra.mxu2 %v9224_v19 }
 0x159   :  { %5671 = vmatpush.bf16.msra.mxu3 %v9232_v31  ;;  %v9240_v31 = vld [vmem:[%s11821_s1 + $0xb10] sm:$0xff] }
 0x15a   :  { %5630 = vmatpush.bf16.msra.mxu0 %v9207_v15  ;;  %v9256_v15 = vld [vmem:[%s11821_s1 + $0xb90] sm:$0xff] }
 0x15b   :  { %5644 = vmatpush.bf16.msra.mxu1 %v9215_v60  ;;  %v9264_v60 = vld [vmem:[%s11821_s1 + $0xbd0] sm:$0xff] }
 0x15c   :  { %5658 = vmatpush.bf16.msra.mxu2 %v9223_v61 }
 0x15d   :  { %5672 = vmatpush.bf16.msra.mxu3 %v9231_v34 }
 0x15e   :  { %5631 = vmatpush.bf16.msra.mxu0 %v9206_v63  ;;  %v5409_v43 = vpop.f32.mrf.mxu0  ;;  %v9247_v63 = vld [vmem:[%s11821_s1 + $0xb48] sm:$0xff] }
 0x15f   :  { %5645 = vmatpush.bf16.msra.mxu1 %v9214_v0  ;;  %v5410_v45 = vadd.f32 %v5409_v43, %v10847_v56  ;;  %v5423_v29 = vpop.f32.mrf.mxu1  ;;  %v9255_v0 = vld [vmem:[%s11821_s1 + $0xb88] sm:$0xff] }
 0x160   :  { %5659 = vmatpush.bf16.msra.mxu2 %v9222_v24  ;;  %v9263_v24 = vld [vmem:[%s11821_s1 + $0xbc8] sm:$0xff] }
 0x161   :  { %5673 = vmatpush.bf16.msra.mxu3 %v9230_v1  ;;  %5632 = vmatmul.bf16.vlgmr.msra.gmra.mxu0 %v6353_v25  ;;  %v5424_v50 = vadd.f32 %v5423_v29, %v5410_v45  ;;  %v6370_v25 = vld [vmem:[%s11822_s0 + $0x1d0] sm:$0xf0]  ;;  %v9282_v45 = vld [vmem:[%s11821_s1 + $0xc60] sm:$0xff] }
 0x162   :  { %5680 = vmatpush.bf16.msrb.mxu0 %v9245_v2  ;;  %5646 = vmatmul.bf16.vlgmr.msra.gmra.mxu1 %v6357_v26  ;;  %v9293_v26 = vld [vmem:[%s11821_s1 + $0xcb8] sm:$0xff]  ;;  %v9298_v29 = vld [vmem:[%s11821_s1 + $0xce0] sm:$0xff] }
 0x163   :  { %5694 = vmatpush.bf16.msrb.mxu1 %v9253_v3  ;;  %5660 = vmatmul.bf16.vlgmr.msra.gmra.mxu2 %v6361_v38  ;;  %v8837_v38 = vld [vmem:[%s11822_s0 + $0xbc] sm:$0xf] }
 0x164   :  { %5708 = vmatpush.bf16.msrb.mxu2 %v9261_v18  ;;  %5674 = vmatmul.bf16.vlgmr.msra.gmra.mxu3 %v6365_v30  ;;  %v6376_v18 = vld [vmem:[%s11822_s0 + $0xb8] sm:$0xf] }
 0x165   :  { %5722 = vmatpush.bf16.msrb.mxu3 %v9269_v20  ;;  %v8873_v20 = vld [vmem:[%s11822_s0 + $0x1d4] sm:$0xf0] }
 0x166   :  { %5681 = vmatpush.bf16.msrb.mxu0 %v9244_v33  ;;  %v5437_v54 = vpop.f32.mrf.mxu2  ;;  %v5411_v57 = vpop.f32.mrf.mxu0  ;;  %v9301_v30 = vld [vmem:[%s11821_s1 + $0xcf8] sm:$0xff]  ;;  %v6377_v33 = vor.u32 %v8873_v20, %v6376_v18  ;;  %v8839_v18 = vld [vmem:[%s11822_s0 + $0xcc] sm:$0xf] }
 0x167   :  { %5695 = vmatpush.bf16.msrb.mxu1 %v9252_v22  ;;  %v5438_v12 = vadd.f32 %v5437_v54, %v5424_v50  ;;  %v5451_v56 = vpop.f32.mrf.mxu3  ;;  %v5412_v58 = vadd.f32 %v5411_v57, %v5398_v55  ;;  %v5425_v61 = vpop.f32.mrf.mxu1  ;;  %v6373_v22 = vor.u32 %v8836_v21, %v6370_v25  ;;  %v9289_v50 = vld [vmem:[%s11821_s1 + $0xc98] sm:$0xff]  ;;  %v9280_v57 = vld [vmem:[%s11821_s1 + $0xc50] sm:$0xff]  ;;  %v6394_v20 = vld [vmem:[%s11822_s0 + $0x1e8] sm:$0xf0] }
 0x168   :  { %5709 = vmatpush.bf16.msrb.mxu2 %v9260_v35  ;;  %v6381_v35 = vor.u32 %v8837_v38, %v6378_v17  ;;  %v9325_v21 = vld [vmem:[%s11821_s1 + $0xdb8] sm:$0xff] }
 0x169   :  { %5723 = vmatpush.bf16.msrb.mxu3 %v9268_v36  ;;  %v10975_v19 = vadd.f32 %v5451_v56, %v5438_v12  ;;  %v5426_v34 = vadd.f32 %v5425_v61, %v5412_v58  ;;  %v9276_v36 = vld [vmem:[%s11821_s1 + $0xc30] sm:$0xff]  ;;  %v9287_v61 = vld [vmem:[%s11821_s1 + $0xc88] sm:$0xff]  ;;  %v9333_v25 = vld [vmem:[%s11821_s1 + $0xdf8] sm:$0xff] }
 0x16a   :  { %5682 = vmatpush.bf16.msrb.mxu0 %v9243_v40  ;;  %v9300_v40 = vld [vmem:[%s11821_s1 + $0xcf0] sm:$0xff] }
 0x16b   :  { %5696 = vmatpush.bf16.msrb.mxu1 %v9251_v13  ;;  %v9275_v13 = vld [vmem:[%s11821_s1 + $0xc28] sm:$0xff]  ;;  %v9272_v56 = vld [vmem:[%s11821_s1 + $0xc10] sm:$0xff] }
 0x16c   :  { %5710 = vmatpush.bf16.msrb.mxu2 %v9259_v41  ;;  %v9291_v41 = vld [vmem:[%s11821_s1 + $0xca8] sm:$0xff] }
 0x16d   :  { %5724 = vmatpush.bf16.msrb.mxu3 %v9267_v42  ;;  %v9299_v42 = vld [vmem:[%s11821_s1 + $0xce8] sm:$0xff] }
 0x16e   :  { %5683 = vmatpush.bf16.msrb.mxu0 %v9242_v46  ;;  %v5439_v1 = vpop.f32.mrf.mxu2 }
 0x16f   :  { %5697 = vmatpush.bf16.msrb.mxu1 %v9250_v47  ;;  %v5440_v2 = vadd.f32 %v5439_v1, %v5426_v34  ;;  %v5453_v3 = vpop.f32.mrf.mxu3  ;;  %v9290_v47 = vld [vmem:[%s11821_s1 + $0xca0] sm:$0xff]  ;;  %v9295_v34 = vld [vmem:[%s11821_s1 + $0xcc8] sm:$0xff] }
 0x170   :  { %5711 = vmatpush.bf16.msrb.mxu2 %v9258_v32  ;;  %v9278_v1 = vld [vmem:[%s11821_s1 + $0xc40] sm:$0xff] }
 0x171   :  { %5725 = vmatpush.bf16.msrb.mxu3 %v9266_v48  ;;  %v11013_v8 = vadd.f32 %v5453_v3, %v5440_v2  ;;  %v9273_v48 = vld [vmem:[%s11821_s1 + $0xc18] sm:$0xff]  ;;  %v9286_v2 = vld [vmem:[%s11821_s1 + $0xc80] sm:$0xff] }
 0x172   :  { %5684 = vmatpush.bf16.msrb.mxu0 %v9241_v51  ;;  %v9297_v51 = vld [vmem:[%s11821_s1 + $0xcd8] sm:$0xff]  ;;  %v9294_v3 = vld [vmem:[%s11821_s1 + $0xcc0] sm:$0xff] }
 0x173   :  { %5698 = vmatpush.bf16.msrb.mxu1 %v9249_v11 }
 0x174   :  { %5712 = vmatpush.bf16.msrb.mxu2 %v9257_v52 }
 0x175   :  { %5726 = vmatpush.bf16.msrb.mxu3 %v9265_v53 }
 0x176   :  { %5685 = vmatpush.bf16.msrb.mxu0 %v9240_v31  ;;  %v9296_v31 = vld [vmem:[%s11821_s1 + $0xcd0] sm:$0xff] }
 0x177   :  { %5699 = vmatpush.bf16.msrb.mxu1 %v9248_v59 }
 0x178   :  { %5713 = vmatpush.bf16.msrb.mxu2 %v9256_v15  ;;  %v9271_v15 = vld [vmem:[%s11821_s1 + $0xc08] sm:$0xff] }
 0x179   :  { %5727 = vmatpush.bf16.msrb.mxu3 %v9264_v60  ;;  %v9279_v60 = vld [vmem:[%s11821_s1 + $0xc48] sm:$0xff] }
 0x17a   :  { %5686 = vmatpush.bf16.msrb.mxu0 %v9239_v62 }
 0x17b   :  { %5700 = vmatpush.bf16.msrb.mxu1 %v9247_v63 }
 0x17c   :  { %5714 = vmatpush.bf16.msrb.mxu2 %v9255_v0 }
 0x17d   :  { %5728 = vmatpush.bf16.msrb.mxu3 %v9263_v24  ;;  %v9270_v24 = vld [vmem:[%s11821_s1 + $0xc00] sm:$0xff] }
 0x17e   :  { %5687 = vmatpush.bf16.msrb.mxu0 %v9238_v4  ;;  %v5465_v27 = vpop.f32.mrf.mxu0 }
 0x17f   :  { %5701 = vmatpush.bf16.msrb.mxu1 %v9246_v5  ;;  %v5466_v43 = vadd.f32 %v5465_v27, %v10975_v19  ;;  %v5479_v46 = vpop.f32.mrf.mxu1  ;;  %v9288_v19 = vld [vmem:[%s11821_s1 + $0xc90] sm:$0xff]  ;;  %v9309_v5 = vld [vmem:[%s11821_s1 + $0xd38] sm:$0xff] }
 0x180   :  { %5715 = vmatpush.bf16.msrb.mxu2 %v9254_v6  ;;  %v9317_v6 = vld [vmem:[%s11821_s1 + $0xd78] sm:$0xff] }
 0x181   :  { %5729 = vmatpush.bf16.msrb.mxu3 %v9262_v7  ;;  %5688 = vmatmul.bf16.vlgmr.msrb.gmra.mxu0 %v6369_v9  ;;  %v5480_v32 = vadd.f32 %v5479_v46, %v5466_v43  ;;  %v6384_v7 = vld [vmem:[%s11822_s0 + $0xc0] sm:$0xf]  ;;  %v9308_v9 = vld [vmem:[%s11821_s1 + $0xd30] sm:$0xff]  ;;  %v9305_v46 = vld [vmem:[%s11821_s1 + $0xd18] sm:$0xff] }
 0x182   :  { %5736 = vmatpush.bf16.msra.mxu0 %v9277_v10  ;;  %5702 = vmatmul.bf16.vlgmr.msrb.gmra.mxu1 %v6373_v22  ;;  %v6392_v10 = vld [vmem:[%s11822_s0 + $0xc8] sm:$0xf]  ;;  %v9324_v22 = vld [vmem:[%s11821_s1 + $0xdb0] sm:$0xff]  ;;  %v9322_v43 = vld [vmem:[%s11821_s1 + $0xda0] sm:$0xff] }
 0x183   :  { %5750 = vmatpush.bf16.msra.mxu1 %v9285_v14  ;;  %5716 = vmatmul.bf16.vlgmr.msrb.gmra.mxu2 %v6377_v33  ;;  %v8875_v14 = vld [vmem:[%s11822_s0 + $0x1e4] sm:$0xf0]  ;;  %v9316_v33 = vld [vmem:[%s11821_s1 + $0xd70] sm:$0xff] }
 0x184   :  { %5764 = vmatpush.bf16.msra.mxu2 %v9293_v26  ;;  %5730 = vmatmul.bf16.vlgmr.msrb.gmra.mxu3 %v6381_v35  ;;  %v6393_v17 = vor.u32 %v8875_v14, %v6392_v10  ;;  %v6389_v26 = vor.u32 %v8838_v16, %v6386_v28  ;;  %v9332_v35 = vld [vmem:[%s11821_s1 + $0xdf0] sm:$0xff]  ;;  %v8841_v10 = vld [vmem:[%s11822_s0 + $0xdc] sm:$0xf] }
 0x185   :  { %5778 = vmatpush.bf16.msra.mxu3 %v9301_v30  ;;  %v6397_v30 = vor.u32 %v8839_v18, %v6394_v20  ;;  %v6410_v14 = vld [vmem:[%s11822_s0 + $0x1f8] sm:$0xf0] }
 0x186   :  { %5737 = vmatpush.bf16.msra.mxu0 %v9276_v36  ;;  %v5493_v11 = vpop.f32.mrf.mxu2  ;;  %v5467_v54 = vpop.f32.mrf.mxu0  ;;  %v9307_v36 = vld [vmem:[%s11821_s1 + $0xd28] sm:$0xff]  ;;  %v9357_v16 = vld [vmem:[%s11821_s1 + $0xeb8] sm:$0xff] }
 0x187   :  { %5751 = vmatpush.bf16.msra.mxu1 %v9284_v37  ;;  %v5494_v52 = vadd.f32 %v5493_v11, %v5480_v32  ;;  %v5507_v53 = vpop.f32.mrf.mxu3  ;;  %v5468_v55 = vadd.f32 %v5467_v54, %v11013_v8  ;;  %v5481_v58 = vpop.f32.mrf.mxu1  ;;  %v8874_v8 = vld [vmem:[%s11822_s0 + $0x1dc] sm:$0xf0]  ;;  %v9315_v37 = vld [vmem:[%s11821_s1 + $0xd68] sm:$0xff]  ;;  %v9329_v32 = vld [vmem:[%s11821_s1 + $0xdd8] sm:$0xff] }
 0x188   :  { %5765 = vmatpush.bf16.msra.mxu2 %v9292_v39  ;;  %v6385_v38 = vor.u32 %v8874_v8, %v6384_v7  ;;  %v9323_v39 = vld [vmem:[%s11821_s1 + $0xda8] sm:$0xff]  ;;  %v9312_v54 = vld [vmem:[%s11821_s1 + $0xd50] sm:$0xff]  ;;  %v9365_v28 = vld [vmem:[%s11821_s1 + $0xef8] sm:$0xff] }
 0x189   :  { %5779 = vmatpush.bf16.msra.mxu3 %v9300_v40  ;;  %v11101_v12 = vadd.f32 %v5507_v53, %v5494_v52  ;;  %v5482_v59 = vadd.f32 %v5481_v58, %v5468_v55  ;;  %v9331_v40 = vld [vmem:[%s11821_s1 + $0xde8] sm:$0xff]  ;;  %v9304_v53 = vld [vmem:[%s11821_s1 + $0xd10] sm:$0xff] }
 0x18a   :  { %5738 = vmatpush.bf16.msra.mxu0 %v9275_v13  ;;  %v9303_v58 = vld [vmem:[%s11821_s1 + $0xd08] sm:$0xff]  ;;  %v8840_v7 = vld [vmem:[%s11822_s0 + $0xd4] sm:$0xf] }
 0x18b   :  { %5752 = vmatpush.bf16.msra.mxu1 %v9283_v23  ;;  %v6402_v8 = vld [vmem:[%s11822_s0 + $0x1f0] sm:$0xf0] }
 0x18c   :  { %5766 = vmatpush.bf16.msra.mxu2 %v9291_v41  ;;  %v9306_v41 = vld [vmem:[%s11821_s1 + $0xd20] sm:$0xff] }
 0x18d   :  { %5780 = vmatpush.bf16.msra.mxu3 %v9299_v42  ;;  %v9314_v42 = vld [vmem:[%s11821_s1 + $0xd60] sm:$0xff] }
 0x18e   :  { %5739 = vmatpush.bf16.msra.mxu0 %v9274_v44  ;;  %v5495_v62 = vpop.f32.mrf.mxu2  ;;  %v9330_v44 = vld [vmem:[%s11821_s1 + $0xde0] sm:$0xff] }
 0x18f   :  { %5753 = vmatpush.bf16.msra.mxu1 %v9282_v45  ;;  %v5496_v63 = vadd.f32 %v5495_v62, %v5482_v59  ;;  %v5509_v0 = vpop.f32.mrf.mxu3  ;;  %v9327_v59 = vld [vmem:[%s11821_s1 + $0xdc8] sm:$0xff]  ;;  %v9310_v62 = vld [vmem:[%s11821_s1 + $0xd40] sm:$0xff] }
 0x190   :  { %5767 = vmatpush.bf16.msra.mxu2 %v9290_v47  ;;  %v9313_v47 = vld [vmem:[%s11821_s1 + $0xd58] sm:$0xff] }
 0x191   :  { %5781 = vmatpush.bf16.msra.mxu3 %v9298_v29  ;;  %v11139_v4 = vadd.f32 %v5509_v0, %v5496_v63  ;;  %v9321_v29 = vld [vmem:[%s11821_s1 + $0xd98] sm:$0xff]  ;;  %v9318_v63 = vld [vmem:[%s11821_s1 + $0xd80] sm:$0xff] }
 0x192   :  { %5740 = vmatpush.bf16.msra.mxu0 %v9273_v48  ;;  %v9326_v0 = vld [vmem:[%s11821_s1 + $0xdc0] sm:$0xff] }
 0x193   :  { %5754 = vmatpush.bf16.msra.mxu1 %v9281_v49 }
 0x194   :  { %5768 = vmatpush.bf16.msra.mxu2 %v9289_v50 }
 0x195   :  { %5782 = vmatpush.bf16.msra.mxu3 %v9297_v51 }
 0x196   :  { %5741 = vmatpush.bf16.msra.mxu0 %v9272_v56  ;;  %v9328_v56 = vld [vmem:[%s11821_s1 + $0xdd0] sm:$0xff] }
 0x197   :  { %5755 = vmatpush.bf16.msra.mxu1 %v9280_v57 }
 0x198   :  { %5769 = vmatpush.bf16.msra.mxu2 %v9288_v19  ;;  %v9311_v19 = vld [vmem:[%s11821_s1 + $0xd48] sm:$0xff] }
 0x199   :  { %5783 = vmatpush.bf16.msra.mxu3 %v9296_v31  ;;  %v9319_v31 = vld [vmem:[%s11821_s1 + $0xd88] sm:$0xff] }
 0x19a   :  { %5742 = vmatpush.bf16.msra.mxu0 %v9271_v15 }
 0x19b   :  { %5756 = vmatpush.bf16.msra.mxu1 %v9279_v60 }
 0x19c   :  { %5770 = vmatpush.bf16.msra.mxu2 %v9287_v61 }
 0x19d   :  { %5784 = vmatpush.bf16.msra.mxu3 %v9295_v34  ;;  %v9302_v34 = vld [vmem:[%s11821_s1 + $0xd00] sm:$0xff] }
 0x19e   :  { %5743 = vmatpush.bf16.msra.mxu0 %v9270_v24  ;;  %v5521_v13 = vpop.f32.mrf.mxu0 }
 0x19f   :  { %5757 = vmatpush.bf16.msra.mxu1 %v9278_v1  ;;  %v5522_v23 = vadd.f32 %v5521_v13, %v11101_v12  ;;  %v5535_v27 = vpop.f32.mrf.mxu1  ;;  %v9320_v12 = vld [vmem:[%s11821_s1 + $0xd90] sm:$0xff]  ;;  %v9341_v1 = vld [vmem:[%s11821_s1 + $0xe38] sm:$0xff] }
 0x1a0   :  { %5771 = vmatpush.bf16.msra.mxu2 %v9286_v2  ;;  %v9349_v2 = vld [vmem:[%s11821_s1 + $0xe78] sm:$0xff] }
 0x1a1   :  { %5785 = vmatpush.bf16.msra.mxu3 %v9294_v3  ;;  %5744 = vmatmul.bf16.vlgmr.msra.gmra.mxu0 %v6385_v38  ;;  %v5536_v45 = vadd.f32 %v5535_v27, %v5522_v23  ;;  %v6400_v3 = vld [vmem:[%s11822_s0 + $0xd0] sm:$0xf]  ;;  %v9354_v23 = vld [vmem:[%s11821_s1 + $0xea0] sm:$0xff]  ;;  %v9337_v27 = vld [vmem:[%s11821_s1 + $0xe18] sm:$0xff] }
 0x1a2   :  { %5792 = vmatpush.bf16.msrb.mxu0 %v9309_v5  ;;  %5758 = vmatmul.bf16.vlgmr.msra.gmra.mxu1 %v6389_v26  ;;  %v6408_v5 = vld [vmem:[%s11822_s0 + $0xd8] sm:$0xf]  ;;  %v9340_v38 = vld [vmem:[%s11821_s1 + $0xe30] sm:$0xff] }
 0x1a3   :  { %5806 = vmatpush.bf16.msrb.mxu1 %v9317_v6  ;;  %5772 = vmatmul.bf16.vlgmr.msra.gmra.mxu2 %v6393_v17  ;;  %v8877_v6 = vld [vmem:[%s11822_s0 + $0x1f4] sm:$0xf0]  ;;  %v9348_v17 = vld [vmem:[%s11821_s1 + $0xe70] sm:$0xff] }
 0x1a4   :  { %5820 = vmatpush.bf16.msrb.mxu2 %v9325_v21  ;;  %5786 = vmatmul.bf16.vlgmr.msra.gmra.mxu3 %v6397_v30  ;;  %v6409_v20 = vor.u32 %v8877_v6, %v6408_v5  ;;  %v6405_v21 = vor.u32 %v8840_v7, %v6402_v8  ;;  %v9356_v26 = vld [vmem:[%s11821_s1 + $0xeb0] sm:$0xff]  ;;  %v8843_v5 = vld [vmem:[%s11822_s0 + $0xec] sm:$0xf]  ;;  %v9389_v7 = vld [vmem:[%s11821_s1 + $0xfb8] sm:$0xff] }
 0x1a5   :  { %5834 = vmatpush.bf16.msrb.mxu3 %v9333_v25  ;;  %v6413_v25 = vor.u32 %v8841_v10, %v6410_v14  ;;  %v9364_v30 = vld [vmem:[%s11821_s1 + $0xef0] sm:$0xff]  ;;  %v6426_v6 = vld [vmem:[%s11822_s0 + $0x208] sm:$0xf0]  ;;  %v9397_v8 = vld [vmem:[%s11821_s1 + $0xff8] sm:$0xff] }
 0x1a6   :  { %5793 = vmatpush.bf16.msrb.mxu0 %v9308_v9  ;;  %v5549_v48 = vpop.f32.mrf.mxu2  ;;  %v5523_v51 = vpop.f32.mrf.mxu0  ;;  %v9339_v9 = vld [vmem:[%s11821_s1 + $0xe28] sm:$0xff] }
 0x1a7   :  { %5807 = vmatpush.bf16.msrb.mxu1 %v9316_v33  ;;  %v5550_v49 = vadd.f32 %v5549_v48, %v5536_v45  ;;  %v5563_v50 = vpop.f32.mrf.mxu3  ;;  %v5524_v11 = vadd.f32 %v5523_v51, %v11139_v4  ;;  %v5537_v55 = vpop.f32.mrf.mxu1  ;;  %v8876_v4 = vld [vmem:[%s11822_s0 + $0x1ec] sm:$0xf0]  ;;  %v9347_v33 = vld [vmem:[%s11821_s1 + $0xe68] sm:$0xff]  ;;  %v9361_v45 = vld [vmem:[%s11821_s1 + $0xed8] sm:$0xff] }
 0x1a8   :  { %5821 = vmatpush.bf16.msrb.mxu2 %v9324_v22  ;;  %v6401_v18 = vor.u32 %v8876_v4, %v6400_v3  ;;  %v9355_v22 = vld [vmem:[%s11821_s1 + $0xea8] sm:$0xff]  ;;  %v9344_v51 = vld [vmem:[%s11821_s1 + $0xe50] sm:$0xff]  ;;  %v8842_v3 = vld [vmem:[%s11822_s0 + $0xe4] sm:$0xf] }
 0x1a9   :  { %5835 = vmatpush.bf16.msrb.mxu3 %v9332_v35  ;;  %v11227_v52 = vadd.f32 %v5563_v50, %v5550_v49  ;;  %v5538_v57 = vadd.f32 %v5537_v55, %v5524_v11  ;;  %v9363_v35 = vld [vmem:[%s11821_s1 + $0xee8] sm:$0xff]  ;;  %v9336_v50 = vld [vmem:[%s11821_s1 + $0xe10] sm:$0xff]  ;;  %v6418_v4 = vld [vmem:[%s11822_s0 + $0x200] sm:$0xf0] }
 0x1aa   :  { %5794 = vmatpush.bf16.msrb.mxu0 %v9307_v36  ;;  %v9335_v55 = vld [vmem:[%s11821_s1 + $0xe08] sm:$0xff] }
 0x1ab   :  { %5808 = vmatpush.bf16.msrb.mxu1 %v9315_v37 }
 0x1ac   :  { %5822 = vmatpush.bf16.msrb.mxu2 %v9323_v39  ;;  %v9338_v39 = vld [vmem:[%s11821_s1 + $0xe20] sm:$0xff] }
 0x1ad   :  { %5836 = vmatpush.bf16.msrb.mxu3 %v9331_v40  ;;  %v9346_v40 = vld [vmem:[%s11821_s1 + $0xe60] sm:$0xff] }
 0x1ae   :  { %5795 = vmatpush.bf16.msrb.mxu0 %v9306_v41  ;;  %v5551_v15 = vpop.f32.mrf.mxu2  ;;  %v9362_v41 = vld [vmem:[%s11821_s1 + $0xee0] sm:$0xff] }
 0x1af   :  { %5809 = vmatpush.bf16.msrb.mxu1 %v9314_v42  ;;  %v5552_v60 = vadd.f32 %v5551_v15, %v5538_v57  ;;  %v5565_v61 = vpop.f32.mrf.mxu3  ;;  %v9359_v57 = vld [vmem:[%s11821_s1 + $0xec8] sm:$0xff]  ;;  %v9342_v15 = vld [vmem:[%s11821_s1 + $0xe40] sm:$0xff] }
 0x1b0   :  { %5823 = vmatpush.bf16.msrb.mxu2 %v9322_v43  ;;  %v9345_v43 = vld [vmem:[%s11821_s1 + $0xe58] sm:$0xff] }
 0x1b1   :  { %5837 = vmatpush.bf16.msrb.mxu3 %v9330_v44  ;;  %v11265_v24 = vadd.f32 %v5565_v61, %v5552_v60  ;;  %v9353_v44 = vld [vmem:[%s11821_s1 + $0xe98] sm:$0xff]  ;;  %v9350_v60 = vld [vmem:[%s11821_s1 + $0xe80] sm:$0xff] }
 0x1b2   :  { %5796 = vmatpush.bf16.msrb.mxu0 %v9305_v46  ;;  %v9358_v61 = vld [vmem:[%s11821_s1 + $0xec0] sm:$0xff] }
 0x1b3   :  { %5810 = vmatpush.bf16.msrb.mxu1 %v9313_v47 }
 0x1b4   :  { %5824 = vmatpush.bf16.msrb.mxu2 %v9321_v29 }
 0x1b5   :  { %5838 = vmatpush.bf16.msrb.mxu3 %v9329_v32 }
 0x1b6   :  { %5797 = vmatpush.bf16.msrb.mxu0 %v9304_v53  ;;  %v9360_v53 = vld [vmem:[%s11821_s1 + $0xed0] sm:$0xff] }
 0x1b7   :  { %5811 = vmatpush.bf16.msrb.mxu1 %v9312_v54 }
 0x1b8   :  { %5825 = vmatpush.bf16.msrb.mxu2 %v9320_v12  ;;  %v9343_v12 = vld [vmem:[%s11821_s1 + $0xe48] sm:$0xff] }
 0x1b9   :  { %5839 = vmatpush.bf16.msrb.mxu3 %v9328_v56  ;;  %v9351_v56 = vld [vmem:[%s11821_s1 + $0xe88] sm:$0xff] }
 0x1ba   :  { %5798 = vmatpush.bf16.msrb.mxu0 %v9303_v58 }
 0x1bb   :  { %5812 = vmatpush.bf16.msrb.mxu1 %v9311_v19 }
 0x1bc   :  { %5826 = vmatpush.bf16.msrb.mxu2 %v9319_v31 }
 0x1bd   :  { %5840 = vmatpush.bf16.msrb.mxu3 %v9327_v59  ;;  %v9334_v59 = vld [vmem:[%s11821_s1 + $0xe00] sm:$0xff] }
 0x1be   :  { %5799 = vmatpush.bf16.msrb.mxu0 %v9302_v34  ;;  %v5577_v36 = vpop.f32.mrf.mxu0 }
 0x1bf   :  { %5813 = vmatpush.bf16.msrb.mxu1 %v9310_v62  ;;  %v5578_v37 = vadd.f32 %v5577_v36, %v11227_v52  ;;  %v5591_v13 = vpop.f32.mrf.mxu1  ;;  %v9352_v52 = vld [vmem:[%s11821_s1 + $0xe90] sm:$0xff]  ;;  %v9373_v62 = vld [vmem:[%s11821_s1 + $0xf38] sm:$0xff] }
 0x1c0   :  { %5827 = vmatpush.bf16.msrb.mxu2 %v9318_v63  ;;  %v9381_v63 = vld [vmem:[%s11821_s1 + $0xf78] sm:$0xff] }
 0x1c1   :  { %5841 = vmatpush.bf16.msrb.mxu3 %v9326_v0  ;;  %5800 = vmatmul.bf16.vlgmr.msrb.gmra.mxu0 %v6401_v18  ;;  %v5592_v42 = vadd.f32 %v5591_v13, %v5578_v37  ;;  %v6416_v0 = vld [vmem:[%s11822_s0 + $0xe0] sm:$0xf]  ;;  %v9372_v18 = vld [vmem:[%s11821_s1 + $0xf30] sm:$0xff]  ;;  %v9369_v13 = vld [vmem:[%s11821_s1 + $0xf18] sm:$0xff] }
 0x1c2   :  { %5848 = vmatpush.bf16.msra.mxu0 %v9341_v1  ;;  %5814 = vmatmul.bf16.vlgmr.msrb.gmra.mxu1 %v6405_v21  ;;  %v6424_v1 = vld [vmem:[%s11822_s0 + $0xe8] sm:$0xf]  ;;  %v9388_v21 = vld [vmem:[%s11821_s1 + $0xfb0] sm:$0xff]  ;;  %v9386_v37 = vld [vmem:[%s11821_s1 + $0xfa0] sm:$0xff] }
 0x1c3   :  { %5862 = vmatpush.bf16.msra.mxu1 %v9349_v2  ;;  %5828 = vmatmul.bf16.vlgmr.msrb.gmra.mxu2 %v6409_v20  ;;  %v8879_v2 = vld [vmem:[%s11822_s0 + $0x204] sm:$0xf0]  ;;  %v9380_v20 = vld [vmem:[%s11821_s1 + $0xf70] sm:$0xff] }
 0x1c4   :  { %5876 = vmatpush.bf16.msra.mxu2 %v9357_v16  ;;  %5842 = vmatmul.bf16.vlgmr.msrb.gmra.mxu3 %v6413_v25  ;;  %v6425_v14 = vor.u32 %v8879_v2, %v6424_v1  ;;  %v6421_v16 = vor.u32 %v8842_v3, %v6418_v4  ;;  %v9396_v25 = vld [vmem:[%s11821_s1 + $0xff0] sm:$0xff] }
 0x1c5   :  { %5890 = vmatpush.bf16.msra.mxu3 %v9365_v28  ;;  %v6429_v28 = vor.u32 %v8843_v5, %v6426_v6  ;;  %v9404_v2 = vld [vmem:[%s11821_s1 + $0x1030] sm:$0xff]  ;;  %v9403_v6 = vld [vmem:[%s11821_s1 + $0x1028] sm:$0xff] }
 0x1c6   :  { %5849 = vmatpush.bf16.msra.mxu0 %v9340_v38  ;;  %v5605_v46 = vpop.f32.mrf.mxu2  ;;  %v5579_v32 = vpop.f32.mrf.mxu0  ;;  %v9371_v38 = vld [vmem:[%s11821_s1 + $0xf28] sm:$0xff]  ;;  %v9412_v3 = vld [vmem:[%s11821_s1 + $0x1070] sm:$0xff] }
 0x1c7   :  { %5863 = vmatpush.bf16.msra.mxu1 %v9348_v17  ;;  %v5606_v47 = vadd.f32 %v5605_v46, %v5592_v42  ;;  %v5619_v29 = vpop.f32.mrf.mxu3  ;;  %v5580_v48 = vadd.f32 %v5579_v32, %v11265_v24  ;;  %v5593_v11 = vpop.f32.mrf.mxu1  ;;  %v8878_v24 = vld [vmem:[%s11822_s0 + $0x1fc] sm:$0xf0]  ;;  %v9379_v17 = vld [vmem:[%s11821_s1 + $0xf68] sm:$0xff]  ;;  %v9393_v42 = vld [vmem:[%s11821_s1 + $0xfd8] sm:$0xff] }
 0x1c8   :  { %5877 = vmatpush.bf16.msra.mxu2 %v9356_v26  ;;  %v6417_v10 = vor.u32 %v8878_v24, %v6416_v0  ;;  %v9387_v26 = vld [vmem:[%s11821_s1 + $0xfa8] sm:$0xff]  ;;  %v9368_v46 = vld [vmem:[%s11821_s1 + $0xf10] sm:$0xff] }
 0x1c9   :  { %5891 = vmatpush.bf16.msra.mxu3 %v9364_v30  ;;  %v11353_v49 = vadd.f32 %v5619_v29, %v5606_v47  ;;  %v5594_v54 = vadd.f32 %v5593_v11, %v5580_v48  ;;  %v9395_v30 = vld [vmem:[%s11821_s1 + $0xfe8] sm:$0xff]  ;;  %v9376_v47 = vld [vmem:[%s11821_s1 + $0xf50] sm:$0xff]  ;;  %v9366_v11 = vld [vmem:[%s11821_s1 + $0xf00] sm:$0xff] }
 0x1ca   :  { %5850 = vmatpush.bf16.msra.mxu0 %v9339_v9  ;;  %v9384_v29 = vld [vmem:[%s11821_s1 + $0xf90] sm:$0xff]  ;;  %v9367_v48 = vld [vmem:[%s11821_s1 + $0xf08] sm:$0xff] }
 0x1cb   :  { %5864 = vmatpush.bf16.msra.mxu1 %v9347_v33  ;;  %v9392_v32 = vld [vmem:[%s11821_s1 + $0xfd0] sm:$0xff] }
 0x1cc   :  { %5878 = vmatpush.bf16.msra.mxu2 %v9355_v22  ;;  %v9370_v22 = vld [vmem:[%s11821_s1 + $0xf20] sm:$0xff]  ;;  %v9420_v4 = vld [vmem:[%s11821_s1 + $0x10b0] sm:$0xff] }
 0x1cd   :  { %5892 = vmatpush.bf16.msra.mxu3 %v9363_v35  ;;  %v9378_v35 = vld [vmem:[%s11821_s1 + $0xf60] sm:$0xff]  ;;  %v9428_v5 = vld [vmem:[%s11821_s1 + $0x10f0] sm:$0xff] }
 0x1ce   :  { %5851 = vmatpush.bf16.msra.mxu0 %v9338_v39  ;;  %v5607_v58 = vpop.f32.mrf.mxu2  ;;  %v9394_v39 = vld [vmem:[%s11821_s1 + $0xfe0] sm:$0xff] }
 0x1cf   :  { %5865 = vmatpush.bf16.msra.mxu1 %v9346_v40  ;;  %v5608_v19 = vadd.f32 %v5607_v58, %v5594_v54  ;;  %v5621_v31 = vpop.f32.mrf.mxu3  ;;  %v9390_v54 = vld [vmem:[%s11821_s1 + $0xfc0] sm:$0xff]  ;;  %v6440_v58 = vld [vmem:[%s11822_s0 + $0xf8] sm:$0xf] }
 0x1d0   :  { %5879 = vmatpush.bf16.msra.mxu2 %v9354_v23  ;;  %v9377_v23 = vld [vmem:[%s11821_s1 + $0xf58] sm:$0xff] }
 0x1d1   :  { %5893 = vmatpush.bf16.msra.mxu3 %v9362_v41  ;;  %v11391_v34 = vadd.f32 %v5621_v31, %v5608_v19  ;;  %v9385_v41 = vld [vmem:[%s11821_s1 + $0xf98] sm:$0xff]  ;;  %v8844_v31 = vld [vmem:[%s11822_s0 + $0xf4] sm:$0xf] }
 0x1d2   :  { %5852 = vmatpush.bf16.msra.mxu0 %v9337_v27  ;;  %v8881_v19 = vld [vmem:[%s11822_s0 + $0x214] sm:$0xf0] }
 0x1d3   :  { %5866 = vmatpush.bf16.msra.mxu1 %v9345_v43  ;;  %v6441_v0 = vor.u32 %v8881_v19, %v6440_v58  ;;  %v9451_v58 = vld [vmem:[%s11821_s1 + $0x11a8] sm:$0xff] }
 0x1d4   :  { %5880 = vmatpush.bf16.msra.mxu2 %v9353_v44  ;;  %v9459_v19 = vld [vmem:[%s11821_s1 + $0x11e8] sm:$0xff] }
 0x1d5   :  { %5894 = vmatpush.bf16.msra.mxu3 %v9361_v45 }
 0x1d6   :  { %5853 = vmatpush.bf16.msra.mxu0 %v9336_v50  ;;  %v9383_v50 = vld [vmem:[%s11821_s1 + $0xf88] sm:$0xff] }
 0x1d7   :  { %5867 = vmatpush.bf16.msra.mxu1 %v9344_v51  ;;  %v9391_v51 = vld [vmem:[%s11821_s1 + $0xfc8] sm:$0xff] }
 0x1d8   :  { %5881 = vmatpush.bf16.msra.mxu2 %v9352_v52  ;;  %v9374_v52 = vld [vmem:[%s11821_s1 + $0xf40] sm:$0xff] }
 0x1d9   :  { %5895 = vmatpush.bf16.msra.mxu3 %v9360_v53  ;;  %v9382_v53 = vld [vmem:[%s11821_s1 + $0xf80] sm:$0xff] }
 0x1da   :  { %5854 = vmatpush.bf16.msra.mxu0 %v9335_v55  ;;  %v9405_v55 = vld [vmem:[%s11821_s1 + $0x1038] sm:$0xff] }
 0x1db   :  { %5868 = vmatpush.bf16.msra.mxu1 %v9343_v12  ;;  %v9413_v12 = vld [vmem:[%s11821_s1 + $0x1078] sm:$0xff] }
 0x1dc   :  { %5882 = vmatpush.bf16.msra.mxu2 %v9351_v56  ;;  %v6432_v56 = vld [vmem:[%s11822_s0 + $0xf0] sm:$0xf] }
 0x1dd   :  { %5896 = vmatpush.bf16.msra.mxu3 %v9359_v57  ;;  %v8880_v57 = vld [vmem:[%s11822_s0 + $0x20c] sm:$0xf0] }
 0x1de   :  { %5855 = vmatpush.bf16.msra.mxu0 %v9334_v59  ;;  %v5633_v9 = vpop.f32.mrf.mxu0  ;;  %v6434_v59 = vld [vmem:[%s11822_s0 + $0x210] sm:$0xf0] }
 0x1df   :  { %5869 = vmatpush.bf16.msra.mxu1 %v9342_v15  ;;  %v5634_v33 = vadd.f32 %v5633_v9, %v11353_v49  ;;  %v5647_v36 = vpop.f32.mrf.mxu1  ;;  %v9375_v49 = vld [vmem:[%s11821_s1 + $0xf48] sm:$0xff]  ;;  %v8845_v15 = vld [vmem:[%s11822_s0 + $0xfc] sm:$0xf]  ;;  %v6437_v24 = vor.u32 %v8844_v31, %v6434_v59  ;;  %v9424_v9 = vld [vmem:[%s11821_s1 + $0x10d0] sm:$0xff] }
 0x1e0   :  { %5883 = vmatpush.bf16.msra.mxu2 %v9350_v60  ;;  %v6442_v60 = vld [vmem:[%s11822_s0 + $0x218] sm:$0xf0]  ;;  %v9434_v31 = vld [vmem:[%s11821_s1 + $0x1120] sm:$0xff] }
 0x1e1   :  { %5897 = vmatpush.bf16.msra.mxu3 %v9358_v61  ;;  %5856 = vmatmul.bf16.vlgmr.msra.gmra.mxu0 %v6417_v10  ;;  %v5648_v40 = vadd.f32 %v5647_v36, %v5634_v33  ;;  %v9421_v61 = vld [vmem:[%s11821_s1 + $0x10b8] sm:$0xff]  ;;  %v6445_v1 = vor.u32 %v8845_v15, %v6442_v60  ;;  %v9427_v10 = vld [vmem:[%s11821_s1 + $0x10e8] sm:$0xff]  ;;  %v9442_v59 = vld [vmem:[%s11821_s1 + $0x1160] sm:$0xff] }
 0x1e2   :  { %5904 = vmatpush.bf16.msrb.mxu0 %v9373_v62  ;;  %5870 = vmatmul.bf16.vlgmr.msra.gmra.mxu1 %v6421_v16  ;;  %v9429_v62 = vld [vmem:[%s11821_s1 + $0x10f8] sm:$0xff]  ;;  %v9410_v16 = vld [vmem:[%s11821_s1 + $0x1060] sm:$0xff]  ;;  %v9399_v33 = vld [vmem:[%s11821_s1 + $0x1008] sm:$0xff] }
 0x1e3   :  { %5918 = vmatpush.bf16.msrb.mxu1 %v9381_v63  ;;  %5884 = vmatmul.bf16.vlgmr.msra.gmra.mxu2 %v6425_v14  ;;  %v6433_v63 = vor.u32 %v8880_v57, %v6432_v56  ;;  %v9402_v14 = vld [vmem:[%s11821_s1 + $0x1020] sm:$0xff]  ;;  %v9423_v36 = vld [vmem:[%s11821_s1 + $0x10c8] sm:$0xff] }
 0x1e4   :  { %5932 = vmatpush.bf16.msrb.mxu2 %v9389_v7  ;;  %5898 = vmatmul.bf16.vlgmr.msra.gmra.mxu3 %v6429_v28  ;;  %v9411_v7 = vld [vmem:[%s11821_s1 + $0x1068] sm:$0xff]  ;;  %v9418_v28 = vld [vmem:[%s11821_s1 + $0x10a0] sm:$0xff] }
 0x1e5   :  { %5946 = vmatpush.bf16.msrb.mxu3 %v9397_v8  ;;  %v9419_v8 = vld [vmem:[%s11821_s1 + $0x10a8] sm:$0xff]  ;;  %v9450_v15 = vld [vmem:[%s11821_s1 + $0x11a0] sm:$0xff] }
 0x1e6   :  { %5905 = vmatpush.bf16.msrb.mxu0 %v9372_v18  ;;  %v5661_v27 = vpop.f32.mrf.mxu2  ;;  %v9426_v18 = vld [vmem:[%s11821_s1 + $0x10e0] sm:$0xff]  ;;  %v9435_v56 = vld [vmem:[%s11821_s1 + $0x1128] sm:$0xff] }
 0x1e7   :  { %5919 = vmatpush.bf16.msrb.mxu1 %v9380_v20  ;;  %v5662_v43 = vadd.f32 %v5661_v27, %v5648_v40  ;;  %v5675_v44 = vpop.f32.mrf.mxu3  ;;  %v9401_v20 = vld [vmem:[%s11821_s1 + $0x1018] sm:$0xff]  ;;  %v9414_v40 = vld [vmem:[%s11821_s1 + $0x1080] sm:$0xff]  ;;  %v9443_v57 = vld [vmem:[%s11821_s1 + $0x1168] sm:$0xff] }
 0x1e8   :  { %5933 = vmatpush.bf16.msrb.mxu2 %v9388_v21  ;;  %v9409_v21 = vld [vmem:[%s11821_s1 + $0x1058] sm:$0xff]  ;;  %v8882_v27 = vld [vmem:[%s11822_s0 + $0x21c] sm:$0xf0] }
 0x1e9   :  { %5947 = vmatpush.bf16.msrb.mxu3 %v9396_v25  ;;  %v11478_v45 = vadd.f32 %v5675_v44, %v5662_v43  ;;  %v9417_v25 = vld [vmem:[%s11821_s1 + $0x1098] sm:$0xff]  ;;  %v6456_v43 = vld [vmem:[%s11822_s0 + $0x108] sm:$0xf]  ;;  %v9458_v60 = vld [vmem:[%s11821_s1 + $0x11e0] sm:$0xff] }
 0x1ea   :  { %5906 = vmatpush.bf16.msrb.mxu0 %v9371_v38  ;;  %v9425_v38 = vld [vmem:[%s11821_s1 + $0x10d8] sm:$0xff]  ;;  %v8883_v44 = vld [vmem:[%s11822_s0 + $0x224] sm:$0xf0] }
 0x1eb   :  { %5920 = vmatpush.bf16.msrb.mxu1 %v9379_v17  ;;  %v9400_v17 = vld [vmem:[%s11821_s1 + $0x1010] sm:$0xff] }
 0x1ec   :  { %5934 = vmatpush.bf16.msrb.mxu2 %v9387_v26  ;;  %v9408_v26 = vld [vmem:[%s11821_s1 + $0x1050] sm:$0xff] }
 0x1ed   :  { %5948 = vmatpush.bf16.msrb.mxu3 %v9395_v30  ;;  %v9416_v30 = vld [vmem:[%s11821_s1 + $0x1090] sm:$0xff] }
 0x1ee   :  { %5907 = vmatpush.bf16.msrb.mxu0 %v9370_v22  ;;  %v9407_v22 = vld [vmem:[%s11821_s1 + $0x1048] sm:$0xff] }
 0x1ef   :  { %5921 = vmatpush.bf16.msrb.mxu1 %v9378_v35  ;;  %v9415_v35 = vld [vmem:[%s11821_s1 + $0x1088] sm:$0xff] }
 0x1f0   :  { %5935 = vmatpush.bf16.msrb.mxu2 %v9386_v37  ;;  %v9398_v37 = vld [vmem:[%s11821_s1 + $0x1000] sm:$0xff] }
 0x1f1   :  { %5949 = vmatpush.bf16.msrb.mxu3 %v9394_v39  ;;  %v9406_v39 = vld [vmem:[%s11821_s1 + $0x1040] sm:$0xff] }
 0x1f2   :  { %5908 = vmatpush.bf16.msrb.mxu0 %v9369_v13  ;;  %v9422_v13 = vld [vmem:[%s11821_s1 + $0x10c0] sm:$0xff] }
 0x1f3   :  { %5922 = vmatpush.bf16.msrb.mxu1 %v9377_v23  ;;  %v9437_v23 = vld [vmem:[%s11821_s1 + $0x1138] sm:$0xff] }
 0x1f4   :  { %5936 = vmatpush.bf16.msrb.mxu2 %v9385_v41  ;;  %v9445_v41 = vld [vmem:[%s11821_s1 + $0x1178] sm:$0xff] }
 0x1f5   :  { %5950 = vmatpush.bf16.msrb.mxu3 %v9393_v42  ;;  %v6448_v42 = vld [vmem:[%s11822_s0 + $0x100] sm:$0xf] }
 0x1f6   :  { %5909 = vmatpush.bf16.msrb.mxu0 %v9368_v46  ;;  %v8846_v46 = vld [vmem:[%s11822_s0 + $0x104] sm:$0xf] }
 0x1f7   :  { %5923 = vmatpush.bf16.msrb.mxu1 %v9376_v47  ;;  %v6450_v47 = vld [vmem:[%s11822_s0 + $0x220] sm:$0xf0] }
 0x1f8   :  { %5937 = vmatpush.bf16.msrb.mxu2 %v9384_v29  ;;  %v8847_v29 = vld [vmem:[%s11822_s0 + $0x10c] sm:$0xf] }
 0x1f9   :  { %5951 = vmatpush.bf16.msrb.mxu3 %v9392_v32  ;;  %v6458_v32 = vld [vmem:[%s11822_s0 + $0x228] sm:$0xf0] }
 0x1fa   :  { %5910 = vmatpush.bf16.msrb.mxu0 %v9367_v48  ;;  %v9453_v48 = vld [vmem:[%s11821_s1 + $0x11b8] sm:$0xff] }
 0x1fb   :  { %5924 = vmatpush.bf16.msrb.mxu1 %v9375_v49  ;;  %v9461_v49 = vld [vmem:[%s11821_s1 + $0x11f8] sm:$0xff] }
 0x1fc   :  { %5938 = vmatpush.bf16.msrb.mxu2 %v9383_v50  ;;  %v6449_v50 = vor.u32 %v8882_v27, %v6448_v42 }
 0x1fd   :  { %5952 = vmatpush.bf16.msrb.mxu3 %v9391_v51  ;;  %v6457_v51 = vor.u32 %v8883_v44, %v6456_v43 }
 0x1fe   :  { %5911 = vmatpush.bf16.msrb.mxu0 %v9366_v11  ;;  %v6453_v11 = vor.u32 %v8846_v46, %v6450_v47 }
 0x1ff   :  { %5925 = vmatpush.bf16.msrb.mxu1 %v9374_v52  ;;  %v6461_v52 = vor.u32 %v8847_v29, %v6458_v32 }
 0x200   :  { %5939 = vmatpush.bf16.msrb.mxu2 %v9382_v53  ;;  %v9436_v53 = vld [vmem:[%s11821_s1 + $0x1130] sm:$0xff] }
 0x201   :  { %5953 = vmatpush.bf16.msrb.mxu3 %v9390_v54  ;;  %5912 = vmatmul.bf16.vlgmr.msrb.gmra.mxu0 %v6433_v63  ;;  %v9444_v54 = vld [vmem:[%s11821_s1 + $0x1170] sm:$0xff]  ;;  %v9449_v63 = vld [vmem:[%s11821_s1 + $0x1198] sm:$0xff] }
 0x202   :  { %5960 = vmatpush.bf16.msra.mxu0 %v9405_v55  ;;  %5926 = vmatmul.bf16.vlgmr.msrb.gmra.mxu1 %v6437_v24  ;;  %v9452_v55 = vld [vmem:[%s11821_s1 + $0x11b0] sm:$0xff] }
 0x203   :  { %5974 = vmatpush.bf16.msra.mxu1 %v9413_v12  ;;  %5940 = vmatmul.bf16.vlgmr.msrb.gmra.mxu2 %v6441_v0  ;;  %v9460_v12 = vld [vmem:[%s11821_s1 + $0x11f0] sm:$0xff]  ;;  %v9457_v0 = vld [vmem:[%s11821_s1 + $0x11d8] sm:$0xff] }
 0x204   :  { %5988 = vmatpush.bf16.msra.mxu2 %v9421_v61  ;;  %5954 = vmatmul.bf16.vlgmr.msrb.gmra.mxu3 %v6445_v1  ;;  %v9433_v61 = vld [vmem:[%s11821_s1 + $0x1118] sm:$0xff]  ;;  %v9432_v24 = vld [vmem:[%s11821_s1 + $0x1110] sm:$0xff] }
 0x205   :  { %6002 = vmatpush.bf16.msra.mxu3 %v9429_v62  ;;  %v9441_v62 = vld [vmem:[%s11821_s1 + $0x1158] sm:$0xff]  ;;  %v9440_v1 = vld [vmem:[%s11821_s1 + $0x1150] sm:$0xff] }
 0x206   :  { %5961 = vmatpush.bf16.msra.mxu0 %v9404_v2  ;;  %v9448_v2 = vld [vmem:[%s11821_s1 + $0x1190] sm:$0xff] }
 0x207   :  { %5975 = vmatpush.bf16.msra.mxu1 %v9412_v3  ;;  %v9456_v3 = vld [vmem:[%s11821_s1 + $0x11d0] sm:$0xff] }
 0x208   :  { %5989 = vmatpush.bf16.msra.mxu2 %v9420_v4  ;;  %v9431_v4 = vld [vmem:[%s11821_s1 + $0x1108] sm:$0xff] }
 0x209   :  { %6003 = vmatpush.bf16.msra.mxu3 %v9428_v5  ;;  %v9439_v5 = vld [vmem:[%s11821_s1 + $0x1148] sm:$0xff] }
 0x20a   :  { %5962 = vmatpush.bf16.msra.mxu0 %v9403_v6  ;;  %v9447_v6 = vld [vmem:[%s11821_s1 + $0x1188] sm:$0xff] }
 0x20b   :  { %5976 = vmatpush.bf16.msra.mxu1 %v9411_v7  ;;  %v9455_v7 = vld [vmem:[%s11821_s1 + $0x11c8] sm:$0xff] }
 0x20c   :  { %5990 = vmatpush.bf16.msra.mxu2 %v9419_v8  ;;  %v9430_v8 = vld [vmem:[%s11821_s1 + $0x1100] sm:$0xff] }
 0x20d   :  { %6004 = vmatpush.bf16.msra.mxu3 %v9427_v10  ;;  %v9438_v10 = vld [vmem:[%s11821_s1 + $0x1140] sm:$0xff] }
 0x20e   :  { %5963 = vmatpush.bf16.msra.mxu0 %v9402_v14  ;;  %v9446_v14 = vld [vmem:[%s11821_s1 + $0x1180] sm:$0xff] }
 0x20f   :  { %5977 = vmatpush.bf16.msra.mxu1 %v9410_v16  ;;  %v9454_v16 = vld [vmem:[%s11821_s1 + $0x11c0] sm:$0xff] }
 0x210   :  { %5991 = vmatpush.bf16.msra.mxu2 %v9418_v28  ;;  %v6464_v28 = vld [vmem:[%s11822_s0 + $0x110] sm:$0xf] }
 0x211   :  { %6005 = vmatpush.bf16.msra.mxu3 %v9426_v18  ;;  %v8884_v18 = vld [vmem:[%s11822_s0 + $0x22c] sm:$0xf0] }
 0x212   :  { %5964 = vmatpush.bf16.msra.mxu0 %v9401_v20  ;;  %v8848_v20 = vld [vmem:[%s11822_s0 + $0x114] sm:$0xf] }
 0x213   :  { %5978 = vmatpush.bf16.msra.mxu1 %v9409_v21  ;;  %v6466_v21 = vld [vmem:[%s11822_s0 + $0x230] sm:$0xf0] }
 0x214   :  { %5992 = vmatpush.bf16.msra.mxu2 %v9417_v25  ;;  %v6472_v25 = vld [vmem:[%s11822_s0 + $0x118] sm:$0xf] }
 0x215   :  { %6006 = vmatpush.bf16.msra.mxu3 %v9425_v38  ;;  %v8885_v38 = vld [vmem:[%s11822_s0 + $0x234] sm:$0xf0] }
 0x216   :  { %5965 = vmatpush.bf16.msra.mxu0 %v9400_v17  ;;  %v8849_v17 = vld [vmem:[%s11822_s0 + $0x11c] sm:$0xf] }
 0x217   :  { %5979 = vmatpush.bf16.msra.mxu1 %v9408_v26  ;;  %v6474_v26 = vld [vmem:[%s11822_s0 + $0x238] sm:$0xf0] }
 0x218   :  { %5993 = vmatpush.bf16.msra.mxu2 %v9416_v30  ;;  %v6465_v30 = vor.u32 %v8884_v18, %v6464_v28  ;;  %v9469_v28 = vld [vmem:[%s11825_s3 + $0x38] sm:$0xff] }
 0x219   :  { %6007 = vmatpush.bf16.msra.mxu3 %v9424_v9  ;;  %v6469_v9 = vor.u32 %v8848_v20, %v6466_v21  ;;  %v9468_v20 = vld [vmem:[%s11825_s3 + $0x30] sm:$0xff] }
 0x21a   :  { %5966 = vmatpush.bf16.msra.mxu0 %v9399_v33  ;;  %v6473_v33 = vor.u32 %v8885_v38, %v6472_v25 }
 0x21b   :  { %5980 = vmatpush.bf16.msra.mxu1 %v9407_v22  ;;  %v6477_v22 = vor.u32 %v8849_v17, %v6474_v26 }
 0x21c   :  { %5994 = vmatpush.bf16.msra.mxu2 %v9415_v35  ;;  %v5635_v35 = vpop.f32.mrf.mxu0 }
 0x21d   :  { %6008 = vmatpush.bf16.msra.mxu3 %v9423_v36  ;;  %v5649_v36 = vpop.f32.mrf.mxu1 }
 0x21e   :  { %5967 = vmatpush.bf16.msra.mxu0 %v9398_v37  ;;  %v5663_v37 = vpop.f32.mrf.mxu2 }
 0x21f   :  { %5981 = vmatpush.bf16.msra.mxu1 %v9406_v39  ;;  %v5677_v39 = vpop.f32.mrf.mxu3 }
 0x220   :  { %5995 = vmatpush.bf16.msra.mxu2 %v9414_v40 }
 0x221   :  { %6009 = vmatpush.bf16.msra.mxu3 %v9422_v13  ;;  %5968 = vmatmul.bf16.vlgmr.msra.gmra.mxu0 %v6449_v50  ;;  %v5636_v50 = vadd.f32 %v5635_v35, %v11391_v34 }
 0x222   :  { %6016 = vmatpush.bf16.msrb.mxu0 %v9437_v23  ;;  %5982 = vmatmul.bf16.vlgmr.msra.gmra.mxu1 %v6453_v11 }
 0x223   :  { %6030 = vmatpush.bf16.msrb.mxu1 %v9445_v41  ;;  %5996 = vmatmul.bf16.vlgmr.msra.gmra.mxu2 %v6457_v51 }
 0x224   :  { %6044 = vmatpush.bf16.msrb.mxu2 %v9453_v48  ;;  %6010 = vmatmul.bf16.vlgmr.msra.gmra.mxu3 %v6461_v52  ;;  %v5689_v40 = vpop.f32.mrf.mxu0 }
 0x225   :  { %6058 = vmatpush.bf16.msrb.mxu3 %v9461_v49  ;;  %v5703_v13 = vpop.f32.mrf.mxu1 }
 0x226   :  { %6017 = vmatpush.bf16.msrb.mxu0 %v9436_v53  ;;  %v5717_v23 = vpop.f32.mrf.mxu2  ;;  %v5650_v53 = vadd.f32 %v5649_v36, %v5636_v50  ;;  %v9467_v36 = vld [vmem:[%s11825_s3 + $0x28] sm:$0xff] }
 0x227   :  { %6031 = vmatpush.bf16.msrb.mxu1 %v9444_v54  ;;  %v5731_v41 = vpop.f32.mrf.mxu3 }
 0x228   :  { %6045 = vmatpush.bf16.msrb.mxu2 %v9452_v55  ;;  %v5664_v55 = vadd.f32 %v5663_v37, %v5650_v53 }
 0x229   :  { %6059 = vmatpush.bf16.msrb.mxu3 %v9460_v12  ;;  %v5690_v12 = vadd.f32 %v5689_v40, %v11478_v45 }
 0x22a   :  { %6018 = vmatpush.bf16.msrb.mxu0 %v9435_v56 }
 0x22b   :  { %6032 = vmatpush.bf16.msrb.mxu1 %v9443_v57 }
 0x22c   :  { %6046 = vmatpush.bf16.msrb.mxu2 %v9451_v58  ;;  %v5691_v42 = vpop.f32.mrf.mxu0  ;;  %v5678_v58 = vadd.f32 %v5677_v39, %v5664_v55 }
 0x22d   :  { %6060 = vmatpush.bf16.msrb.mxu3 %v9459_v19  ;;  %v5705_v27 = vpop.f32.mrf.mxu1  ;;  %v5704_v19 = vadd.f32 %v5703_v13, %v5690_v12 }
 0x22e   :  { %6019 = vmatpush.bf16.msrb.mxu0 %v9434_v31  ;;  %v5719_v43 = vpop.f32.mrf.mxu2  ;;  %v5692_v31 = vadd.f32 %v5691_v42, %v5678_v58  ;;  %v9462_v58 = vld [vmem:[%s11825_s3] sm:$0xff] }
 0x22f   :  { %6033 = vmatpush.bf16.msrb.mxu1 %v9442_v59  ;;  %v5733_v44 = vpop.f32.mrf.mxu3 }
 0x230   :  { %6047 = vmatpush.bf16.msrb.mxu2 %v9450_v15  ;;  %v5718_v15 = vadd.f32 %v5717_v23, %v5704_v19 }
 0x231   :  { %6061 = vmatpush.bf16.msrb.mxu3 %v9458_v60 }
 0x232   :  { %6020 = vmatpush.bf16.msrb.mxu0 %v9433_v61  ;;  %v5706_v61 = vadd.f32 %v5705_v27, %v5692_v31 }
 0x233   :  { %6034 = vmatpush.bf16.msrb.mxu1 %v9441_v62  ;;  %v5732_v62 = vadd.f32 %v5731_v41, %v5718_v15  ;;  %v9466_v41 = vld [vmem:[%s11825_s3 + $0x20] sm:$0xff] }
 0x234   :  { %6048 = vmatpush.bf16.msrb.mxu2 %v9449_v63  ;;  %v5745_v46 = vpop.f32.mrf.mxu0  ;;  %v5720_v63 = vadd.f32 %v5719_v43, %v5706_v61 }
 0x235   :  { %6062 = vmatpush.bf16.msrb.mxu3 %v9457_v0  ;;  %v5759_v47 = vpop.f32.mrf.mxu1 }
 0x236   :  { %6021 = vmatpush.bf16.msrb.mxu0 %v9432_v24  ;;  %v5773_v29 = vpop.f32.mrf.mxu2  ;;  %v5746_v24 = vadd.f32 %v5745_v46, %v5732_v62  ;;  %v9465_v46 = vld [vmem:[%s11825_s3 + $0x18] sm:$0xff] }
 0x237   :  { %6035 = vmatpush.bf16.msrb.mxu1 %v9440_v1  ;;  %v5787_v32 = vpop.f32.mrf.mxu3 }
 0x238   :  { %6049 = vmatpush.bf16.msrb.mxu2 %v9448_v2  ;;  %v5734_v2 = vadd.f32 %v5733_v44, %v5720_v63 }
 0x239   :  { %6063 = vmatpush.bf16.msrb.mxu3 %v9456_v3 }
 0x23a   :  { %6022 = vmatpush.bf16.msrb.mxu0 %v9431_v4  ;;  %v5760_v4 = vadd.f32 %v5759_v47, %v5746_v24 }
 0x23b   :  { %6036 = vmatpush.bf16.msrb.mxu1 %v9439_v5 }
 0x23c   :  { %6050 = vmatpush.bf16.msrb.mxu2 %v9447_v6  ;;  %v5747_v48 = vpop.f32.mrf.mxu0  ;;  %v5774_v45 = vadd.f32 %v5773_v29, %v5760_v4 }
 0x23d   :  { %6064 = vmatpush.bf16.msrb.mxu3 %v9455_v7  ;;  %v5761_v49 = vpop.f32.mrf.mxu1  ;;  %v5748_v5 = vadd.f32 %v5747_v48, %v5734_v2  ;;  %v9464_v48 = vld [vmem:[%s11825_s3 + $0x10] sm:$0xff] }
 0x23e   :  { %6023 = vmatpush.bf16.msrb.mxu0 %v9430_v8  ;;  %v5775_v51 = vpop.f32.mrf.mxu2 }
 0x23f   :  { %6037 = vmatpush.bf16.msrb.mxu1 %v9438_v10  ;;  %v5789_v11 = vpop.f32.mrf.mxu3  ;;  %v5762_v8 = vadd.f32 %v5761_v49, %v5748_v5  ;;  %v5788_v10 = vadd.f32 %v5787_v32, %v5774_v45 }
 0x240   :  { %6051 = vmatpush.bf16.msrb.mxu2 %v9446_v14 }
 0x241   :  { %6065 = vmatpush.bf16.msrb.mxu3 %v9454_v16  ;;  %6024 = vmatmul.bf16.vlgmr.msrb.gmra.mxu0 %v6465_v30  ;;  %v5776_v14 = vadd.f32 %v5775_v51, %v5762_v8 }
 0x242   :  { %6038 = vmatmul.bf16.vlgmr.msrb.gmra.mxu1 %v6469_v9  ;;  %6143 = vmatpush.bf16.msra.mxu0 %v9469_v28 }
 0x243   :  { %6052 = vmatmul.bf16.vlgmr.msrb.gmra.mxu2 %v6473_v33  ;;  %v5790_v25 = vadd.f32 %v5789_v11, %v5776_v14 }
 0x244   :  { %6066 = vmatmul.bf16.vlgmr.msrb.gmra.mxu3 %v6477_v22  ;;  %v5801_v52 = vpop.f32.mrf.mxu0 }
 0x245   :  { %v5815_v54 = vpop.f32.mrf.mxu1  ;;  %v5802_v18 = vadd.f32 %v5801_v52, %v5788_v10 }
 0x246   :  { %v5829_v56 = vpop.f32.mrf.mxu2  ;;  %6144 = vmatpush.bf16.msra.mxu0 %v9468_v20 }
 0x247   :  { %v5843_v57 = vpop.f32.mrf.mxu3  ;;  %v5816_v38 = vadd.f32 %v5815_v54, %v5802_v18  ;;  %v9463_v54 = vld [vmem:[%s11825_s3 + $0x8] sm:$0xff] }
 0x249   :  { %v5830_v9 = vadd.f32 %v5829_v56, %v5816_v38 }
 0x24a   :  { %6145 = vmatpush.bf16.msra.mxu0 %v9467_v36 }
 0x24b   :  { %v5844_v37 = vadd.f32 %v5843_v57, %v5830_v9 }
 0x24c   :  { %v5803_v59 = vpop.f32.mrf.mxu0 }
 0x24d   :  { %v5817_v60 = vpop.f32.mrf.mxu1  ;;  %v5804_v17 = vadd.f32 %v5803_v59, %v5790_v25 }
 0x24e   :  { %v5831_v34 = vpop.f32.mrf.mxu2  ;;  %6146 = vmatpush.bf16.msra.mxu0 %v9466_v41 }
 0x24f   :  { %v5845_v0 = vpop.f32.mrf.mxu3  ;;  %v5818_v22 = vadd.f32 %v5817_v60, %v5804_v17 }
 0x251   :  { %v5832_v39 = vadd.f32 %v5831_v34, %v5818_v22 }
 0x252   :  { %6147 = vmatpush.bf16.msra.mxu0 %v9465_v46 }
 0x253   :  { %v5846_v42 = vadd.f32 %v5845_v0, %v5832_v39  ;;  %v9471_v39 = vld [vmem:[%s11824_s4] ss:$0 sm:$0xff] }
 0x256   :  { %6148 = vmatpush.bf16.msra.mxu0 %v9464_v48 }
 0x25a   :  { %6149 = vmatpush.bf16.msra.mxu0 %v9463_v54 }
 0x25e   :  { %v5857_v1 = vpop.f32.mrf.mxu0  ;;  %6150 = vmatpush.bf16.msra.mxu0 %v9462_v58 }
 0x25f   :  { %v5871_v3 = vpop.f32.mrf.mxu1  ;;  %v5858_v40 = vadd.f32 %v5857_v1, %v5844_v37 }
 0x261   :  { %v5872_v27 = vadd.f32 %v5871_v3, %v5858_v40 }
 0x266   :  { %v5885_v6 = vpop.f32.mrf.mxu2  ;;  %v5859_v16 = vpop.f32.mrf.mxu0 }
 0x267   :  { %v5899_v7 = vpop.f32.mrf.mxu3  ;;  %v5873_v21 = vpop.f32.mrf.mxu1  ;;  %v5860_v43 = vadd.f32 %v5859_v16, %v5846_v42  ;;  %v5886_v47 = vadd.f32 %v5885_v6, %v5872_v27 }
 0x269   :  { %v5874_v32 = vadd.f32 %v5873_v21, %v5860_v43  ;;  %v5900_v49 = vadd.f32 %v5899_v7, %v5886_v47 }
 0x26e   :  { %v5887_v26 = vpop.f32.mrf.mxu2 }
 0x26f   :  { %v5901_v30 = vpop.f32.mrf.mxu3  ;;  %v5888_v50 = vadd.f32 %v5887_v26, %v5874_v32 }
 0x271   :  { %v5902_v55 = vadd.f32 %v5901_v30, %v5888_v50 }
 0x27e   :  { %v5913_v33 = vpop.f32.mrf.mxu0 }
 0x27f   :  { %v5927_v35 = vpop.f32.mrf.mxu1  ;;  %v5914_v52 = vadd.f32 %v5913_v33, %v5900_v49 }
 0x281   :  { %v5928_v56 = vadd.f32 %v5927_v35, %v5914_v52 }
 0x286   :  { %v5941_v13 = vpop.f32.mrf.mxu2  ;;  %v5915_v44 = vpop.f32.mrf.mxu0 }
 0x287   :  { %v5955_v23 = vpop.f32.mrf.mxu3  ;;  %v5929_v29 = vpop.f32.mrf.mxu1  ;;  %v5916_v57 = vadd.f32 %v5915_v44, %v5902_v55  ;;  %v5942_v19 = vadd.f32 %v5941_v13, %v5928_v56 }
 0x289   :  { %v5930_v15 = vadd.f32 %v5929_v29, %v5916_v57  ;;  %v5956_v60 = vadd.f32 %v5955_v23, %v5942_v19 }
 0x28e   :  { %v5943_v51 = vpop.f32.mrf.mxu2 }
 0x28f   :  { %v5957_v11 = vpop.f32.mrf.mxu3  ;;  %v5944_v61 = vadd.f32 %v5943_v51, %v5930_v15 }
 0x291   :  { %v5958_v0 = vadd.f32 %v5957_v11, %v5944_v61 }
 0x29e   :  { %v5969_v53 = vpop.f32.mrf.mxu0 }
 0x29f   :  { %v5983_v12 = vpop.f32.mrf.mxu1  ;;  %v5970_v63 = vadd.f32 %v5969_v53, %v5956_v60 }
 0x2a1   :  { %v5984_v24 = vadd.f32 %v5983_v12, %v5970_v63 }
 0x2a6   :  { %v5997_v31 = vpop.f32.mrf.mxu2  ;;  %v5971_v62 = vpop.f32.mrf.mxu0 }
 0x2a7   :  { %v6011_v59 = vpop.f32.mrf.mxu3  ;;  %v5985_v34 = vpop.f32.mrf.mxu1  ;;  %v5972_v1 = vadd.f32 %v5971_v62, %v5958_v0  ;;  %v5998_v4 = vadd.f32 %v5997_v31, %v5984_v24 }
 0x2a9   :  { %v5986_v45 = vadd.f32 %v5985_v34, %v5972_v1  ;;  %v6012_v7 = vadd.f32 %v6011_v59, %v5998_v4 }
 0x2ae   :  { %v5999_v2 = vpop.f32.mrf.mxu2 }
 0x2af   :  { %v6013_v3 = vpop.f32.mrf.mxu3  ;;  %v6000_v8 = vadd.f32 %v5999_v2, %v5986_v45 }
 0x2b1   :  { %v6014_v28 = vadd.f32 %v6013_v3, %v6000_v8 }
 0x2be   :  { %v6025_v5 = vpop.f32.mrf.mxu0 }
 0x2bf   :  { %v6039_v6 = vpop.f32.mrf.mxu1  ;;  %v6026_v10 = vadd.f32 %v6025_v5, %v6012_v7 }
 0x2c1   :  { %v6040_v20 = vadd.f32 %v6039_v6, %v6026_v10 }
 0x2c6   :  { %v6053_v14 = vpop.f32.mrf.mxu2  ;;  %v6027_v18 = vpop.f32.mrf.mxu0 }
 0x2c7   :  { %v6067_v16 = vpop.f32.mrf.mxu3  ;;  %v6028_v21 = vadd.f32 %v6027_v18, %v6014_v28  ;;  %v6054_v25 = vadd.f32 %v6053_v14, %v6040_v20  ;;  %v6041_v38 = vpop.f32.mrf.mxu1 }
 0x2c9   :  { %v6042_v17 = vadd.f32 %v6041_v38, %v6028_v21  ;;  %v6068_v30 = vadd.f32 %v6067_v16, %v6054_v25 }
 0x2cb   :  { %v6072_v35 = vmax.f32 %v6068_v30, 0.0 }
 0x2ce   :  { %v6055_v26 = vpop.f32.mrf.mxu2 }
 0x2cf   :  { %v6056_v9 = vadd.f32 %v6055_v26, %v6042_v17  ;;  %v6069_v33 = vpop.f32.mrf.mxu3 }
 0x2d1   :  { %v6070_v22 = vadd.f32 %v6069_v33, %v6056_v9 }
 0x2d3   :  { %v6073_v36 = vmax.f32 %v6070_v22, 0.0 }
 0x2d5   :  { %v6074_v37 = vpack.c.bf16 %v6073_v36, %v6072_v35 }
 0x2d7   :  { %6151 = vmatmul.bf16.vlgmr.msra.gmra.mxu0 %v6074_v37 }
 0x354   :  { %v6152_v40 = vpop.f32.mrf.mxu0 }
 0x355   :  { %v6153_v13 = vadd.f32 %v9471_v39, %v6152_v40 }
 0x357   :  { %v6158_v23 = vsel %vm6157_vm0, %v6153_v13, -inf }
 0x358   :  { %6159 = vmax.xlane.f32.xlu0 %v6158_v23 }
 0x35c   :  { %v6154_v41 = vpop.f32.mrf.mxu0 }
 0x35d   :  { %v6155_v42 = vadd.f32 %v9471_v39, %v6154_v41 }
 0x35f   :  { %v6161_v27 = vsel %vm6157_vm0, %v6155_v42, -inf }
 0x360   :  { %6162 = vmax.xlane.f32.xlu0 %v6161_v27 }
 0x3cb   :  { %v6160_v43 = vpop.xlane.xlu0 %6159 }
 0x3cc   :  { %v6164_v44 = vsub.f32 %v6153_v13, %v6160_v43 }
 0x3ce   :  { %v6166_v46 = vmul.f32 1.442695, %v6164_v44 }
 0x3d0   :  { %9472 = vpow2.f32 %v6166_v46 }
 0x3d3   :  { %v6163_v47 = vpop.xlane.xlu0 %6162 }
 0x3d4   :  { %v6165_v29 = vsub.f32 %v6155_v42, %v6163_v47 }
 0x3d6   :  { %v9473_v32 = vpop.eup %9472  ;;  %v6168_v48 = vmul.f32 1.442695, %v6165_v29 }
 0x3d7   :  { %v6170_v49 = vsel %vm6157_vm0, %v9473_v32, 0.0 }
 0x3d8   :  { %9474 = vpow2.f32 %v6168_v48  ;;  %6171 = vadd.xlane.f32.xlu1 %v6170_v49 }
 0x3de   :  { %v9475_v50 = vpop.eup %9474 }
 0x3df   :  { %v6173_v51 = vsel %vm6157_vm0, %v9475_v50, 0.0 }
 0x3e0   :  { %6174 = vadd.xlane.f32.xlu1 %v6173_v51 }
 0x44b   :  { %v6172_v11 = vpop.xlane.xlu1 %6171 }
 0x44c   :  { %9476 = vlog2.f32 %v6172_v11 }
 0x452   :  { %v9477_v52 = vpop.eup %9476 }
 0x453   :  { %v6177_v53 = vmul.f32 0.6931472, %v9477_v52  ;;  %v6175_v54 = vpop.xlane.xlu1 %6174 }
 0x454   :  { %9478 = vlog2.f32 %v6175_v54 }
 0x455   :  { %v6180_v55 = vadd.f32 %v6177_v53, %v6160_v43 }
 0x457   :  { %v6182_v12 = vsub.f32 %v6153_v13, %v6180_v55 }
 0x459   :  { %6184 = vst.msk [vmem:[%s11826_s5] sm:$0xff] %vm6157_vm0, %v6182_v12 }
 0x45a   :  { %v9479_v56 = vpop.eup %9478 }
 0x45b   :  { %v6179_v57 = vmul.f32 0.6931472, %v9479_v56 }
 0x45d   :  { %v6181_v58 = vadd.f32 %v6179_v57, %v6163_v47 }
 0x45f   :  { %v6183_v19 = vsub.f32 %v6155_v42, %v6181_v58 }
 0x461   :  { %6185 = vst.msk [vmem:[%s11826_s5 + $0x8] sm:$0xff] %vm6157_vm0, %v6183_v19 }

</bundles_post_ra>
